<compile_context>
chip_gen: v7x
topology: tpu7x:2x2x1
jax: 0.10.0
libtpu: 0.0.40
codegen_flags: <defaults>
</compile_context>

<pallas_src>
import jax
import jax.numpy as jnp
from jax.experimental import pallas as pl
from jax.experimental.pallas import tpu as pltpu

EPS = 1e-5  # torch BatchNorm default eps

# For a deconv sub-pixel phase r (per spatial dim), the spatial shifts d at
# which its values are read by the next stage / written from the projections.
_SHIFTS = {0: (0, 1), 1: (-1, 0)}


# ---------------- fused [Linear+BN1d+ReLU] x2 (fc1 + fc2) --------------------
def _fc_fused_kernel(z_ref, w1_ref, g1_ref, bt1_ref, w2_ref, g2_ref, bt2_ref,
                     o_ref):
    # fc1 + BatchNorm1d(batch stats) + ReLU.  Linear biases are exact no-ops in
    # front of BatchNorm and are dropped.  fc1 is recomputed per grid step
    # (~0.26 MFLOP), so the only streamed operand is this step's w2 tile.
    z = z_ref[...].astype(jnp.bfloat16)
    h = jnp.dot(z, w1_ref[...], preferred_element_type=jnp.float32)     # (B, 1024)
    m1 = jnp.mean(h, axis=0, keepdims=True)
    v1 = jnp.maximum(jnp.mean(h * h, axis=0, keepdims=True) - m1 * m1, 0.0)
    h = jnp.maximum(
        g1_ref[...] * (h - m1) * jax.lax.rsqrt(v1 + EPS) + bt1_ref[...], 0.0)

    # fc2 (this tile of HWC-permuted output features) + BN + ReLU.
    h2 = jnp.dot(h.astype(jnp.bfloat16), w2_ref[...],
                 preferred_element_type=jnp.float32)                    # (B, tn)
    m2 = jnp.mean(h2, axis=0, keepdims=True)
    v2 = jnp.maximum(jnp.mean(h2 * h2, axis=0, keepdims=True) - m2 * m2, 0.0)
    y = jnp.maximum(
        g2_ref[...] * (h2 - m2) * jax.lax.rsqrt(v2 + EPS) + bt2_ref[...], 0.0)
    o_ref[...] = y.astype(o_ref.dtype)


def _pick_fc_tile(d2, cap=512):
    # ~1 MiB bf16 w2 tile: >= 4 grid steps at input_size=16 so BlockSpec
    # double-buffering hides the HBM-bound w2 stream and the 'parallel' axis
    # can split across v7x megacore.
    if d2 <= cap:
        return d2
    tn = cap
    while tn >= 128:
        if d2 % tn == 0:
            return tn
        tn -= 128
    return d2


def fc_fused(z, w1, g1, bt1, w2, g2, bt2):
    B, Din = z.shape
    H = w1.shape[1]
    D2 = w2.shape[1]
    tn = _pick_fc_tile(D2)
    assert D2 % tn == 0
    # NOTE: B=4 leaves half of each 8-sublane vreg empty; padding the batch
    # would change the BatchNorm batch statistics, so it is not done here.
    return pl.pallas_call(
        _fc_fused_kernel,
        out_shape=jax.ShapeDtypeStruct((B, D2), jnp.bfloat16),
        grid=(D2 // tn,),
        in_specs=[
            pl.BlockSpec((B, Din), lambda j: (0, 0)),
            pl.BlockSpec((Din, H), lambda j: (0, 0)),
            pl.BlockSpec((1, H), lambda j: (0, 0)),
            pl.BlockSpec((1, H), lambda j: (0, 0)),
            pl.BlockSpec((H, tn), lambda j: (0, j)),
            pl.BlockSpec((1, tn), lambda j: (0, j)),
            pl.BlockSpec((1, tn), lambda j: (0, j)),
        ],
        out_specs=pl.BlockSpec((B, tn), lambda j: (0, j)),
        compiler_params=pltpu.CompilerParams(
            dimension_semantics=("parallel",)),
    )(z, w1, g1, bt1, w2, g2, bt2)


# ------- fused ConvT(128->64,4,2,1)+BN+ReLU + ConvT(64->Cout,4,2,1)+Tanh ------
# Sub-pixel decomposition of ConvTranspose2d(k=4, s=2, p=1) (per spatial dim):
#   y[2m+r] = sum_a x[m+r+a-1] * W[3-r-2a],  a,r in {0,1},  x OOB -> 0.
def _deconv_fused_kernel(x_ref, w1_ref, g1_ref, b1_ref, w2_ref, b2_ref,
                         o_ref, h00_ref, h01_ref, h10_ref, h11_ref):
    B, s4, _, C0 = x_ref.shape          # (B, s4, s4, 128) bf16, HWC
    C1P = h00_ref.shape[-1]             # deconv1 channels padded 64 -> 128
    N1 = B * s4 * s4
    hp = ((h00_ref, h01_ref), (h10_ref, h11_ref))

    # ---- deconv1: one projection matmul of the UNPADDED input against all 16
    # kernel positions (column block kpos=4*ky+kx) -----------------------------
    proj = jnp.dot(x_ref[...].reshape(N1, C0), w1_ref[...],
                   preferred_element_type=jnp.float32)          # (N1, 16*C1P)

    # ---- assemble the 4 deconv1 sub-pixel phases with shifted adds -----------
    #  h1[2my+ry,2mx+rx] = sum_{a,b} proj_(3-ry-2a,3-rx-2b)[my+ry+a-1, mx+rx+b-1]
    for ry in range(2):
        for rx in range(2):
            ref = hp[ry][rx]
            # zero only the 1-pixel halo (interior gets fully overwritten)
            ref[:, 0:1, :, :] = jnp.zeros((B, 1, s4 + 2, C1P), ref.dtype)
            ref[:, s4 + 1:s4 + 2, :, :] = jnp.zeros((B, 1, s4 + 2, C1P), ref.dtype)
            ref[:, 1:s4 + 1, 0:1, :] = jnp.zeros((B, s4, 1, C1P), ref.dtype)
            ref[:, 1:s4 + 1, s4 + 1:s4 + 2, :] = jnp.zeros((B, s4, 1, C1P),
                                                           ref.dtype)

            a0, b0 = 1 - ry, 1 - rx     # tap with (dy, dx) == (0, 0) goes first
            taps = [(a0, b0)] + [(a, b) for a in range(2) for b in range(2)
                                 if (a, b) != (a0, b0)]
            for t, (a, b) in enumerate(taps):
                dy, dx = ry + a - 1, rx + b - 1
                kpos = 4 * (3 - ry - 2 * a) + (3 - rx - 2 * b)
                slab = (proj[:, kpos * C1P:(kpos + 1) * C1P]
                        .reshape(B, s4, s4, C1P))
                if t == 0:
                    ref[:, 1:s4 + 1, 1:s4 + 1, :] = slab         # full interior
                else:
                    ylo, yhi = max(0, -dy), s4 - max(0, dy)
                    xlo, xhi = max(0, -dx), s4 - max(0, dx)
                    ref[:, 1 + ylo:1 + yhi, 1 + xlo:1 + xhi, :] += \
                        slab[:, ylo + dy:yhi + dy, xlo + dx:xhi + dx, :]

    # ---- BatchNorm2d (training stats over batch*spatial per channel) + ReLU --
    ssum = jnp.zeros((1, C1P), jnp.float32)
    ssq = jnp.zeros((1, C1P), jnp.float32)
    hin = [[None, None], [None, None]]
    for ry in range(2):
        for rx in range(2):
            v = hp[ry][rx][:, 1:s4 + 1, 1:s4 + 1, :].reshape(N1, C1P)
            hin[ry][rx] = v
            ssum = ssum + jnp.sum(v, axis=0, keepdims=True)
            ssq = ssq + jnp.sum(v * v, axis=0, keepdims=True)
    inv_n = 1.0 / (4.0 * N1)
    mean = ssum * inv_n
    var = jnp.maximum(ssq * inv_n - mean * mean, 0.0)
    scale = g1_ref[...] * jax.lax.rsqrt(var + EPS)
    shift = b1_ref[...] - mean * scale
    for ry in range(2):
        for rx in range(2):
            h = jnp.maximum(hin[ry][rx] * scale + shift, 0.0)
            hp[ry][rx][:, 1:s4 + 1, 1:s4 + 1, :] = h.reshape(B, s4, s4, C1P)

    # ---- deconv2 + bias + tanh: ONE matmul over all 16 (phase, shift) taps ---
    # Tap order is (2*ry+rx)-major, (shift_y, shift_x)-minor, matching the
    # (16*C1P, 16*Cout) weight packed in pack_generator_params whose columns
    # are the 16 OUTPUT phases -> a single lane-dense (N1, 16*Cout) store.
    taps2 = []
    for ry in range(2):
        for rx in range(2):
            for dy in _SHIFTS[ry]:
                for dx in _SHIFTS[rx]:
                    taps2.append(
                        hp[ry][rx][:, 1 + dy:1 + dy + s4, 1 + dx:1 + dx + s4, :]
                        .astype(jnp.bfloat16).reshape(N1, C1P))
    patch = jnp.concatenate(taps2, axis=-1)                     # (N1, 16*C1P) bf16
    z2 = jnp.dot(patch, w2_ref[...], preferred_element_type=jnp.float32)
    o_ref[...] = jnp.tanh(z2 + b2_ref[...])


def deconv_fused(x, wd1p, gd1p, btd1p, wd2p, bd2t):
    B, s4, _, _ = x.shape
    C1P = wd1p.shape[-1] // 16
    PCout = wd2p.shape[-1]                       # 16 * Cout
    N1 = B * s4 * s4
    # Single grid step: BatchNorm2d statistics couple the whole batch*spatial
    # extent.  (A v7x two-core split would have to duplicate deconv1+BN per
    # core; skipped, this kernel is tiny.)
    return pl.pallas_call(
        _deconv_fused_kernel,
        out_shape=jax.ShapeDtypeStruct((N1, PCout), jnp.float32),
        scratch_shapes=[pltpu.VMEM((B, s4 + 2, s4 + 2, C1P), jnp.float32)
                        for _ in range(4)],
    )(x, wd1p, gd1p, btd1p, wd2p, bd2t)


# ------------------------------ parameters -----------------------------------
def init_generator_params(key, input_dim, output_dim, input_size):
    """Torch-layout params (Utils.initialize_weights: N(0, 0.02), zero biases).
    Linear / deconv1 biases feeding a BatchNorm are omitted: exact no-ops."""
    s4 = input_size // 4
    d2 = 128 * s4 * s4
    ks = jax.random.split(key, 4)
    std = 0.02
    return {
        "w1": std * jax.random.normal(ks[0], (input_dim, 1024), jnp.float32),
        "g1": jnp.ones((1024,), jnp.float32),
        "bt1": jnp.zeros((1024,), jnp.float32),
        "w2": std * jax.random.normal(ks[1], (1024, d2), jnp.float32),
        "g2": jnp.ones((d2,), jnp.float32),
        "bt2": jnp.zeros((d2,), jnp.float32),
        "wd1": std * jax.random.normal(ks[2], (128, 64, 4, 4), jnp.float32),
        "gd1": jnp.ones((64,), jnp.float32),
        "btd1": jnp.zeros((64,), jnp.float32),
        "wd2": std * jax.random.normal(ks[3], (64, output_dim, 4, 4), jnp.float32),
        "bd2": jnp.zeros((output_dim,), jnp.float32),
    }


def pack_generator_params(p, input_size):
    """One-time repack: bf16 matmul weights, fc2 columns permuted to HWC order,
    deconv1 packed as 16 side-by-side kernel-position projections (128-padded),
    deconv2 packed as one (16*C1P, 16*Cout) matrix keyed by
    (h1 phase, shift) x (output phase, out channel)."""
    s4 = input_size // 4
    C0 = 128
    C1 = p["wd1"].shape[1]
    C1P = 128
    Cout = p["wd2"].shape[1]

    # fc2 column perm: kernel feature (i, j, c) <- torch feature c*s4*s4+i*s4+j
    c = jnp.arange(C0)
    i = jnp.arange(s4)
    j = jnp.arange(s4)
    perm = (c[None, None, :] * (s4 * s4) + i[:, None, None] * s4
            + j[None, :, None]).reshape(-1)

    # deconv1: columns [kpos*C1P : kpos*C1P+C1] = W1[:, :, ky, kx], kpos=4*ky+kx
    w1p = jnp.zeros((C0, 16 * C1P), jnp.float32)
    for ky in range(4):
        for kx in range(4):
            kpos = 4 * ky + kx
            w1p = w1p.at[:, kpos * C1P:kpos * C1P + C1].set(p["wd1"][:, :, ky, kx])

    # deconv2: K block kb = (h1 phase (ry,rx), shift (dy,dx)); column =
    # output phase (py,px)*Cout + co.  Each output phase has exactly 4 nonzero
    # K blocks (its 4 taps).
    w2p = jnp.zeros((16 * C1P, 16 * Cout), jnp.float32)
    for py in range(4):
        ty, sy = py // 2, py % 2
        for px in range(4):
            tx, sx = px // 2, px % 2
            for a in range(2):
                ey = ty + sy + a - 1
                ry, dy, ky = ey % 2, ey // 2, 3 - sy - 2 * a
                for b in range(2):
                    ex = tx + sx + b - 1
                    rx, dx, kx = ex % 2, ex // 2, 3 - sx - 2 * b
                    kb = (4 * (2 * ry + rx)
                          + 2 * _SHIFTS[ry].index(dy) + _SHIFTS[rx].index(dx))
                    col = (4 * py + px) * Cout
                    w2p = w2p.at[kb * C1P:kb * C1P + C1, col:col + Cout].add(
                        p["wd2"][:, :, ky, kx])

    return {
        "w1": p["w1"].astype(jnp.bfloat16),
        "g1": p["g1"][None, :],
        "bt1": p["bt1"][None, :],
        "w2": p["w2"][:, perm].astype(jnp.bfloat16),
        "g2": p["g2"][perm][None, :],
        "bt2": p["bt2"][perm][None, :],
        "wd1": w1p.astype(jnp.bfloat16),
        "gd1": jnp.zeros((1, C1P), jnp.float32).at[0, :C1].set(p["gd1"]),
        "btd1": jnp.zeros((1, C1P), jnp.float32).at[0, :C1].set(p["btd1"]),
        "wd2": w2p.astype(jnp.bfloat16),
        "bd2": jnp.tile(p["bd2"], 16)[None, :],
    }


# ------------------------------- generator -----------------------------------
def generator_forward(pp, z, input_size):
    s4 = input_size // 4
    B = z.shape[0]
    x = fc_fused(z, pp["w1"], pp["g1"], pp["bt1"],
                 pp["w2"], pp["g2"], pp["bt2"])               # (B, d2) bf16, HWC
    x = x.reshape(B, s4, s4, 128)                             # free reshape
    o = deconv_fused(x, pp["wd1"], pp["gd1"], pp["btd1"],
                     pp["wd2"], pp["bd2"])                    # (B*s4*s4, 16*Cout)
    Cout = o.shape[-1] // 16
    # tiny (4 KiB) phase-interleave to NCHW: y[b, co, 4q+py, 4r+px]
    y = (o.reshape(B, s4, s4, 4, 4, Cout)
          .transpose(0, 5, 1, 3, 2, 4)
          .reshape(B, Cout, 4 * s4, 4 * s4))
    return y


# --------------------------- pure-JAX reference -------------------------------
def generator_reference(p, z, input_size):
    """f32 reference of the torch module's forward (training-mode BatchNorm)."""
    s4 = input_size // 4

    def bn(x, g, b, axes):
        m = jnp.mean(x, axis=axes, keepdims=True)
        v = jnp.var(x, axis=axes, keepdims=True)
        return g * (x - m) * jax.lax.rsqrt(v + EPS) + b

    def deconv(x, w):   # ConvTranspose2d(k=4, s=2, p=1), torch weight (Cin,Cout,4,4)
        wk = jnp.transpose(w, (1, 0, 2, 3))[:, :, ::-1, ::-1]
        return jax.lax.conv_general_dilated(
            x, wk, window_strides=(1, 1), padding=((2, 2), (2, 2)),
            lhs_dilation=(2, 2), dimension_numbers=("NCHW", "OIHW", "NCHW"))

    h = jnp.maximum(bn(z @ p["w1"], p["g1"], p["bt1"], 0), 0.0)
    h = jnp.maximum(bn(h @ p["w2"], p["g2"], p["bt2"], 0), 0.0)
    x = h.reshape(-1, 128, s4, s4)
    x = deconv(x, p["wd1"])
    x = jnp.maximum(bn(x, p["gd1"].reshape(1, -1, 1, 1),
                       p["btd1"].reshape(1, -1, 1, 1), (0, 2, 3)), 0.0)
    x = deconv(x, p["wd2"]) + p["bd2"].reshape(1, -1, 1, 1)
    return jnp.tanh(x)


if __name__ == "__main__":
    batch, input_dim, output_dim, input_size = 4, 32, 1, 16
    key = jax.random.PRNGKey(0)
    kp, kz = jax.random.split(key)
    raw = init_generator_params(kp, input_dim, output_dim, input_size)
    params = pack_generator_params(raw, input_size)
    z = jax.random.normal(kz, (batch, input_dim), jnp.float32)

    fwd = jax.jit(generator_forward, static_argnums=2)
    out = jax.block_until_ready(fwd(params, z, input_size))
    assert out.shape == (batch, output_dim, input_size, input_size), out.shape
    assert bool(jnp.all(jnp.isfinite(out))), "non-finite output"

    # numerical check against the pure-JAX f32 reference (bf16 tolerance)
    ref = jax.block_until_ready(
        jax.jit(generator_reference, static_argnums=2)(raw, z, input_size))
    err = float(jnp.max(jnp.abs(out - ref)))
    assert err < 0.1, f"mismatch vs reference: max abs err = {err}"
    print("KERNEL_OK")
</pallas_src>

<mosaic_0001>
module attributes {stable_mosaic.version = 11 : i64} {
  func.func @_fc_fused_kernel(%arg0: i32, %arg1: memref<4x32xf32, #tpu.memory_space<vmem>>, %arg2: memref<32x1024xbf16, #tpu.memory_space<vmem>>, %arg3: memref<1x1024xf32, #tpu.memory_space<vmem>>, %arg4: memref<1x1024xf32, #tpu.memory_space<vmem>>, %arg5: memref<1024x512xbf16, #tpu.memory_space<vmem>>, %arg6: memref<1x512xf32, #tpu.memory_space<vmem>>, %arg7: memref<1x512xf32, #tpu.memory_space<vmem>>, %arg8: memref<4x512xbf16, #tpu.memory_space<vmem>>) attributes {dimension_semantics = [#tpu.dimension_semantics<parallel>], iteration_bounds = array<i64: 4>, scalar_prefetch = 0 : i64, scratch_operands = 0 : i64, tpu.core_type = #tpu.core_type<tc>, window_params = [{pipeline_mode = #tpu.pipeline_mode<synchronous>, transform_indices = @transform_0, window_bounds = array<i64: 4, 32>}, {pipeline_mode = #tpu.pipeline_mode<synchronous>, transform_indices = @transform_1, window_bounds = array<i64: 32, 1024>}, {pipeline_mode = #tpu.pipeline_mode<synchronous>, transform_indices = @transform_2, window_bounds = array<i64: 1, 1024>}, {pipeline_mode = #tpu.pipeline_mode<synchronous>, transform_indices = @transform_3, window_bounds = array<i64: 1, 1024>}, {transform_indices = @transform_4, window_bounds = array<i64: 1024, 512>}, {transform_indices = @transform_5, window_bounds = array<i64: 1, 512>}, {transform_indices = @transform_6, window_bounds = array<i64: 1, 512>}, {transform_indices = @transform_7, window_bounds = array<i64: 4, 512>}]} {
    %c0 = arith.constant 0 : index
    %c0_0 = arith.constant 0 : index
    %0 = vector.load %arg1[%c0, %c0_0] : memref<4x32xf32, #tpu.memory_space<vmem>>, vector<4x32xf32>
    %1 = arith.truncf %0 : vector<4x32xf32> to vector<4x32xbf16>
    %c0_1 = arith.constant 0 : index
    %c0_2 = arith.constant 0 : index
    %2 = vector.load %arg2[%c0_1, %c0_2] : memref<32x1024xbf16, #tpu.memory_space<vmem>>, vector<32x1024xbf16>
    %cst = arith.constant dense<0.000000e+00> : vector<4x1024xf32>
    %3 = tpu.matmul %1, %2, %cst {dimension_numbers = #tpu.dot_dimension_numbers<[1], [0], [0], [1], [0, 0, 1, 1], [], []>} : vector<4x32xbf16>, vector<32x1024xbf16>, vector<4x1024xf32> -> vector<4x1024xf32>
    %cst_3 = arith.constant dense<0.000000e+00> : vector<1024xf32>
    %4 = vector.multi_reduction <add>, %3, %cst_3 [0] : vector<4x1024xf32> to vector<1024xf32>
    %5 = vector.shape_cast %4 : vector<1024xf32> to vector<1x1024xf32>
    %cst_4 = arith.constant 4.000000e+00 : f32
    %6 = vector.broadcast %cst_4 : f32 to vector<1x1024xf32>
    %7 = arith.divf %5, %6 : vector<1x1024xf32>
    %8 = arith.mulf %3, %3 : vector<4x1024xf32>
    %cst_5 = arith.constant dense<0.000000e+00> : vector<1024xf32>
    %9 = vector.multi_reduction <add>, %8, %cst_5 [0] : vector<4x1024xf32> to vector<1024xf32>
    %10 = vector.shape_cast %9 : vector<1024xf32> to vector<1x1024xf32>
    %cst_6 = arith.constant 4.000000e+00 : f32
    %11 = vector.broadcast %cst_6 : f32 to vector<1x1024xf32>
    %12 = arith.divf %10, %11 : vector<1x1024xf32>
    %13 = arith.mulf %7, %7 : vector<1x1024xf32>
    %14 = arith.subf %12, %13 : vector<1x1024xf32>
    %cst_7 = arith.constant 0.000000e+00 : f32
    %15 = vector.broadcast %cst_7 : f32 to vector<1x1024xf32>
    %16 = arith.maximumf %14, %15 : vector<1x1024xf32>
    %c0_8 = arith.constant 0 : index
    %c0_9 = arith.constant 0 : index
    %17 = vector.load %arg3[%c0_8, %c0_9] : memref<1x1024xf32, #tpu.memory_space<vmem>>, vector<1x1024xf32>
    %18 = vector.broadcast %7 : vector<1x1024xf32> to vector<4x1024xf32>
    %19 = arith.subf %3, %18 : vector<4x1024xf32>
    %20 = vector.broadcast %17 : vector<1x1024xf32> to vector<4x1024xf32>
    %21 = arith.mulf %20, %19 : vector<4x1024xf32>
    %cst_10 = arith.constant 9.99999974E-6 : f32
    %22 = vector.broadcast %cst_10 : f32 to vector<1x1024xf32>
    %23 = arith.addf %16, %22 : vector<1x1024xf32>
    %24 = math.rsqrt %23 : vector<1x1024xf32>
    %25 = vector.broadcast %24 : vector<1x1024xf32> to vector<4x1024xf32>
    %26 = arith.mulf %21, %25 : vector<4x1024xf32>
    %c0_11 = arith.constant 0 : index
    %c0_12 = arith.constant 0 : index
    %27 = vector.load %arg4[%c0_11, %c0_12] : memref<1x1024xf32, #tpu.memory_space<vmem>>, vector<1x1024xf32>
    %28 = vector.broadcast %27 : vector<1x1024xf32> to vector<4x1024xf32>
    %29 = arith.addf %26, %28 : vector<4x1024xf32>
    %cst_13 = arith.constant 0.000000e+00 : f32
    %30 = vector.broadcast %cst_13 : f32 to vector<4x1024xf32>
    %31 = arith.maximumf %29, %30 : vector<4x1024xf32>
    %32 = arith.truncf %31 : vector<4x1024xf32> to vector<4x1024xbf16>
    %c0_14 = arith.constant 0 : index
    %c0_15 = arith.constant 0 : index
    %33 = vector.load %arg5[%c0_14, %c0_15] : memref<1024x512xbf16, #tpu.memory_space<vmem>>, vector<1024x512xbf16>
    %cst_16 = arith.constant dense<0.000000e+00> : vector<4x512xf32>
    %34 = tpu.matmul %32, %33, %cst_16 {dimension_numbers = #tpu.dot_dimension_numbers<[1], [0], [0], [1], [0, 0, 1, 1], [], []>} : vector<4x1024xbf16>, vector<1024x512xbf16>, vector<4x512xf32> -> vector<4x512xf32>
    %cst_17 = arith.constant dense<0.000000e+00> : vector<512xf32>
    %35 = vector.multi_reduction <add>, %34, %cst_17 [0] : vector<4x512xf32> to vector<512xf32>
    %36 = vector.shape_cast %35 : vector<512xf32> to vector<1x512xf32>
    %cst_18 = arith.constant 4.000000e+00 : f32
    %37 = vector.broadcast %cst_18 : f32 to vector<1x512xf32>
    %38 = arith.divf %36, %37 : vector<1x512xf32>
    %39 = arith.mulf %34, %34 : vector<4x512xf32>
    %cst_19 = arith.constant dense<0.000000e+00> : vector<512xf32>
    %40 = vector.multi_reduction <add>, %39, %cst_19 [0] : vector<4x512xf32> to vector<512xf32>
    %41 = vector.shape_cast %40 : vector<512xf32> to vector<1x512xf32>
    %cst_20 = arith.constant 4.000000e+00 : f32
    %42 = vector.broadcast %cst_20 : f32 to vector<1x512xf32>
    %43 = arith.divf %41, %42 : vector<1x512xf32>
    %44 = arith.mulf %38, %38 : vector<1x512xf32>
    %45 = arith.subf %43, %44 : vector<1x512xf32>
    %cst_21 = arith.constant 0.000000e+00 : f32
    %46 = vector.broadcast %cst_21 : f32 to vector<1x512xf32>
    %47 = arith.maximumf %45, %46 : vector<1x512xf32>
    %c0_22 = arith.constant 0 : index
    %c0_23 = arith.constant 0 : index
    %48 = vector.load %arg6[%c0_22, %c0_23] : memref<1x512xf32, #tpu.memory_space<vmem>>, vector<1x512xf32>
    %49 = vector.broadcast %38 : vector<1x512xf32> to vector<4x512xf32>
    %50 = arith.subf %34, %49 : vector<4x512xf32>
    %51 = vector.broadcast %48 : vector<1x512xf32> to vector<4x512xf32>
    %52 = arith.mulf %51, %50 : vector<4x512xf32>
    %cst_24 = arith.constant 9.99999974E-6 : f32
    %53 = vector.broadcast %cst_24 : f32 to vector<1x512xf32>
    %54 = arith.addf %47, %53 : vector<1x512xf32>
    %55 = math.rsqrt %54 : vector<1x512xf32>
    %56 = vector.broadcast %55 : vector<1x512xf32> to vector<4x512xf32>
    %57 = arith.mulf %52, %56 : vector<4x512xf32>
    %c0_25 = arith.constant 0 : index
    %c0_26 = arith.constant 0 : index
    %58 = vector.load %arg7[%c0_25, %c0_26] : memref<1x512xf32, #tpu.memory_space<vmem>>, vector<1x512xf32>
    %59 = vector.broadcast %58 : vector<1x512xf32> to vector<4x512xf32>
    %60 = arith.addf %57, %59 : vector<4x512xf32>
    %cst_27 = arith.constant 0.000000e+00 : f32
    %61 = vector.broadcast %cst_27 : f32 to vector<4x512xf32>
    %62 = arith.maximumf %60, %61 : vector<4x512xf32>
    %63 = arith.truncf %62 : vector<4x512xf32> to vector<4x512xbf16>
    %c0_28 = arith.constant 0 : index
    %c0_29 = arith.constant 0 : index
    %64 = vector.load %arg8[%c0_28, %c0_29] : memref<4x512xbf16, #tpu.memory_space<vmem>>, vector<4x512xbf16>
    tpu.vector_store %arg8[%c0_28, %c0_29], %63 {strides = array<i32>} : memref<4x512xbf16, #tpu.memory_space<vmem>>, vector<4x512xbf16>,
    return
  }
  func.func @transform_0(%arg0: i32) -> (i32, i32) {
    %c0_i32 = arith.constant 0 : i32
    %c0_i32_0 = arith.constant 0 : i32
    %c0_i32_1 = arith.constant 0 : i32
    return %c0_i32, %c0_i32_0 : i32, i32
  }
  func.func @transform_1(%arg0: i32) -> (i32, i32) {
    %c0_i32 = arith.constant 0 : i32
    %c0_i32_0 = arith.constant 0 : i32
    %c0_i32_1 = arith.constant 0 : i32
    return %c0_i32, %c0_i32_0 : i32, i32
  }
  func.func @transform_2(%arg0: i32) -> (i32, i32) {
    %c0_i32 = arith.constant 0 : i32
    %c0_i32_0 = arith.constant 0 : i32
    %c0_i32_1 = arith.constant 0 : i32
    return %c0_i32, %c0_i32_0 : i32, i32
  }
  func.func @transform_3(%arg0: i32) -> (i32, i32) {
    %c0_i32 = arith.constant 0 : i32
    %c0_i32_0 = arith.constant 0 : i32
    %c0_i32_1 = arith.constant 0 : i32
    return %c0_i32, %c0_i32_0 : i32, i32
  }
  func.func @transform_4(%arg0: i32) -> (i32, i32) {
    %c0_i32 = arith.constant 0 : i32
    %c0_i32_0 = arith.constant 0 : i32
    return %c0_i32, %arg0 : i32, i32
  }
  func.func @transform_5(%arg0: i32) -> (i32, i32) {
    %c0_i32 = arith.constant 0 : i32
    %c0_i32_0 = arith.constant 0 : i32
    return %c0_i32, %arg0 : i32, i32
  }
  func.func @transform_6(%arg0: i32) -> (i32, i32) {
    %c0_i32 = arith.constant 0 : i32
    %c0_i32_0 = arith.constant 0 : i32
    return %c0_i32, %arg0 : i32, i32
  }
  func.func @transform_7(%arg0: i32) -> (i32, i32) {
    %c0_i32 = arith.constant 0 : i32
    %c0_i32_0 = arith.constant 0 : i32
    return %c0_i32, %arg0 : i32, i32
  }
}

module attributes {stable_mosaic.version = 11 : i64} {
  func.func @_deconv_fused_kernel(%arg0: memref<4x4x4x128xbf16, #tpu.memory_space<vmem>>, %arg1: memref<128x2048xbf16, #tpu.memory_space<vmem>>, %arg2: memref<1x128xf32, #tpu.memory_space<vmem>>, %arg3: memref<1x128xf32, #tpu.memory_space<vmem>>, %arg4: memref<2048x16xbf16, #tpu.memory_space<vmem>>, %arg5: memref<1x16xf32, #tpu.memory_space<vmem>>, %arg6: memref<64x16xf32, #tpu.memory_space<vmem>>, %arg7: memref<4x6x6x128xf32, #tpu.memory_space<vmem>>, %arg8: memref<4x6x6x128xf32, #tpu.memory_space<vmem>>, %arg9: memref<4x6x6x128xf32, #tpu.memory_space<vmem>>, %arg10: memref<4x6x6x128xf32, #tpu.memory_space<vmem>>) attributes {dimension_semantics = [], scalar_prefetch = 0 : i64, scratch_operands = 4 : i64, tpu.core_type = #tpu.core_type<tc>} {
    %c0 = arith.constant 0 : index
    %c0_0 = arith.constant 0 : index
    %c0_1 = arith.constant 0 : index
    %c0_2 = arith.constant 0 : index
    %0 = vector.load %arg0[%c0, %c0_0, %c0_1, %c0_2] : memref<4x4x4x128xbf16, #tpu.memory_space<vmem>>, vector<4x4x4x128xbf16>
    %1 = vector.shape_cast %0 : vector<4x4x4x128xbf16> to vector<64x128xbf16>
    %c0_3 = arith.constant 0 : index
    %c0_4 = arith.constant 0 : index
    %2 = vector.load %arg1[%c0_3, %c0_4] : memref<128x2048xbf16, #tpu.memory_space<vmem>>, vector<128x2048xbf16>
    %cst = arith.constant dense<0.000000e+00> : vector<64x2048xf32>
    %3 = tpu.matmul %1, %2, %cst {dimension_numbers = #tpu.dot_dimension_numbers<[1], [0], [0], [1], [0, 0, 1, 1], [], []>} : vector<64x128xbf16>, vector<128x2048xbf16>, vector<64x2048xf32> -> vector<64x2048xf32>
    %cst_5 = arith.constant 0.000000e+00 : f32
    %4 = vector.broadcast %cst_5 : f32 to vector<4x1x6x128xf32>
    %c0_6 = arith.constant 0 : index
    %c0_7 = arith.constant 0 : index
    %c0_8 = arith.constant 0 : index
    %c0_9 = arith.constant 0 : index
    %5 = vector.load %arg7[%c0_6, %c0_7, %c0_8, %c0_9] : memref<4x6x6x128xf32, #tpu.memory_space<vmem>>, vector<4x1x6x128xf32>
    tpu.vector_store %arg7[%c0_6, %c0_7, %c0_8, %c0_9], %4 {strides = array<i32>} : memref<4x6x6x128xf32, #tpu.memory_space<vmem>>, vector<4x1x6x128xf32>,
    %cst_10 = arith.constant 0.000000e+00 : f32
    %6 = vector.broadcast %cst_10 : f32 to vector<4x1x6x128xf32>
    %c0_11 = arith.constant 0 : index
    %c5 = arith.constant 5 : index
    %c0_12 = arith.constant 0 : index
    %c0_13 = arith.constant 0 : index
    %7 = vector.load %arg7[%c0_11, %c5, %c0_12, %c0_13] : memref<4x6x6x128xf32, #tpu.memory_space<vmem>>, vector<4x1x6x128xf32>
    tpu.vector_store %arg7[%c0_11, %c5, %c0_12, %c0_13], %6 {strides = array<i32>} : memref<4x6x6x128xf32, #tpu.memory_space<vmem>>, vector<4x1x6x128xf32>,
    %cst_14 = arith.constant 0.000000e+00 : f32
    %8 = vector.broadcast %cst_14 : f32 to vector<4x4x1x128xf32>
    %c0_15 = arith.constant 0 : index
    %c1 = arith.constant 1 : index
    %c0_16 = arith.constant 0 : index
    %c0_17 = arith.constant 0 : index
    %9 = vector.load %arg7[%c0_15, %c1, %c0_16, %c0_17] : memref<4x6x6x128xf32, #tpu.memory_space<vmem>>, vector<4x4x1x128xf32>
    tpu.vector_store %arg7[%c0_15, %c1, %c0_16, %c0_17], %8 {strides = array<i32>} : memref<4x6x6x128xf32, #tpu.memory_space<vmem>>, vector<4x4x1x128xf32>,
    %cst_18 = arith.constant 0.000000e+00 : f32
    %10 = vector.broadcast %cst_18 : f32 to vector<4x4x1x128xf32>
    %c0_19 = arith.constant 0 : index
    %c1_20 = arith.constant 1 : index
    %c5_21 = arith.constant 5 : index
    %c0_22 = arith.constant 0 : index
    %11 = vector.load %arg7[%c0_19, %c1_20, %c5_21, %c0_22] : memref<4x6x6x128xf32, #tpu.memory_space<vmem>>, vector<4x4x1x128xf32>
    tpu.vector_store %arg7[%c0_19, %c1_20, %c5_21, %c0_22], %10 {strides = array<i32>} : memref<4x6x6x128xf32, #tpu.memory_space<vmem>>, vector<4x4x1x128xf32>,
    %12 = vector.extract_strided_slice %3 {offsets = [0, 640], sizes = [64, 128], strides = [1, 1]} : vector<64x2048xf32> to vector<64x128xf32>
    %13 = vector.shape_cast %12 : vector<64x128xf32> to vector<4x4x4x128xf32>
    %c0_23 = arith.constant 0 : index
    %c1_24 = arith.constant 1 : index
    %c1_25 = arith.constant 1 : index
    %c0_26 = arith.constant 0 : index
    %14 = vector.load %arg7[%c0_23, %c1_24, %c1_25, %c0_26] : memref<4x6x6x128xf32, #tpu.memory_space<vmem>>, vector<4x4x4x128xf32>
    tpu.vector_store %arg7[%c0_23, %c1_24, %c1_25, %c0_26], %13 {strides = array<i32>} : memref<4x6x6x128xf32, #tpu.memory_space<vmem>>, vector<4x4x4x128xf32>,
    %15 = vector.extract_strided_slice %3 {offsets = [0, 1920], sizes = [64, 128], strides = [1, 1]} : vector<64x2048xf32> to vector<64x128xf32>
    %16 = vector.shape_cast %15 : vector<64x128xf32> to vector<4x4x4x128xf32>
    %c0_27 = arith.constant 0 : index
    %c2 = arith.constant 2 : index
    %c2_28 = arith.constant 2 : index
    %c0_29 = arith.constant 0 : index
    %17 = vector.load %arg7[%c0_27, %c2, %c2_28, %c0_29] : memref<4x6x6x128xf32, #tpu.memory_space<vmem>>, vector<4x3x3x128xf32>
    %18 = vector.extract_strided_slice %16 {offsets = [0, 0, 0, 0], sizes = [4, 3, 3, 128], strides = [1, 1, 1, 1]} : vector<4x4x4x128xf32> to vector<4x3x3x128xf32>
    %19 = arith.addf %17, %18 : vector<4x3x3x128xf32>
    %c0_30 = arith.constant 0 : index
    %c2_31 = arith.constant 2 : index
    %c2_32 = arith.constant 2 : index
    %c0_33 = arith.constant 0 : index
    %20 = vector.load %arg7[%c0_30, %c2_31, %c2_32, %c0_33] : memref<4x6x6x128xf32, #tpu.memory_space<vmem>>, vector<4x3x3x128xf32>
    tpu.vector_store %arg7[%c0_30, %c2_31, %c2_32, %c0_33], %19 {strides = array<i32>} : memref<4x6x6x128xf32, #tpu.memory_space<vmem>>, vector<4x3x3x128xf32>,
    %21 = vector.extract_strided_slice %3 {offsets = [0, 1664], sizes = [64, 128], strides = [1, 1]} : vector<64x2048xf32> to vector<64x128xf32>
    %22 = vector.shape_cast %21 : vector<64x128xf32> to vector<4x4x4x128xf32>
    %c0_34 = arith.constant 0 : index
    %c2_35 = arith.constant 2 : index
    %c1_36 = arith.constant 1 : index
    %c0_37 = arith.constant 0 : index
    %23 = vector.load %arg7[%c0_34, %c2_35, %c1_36, %c0_37] : memref<4x6x6x128xf32, #tpu.memory_space<vmem>>, vector<4x3x4x128xf32>
    %24 = vector.extract_strided_slice %22 {offsets = [0, 0, 0, 0], sizes = [4, 3, 4, 128], strides = [1, 1, 1, 1]} : vector<4x4x4x128xf32> to vector<4x3x4x128xf32>
    %25 = arith.addf %23, %24 : vector<4x3x4x128xf32>
    %c0_38 = arith.constant 0 : index
    %c2_39 = arith.constant 2 : index
    %c1_40 = arith.constant 1 : index
    %c0_41 = arith.constant 0 : index
    %26 = vector.load %arg7[%c0_38, %c2_39, %c1_40, %c0_41] : memref<4x6x6x128xf32, #tpu.memory_space<vmem>>, vector<4x3x4x128xf32>
    tpu.vector_store %arg7[%c0_38, %c2_39, %c1_40, %c0_41], %25 {strides = array<i32>} : memref<4x6x6x128xf32, #tpu.memory_space<vmem>>, vector<4x3x4x128xf32>,
    %27 = vector.extract_strided_slice %3 {offsets = [0, 896], sizes = [64, 128], strides = [1, 1]} : vector<64x2048xf32> to vector<64x128xf32>
    %28 = vector.shape_cast %27 : vector<64x128xf32> to vector<4x4x4x128xf32>
    %c0_42 = arith.constant 0 : index
    %c1_43 = arith.constant 1 : index
    %c2_44 = arith.constant 2 : index
    %c0_45 = arith.constant 0 : index
    %29 = vector.load %arg7[%c0_42, %c1_43, %c2_44, %c0_45] : memref<4x6x6x128xf32, #tpu.memory_space<vmem>>, vector<4x4x3x128xf32>
    %30 = vector.extract_strided_slice %28 {offsets = [0, 0, 0, 0], sizes = [4, 4, 3, 128], strides = [1, 1, 1, 1]} : vector<4x4x4x128xf32> to vector<4x4x3x128xf32>
    %31 = arith.addf %29, %30 : vector<4x4x3x128xf32>
    %c0_46 = arith.constant 0 : index
    %c1_47 = arith.constant 1 : index
    %c2_48 = arith.constant 2 : index
    %c0_49 = arith.constant 0 : index
    %32 = vector.load %arg7[%c0_46, %c1_47, %c2_48, %c0_49] : memref<4x6x6x128xf32, #tpu.memory_space<vmem>>, vector<4x4x3x128xf32>
    tpu.vector_store %arg7[%c0_46, %c1_47, %c2_48, %c0_49], %31 {strides = array<i32>} : memref<4x6x6x128xf32, #tpu.memory_space<vmem>>, vector<4x4x3x128xf32>,
    %cst_50 = arith.constant 0.000000e+00 : f32
    %33 = vector.broadcast %cst_50 : f32 to vector<4x1x6x128xf32>
    %c0_51 = arith.constant 0 : index
    %c0_52 = arith.constant 0 : index
    %c0_53 = arith.constant 0 : index
    %c0_54 = arith.constant 0 : index
    %34 = vector.load %arg8[%c0_51, %c0_52, %c0_53, %c0_54] : memref<4x6x6x128xf32, #tpu.memory_space<vmem>>, vector<4x1x6x128xf32>
    tpu.vector_store %arg8[%c0_51, %c0_52, %c0_53, %c0_54], %33 {strides = array<i32>} : memref<4x6x6x128xf32, #tpu.memory_space<vmem>>, vector<4x1x6x128xf32>,
    %cst_55 = arith.constant 0.000000e+00 : f32
    %35 = vector.broadcast %cst_55 : f32 to vector<4x1x6x128xf32>
    %c0_56 = arith.constant 0 : index
    %c5_57 = arith.constant 5 : index
    %c0_58 = arith.constant 0 : index
    %c0_59 = arith.constant 0 : index
    %36 = vector.load %arg8[%c0_56, %c5_57, %c0_58, %c0_59] : memref<4x6x6x128xf32, #tpu.memory_space<vmem>>, vector<4x1x6x128xf32>
    tpu.vector_store %arg8[%c0_56, %c5_57, %c0_58, %c0_59], %35 {strides = array<i32>} : memref<4x6x6x128xf32, #tpu.memory_space<vmem>>, vector<4x1x6x128xf32>,
    %cst_60 = arith.constant 0.000000e+00 : f32
    %37 = vector.broadcast %cst_60 : f32 to vector<4x4x1x128xf32>
    %c0_61 = arith.constant 0 : index
    %c1_62 = arith.constant 1 : index
    %c0_63 = arith.constant 0 : index
    %c0_64 = arith.constant 0 : index
    %38 = vector.load %arg8[%c0_61, %c1_62, %c0_63, %c0_64] : memref<4x6x6x128xf32, #tpu.memory_space<vmem>>, vector<4x4x1x128xf32>
    tpu.vector_store %arg8[%c0_61, %c1_62, %c0_63, %c0_64], %37 {strides = array<i32>} : memref<4x6x6x128xf32, #tpu.memory_space<vmem>>, vector<4x4x1x128xf32>,
    %cst_65 = arith.constant 0.000000e+00 : f32
    %39 = vector.broadcast %cst_65 : f32 to vector<4x4x1x128xf32>
    %c0_66 = arith.constant 0 : index
    %c1_67 = arith.constant 1 : index
    %c5_68 = arith.constant 5 : index
    %c0_69 = arith.constant 0 : index
    %40 = vector.load %arg8[%c0_66, %c1_67, %c5_68, %c0_69] : memref<4x6x6x128xf32, #tpu.memory_space<vmem>>, vector<4x4x1x128xf32>
    tpu.vector_store %arg8[%c0_66, %c1_67, %c5_68, %c0_69], %39 {strides = array<i32>} : memref<4x6x6x128xf32, #tpu.memory_space<vmem>>, vector<4x4x1x128xf32>,
    %41 = vector.extract_strided_slice %3 {offsets = [0, 768], sizes = [64, 128], strides = [1, 1]} : vector<64x2048xf32> to vector<64x128xf32>
    %42 = vector.shape_cast %41 : vector<64x128xf32> to vector<4x4x4x128xf32>
    %c0_70 = arith.constant 0 : index
    %c1_71 = arith.constant 1 : index
    %c1_72 = arith.constant 1 : index
    %c0_73 = arith.constant 0 : index
    %43 = vector.load %arg8[%c0_70, %c1_71, %c1_72, %c0_73] : memref<4x6x6x128xf32, #tpu.memory_space<vmem>>, vector<4x4x4x128xf32>
    tpu.vector_store %arg8[%c0_70, %c1_71, %c1_72, %c0_73], %42 {strides = array<i32>} : memref<4x6x6x128xf32, #tpu.memory_space<vmem>>, vector<4x4x4x128xf32>,
    %44 = vector.extract_strided_slice %3 {offsets = [0, 1792], sizes = [64, 128], strides = [1, 1]} : vector<64x2048xf32> to vector<64x128xf32>
    %45 = vector.shape_cast %44 : vector<64x128xf32> to vector<4x4x4x128xf32>
    %c0_74 = arith.constant 0 : index
    %c2_75 = arith.constant 2 : index
    %c1_76 = arith.constant 1 : index
    %c0_77 = arith.constant 0 : index
    %46 = vector.load %arg8[%c0_74, %c2_75, %c1_76, %c0_77] : memref<4x6x6x128xf32, #tpu.memory_space<vmem>>, vector<4x3x4x128xf32>
    %47 = vector.extract_strided_slice %45 {offsets = [0, 0, 0, 0], sizes = [4, 3, 4, 128], strides = [1, 1, 1, 1]} : vector<4x4x4x128xf32> to vector<4x3x4x128xf32>
    %48 = arith.addf %46, %47 : vector<4x3x4x128xf32>
    %c0_78 = arith.constant 0 : index
    %c2_79 = arith.constant 2 : index
    %c1_80 = arith.constant 1 : index
    %c0_81 = arith.constant 0 : index
    %49 = vector.load %arg8[%c0_78, %c2_79, %c1_80, %c0_81] : memref<4x6x6x128xf32, #tpu.memory_space<vmem>>, vector<4x3x4x128xf32>
    tpu.vector_store %arg8[%c0_78, %c2_79, %c1_80, %c0_81], %48 {strides = array<i32>} : memref<4x6x6x128xf32, #tpu.memory_space<vmem>>, vector<4x3x4x128xf32>,
    %50 = vector.extract_strided_slice %3 {offsets = [0, 1536], sizes = [64, 128], strides = [1, 1]} : vector<64x2048xf32> to vector<64x128xf32>
    %51 = vector.shape_cast %50 : vector<64x128xf32> to vector<4x4x4x128xf32>
    %c0_82 = arith.constant 0 : index
    %c2_83 = arith.constant 2 : index
    %c1_84 = arith.constant 1 : index
    %c0_85 = arith.constant 0 : index
    %52 = vector.load %arg8[%c0_82, %c2_83, %c1_84, %c0_85] : memref<4x6x6x128xf32, #tpu.memory_space<vmem>>, vector<4x3x3x128xf32>
    %53 = vector.extract_strided_slice %51 {offsets = [0, 0, 1, 0], sizes = [4, 3, 3, 128], strides = [1, 1, 1, 1]} : vector<4x4x4x128xf32> to vector<4x3x3x128xf32>
    %54 = arith.addf %52, %53 : vector<4x3x3x128xf32>
    %c0_86 = arith.constant 0 : index
    %c2_87 = arith.constant 2 : index
    %c1_88 = arith.constant 1 : index
    %c0_89 = arith.constant 0 : index
    %55 = vector.load %arg8[%c0_86, %c2_87, %c1_88, %c0_89] : memref<4x6x6x128xf32, #tpu.memory_space<vmem>>, vector<4x3x3x128xf32>
    tpu.vector_store %arg8[%c0_86, %c2_87, %c1_88, %c0_89], %54 {strides = array<i32>} : memref<4x6x6x128xf32, #tpu.memory_space<vmem>>, vector<4x3x3x128xf32>,
    %56 = vector.extract_strided_slice %3 {offsets = [0, 512], sizes = [64, 128], strides = [1, 1]} : vector<64x2048xf32> to vector<64x128xf32>
    %57 = vector.shape_cast %56 : vector<64x128xf32> to vector<4x4x4x128xf32>
    %c0_90 = arith.constant 0 : index
    %c1_91 = arith.constant 1 : index
    %c1_92 = arith.constant 1 : index
    %c0_93 = arith.constant 0 : index
    %58 = vector.load %arg8[%c0_90, %c1_91, %c1_92, %c0_93] : memref<4x6x6x128xf32, #tpu.memory_space<vmem>>, vector<4x4x3x128xf32>
    %59 = vector.extract_strided_slice %57 {offsets = [0, 0, 1, 0], sizes = [4, 4, 3, 128], strides = [1, 1, 1, 1]} : vector<4x4x4x128xf32> to vector<4x4x3x128xf32>
    %60 = arith.addf %58, %59 : vector<4x4x3x128xf32>
    %c0_94 = arith.constant 0 : index
    %c1_95 = arith.constant 1 : index
    %c1_96 = arith.constant 1 : index
    %c0_97 = arith.constant 0 : index
    %61 = vector.load %arg8[%c0_94, %c1_95, %c1_96, %c0_97] : memref<4x6x6x128xf32, #tpu.memory_space<vmem>>, vector<4x4x3x128xf32>
    tpu.vector_store %arg8[%c0_94, %c1_95, %c1_96, %c0_97], %60 {strides = array<i32>} : memref<4x6x6x128xf32, #tpu.memory_space<vmem>>, vector<4x4x3x128xf32>,
    %cst_98 = arith.constant 0.000000e+00 : f32
    %62 = vector.broadcast %cst_98 : f32 to vector<4x1x6x128xf32>
    %c0_99 = arith.constant 0 : index
    %c0_100 = arith.constant 0 : index
    %c0_101 = arith.constant 0 : index
    %c0_102 = arith.constant 0 : index
    %63 = vector.load %arg9[%c0_99, %c0_100, %c0_101, %c0_102] : memref<4x6x6x128xf32, #tpu.memory_space<vmem>>, vector<4x1x6x128xf32>
    tpu.vector_store %arg9[%c0_99, %c0_100, %c0_101, %c0_102], %62 {strides = array<i32>} : memref<4x6x6x128xf32, #tpu.memory_space<vmem>>, vector<4x1x6x128xf32>,
    %cst_103 = arith.constant 0.000000e+00 : f32
    %64 = vector.broadcast %cst_103 : f32 to vector<4x1x6x128xf32>
    %c0_104 = arith.constant 0 : index
    %c5_105 = arith.constant 5 : index
    %c0_106 = arith.constant 0 : index
    %c0_107 = arith.constant 0 : index
    %65 = vector.load %arg9[%c0_104, %c5_105, %c0_106, %c0_107] : memref<4x6x6x128xf32, #tpu.memory_space<vmem>>, vector<4x1x6x128xf32>
    tpu.vector_store %arg9[%c0_104, %c5_105, %c0_106, %c0_107], %64 {strides = array<i32>} : memref<4x6x6x128xf32, #tpu.memory_space<vmem>>, vector<4x1x6x128xf32>,
    %cst_108 = arith.constant 0.000000e+00 : f32
    %66 = vector.broadcast %cst_108 : f32 to vector<4x4x1x128xf32>
    %c0_109 = arith.constant 0 : index
    %c1_110 = arith.constant 1 : index
    %c0_111 = arith.constant 0 : index
    %c0_112 = arith.constant 0 : index
    %67 = vector.load %arg9[%c0_109, %c1_110, %c0_111, %c0_112] : memref<4x6x6x128xf32, #tpu.memory_space<vmem>>, vector<4x4x1x128xf32>
    tpu.vector_store %arg9[%c0_109, %c1_110, %c0_111, %c0_112], %66 {strides = array<i32>} : memref<4x6x6x128xf32, #tpu.memory_space<vmem>>, vector<4x4x1x128xf32>,
    %cst_113 = arith.constant 0.000000e+00 : f32
    %68 = vector.broadcast %cst_113 : f32 to vector<4x4x1x128xf32>
    %c0_114 = arith.constant 0 : index
    %c1_115 = arith.constant 1 : index
    %c5_116 = arith.constant 5 : index
    %c0_117 = arith.constant 0 : index
    %69 = vector.load %arg9[%c0_114, %c1_115, %c5_116, %c0_117] : memref<4x6x6x128xf32, #tpu.memory_space<vmem>>, vector<4x4x1x128xf32>
    tpu.vector_store %arg9[%c0_114, %c1_115, %c5_116, %c0_117], %68 {strides = array<i32>} : memref<4x6x6x128xf32, #tpu.memory_space<vmem>>, vector<4x4x1x128xf32>,
    %70 = vector.extract_strided_slice %3 {offsets = [0, 1152], sizes = [64, 128], strides = [1, 1]} : vector<64x2048xf32> to vector<64x128xf32>
    %71 = vector.shape_cast %70 : vector<64x128xf32> to vector<4x4x4x128xf32>
    %c0_118 = arith.constant 0 : index
    %c1_119 = arith.constant 1 : index
    %c1_120 = arith.constant 1 : index
    %c0_121 = arith.constant 0 : index
    %72 = vector.load %arg9[%c0_118, %c1_119, %c1_120, %c0_121] : memref<4x6x6x128xf32, #tpu.memory_space<vmem>>, vector<4x4x4x128xf32>
    tpu.vector_store %arg9[%c0_118, %c1_119, %c1_120, %c0_121], %71 {strides = array<i32>} : memref<4x6x6x128xf32, #tpu.memory_space<vmem>>, vector<4x4x4x128xf32>,
    %73 = vector.extract_strided_slice %3 {offsets = [0, 1408], sizes = [64, 128], strides = [1, 1]} : vector<64x2048xf32> to vector<64x128xf32>
    %74 = vector.shape_cast %73 : vector<64x128xf32> to vector<4x4x4x128xf32>
    %c0_122 = arith.constant 0 : index
    %c1_123 = arith.constant 1 : index
    %c2_124 = arith.constant 2 : index
    %c0_125 = arith.constant 0 : index
    %75 = vector.load %arg9[%c0_122, %c1_123, %c2_124, %c0_125] : memref<4x6x6x128xf32, #tpu.memory_space<vmem>>, vector<4x4x3x128xf32>
    %76 = vector.extract_strided_slice %74 {offsets = [0, 0, 0, 0], sizes = [4, 4, 3, 128], strides = [1, 1, 1, 1]} : vector<4x4x4x128xf32> to vector<4x4x3x128xf32>
    %77 = arith.addf %75, %76 : vector<4x4x3x128xf32>
    %c0_126 = arith.constant 0 : index
    %c1_127 = arith.constant 1 : index
    %c2_128 = arith.constant 2 : index
    %c0_129 = arith.constant 0 : index
    %78 = vector.load %arg9[%c0_126, %c1_127, %c2_128, %c0_129] : memref<4x6x6x128xf32, #tpu.memory_space<vmem>>, vector<4x4x3x128xf32>
    tpu.vector_store %arg9[%c0_126, %c1_127, %c2_128, %c0_129], %77 {strides = array<i32>} : memref<4x6x6x128xf32, #tpu.memory_space<vmem>>, vector<4x4x3x128xf32>,
    %79 = vector.extract_strided_slice %3 {offsets = [0, 384], sizes = [64, 128], strides = [1, 1]} : vector<64x2048xf32> to vector<64x128xf32>
    %80 = vector.shape_cast %79 : vector<64x128xf32> to vector<4x4x4x128xf32>
    %c0_130 = arith.constant 0 : index
    %c1_131 = arith.constant 1 : index
    %c2_132 = arith.constant 2 : index
    %c0_133 = arith.constant 0 : index
    %81 = vector.load %arg9[%c0_130, %c1_131, %c2_132, %c0_133] : memref<4x6x6x128xf32, #tpu.memory_space<vmem>>, vector<4x3x3x128xf32>
    %82 = vector.extract_strided_slice %80 {offsets = [0, 1, 0, 0], sizes = [4, 3, 3, 128], strides = [1, 1, 1, 1]} : vector<4x4x4x128xf32> to vector<4x3x3x128xf32>
    %83 = arith.addf %81, %82 : vector<4x3x3x128xf32>
    %c0_134 = arith.constant 0 : index
    %c1_135 = arith.constant 1 : index
    %c2_136 = arith.constant 2 : index
    %c0_137 = arith.constant 0 : index
    %84 = vector.load %arg9[%c0_134, %c1_135, %c2_136, %c0_137] : memref<4x6x6x128xf32, #tpu.memory_space<vmem>>, vector<4x3x3x128xf32>
    tpu.vector_store %arg9[%c0_134, %c1_135, %c2_136, %c0_137], %83 {strides = array<i32>} : memref<4x6x6x128xf32, #tpu.memory_space<vmem>>, vector<4x3x3x128xf32>,
    %85 = vector.extract_strided_slice %3 {offsets = [0, 128], sizes = [64, 128], strides = [1, 1]} : vector<64x2048xf32> to vector<64x128xf32>
    %86 = vector.shape_cast %85 : vector<64x128xf32> to vector<4x4x4x128xf32>
    %c0_138 = arith.constant 0 : index
    %c1_139 = arith.constant 1 : index
    %c1_140 = arith.constant 1 : index
    %c0_141 = arith.constant 0 : index
    %87 = vector.load %arg9[%c0_138, %c1_139, %c1_140, %c0_141] : memref<4x6x6x128xf32, #tpu.memory_space<vmem>>, vector<4x3x4x128xf32>
    %88 = vector.extract_strided_slice %86 {offsets = [0, 1, 0, 0], sizes = [4, 3, 4, 128], strides = [1, 1, 1, 1]} : vector<4x4x4x128xf32> to vector<4x3x4x128xf32>
    %89 = arith.addf %87, %88 : vector<4x3x4x128xf32>
    %c0_142 = arith.constant 0 : index
    %c1_143 = arith.constant 1 : index
    %c1_144 = arith.constant 1 : index
    %c0_145 = arith.constant 0 : index
    %90 = vector.load %arg9[%c0_142, %c1_143, %c1_144, %c0_145] : memref<4x6x6x128xf32, #tpu.memory_space<vmem>>, vector<4x3x4x128xf32>
    tpu.vector_store %arg9[%c0_142, %c1_143, %c1_144, %c0_145], %89 {strides = array<i32>} : memref<4x6x6x128xf32, #tpu.memory_space<vmem>>, vector<4x3x4x128xf32>,
    %cst_146 = arith.constant 0.000000e+00 : f32
    %91 = vector.broadcast %cst_146 : f32 to vector<4x1x6x128xf32>
    %c0_147 = arith.constant 0 : index
    %c0_148 = arith.constant 0 : index
    %c0_149 = arith.constant 0 : index
    %c0_150 = arith.constant 0 : index
    %92 = vector.load %arg10[%c0_147, %c0_148, %c0_149, %c0_150] : memref<4x6x6x128xf32, #tpu.memory_space<vmem>>, vector<4x1x6x128xf32>
    tpu.vector_store %arg10[%c0_147, %c0_148, %c0_149, %c0_150], %91 {strides = array<i32>} : memref<4x6x6x128xf32, #tpu.memory_space<vmem>>, vector<4x1x6x128xf32>,
    %cst_151 = arith.constant 0.000000e+00 : f32
    %93 = vector.broadcast %cst_151 : f32 to vector<4x1x6x128xf32>
    %c0_152 = arith.constant 0 : index
    %c5_153 = arith.constant 5 : index
    %c0_154 = arith.constant 0 : index
    %c0_155 = arith.constant 0 : index
    %94 = vector.load %arg10[%c0_152, %c5_153, %c0_154, %c0_155] : memref<4x6x6x128xf32, #tpu.memory_space<vmem>>, vector<4x1x6x128xf32>
    tpu.vector_store %arg10[%c0_152, %c5_153, %c0_154, %c0_155], %93 {strides = array<i32>} : memref<4x6x6x128xf32, #tpu.memory_space<vmem>>, vector<4x1x6x128xf32>,
    %cst_156 = arith.constant 0.000000e+00 : f32
    %95 = vector.broadcast %cst_156 : f32 to vector<4x4x1x128xf32>
    %c0_157 = arith.constant 0 : index
    %c1_158 = arith.constant 1 : index
    %c0_159 = arith.constant 0 : index
    %c0_160 = arith.constant 0 : index
    %96 = vector.load %arg10[%c0_157, %c1_158, %c0_159, %c0_160] : memref<4x6x6x128xf32, #tpu.memory_space<vmem>>, vector<4x4x1x128xf32>
    tpu.vector_store %arg10[%c0_157, %c1_158, %c0_159, %c0_160], %95 {strides = array<i32>} : memref<4x6x6x128xf32, #tpu.memory_space<vmem>>, vector<4x4x1x128xf32>,
    %cst_161 = arith.constant 0.000000e+00 : f32
    %97 = vector.broadcast %cst_161 : f32 to vector<4x4x1x128xf32>
    %c0_162 = arith.constant 0 : index
    %c1_163 = arith.constant 1 : index
    %c5_164 = arith.constant 5 : index
    %c0_165 = arith.constant 0 : index
    %98 = vector.load %arg10[%c0_162, %c1_163, %c5_164, %c0_165] : memref<4x6x6x128xf32, #tpu.memory_space<vmem>>, vector<4x4x1x128xf32>
    tpu.vector_store %arg10[%c0_162, %c1_163, %c5_164, %c0_165], %97 {strides = array<i32>} : memref<4x6x6x128xf32, #tpu.memory_space<vmem>>, vector<4x4x1x128xf32>,
    %99 = vector.extract_strided_slice %3 {offsets = [0, 1280], sizes = [64, 128], strides = [1, 1]} : vector<64x2048xf32> to vector<64x128xf32>
    %100 = vector.shape_cast %99 : vector<64x128xf32> to vector<4x4x4x128xf32>
    %c0_166 = arith.constant 0 : index
    %c1_167 = arith.constant 1 : index
    %c1_168 = arith.constant 1 : index
    %c0_169 = arith.constant 0 : index
    %101 = vector.load %arg10[%c0_166, %c1_167, %c1_168, %c0_169] : memref<4x6x6x128xf32, #tpu.memory_space<vmem>>, vector<4x4x4x128xf32>
    tpu.vector_store %arg10[%c0_166, %c1_167, %c1_168, %c0_169], %100 {strides = array<i32>} : memref<4x6x6x128xf32, #tpu.memory_space<vmem>>, vector<4x4x4x128xf32>,
    %102 = vector.extract_strided_slice %3 {offsets = [0, 1024], sizes = [64, 128], strides = [1, 1]} : vector<64x2048xf32> to vector<64x128xf32>
    %103 = vector.shape_cast %102 : vector<64x128xf32> to vector<4x4x4x128xf32>
    %c0_170 = arith.constant 0 : index
    %c1_171 = arith.constant 1 : index
    %c1_172 = arith.constant 1 : index
    %c0_173 = arith.constant 0 : index
    %104 = vector.load %arg10[%c0_170, %c1_171, %c1_172, %c0_173] : memref<4x6x6x128xf32, #tpu.memory_space<vmem>>, vector<4x4x3x128xf32>
    %105 = vector.extract_strided_slice %103 {offsets = [0, 0, 1, 0], sizes = [4, 4, 3, 128], strides = [1, 1, 1, 1]} : vector<4x4x4x128xf32> to vector<4x4x3x128xf32>
    %106 = arith.addf %104, %105 : vector<4x4x3x128xf32>
    %c0_174 = arith.constant 0 : index
    %c1_175 = arith.constant 1 : index
    %c1_176 = arith.constant 1 : index
    %c0_177 = arith.constant 0 : index
    %107 = vector.load %arg10[%c0_174, %c1_175, %c1_176, %c0_177] : memref<4x6x6x128xf32, #tpu.memory_space<vmem>>, vector<4x4x3x128xf32>
    tpu.vector_store %arg10[%c0_174, %c1_175, %c1_176, %c0_177], %106 {strides = array<i32>} : memref<4x6x6x128xf32, #tpu.memory_space<vmem>>, vector<4x4x3x128xf32>,
    %108 = vector.extract_strided_slice %3 {offsets = [0, 256], sizes = [64, 128], strides = [1, 1]} : vector<64x2048xf32> to vector<64x128xf32>
    %109 = vector.shape_cast %108 : vector<64x128xf32> to vector<4x4x4x128xf32>
    %c0_178 = arith.constant 0 : index
    %c1_179 = arith.constant 1 : index
    %c1_180 = arith.constant 1 : index
    %c0_181 = arith.constant 0 : index
    %110 = vector.load %arg10[%c0_178, %c1_179, %c1_180, %c0_181] : memref<4x6x6x128xf32, #tpu.memory_space<vmem>>, vector<4x3x4x128xf32>
    %111 = vector.extract_strided_slice %109 {offsets = [0, 1, 0, 0], sizes = [4, 3, 4, 128], strides = [1, 1, 1, 1]} : vector<4x4x4x128xf32> to vector<4x3x4x128xf32>
    %112 = arith.addf %110, %111 : vector<4x3x4x128xf32>
    %c0_182 = arith.constant 0 : index
    %c1_183 = arith.constant 1 : index
    %c1_184 = arith.constant 1 : index
    %c0_185 = arith.constant 0 : index
    %113 = vector.load %arg10[%c0_182, %c1_183, %c1_184, %c0_185] : memref<4x6x6x128xf32, #tpu.memory_space<vmem>>, vector<4x3x4x128xf32>
    tpu.vector_store %arg10[%c0_182, %c1_183, %c1_184, %c0_185], %112 {strides = array<i32>} : memref<4x6x6x128xf32, #tpu.memory_space<vmem>>, vector<4x3x4x128xf32>,
    %114 = vector.extract_strided_slice %3 {offsets = [0, 0], sizes = [64, 128], strides = [1, 1]} : vector<64x2048xf32> to vector<64x128xf32>
    %115 = vector.shape_cast %114 : vector<64x128xf32> to vector<4x4x4x128xf32>
    %c0_186 = arith.constant 0 : index
    %c1_187 = arith.constant 1 : index
    %c1_188 = arith.constant 1 : index
    %c0_189 = arith.constant 0 : index
    %116 = vector.load %arg10[%c0_186, %c1_187, %c1_188, %c0_189] : memref<4x6x6x128xf32, #tpu.memory_space<vmem>>, vector<4x3x3x128xf32>
    %117 = vector.extract_strided_slice %115 {offsets = [0, 1, 1, 0], sizes = [4, 3, 3, 128], strides = [1, 1, 1, 1]} : vector<4x4x4x128xf32> to vector<4x3x3x128xf32>
    %118 = arith.addf %116, %117 : vector<4x3x3x128xf32>
    %c0_190 = arith.constant 0 : index
    %c1_191 = arith.constant 1 : index
    %c1_192 = arith.constant 1 : index
    %c0_193 = arith.constant 0 : index
    %119 = vector.load %arg10[%c0_190, %c1_191, %c1_192, %c0_193] : memref<4x6x6x128xf32, #tpu.memory_space<vmem>>, vector<4x3x3x128xf32>
    tpu.vector_store %arg10[%c0_190, %c1_191, %c1_192, %c0_193], %118 {strides = array<i32>} : memref<4x6x6x128xf32, #tpu.memory_space<vmem>>, vector<4x3x3x128xf32>,
    %cst_194 = arith.constant 0.000000e+00 : f32
    %120 = vector.broadcast %cst_194 : f32 to vector<1x128xf32>
    %cst_195 = arith.constant 0.000000e+00 : f32
    %121 = vector.broadcast %cst_195 : f32 to vector<1x128xf32>
    %c0_196 = arith.constant 0 : index
    %c1_197 = arith.constant 1 : index
    %c1_198 = arith.constant 1 : index
    %c0_199 = arith.constant 0 : index
    %122 = vector.load %arg7[%c0_196, %c1_197, %c1_198, %c0_199] : memref<4x6x6x128xf32, #tpu.memory_space<vmem>>, vector<4x4x4x128xf32>
    %123 = vector.shape_cast %122 : vector<4x4x4x128xf32> to vector<64x128xf32>
    %cst_200 = arith.constant dense<0.000000e+00> : vector<128xf32>
    %124 = vector.multi_reduction <add>, %123, %cst_200 [0] : vector<64x128xf32> to vector<128xf32>
    %125 = vector.shape_cast %124 : vector<128xf32> to vector<1x128xf32>
    %126 = arith.addf %120, %125 : vector<1x128xf32>
    %127 = arith.mulf %123, %123 : vector<64x128xf32>
    %cst_201 = arith.constant dense<0.000000e+00> : vector<128xf32>
    %128 = vector.multi_reduction <add>, %127, %cst_201 [0] : vector<64x128xf32> to vector<128xf32>
    %129 = vector.shape_cast %128 : vector<128xf32> to vector<1x128xf32>
    %130 = arith.addf %121, %129 : vector<1x128xf32>
    %c0_202 = arith.constant 0 : index
    %c1_203 = arith.constant 1 : index
    %c1_204 = arith.constant 1 : index
    %c0_205 = arith.constant 0 : index
    %131 = vector.load %arg8[%c0_202, %c1_203, %c1_204, %c0_205] : memref<4x6x6x128xf32, #tpu.memory_space<vmem>>, vector<4x4x4x128xf32>
    %132 = vector.shape_cast %131 : vector<4x4x4x128xf32> to vector<64x128xf32>
    %cst_206 = arith.constant dense<0.000000e+00> : vector<128xf32>
    %133 = vector.multi_reduction <add>, %132, %cst_206 [0] : vector<64x128xf32> to vector<128xf32>
    %134 = vector.shape_cast %133 : vector<128xf32> to vector<1x128xf32>
    %135 = arith.addf %126, %134 : vector<1x128xf32>
    %136 = arith.mulf %132, %132 : vector<64x128xf32>
    %cst_207 = arith.constant dense<0.000000e+00> : vector<128xf32>
    %137 = vector.multi_reduction <add>, %136, %cst_207 [0] : vector<64x128xf32> to vector<128xf32>
    %138 = vector.shape_cast %137 : vector<128xf32> to vector<1x128xf32>
    %139 = arith.addf %130, %138 : vector<1x128xf32>
    %c0_208 = arith.constant 0 : index
    %c1_209 = arith.constant 1 : index
    %c1_210 = arith.constant 1 : index
    %c0_211 = arith.constant 0 : index
    %140 = vector.load %arg9[%c0_208, %c1_209, %c1_210, %c0_211] : memref<4x6x6x128xf32, #tpu.memory_space<vmem>>, vector<4x4x4x128xf32>
    %141 = vector.shape_cast %140 : vector<4x4x4x128xf32> to vector<64x128xf32>
    %cst_212 = arith.constant dense<0.000000e+00> : vector<128xf32>
    %142 = vector.multi_reduction <add>, %141, %cst_212 [0] : vector<64x128xf32> to vector<128xf32>
    %143 = vector.shape_cast %142 : vector<128xf32> to vector<1x128xf32>
    %144 = arith.addf %135, %143 : vector<1x128xf32>
    %145 = arith.mulf %141, %141 : vector<64x128xf32>
    %cst_213 = arith.constant dense<0.000000e+00> : vector<128xf32>
    %146 = vector.multi_reduction <add>, %145, %cst_213 [0] : vector<64x128xf32> to vector<128xf32>
    %147 = vector.shape_cast %146 : vector<128xf32> to vector<1x128xf32>
    %148 = arith.addf %139, %147 : vector<1x128xf32>
    %c0_214 = arith.constant 0 : index
    %c1_215 = arith.constant 1 : index
    %c1_216 = arith.constant 1 : index
    %c0_217 = arith.constant 0 : index
    %149 = vector.load %arg10[%c0_214, %c1_215, %c1_216, %c0_217] : memref<4x6x6x128xf32, #tpu.memory_space<vmem>>, vector<4x4x4x128xf32>
    %150 = vector.shape_cast %149 : vector<4x4x4x128xf32> to vector<64x128xf32>
    %cst_218 = arith.constant dense<0.000000e+00> : vector<128xf32>
    %151 = vector.multi_reduction <add>, %150, %cst_218 [0] : vector<64x128xf32> to vector<128xf32>
    %152 = vector.shape_cast %151 : vector<128xf32> to vector<1x128xf32>
    %153 = arith.addf %144, %152 : vector<1x128xf32>
    %154 = arith.mulf %150, %150 : vector<64x128xf32>
    %cst_219 = arith.constant dense<0.000000e+00> : vector<128xf32>
    %155 = vector.multi_reduction <add>, %154, %cst_219 [0] : vector<64x128xf32> to vector<128xf32>
    %156 = vector.shape_cast %155 : vector<128xf32> to vector<1x128xf32>
    %157 = arith.addf %148, %156 : vector<1x128xf32>
    %cst_220 = arith.constant 3.906250e-03 : f32
    %158 = vector.broadcast %cst_220 : f32 to vector<1x128xf32>
    %159 = arith.mulf %153, %158 : vector<1x128xf32>
    %cst_221 = arith.constant 3.906250e-03 : f32
    %160 = vector.broadcast %cst_221 : f32 to vector<1x128xf32>
    %161 = arith.mulf %157, %160 : vector<1x128xf32>
    %162 = arith.mulf %159, %159 : vector<1x128xf32>
    %163 = arith.subf %161, %162 : vector<1x128xf32>
    %cst_222 = arith.constant 0.000000e+00 : f32
    %164 = vector.broadcast %cst_222 : f32 to vector<1x128xf32>
    %165 = arith.maximumf %163, %164 : vector<1x128xf32>
    %c0_223 = arith.constant 0 : index
    %c0_224 = arith.constant 0 : index
    %166 = vector.load %arg2[%c0_223, %c0_224] : memref<1x128xf32, #tpu.memory_space<vmem>>, vector<1x128xf32>
    %cst_225 = arith.constant 9.99999974E-6 : f32
    %167 = vector.broadcast %cst_225 : f32 to vector<1x128xf32>
    %168 = arith.addf %165, %167 : vector<1x128xf32>
    %169 = math.rsqrt %168 : vector<1x128xf32>
    %170 = arith.mulf %166, %169 : vector<1x128xf32>
    %c0_226 = arith.constant 0 : index
    %c0_227 = arith.constant 0 : index
    %171 = vector.load %arg3[%c0_226, %c0_227] : memref<1x128xf32, #tpu.memory_space<vmem>>, vector<1x128xf32>
    %172 = arith.mulf %159, %170 : vector<1x128xf32>
    %173 = arith.subf %171, %172 : vector<1x128xf32>
    %174 = vector.broadcast %170 : vector<1x128xf32> to vector<64x128xf32>
    %175 = arith.mulf %123, %174 : vector<64x128xf32>
    %176 = vector.broadcast %173 : vector<1x128xf32> to vector<64x128xf32>
    %177 = arith.addf %175, %176 : vector<64x128xf32>
    %cst_228 = arith.constant 0.000000e+00 : f32
    %178 = vector.broadcast %cst_228 : f32 to vector<64x128xf32>
    %179 = arith.maximumf %177, %178 : vector<64x128xf32>
    %180 = vector.shape_cast %179 : vector<64x128xf32> to vector<4x4x4x128xf32>
    %c0_229 = arith.constant 0 : index
    %c1_230 = arith.constant 1 : index
    %c1_231 = arith.constant 1 : index
    %c0_232 = arith.constant 0 : index
    %181 = vector.load %arg7[%c0_229, %c1_230, %c1_231, %c0_232] : memref<4x6x6x128xf32, #tpu.memory_space<vmem>>, vector<4x4x4x128xf32>
    tpu.vector_store %arg7[%c0_229, %c1_230, %c1_231, %c0_232], %180 {strides = array<i32>} : memref<4x6x6x128xf32, #tpu.memory_space<vmem>>, vector<4x4x4x128xf32>,
    %182 = vector.broadcast %170 : vector<1x128xf32> to vector<64x128xf32>
    %183 = arith.mulf %132, %182 : vector<64x128xf32>
    %184 = vector.broadcast %173 : vector<1x128xf32> to vector<64x128xf32>
    %185 = arith.addf %183, %184 : vector<64x128xf32>
    %cst_233 = arith.constant 0.000000e+00 : f32
    %186 = vector.broadcast %cst_233 : f32 to vector<64x128xf32>
    %187 = arith.maximumf %185, %186 : vector<64x128xf32>
    %188 = vector.shape_cast %187 : vector<64x128xf32> to vector<4x4x4x128xf32>
    %c0_234 = arith.constant 0 : index
    %c1_235 = arith.constant 1 : index
    %c1_236 = arith.constant 1 : index
    %c0_237 = arith.constant 0 : index
    %189 = vector.load %arg8[%c0_234, %c1_235, %c1_236, %c0_237] : memref<4x6x6x128xf32, #tpu.memory_space<vmem>>, vector<4x4x4x128xf32>
    tpu.vector_store %arg8[%c0_234, %c1_235, %c1_236, %c0_237], %188 {strides = array<i32>} : memref<4x6x6x128xf32, #tpu.memory_space<vmem>>, vector<4x4x4x128xf32>,
    %190 = vector.broadcast %170 : vector<1x128xf32> to vector<64x128xf32>
    %191 = arith.mulf %141, %190 : vector<64x128xf32>
    %192 = vector.broadcast %173 : vector<1x128xf32> to vector<64x128xf32>
    %193 = arith.addf %191, %192 : vector<64x128xf32>
    %cst_238 = arith.constant 0.000000e+00 : f32
    %194 = vector.broadcast %cst_238 : f32 to vector<64x128xf32>
    %195 = arith.maximumf %193, %194 : vector<64x128xf32>
    %196 = vector.shape_cast %195 : vector<64x128xf32> to vector<4x4x4x128xf32>
    %c0_239 = arith.constant 0 : index
    %c1_240 = arith.constant 1 : index
    %c1_241 = arith.constant 1 : index
    %c0_242 = arith.constant 0 : index
    %197 = vector.load %arg9[%c0_239, %c1_240, %c1_241, %c0_242] : memref<4x6x6x128xf32, #tpu.memory_space<vmem>>, vector<4x4x4x128xf32>
    tpu.vector_store %arg9[%c0_239, %c1_240, %c1_241, %c0_242], %196 {strides = array<i32>} : memref<4x6x6x128xf32, #tpu.memory_space<vmem>>, vector<4x4x4x128xf32>,
    %198 = vector.broadcast %170 : vector<1x128xf32> to vector<64x128xf32>
    %199 = arith.mulf %150, %198 : vector<64x128xf32>
    %200 = vector.broadcast %173 : vector<1x128xf32> to vector<64x128xf32>
    %201 = arith.addf %199, %200 : vector<64x128xf32>
    %cst_243 = arith.constant 0.000000e+00 : f32
    %202 = vector.broadcast %cst_243 : f32 to vector<64x128xf32>
    %203 = arith.maximumf %201, %202 : vector<64x128xf32>
    %204 = vector.shape_cast %203 : vector<64x128xf32> to vector<4x4x4x128xf32>
    %c0_244 = arith.constant 0 : index
    %c1_245 = arith.constant 1 : index
    %c1_246 = arith.constant 1 : index
    %c0_247 = arith.constant 0 : index
    %205 = vector.load %arg10[%c0_244, %c1_245, %c1_246, %c0_247] : memref<4x6x6x128xf32, #tpu.memory_space<vmem>>, vector<4x4x4x128xf32>
    tpu.vector_store %arg10[%c0_244, %c1_245, %c1_246, %c0_247], %204 {strides = array<i32>} : memref<4x6x6x128xf32, #tpu.memory_space<vmem>>, vector<4x4x4x128xf32>,
    %c0_248 = arith.constant 0 : index
    %c1_249 = arith.constant 1 : index
    %c1_250 = arith.constant 1 : index
    %c0_251 = arith.constant 0 : index
    %206 = vector.load %arg7[%c0_248, %c1_249, %c1_250, %c0_251] : memref<4x6x6x128xf32, #tpu.memory_space<vmem>>, vector<4x4x4x128xf32>
    %207 = arith.truncf %206 : vector<4x4x4x128xf32> to vector<4x4x4x128xbf16>
    %208 = vector.shape_cast %207 : vector<4x4x4x128xbf16> to vector<64x128xbf16>
    %c0_252 = arith.constant 0 : index
    %c1_253 = arith.constant 1 : index
    %c2_254 = arith.constant 2 : index
    %c0_255 = arith.constant 0 : index
    %209 = vector.load %arg7[%c0_252, %c1_253, %c2_254, %c0_255] : memref<4x6x6x128xf32, #tpu.memory_space<vmem>>, vector<4x4x4x128xf32>
    %210 = arith.truncf %209 : vector<4x4x4x128xf32> to vector<4x4x4x128xbf16>
    %211 = vector.shape_cast %210 : vector<4x4x4x128xbf16> to vector<64x128xbf16>
    %c0_256 = arith.constant 0 : index
    %c2_257 = arith.constant 2 : index
    %c1_258 = arith.constant 1 : index
    %c0_259 = arith.constant 0 : index
    %212 = vector.load %arg7[%c0_256, %c2_257, %c1_258, %c0_259] : memref<4x6x6x128xf32, #tpu.memory_space<vmem>>, vector<4x4x4x128xf32>
    %213 = arith.truncf %212 : vector<4x4x4x128xf32> to vector<4x4x4x128xbf16>
    %214 = vector.shape_cast %213 : vector<4x4x4x128xbf16> to vector<64x128xbf16>
    %c0_260 = arith.constant 0 : index
    %c2_261 = arith.constant 2 : index
    %c2_262 = arith.constant 2 : index
    %c0_263 = arith.constant 0 : index
    %215 = vector.load %arg7[%c0_260, %c2_261, %c2_262, %c0_263] : memref<4x6x6x128xf32, #tpu.memory_space<vmem>>, vector<4x4x4x128xf32>
    %216 = arith.truncf %215 : vector<4x4x4x128xf32> to vector<4x4x4x128xbf16>
    %217 = vector.shape_cast %216 : vector<4x4x4x128xbf16> to vector<64x128xbf16>
    %c0_264 = arith.constant 0 : index
    %c1_265 = arith.constant 1 : index
    %c0_266 = arith.constant 0 : index
    %c0_267 = arith.constant 0 : index
    %218 = vector.load %arg8[%c0_264, %c1_265, %c0_266, %c0_267] : memref<4x6x6x128xf32, #tpu.memory_space<vmem>>, vector<4x4x4x128xf32>
    %219 = arith.truncf %218 : vector<4x4x4x128xf32> to vector<4x4x4x128xbf16>
    %220 = vector.shape_cast %219 : vector<4x4x4x128xbf16> to vector<64x128xbf16>
    %c0_268 = arith.constant 0 : index
    %c1_269 = arith.constant 1 : index
    %c1_270 = arith.constant 1 : index
    %c0_271 = arith.constant 0 : index
    %221 = vector.load %arg8[%c0_268, %c1_269, %c1_270, %c0_271] : memref<4x6x6x128xf32, #tpu.memory_space<vmem>>, vector<4x4x4x128xf32>
    %222 = arith.truncf %221 : vector<4x4x4x128xf32> to vector<4x4x4x128xbf16>
    %223 = vector.shape_cast %222 : vector<4x4x4x128xbf16> to vector<64x128xbf16>
    %c0_272 = arith.constant 0 : index
    %c2_273 = arith.constant 2 : index
    %c0_274 = arith.constant 0 : index
    %c0_275 = arith.constant 0 : index
    %224 = vector.load %arg8[%c0_272, %c2_273, %c0_274, %c0_275] : memref<4x6x6x128xf32, #tpu.memory_space<vmem>>, vector<4x4x4x128xf32>
    %225 = arith.truncf %224 : vector<4x4x4x128xf32> to vector<4x4x4x128xbf16>
    %226 = vector.shape_cast %225 : vector<4x4x4x128xbf16> to vector<64x128xbf16>
    %c0_276 = arith.constant 0 : index
    %c2_277 = arith.constant 2 : index
    %c1_278 = arith.constant 1 : index
    %c0_279 = arith.constant 0 : index
    %227 = vector.load %arg8[%c0_276, %c2_277, %c1_278, %c0_279] : memref<4x6x6x128xf32, #tpu.memory_space<vmem>>, vector<4x4x4x128xf32>
    %228 = arith.truncf %227 : vector<4x4x4x128xf32> to vector<4x4x4x128xbf16>
    %229 = vector.shape_cast %228 : vector<4x4x4x128xbf16> to vector<64x128xbf16>
    %c0_280 = arith.constant 0 : index
    %c0_281 = arith.constant 0 : index
    %c1_282 = arith.constant 1 : index
    %c0_283 = arith.constant 0 : index
    %230 = vector.load %arg9[%c0_280, %c0_281, %c1_282, %c0_283] : memref<4x6x6x128xf32, #tpu.memory_space<vmem>>, vector<4x4x4x128xf32>
    %231 = arith.truncf %230 : vector<4x4x4x128xf32> to vector<4x4x4x128xbf16>
    %232 = vector.shape_cast %231 : vector<4x4x4x128xbf16> to vector<64x128xbf16>
    %c0_284 = arith.constant 0 : index
    %c0_285 = arith.constant 0 : index
    %c2_286 = arith.constant 2 : index
    %c0_287 = arith.constant 0 : index
    %233 = vector.load %arg9[%c0_284, %c0_285, %c2_286, %c0_287] : memref<4x6x6x128xf32, #tpu.memory_space<vmem>>, vector<4x4x4x128xf32>
    %234 = arith.truncf %233 : vector<4x4x4x128xf32> to vector<4x4x4x128xbf16>
    %235 = vector.shape_cast %234 : vector<4x4x4x128xbf16> to vector<64x128xbf16>
    %c0_288 = arith.constant 0 : index
    %c1_289 = arith.constant 1 : index
    %c1_290 = arith.constant 1 : index
    %c0_291 = arith.constant 0 : index
    %236 = vector.load %arg9[%c0_288, %c1_289, %c1_290, %c0_291] : memref<4x6x6x128xf32, #tpu.memory_space<vmem>>, vector<4x4x4x128xf32>
    %237 = arith.truncf %236 : vector<4x4x4x128xf32> to vector<4x4x4x128xbf16>
    %238 = vector.shape_cast %237 : vector<4x4x4x128xbf16> to vector<64x128xbf16>
    %c0_292 = arith.constant 0 : index
    %c1_293 = arith.constant 1 : index
    %c2_294 = arith.constant 2 : index
    %c0_295 = arith.constant 0 : index
    %239 = vector.load %arg9[%c0_292, %c1_293, %c2_294, %c0_295] : memref<4x6x6x128xf32, #tpu.memory_space<vmem>>, vector<4x4x4x128xf32>
    %240 = arith.truncf %239 : vector<4x4x4x128xf32> to vector<4x4x4x128xbf16>
    %241 = vector.shape_cast %240 : vector<4x4x4x128xbf16> to vector<64x128xbf16>
    %c0_296 = arith.constant 0 : index
    %c0_297 = arith.constant 0 : index
    %c0_298 = arith.constant 0 : index
    %c0_299 = arith.constant 0 : index
    %242 = vector.load %arg10[%c0_296, %c0_297, %c0_298, %c0_299] : memref<4x6x6x128xf32, #tpu.memory_space<vmem>>, vector<4x4x4x128xf32>
    %243 = arith.truncf %242 : vector<4x4x4x128xf32> to vector<4x4x4x128xbf16>
    %244 = vector.shape_cast %243 : vector<4x4x4x128xbf16> to vector<64x128xbf16>
    %c0_300 = arith.constant 0 : index
    %c0_301 = arith.constant 0 : index
    %c1_302 = arith.constant 1 : index
    %c0_303 = arith.constant 0 : index
    %245 = vector.load %arg10[%c0_300, %c0_301, %c1_302, %c0_303] : memref<4x6x6x128xf32, #tpu.memory_space<vmem>>, vector<4x4x4x128xf32>
    %246 = arith.truncf %245 : vector<4x4x4x128xf32> to vector<4x4x4x128xbf16>
    %247 = vector.shape_cast %246 : vector<4x4x4x128xbf16> to vector<64x128xbf16>
    %c0_304 = arith.constant 0 : index
    %c1_305 = arith.constant 1 : index
    %c0_306 = arith.constant 0 : index
    %c0_307 = arith.constant 0 : index
    %248 = vector.load %arg10[%c0_304, %c1_305, %c0_306, %c0_307] : memref<4x6x6x128xf32, #tpu.memory_space<vmem>>, vector<4x4x4x128xf32>
    %249 = arith.truncf %248 : vector<4x4x4x128xf32> to vector<4x4x4x128xbf16>
    %250 = vector.shape_cast %249 : vector<4x4x4x128xbf16> to vector<64x128xbf16>
    %c0_308 = arith.constant 0 : index
    %c1_309 = arith.constant 1 : index
    %c1_310 = arith.constant 1 : index
    %c0_311 = arith.constant 0 : index
    %251 = vector.load %arg10[%c0_308, %c1_309, %c1_310, %c0_311] : memref<4x6x6x128xf32, #tpu.memory_space<vmem>>, vector<4x4x4x128xf32>
    %252 = arith.truncf %251 : vector<4x4x4x128xf32> to vector<4x4x4x128xbf16>
    %253 = vector.shape_cast %252 : vector<4x4x4x128xbf16> to vector<64x128xbf16>
    %254 = tpu.concatenate %208, %211, %214, %217, %220, %223, %226, %229, %232, %235, %238, %241, %244, %247, %250, %253 in 1 : vector<64x128xbf16>, vector<64x128xbf16>, vector<64x128xbf16>, vector<64x128xbf16>, vector<64x128xbf16>, vector<64x128xbf16>, vector<64x128xbf16>, vector<64x128xbf16>, vector<64x128xbf16>, vector<64x128xbf16>, vector<64x128xbf16>, vector<64x128xbf16>, vector<64x128xbf16>, vector<64x128xbf16>, vector<64x128xbf16>, vector<64x128xbf16> -> vector<64x2048xbf16>
    %c0_312 = arith.constant 0 : index
    %c0_313 = arith.constant 0 : index
    %255 = vector.load %arg4[%c0_312, %c0_313] : memref<2048x16xbf16, #tpu.memory_space<vmem>>, vector<2048x16xbf16>
    %cst_314 = arith.constant dense<0.000000e+00> : vector<64x16xf32>
    %256 = tpu.matmul %254, %255, %cst_314 {dimension_numbers = #tpu.dot_dimension_numbers<[1], [0], [0], [1], [0, 0, 1, 1], [], []>} : vector<64x2048xbf16>, vector<2048x16xbf16>, vector<64x16xf32> -> vector<64x16xf32>
    %c0_315 = arith.constant 0 : index
    %c0_316 = arith.constant 0 : index
    %257 = vector.load %arg5[%c0_315, %c0_316] : memref<1x16xf32, #tpu.memory_space<vmem>>, vector<1x16xf32>
    %258 = vector.broadcast %257 : vector<1x16xf32> to vector<64x16xf32>
    %259 = arith.addf %256, %258 : vector<64x16xf32>
    %260 = math.tanh %259 : vector<64x16xf32>
    %c0_317 = arith.constant 0 : index
    %c0_318 = arith.constant 0 : index
    %261 = vector.load %arg6[%c0_317, %c0_318] : memref<64x16xf32, #tpu.memory_space<vmem>>, vector<64x16xf32>
    tpu.vector_store %arg6[%c0_317, %c0_318], %260 {strides = array<i32>} : memref<64x16xf32, #tpu.memory_space<vmem>>, vector<64x16xf32>,
    return
  }
}

</mosaic_0001>

<bundles_post_ra>
// kernel: generator_forward.2
= control target key start
LH: loop header
LB: loop body
LE: loop exit
PB: predicated region body
PF: predicated region fallthrough
CT: control target
= control target key end

     0   :  { %s5059_s0 = inlined_call_operand.hbm [shape: f32[4,32], index: 0, kind: input, shape index: {}]   ;;  %s5060_s1 = inlined_call_operand.hbm [shape: bf16[32,1024], index: 1, kind: input, shape index: {}]   ;;  %s5061_s2 = inlined_call_operand.hbm [shape: f32[1,1024], index: 2, kind: input, shape index: {}]   ;;  %s5062_s3 = inlined_call_operand.hbm [shape: f32[1,1024], index: 3, kind: input, shape index: {}]   ;;  %s5063_s4 = inlined_call_operand.hbm [shape: bf16[1024,2048], index: 4, kind: input, shape index: {}]   ;;  %s5064_s5 = inlined_call_operand.hbm [shape: f32[1,2048], index: 5, kind: input, shape index: {}]   ;;  %s5065_s6 = inlined_call_operand.hbm [shape: f32[1,2048], index: 6, kind: input, shape index: {}]   ;;  %s5066_s7 = inlined_call_operand.vmem [shape: bf16[4,2048], index: 7, kind: output, shape index: {}]  }
   0x1   :  { %5081 = sst [smem:[#allocation18_spill]] %s5059_s0 }
   0x2   :  { %5082 = sst [smem:[#allocation19_spill]] %s5060_s1 }
   0x3   :  { %5083 = sst [smem:[#allocation20_spill]] %s5063_s4 }
   0x4   :  { %12 = vsyncpa [#allocation3], 0 }
   0x5   :  { %13 = vsyncpa [#allocation5], 0 }
   0x6   :  { %14 = vsyncpa [#allocation8], 0  ;;  %s4333_s24 = smov 0   ;;  %s4335_s25 = smov 0  }
   0x7   :  { %s4337_s26 = smov 0   ;;  %s4339_s27 = smov 0  }
   0x8 LB: > { %s4352_s28 = sadd.s32 4294967295, %s4277_s27   ;;  %s4355_s29 = sadd.s32 1, %s4277_s27   ;;  %s4277_s27 = sphi %s4339_s27, %s5112_s27   ;;  %s4273_s26 = sphi %s4337_s26, %s5116_s26   ;;  %s4269_s25 = sphi %s4335_s25, %s5115_s25   ;;  %s4265_s24 = sphi %s4333_s24, %s5114_s24  }
   0x9   : > { %5084 = sst [smem:[#allocation16_spill]] %s4355_s29  ;;  %s108_s30 = ssub.s32 %s4277_s27, %s4355_s29 }
   0xa   : > { %s111_s8 = sadd.s32 1, %s4273_s26  ;;  %p109_p0 = scmp.eq.s32.totalorder %s108_s30, 0 }
   0xb   : > { %p118_p1 = scmp.ne.s32.totalorder %s4273_s26, %s4269_s25  ;;  %p119_p2 = scmp.eq.s32.totalorder %s4277_s27, 0 }
   0xc   : > { %p124_p3 = scmp.ne.s32.totalorder %s4269_s25, %s4265_s24  ;;  %p5067_p5 = scmp.eq.s32.totalorder %s4352_s28, 0 }
   0xd   : > { %s4365_s9 = scalar_select %p109_p0, %s4273_s26, %s111_s8  }
   0xe   : > { %p4367_p4 = por %p119_p2, %p118_p1  ;;  %p3190_p6 = scmp.ge.s32.totalorder %s4277_s27, 1 }
   0xf   : > { %5085 = sst [smem:[#allocation17_spill]] %s4365_s9  ;;  %p213_p7 = scmp.lt.s32.totalorder %s4277_s27, 5 }
  0x10   : > { %p4376_p8 = por %p5067_p5, %p124_p3  ;;  %s4279_s13 = smov [#allocation2]  }
  0x11   : > { %p4380_p9 = pnand %p3190_p6, %p213_p7  ;;  %s226_s14 = sshll.u32 %s4279_s13, 4  ;;  %s227_s14 = int_to_ptr.vmem [resolvable:$true] %s226_s14 }
  0x12   : > { %s5087_s11 = scalar_select %p4376_p8, 1, 0 }
  0x13   : > { %s5088_s12 = scalar_select %p4380_p9, 1, 0 }
  0x14   : > { %p3544_p10 = pneg %p4380_p9  ;;  %p3571_p11 = scmp.lt.s32.totalorder %s4277_s27, 4 }
  0x15   : > { %s272_s15 = sand.u32 1, %s4277_s27   ;;  %s5071_s18 = sand.u32 1, %s4273_s26  }
  0x16   : > { %p4390_p12 = pnand %p3544_p10, %p5067_p5  ;;  %p4396_p13 = pnand %p3571_p11, %p4367_p4 }
  0x17   : > { %s3196_s19 = sshll.u32 %s5071_s18, 11  ;;  %s5091_s0 = sld [smem:[#allocation18_spill]] }
  0x18   : > { %s5089_s16 = scalar_select %p4390_p12, 1, 0 }
  0x19   : > { %s5090_s17 = scalar_select %p4396_p13, 1, 0 }
  0x1a   : > { %p4411_p1 = pneg %p4390_p12 }
  0x1c   : > { %s5092_s30 = scalar_select %p4411_p1, 1, 0 }
  0x1d   : > { %s4029_s22 = scalar_lea.hbm %s5091_s0, 64 }
  0x1e   : > { %p4030_p0 = scmp.ne.s32.totalorder %s5091_s0, %s4029_s22  ;;  %p4036_p4 = scmp.lt.u32.totalorder %s4029_s22, %s5091_s0 }
  0x20   : > { %p4032_p2 = pnand %p4411_p1, %p4030_p0 }
  0x22   : > { %p4033_p3 = pneg %p4032_p2 }
  0x24   : > { %p4038_p6 = pnand %p4036_p4, %p4033_p3 }
  0x26   : > { %4041 = shalt.err (!%p4038_p6)
}
  0x27   : > { %s4042_s13 = scalar_lea.vmem %s227_s14, 64  ;;  %p4050_p5 = scmp.lt.s32.totalorder %s227_s14, %s227_s14 }
  0x28   : > { %p4043_p7 = scmp.ne.s32.totalorder %s227_s14, %s4042_s13  ;;  %p4051_p8 = scmp.lt.s32.totalorder %s4042_s13, %s4042_s13 }
  0x2a   : > { %p4045_p10 = pnand %p4043_p7, %p4411_p1  ;;  %p4052_p9 = por %p4051_p8, %p4050_p5 }
  0x2c   : > { %p4046_p11 = pneg %p4045_p10 }
  0x2e   : > { %p4053_p13 = pnand %p4052_p9, %p4046_p11 }
  0x30   : > { %4056 = shalt.err (!%p4053_p13)
}
  0x31   : > { %3547 = dma.hbm_to_vmem [thread:$0]  (!%p4390_p12), %s5091_s0, 64, %s227_s14, [#allocation3]  }
  0x32   : > { %s3495_s22 = sshll.u32 %s4277_s27, 8  ;;  %s276_s23 = scalar_lea.vmem [#allocation9], %s3196_s19 }
  0x33   : > { %s283_s24 = sshll.u32 %s276_s23, 4  ;;  %s5093_s4 = sld [smem:[#allocation20_spill]]  ;;  %s4433_s24 = int_to_ptr.vmem [resolvable:$true] %s283_s24 }
  0x34   : > { %s4435_s13 = scalar_lea.sflag [#allocation3], %s272_s15  ;;  %p5094_p8 = scmp.ne.s32.totalorder %s5090_s17, 0 }
  0x36   : > { %p4441_p9 = pneg %p5094_p8 }
  0x38   : > { %s5095_s14 = scalar_select %p4441_p9, 1, 0 }
  0x39   : > { %s4431_s18 = scalar_lea.hbm %s5093_s4, %s3495_s22  ;;  %s4062_s22 = scalar_lea.hbm %s5093_s4, 131072 }
  0x3a   : > { %s4057_s20 = scalar_lea.hbm %s4431_s18, 32768  ;;  %p4063_p2 = scmp.lt.u32.totalorder %s4431_s18, %s5093_s4 }
  0x3b   : > { %p4058_p5 = scmp.ne.s32.totalorder %s4431_s18, %s4057_s20  ;;  %p4064_p3 = scmp.lt.u32.totalorder %s4062_s22, %s4057_s20 }
  0x3c   : > { %p4066_p6 = scmp.lt.u32.totalorder %s4057_s20, %s4431_s18 }
  0x3d   : > { %p4060_p13 = pnand %p4441_p9, %p4058_p5  ;;  %p4065_p4 = por %p4064_p3, %p4063_p2 }
  0x3f   : > { %p4061_p0 = pneg %p4060_p13  ;;  %p4067_p7 = por %p4066_p6, %p4065_p4 }
  0x41   : > { %p4068_p10 = pnand %p4067_p7, %p4061_p0 }
  0x43   : > { %4071 = shalt.err (!%p4068_p10)
}
  0x44   : > { %s4072_s15 = scalar_lea.vmem %s4433_s24, 32768  ;;  %s4280_s10 = smov [#allocation9]  }
  0x45   : > { %p4073_p11 = scmp.ne.s32.totalorder %s4433_s24, %s4072_s15  ;;  %s4077_s19 = sshll.u32 %s4280_s10, 4  ;;  %s4078_s19 = int_to_ptr.vmem [resolvable:$false] %s4077_s19 }
  0x46   : > { %s4079_s21 = scalar_lea.vmem %s4078_s19, 65536  ;;  %p4080_p12 = scmp.lt.s32.totalorder %s4433_s24, %s4078_s19 }
  0x47   : > { %p4075_p5 = pnand %p4073_p11, %p4441_p9  ;;  %p4081_p1 = scmp.lt.s32.totalorder %s4079_s21, %s4072_s15 }
  0x49   : > { %p4076_p13 = pneg %p4075_p5  ;;  %p4082_p2 = por %p4081_p1, %p4080_p12 }
  0x4b   : > { %p4083_p3 = pnand %p4082_p2, %p4076_p13 }
  0x4d   : > { %4086 = shalt.err (!%p4083_p3)
}
  0x4e   : > { %s4281_s20 = smov 1024   ;;  %s4282_s22 = smov 256  }
  0x4f   : > { %s4283_s23 = smov 16   ;;  %s4284_s8 = smov [#allocation4]  }
  0x50   : > { %3560 = dma.hbm_to_vmem [thread:$0]  (!%p5094_p8), %s4431_s18, 32768, %s4433_s24, %s4435_s13, %s4281_s20, %s4282_s22, %s4283_s23  }
  0x51   : > { %s236_s0 = sshll.u32 %s4284_s8, 4  ;;  %s5096_s1 = sld [smem:[#allocation19_spill]]  ;;  %s237_s0 = int_to_ptr.vmem [resolvable:$true] %s236_s0 }
  0x52   : > { %p5097_p1 = scmp.ne.s32.totalorder %s5092_s30, 0 }
  0x57   : > { %s4087_s15 = scalar_lea.hbm %s5096_s1, 2048 }
  0x58   : > { %p4088_p12 = scmp.ne.s32.totalorder %s5096_s1, %s4087_s15  ;;  %p4094_p6 = scmp.lt.u32.totalorder %s4087_s15, %s5096_s1 }
  0x5a   : > { %p4090_p0 = pnand %p4088_p12, %p5097_p1 }
  0x5c   : > { %p4091_p4 = pneg %p4090_p0 }
  0x5e   : > { %p4096_p7 = pnand %p4094_p6, %p4091_p4 }
  0x60   : > { %4099 = shalt.err (!%p4096_p7)
}
  0x61   : > { %s4100_s18 = scalar_lea.vmem %s237_s0, 2048  ;;  %p4108_p13 = scmp.lt.s32.totalorder %s237_s0, %s237_s0 }
  0x62   : > { %p4101_p10 = scmp.ne.s32.totalorder %s237_s0, %s4100_s18  ;;  %p4109_p2 = scmp.lt.s32.totalorder %s4100_s18, %s4100_s18 }
  0x64   : > { %p4103_p11 = pnand %p4101_p10, %p5097_p1  ;;  %p4110_p3 = por %p4109_p2, %p4108_p13 }
  0x66   : > { %p4104_p5 = pneg %p4103_p11 }
  0x68   : > { %p4111_p8 = pnand %p4110_p3, %p4104_p5 }
  0x6a   : > { %4114 = shalt.err (!%p4111_p8)
}
  0x6b   : > { %s4285_s4 = smov 512   ;;  %s4286_s29 = smov 32  }
  0x6c   : > { %p5098_p12 = scmp.ne.s32.totalorder %s5089_s16, 0  ;;  %s5099_s20 = sand.u32 1, %s4273_s26  }
  0x6d   : > { %s4485_s22 = sshll.u32 %s5099_s20, 2  ;;  %s3496_s23 = sshll.u32 %s4277_s27, 6 }
  0x6e   : > { %3550 = dma.hbm_to_vmem [thread:$0]  (!%p5098_p12), %s5096_s1, 2048, %s237_s0, [#allocation5], %s4285_s4, %s4285_s4, %s4286_s29  }
  0x6f   : > { %s4493_s15 = scalar_lea.hbm %s5064_s5, %s3496_s23  ;;  %s297_s19 = scalar_lea.vmem [#allocation10], %s4485_s22 }
  0x70   : > { %s305_s21 = sshll.u32 %s297_s19, 4  ;;  %s4287_s0 = smov [#allocation6]   ;;  %s4496_s21 = int_to_ptr.vmem [resolvable:$true] %s305_s21 }
  0x71   : > { %s250_s18 = sshll.u32 %s4287_s0, 4  ;;  %s4115_s4 = scalar_lea.hbm %s4493_s15, 64  ;;  %s251_s18 = int_to_ptr.vmem [resolvable:$true] %s250_s18 }
  0x72   : > { %p4116_p8 = scmp.ne.s32.totalorder %s4493_s15, %s4115_s4  ;;  %s4120_s24 = scalar_lea.hbm %s5064_s5, 256 }
  0x73   : > { %p4121_p6 = scmp.lt.u32.totalorder %s4493_s15, %s5064_s5  ;;  %p4122_p7 = scmp.lt.u32.totalorder %s4120_s24, %s4115_s4 }
  0x74   : > { %p4118_p0 = pnand %p4116_p8, %p4441_p9  ;;  %p4124_p11 = scmp.lt.u32.totalorder %s4115_s4, %s4493_s15 }
  0x75   : > { %p4123_p10 = por %p4122_p7, %p4121_p6 }
  0x76   : > { %p4119_p4 = pneg %p4118_p0 }
  0x77   : > { %p4125_p5 = por %p4124_p11, %p4123_p10 }
  0x79   : > { %p4126_p13 = pnand %p4125_p5, %p4119_p4 }
  0x7b   : > { %4129 = shalt.err (!%p4126_p13)
}
  0x7c   : > { %s4130_s10 = scalar_lea.vmem %s4496_s21, 64  ;;  %s4288_s19 = smov [#allocation10]  }
  0x7d   : > { %p4131_p2 = scmp.ne.s32.totalorder %s4496_s21, %s4130_s10  ;;  %s4135_s0 = sshll.u32 %s4288_s19, 4  ;;  %s4136_s0 = int_to_ptr.vmem [resolvable:$false] %s4135_s0 }
  0x7e   : > { %s4137_s29 = scalar_lea.vmem %s4136_s0, 128  ;;  %p4138_p0 = scmp.lt.s32.totalorder %s4496_s21, %s4136_s0 }
  0x7f   : > { %p4133_p3 = pnand %p4131_p2, %p4441_p9  ;;  %p4139_p12 = scmp.lt.s32.totalorder %s4137_s29, %s4130_s10 }
  0x81   : > { %p4134_p8 = pneg %p4133_p3  ;;  %p4140_p6 = por %p4139_p12, %p4138_p0 }
  0x83   : > { %p4141_p7 = pnand %p4140_p6, %p4134_p8 }
  0x85   : > { %4144 = shalt.err (!%p4141_p7)
}
  0x86   : > { %p5100_p4 = scmp.ne.s32.totalorder %s5090_s17, 0  ;;  %s4145_s24 = scalar_lea.hbm %s5061_s2, 128 }
  0x87   : > { %p4146_p10 = scmp.ne.s32.totalorder %s5061_s2, %s4145_s24  ;;  %p4152_p5 = scmp.lt.u32.totalorder %s4145_s24, %s5061_s2 }
  0x88   : > { %3563 = dma.hbm_to_vmem [thread:$0]  (!%p5100_p4), %s4493_s15, 64, %s4496_s21, %s4435_s13  }
  0x89   : > { %p4148_p12 = pnand %p4146_p10, %p5097_p1 }
  0x8b   : > { %p4149_p11 = pneg %p4148_p12 }
  0x8d   : > { %p4154_p13 = pnand %p4152_p5, %p4149_p11 }
  0x8f   : > { %4157 = shalt.err (!%p4154_p13)
}
  0x90   : > { %s4158_s0 = scalar_lea.vmem %s251_s18, 128  ;;  %p4166_p0 = scmp.lt.s32.totalorder %s251_s18, %s251_s18 }
  0x91   : > { %p4159_p2 = scmp.ne.s32.totalorder %s251_s18, %s4158_s0  ;;  %p4167_p6 = scmp.lt.s32.totalorder %s4158_s0, %s4158_s0 }
  0x93   : > { %p4161_p3 = pnand %p4159_p2, %p5097_p1  ;;  %p4168_p7 = por %p4167_p6, %p4166_p0 }
  0x95   : > { %p4162_p8 = pneg %p4161_p3 }
  0x97   : > { %p4169_p4 = pnand %p4168_p7, %p4162_p8 }
  0x99   : > { %4172 = shalt.err (!%p4169_p4)
}
  0x9a   : > { %p5101_p10 = scmp.ne.s32.totalorder %s5089_s16, 0  ;;  %s4289_s29 = smov [#allocation7]  }
  0x9b   : > { %s261_s4 = sshll.u32 %s4289_s29, 4  ;;  %s4543_s20 = scalar_lea.hbm %s5065_s6, %s3496_s23  ;;  %s262_s4 = int_to_ptr.vmem [resolvable:$true] %s261_s4 }
  0x9c   : > { %3553 = dma.hbm_to_vmem [thread:$0]  (!%p5101_p10), %s5061_s2, 128, %s251_s18, [#allocation5]  }
  0x9d   : > { %s4173_s19 = scalar_lea.hbm %s5062_s3, 128 }
  0x9e   : > { %p4174_p4 = scmp.ne.s32.totalorder %s5062_s3, %s4173_s19  ;;  %p4180_p5 = scmp.lt.u32.totalorder %s4173_s19, %s5062_s3 }
  0xa0   : > { %p4176_p12 = pnand %p4174_p4, %p5097_p1 }
  0xa2   : > { %p4177_p11 = pneg %p4176_p12 }
  0xa4   : > { %p4182_p13 = pnand %p4180_p5, %p4177_p11 }
  0xa6   : > { %4185 = shalt.err (!%p4182_p13)
}
  0xa7   : > { %s4186_s27 = scalar_lea.vmem %s262_s4, 128  ;;  %p4194_p0 = scmp.lt.s32.totalorder %s262_s4, %s262_s4 }
  0xa8   : > { %p4187_p2 = scmp.ne.s32.totalorder %s262_s4, %s4186_s27  ;;  %p4195_p6 = scmp.lt.s32.totalorder %s4186_s27, %s4186_s27 }
  0xaa   : > { %p4189_p3 = pnand %p4187_p2, %p5097_p1  ;;  %p4196_p7 = por %p4195_p6, %p4194_p0 }
  0xac   : > { %p4190_p8 = pneg %p4189_p3 }
  0xae   : > { %p4197_p9 = pnand %p4196_p7, %p4190_p8 }
  0xb0   : > { %4200 = shalt.err (!%p4197_p9)
}
  0xb1   : > { %3556 = dma.hbm_to_vmem [thread:$0]  (!%p5101_p10), %s5062_s3, 128, %s262_s4, [#allocation8]  }
  0xb2   : > { %s316_s30 = scalar_lea.vmem [#allocation11], %s4485_s22  ;;  %s4201_s29 = scalar_lea.hbm %s4543_s20, 64 }
  0xb3   : > { %s324_s21 = sshll.u32 %s316_s30, 4  ;;  %p4202_p1 = scmp.ne.s32.totalorder %s4543_s20, %s4201_s29  ;;  %s325_s21 = int_to_ptr.vmem [resolvable:$true] %s324_s21 }
  0xb4   : > { %p5102_p4 = scmp.ne.s32.totalorder %s5095_s14, 0  ;;  %s4206_s24 = scalar_lea.hbm %s5065_s6, 256 }
  0xb5   : > { %p4207_p11 = scmp.lt.u32.totalorder %s4543_s20, %s5065_s6  ;;  %p4208_p5 = scmp.lt.u32.totalorder %s4206_s24, %s4201_s29 }
  0xb6   : > { %p4204_p12 = pnand %p4202_p1, %p5102_p4  ;;  %p4210_p2 = scmp.lt.u32.totalorder %s4201_s29, %s4543_s20 }
  0xb7   : > { %p4209_p13 = por %p4208_p5, %p4207_p11 }
  0xb8   : > { %p4205_p9 = pneg %p4204_p12 }
  0xb9   : > { %p4211_p10 = por %p4210_p2, %p4209_p13 }
  0xbb   : > { %p4212_p3 = pnand %p4211_p10, %p4205_p9 }
  0xbd   : > { %4215 = shalt.err (!%p4212_p3)
}
  0xbe   : > { %s4216_s22 = scalar_lea.vmem %s325_s21, 64  ;;  %s4290_s4 = smov [#allocation11]  }
  0xbf   : > { %p4217_p8 = scmp.ne.s32.totalorder %s325_s21, %s4216_s22  ;;  %s4221_s19 = sshll.u32 %s4290_s4, 4  ;;  %s4222_s19 = int_to_ptr.vmem [resolvable:$false] %s4221_s19 }
  0xc0   : > { %s4223_s0 = scalar_lea.vmem %s4222_s19, 128  ;;  %p4224_p7 = scmp.lt.s32.totalorder %s325_s21, %s4222_s19 }
  0xc1   : > { %p4219_p0 = pnand %p4217_p8, %p5102_p4  ;;  %p4225_p1 = scmp.lt.s32.totalorder %s4223_s0, %s4216_s22 }
  0xc3   : > { %p4220_p6 = pneg %p4219_p0  ;;  %p4226_p12 = por %p4225_p1, %p4224_p7 }
  0xc5   : > { %p4227_p5 = pnand %p4226_p12, %p4220_p6 }
  0xc7   : > { %4230 = shalt.err (!%p4227_p5)
}
  0xc8   : > { %p5103_p11 = scmp.ne.s32.totalorder %s5090_s17, 0  ;;  %p5104_p9 = scmp.ne.s32.totalorder %s5088_s12, 0 }
  0xc9   : > { %p5105_p4 = scmp.eq.s32.totalorder (!%p5104_p9), %s4352_s28, 0 }
  0xca   : > { %3566 = dma.hbm_to_vmem [thread:$0]  (!%p5103_p11), %s4543_s20, 64, %s325_s21, %s4435_s13  }
  0xcb   : > { %333 = sbr.rel (%p5104_p9) target bundleno = 946 (0x3b2), region = 48 }
  0xd2   : > { %4248 = dma.done.wait (%p5105_p4), [#allocation3], 64   ;;  %p5106_p13 = pmov %p5105_p4 }
  0xd3   : > { %p5107_p2 = pmov %p5105_p4 }
  0xd4   : > { %4250 = vsyncadd (%p5106_p13), [#allocation3], 4294967232 }
  0xd5   : > { %4252 = dma.done.wait (%p5107_p2), [#allocation5], 2176   ;;  %p5108_p10 = pmov %p5107_p2 }
  0xd6   : > { %p5109_p3 = pmov %p5107_p2 }
  0xd7   : > { %4254 = vsyncadd (%p5108_p10), [#allocation5], 4294965120 }
  0xd8   : > { %4256 = dma.done.wait (%p5109_p3), [#allocation8], 128   ;;  %p5110_p8 = pmov %p5107_p2 }
  0xd9   : > { %s351_s12 = sand.u32 1, %s4352_s28   ;;  %s353_s17 = sand.u32 1, %s4269_s25  }
  0xda   : > { %4258 = vsyncadd (%p5110_p8), [#allocation8], 4294967168  ;;  %s3210_s13 = sshll.u32 %s353_s17, 11  ;;  %s352_s14 = scalar_lea.sflag [#allocation3], %s351_s12 }
  0xdb   : > { %s4600_s20 = scalar_lea.vmem [#allocation9], %s3210_s13  ;;  %p5111_p0 = scmp.ne.s32.totalorder %s5087_s11, 0 }
  0xdd   : > { %4260 = dma.done.wait (%p5111_p0), %s352_s14, 32896  }
  0xde   : > { %4262 = vsyncadd (%p5111_p0), %s352_s14, 4294934400  ;;  %v4291_v0 = vmov 0   ;;  %v426_v1 = vld [vmem:[#allocation4] sm:$0xff]  ;;  %v427_v7 = vld [vmem:[#allocation4 + $0x8] sm:$0xff]  ;;  %vm522_vm0 = vcmask 261120   ;;  %vm690_vm1 = vcmask 1043456  }
  0xdf   : > { %558 = vmatprep.mubr.bf16.mxu0 %v4291_v0  ;;  %599 = vmatprep.mubr.bf16.mxu1 %v4291_v0  ;;  %v430_v2 = vld [vmem:[#allocation4 + $0x20] sm:$0xff]  ;;  %v431_v9 = vld [vmem:[#allocation4 + $0x28] sm:$0xff]  ;;  %v428_v15 = vld [vmem:[#allocation4 + $0x10] sm:$0xff]  ;;  %s3211_s11 = sshll.u32 %s353_s17, 2  ;;  %s3213_s27 = sshll.u32 %s4352_s28, 2 }
  0xe0   : > { %v434_v3 = vld [vmem:[#allocation4 + $0x40] sm:$0xff]  ;;  %v3216_v4 = vcombine.high %v426_v1, %v430_v2  ;;  %v3215_v5 = vcombine.low %v426_v1, %v430_v2  ;;  %v435_v10 = vld [vmem:[#allocation4 + $0x48] sm:$0xff]  ;;  %v3218_v12 = vcombine.high %v427_v7, %v431_v9  ;;  %v3217_v13 = vcombine.low %v427_v7, %v431_v9  ;;  %v432_v16 = vld [vmem:[#allocation4 + $0x30] sm:$0xff]  ;;  %s364_s18 = scalar_lea.vmem [#allocation10], %s3211_s11  ;;  %s373_s15 = scalar_lea.vmem [#allocation11], %s3211_s11 }
  0xe1   : > { %v438_v6 = vld [vmem:[#allocation4 + $0x60] sm:$0xff]  ;;  %v439_v11 = vld [vmem:[#allocation4 + $0x68] sm:$0xff]  ;;  %v424_v18 = vld [vmem:[#allocation2] sm:$0xf]  ;;  %v3220_v21 = vcombine.high %v428_v15, %v432_v16  ;;  %v3219_v28 = vcombine.low %v428_v15, %v432_v16  ;;  %p418_p6 = scmp.lt.s32.totalorder %s3213_s27, 15 }
  0xe2   : > { %v3224_v8 = vcombine.high %v434_v3, %v438_v6  ;;  %526 = vmatprep.subr.bf16.mxu0 %v3216_v4  ;;  %v3226_v14 = vcombine.high %v435_v10, %v439_v11  ;;  %v3223_v17 = vcombine.low %v434_v3, %v438_v6  ;;  %v429_v19 = vld [vmem:[#allocation4 + $0x18] sm:$0xff]  ;;  %567 = vmatprep.subr.bf16.mxu1 %v3218_v12  ;;  %v436_v23 = vld [vmem:[#allocation4 + $0x50] sm:$0xff] }
  0xe3   : > { %527 = vmatpush1.bf16.msra.mxu0 %v3215_v5  ;;  %v433_v20 = vld [vmem:[#allocation4 + $0x38] sm:$0xff]  ;;  %568 = vmatpush1.bf16.msra.mxu1 %v3217_v13  ;;  %v3225_v22 = vcombine.low %v435_v10, %v439_v11  ;;  %v440_v24 = vld [vmem:[#allocation4 + $0x70] sm:$0xff]  ;;  %v425_v25 = vpack.c.bf16 %v424_v18, %v424_v18  ;;  %s5118_s27 = smov (!%p418_p6, %s3213_s27), 15 }
  0xe4   : > { %528 = vmatprep.subr.bf16.mxu0 %v3224_v8  ;;  %569 = vmatprep.subr.bf16.mxu1 %v3226_v14  ;;  %v3222_v26 = vcombine.high %v429_v19, %v433_v20  ;;  %v437_v27 = vld [vmem:[#allocation4 + $0x58] sm:$0xff]  ;;  %v3228_v30 = vcombine.high %v436_v23, %v440_v24  ;;  %v3221_v31 = vcombine.low %v429_v19, %v433_v20  ;;  %v3621_v34 = vld [vmem:[%s4600_s20 + $0x4] ss:$16 sps:$4 sm:$0xff]   ;;  %v3619_v37 = vld [vmem:[%s4600_s20] ss:$16 sps:$4 sm:$0xff]   ;;  %s3214_s28 = sshll.u32 %s5118_s27, 1 }
  0xe5   : > { %v441_v29 = vld [vmem:[#allocation4 + $0x78] sm:$0xff]  ;;  %v3227_v33 = vcombine.low %v436_v23, %v440_v24  ;;  %v3627_v39 = vld [vmem:[%s4600_s20 + $0x24] ss:$16 sps:$4 sm:$0xff]   ;;  %v3625_v40 = vld [vmem:[%s4600_s20 + $0x20] ss:$16 sps:$4 sm:$0xff]   ;;  %s421_s30 = scalar_lea.vmem %s5066_s7, %s3214_s28 }
  0xe6   : > { %v3230_v32 = vcombine.high %v437_v27, %v441_v29  ;;  %v3229_v35 = vcombine.low %v437_v27, %v441_v29  ;;  %v3624_v36 = vld [vmem:[%s4600_s20 + $0xc] ss:$16 sps:$4 sm:$0xff]   ;;  %v3622_v38 = vld [vmem:[%s4600_s20 + $0x8] ss:$16 sps:$4 sm:$0xff]   ;;  %v3633_v42 = vld [vmem:[%s4600_s20 + $0x44] ss:$16 sps:$4 sm:$0xff]  }
  0xe7   : > { %529 = vmatpush1.bf16.msra.mxu0 %v3223_v17  ;;  %570 = vmatpush1.bf16.msra.mxu1 %v3225_v22  ;;  %v3630_v41 = vld [vmem:[%s4600_s20 + $0x2c] ss:$16 sps:$4 sm:$0xff]   ;;  %v3628_v43 = vld [vmem:[%s4600_s20 + $0x28] ss:$16 sps:$4 sm:$0xff]   ;;  %v3631_v45 = vld [vmem:[%s4600_s20 + $0x40] ss:$16 sps:$4 sm:$0xff]  }
  0xe8   : > { %608 = vmatprep.subr.bf16.mxu0 %v3220_v21  ;;  %649 = vmatprep.subr.bf16.mxu1 %v3222_v26  ;;  %v3636_v44 = vld [vmem:[%s4600_s20 + $0x4c] ss:$16 sps:$4 sm:$0xff]   ;;  %v3639_v46 = vld [vmem:[%s4600_s20 + $0x64] ss:$16 sps:$4 sm:$0xff]   ;;  %v3634_v47 = vld [vmem:[%s4600_s20 + $0x48] ss:$16 sps:$4 sm:$0xff]  }
  0xe9   : > { %v3642_v48 = vld [vmem:[%s4600_s20 + $0x6c] ss:$16 sps:$4 sm:$0xff]   ;;  %v3637_v49 = vld [vmem:[%s4600_s20 + $0x60] ss:$16 sps:$4 sm:$0xff]   ;;  %v3645_v50 = vld [vmem:[%s4600_s20 + $0x84] ss:$16 sps:$4 sm:$0xff]  }
  0xea   : > { %3231 = vmatmul.mubr.msk.bf16.vlgmr.msra.gmra.mrb[0].mxu0 %vm522_vm0, %v425_v25  ;;  %3232 = vmatmul.mubr.msk.bf16.vlgmr.msra.gmra.mrb[0].mxu1 %vm522_vm0, %v425_v25  ;;  %v3640_v51 = vld [vmem:[%s4600_s20 + $0x68] ss:$16 sps:$4 sm:$0xff]   ;;  %v3648_v52 = vld [vmem:[%s4600_s20 + $0x8c] ss:$16 sps:$4 sm:$0xff]   ;;  %v3643_v53 = vld [vmem:[%s4600_s20 + $0x80] ss:$16 sps:$4 sm:$0xff]  }
  0xeb   : > { %609 = vmatpush1.bf16.msra.mxu0 %v3219_v28  ;;  %640 = vmatprep.mubr.bf16.mxu0 %v4291_v0  ;;  %v3646_v54 = vld [vmem:[%s4600_s20 + $0x88] ss:$16 sps:$4 sm:$0xff]   ;;  %v3651_v55 = vld [vmem:[%s4600_s20 + $0xa4] ss:$16 sps:$4 sm:$0xff]   ;;  %v3654_v56 = vld [vmem:[%s4600_s20 + $0xac] ss:$16 sps:$4 sm:$0xff]  }
  0xec   : > { %610 = vmatprep.subr.bf16.mxu0 %v3228_v30  ;;  %650 = vmatpush1.bf16.msra.mxu1 %v3221_v31  ;;  %v3649_v57 = vld [vmem:[%s4600_s20 + $0xa0] ss:$16 sps:$4 sm:$0xff]   ;;  %v3652_v58 = vld [vmem:[%s4600_s20 + $0xa8] ss:$16 sps:$4 sm:$0xff]   ;;  %v3657_v59 = vld [vmem:[%s4600_s20 + $0xc4] ss:$16 sps:$4 sm:$0xff]  }
  0xed   : > { %681 = vmatprep.mubr.bf16.mxu1 %v4291_v0  ;;  %651 = vmatprep.subr.bf16.mxu1 %v3230_v32  ;;  %v3660_v60 = vld [vmem:[%s4600_s20 + $0xcc] ss:$16 sps:$4 sm:$0xff]   ;;  %v3655_v61 = vld [vmem:[%s4600_s20 + $0xc0] ss:$16 sps:$4 sm:$0xff]   ;;  %v3658_v62 = vld [vmem:[%s4600_s20 + $0xc8] ss:$16 sps:$4 sm:$0xff]  }
  0xee   : > { %v3663_v63 = vld [vmem:[%s4600_s20 + $0xe4] ss:$16 sps:$4 sm:$0xff]   ;;  %v3666_v0 = vld [vmem:[%s4600_s20 + $0xec] ss:$16 sps:$4 sm:$0xff]   ;;  %v3661_v1 = vld [vmem:[%s4600_s20 + $0xe0] ss:$16 sps:$4 sm:$0xff]  }
  0xef   : > { %611 = vmatpush1.bf16.msra.mxu0 %v3227_v33  ;;  %v3664_v2 = vld [vmem:[%s4600_s20 + $0xe8] ss:$16 sps:$4 sm:$0xff]   ;;  %v3669_v3 = vld [vmem:[%s4600_s20 + $0x104] ss:$16 sps:$4 sm:$0xff]   ;;  %v3672_v4 = vld [vmem:[%s4600_s20 + $0x10c] ss:$16 sps:$4 sm:$0xff]  }
  0xf0   : > { %2536 = vmatprep.subr.bf16.mxu0 %v3621_v34  ;;  %652 = vmatpush1.bf16.msra.mxu1 %v3229_v35  ;;  %v3667_v5 = vld [vmem:[%s4600_s20 + $0x100] ss:$16 sps:$4 sm:$0xff]   ;;  %v3670_v6 = vld [vmem:[%s4600_s20 + $0x108] ss:$16 sps:$4 sm:$0xff]   ;;  %v3675_v7 = vld [vmem:[%s4600_s20 + $0x124] ss:$16 sps:$4 sm:$0xff]  }
  0xf1   : > { %2700 = vmatprep.subr.bf16.mxu1 %v3624_v36  ;;  %v3678_v8 = vld [vmem:[%s4600_s20 + $0x12c] ss:$16 sps:$4 sm:$0xff]   ;;  %v3673_v9 = vld [vmem:[%s4600_s20 + $0x120] ss:$16 sps:$4 sm:$0xff]   ;;  %v3676_v10 = vld [vmem:[%s4600_s20 + $0x128] ss:$16 sps:$4 sm:$0xff]  }
  0xf2   : > { %3233 = vmatmul.mubr.msk.bf16.vlgmr.msra.gmra.mrb[4].mxu0 %vm522_vm0, %v425_v25  ;;  %v3681_v11 = vld [vmem:[%s4600_s20 + $0x144] ss:$16 sps:$4 sm:$0xff]   ;;  %v3684_v12 = vld [vmem:[%s4600_s20 + $0x14c] ss:$16 sps:$4 sm:$0xff]   ;;  %v3679_v13 = vld [vmem:[%s4600_s20 + $0x140] ss:$16 sps:$4 sm:$0xff]  }
  0xf3   : > { %2537 = vmatpush1.bf16.msra.mxu0 %v3619_v37  ;;  %3234 = vmatmul.mubr.msk.bf16.vlgmr.msra.gmra.mrb[4].mxu1 %vm522_vm0, %v425_v25  ;;  %v3682_v14 = vld [vmem:[%s4600_s20 + $0x148] ss:$16 sps:$4 sm:$0xff]   ;;  %v3687_v15 = vld [vmem:[%s4600_s20 + $0x164] ss:$16 sps:$4 sm:$0xff]   ;;  %v3690_v16 = vld [vmem:[%s4600_s20 + $0x16c] ss:$16 sps:$4 sm:$0xff]  }
  0xf4   : > { %2538 = vmatprep.subr.bf16.mxu0 %v3627_v39  ;;  %2701 = vmatpush1.bf16.msra.mxu1 %v3622_v38  ;;  %v3685_v17 = vld [vmem:[%s4600_s20 + $0x160] ss:$16 sps:$4 sm:$0xff]   ;;  %v3688_v18 = vld [vmem:[%s4600_s20 + $0x168] ss:$16 sps:$4 sm:$0xff]   ;;  %v3693_v19 = vld [vmem:[%s4600_s20 + $0x184] ss:$16 sps:$4 sm:$0xff]  }
  0xf5   : > { %2702 = vmatprep.subr.bf16.mxu1 %v3630_v41  ;;  %v3696_v20 = vld [vmem:[%s4600_s20 + $0x18c] ss:$16 sps:$4 sm:$0xff]   ;;  %v3691_v21 = vld [vmem:[%s4600_s20 + $0x180] ss:$16 sps:$4 sm:$0xff]   ;;  %v3694_v22 = vld [vmem:[%s4600_s20 + $0x188] ss:$16 sps:$4 sm:$0xff]  }
  0xf6   : > { %v3699_v23 = vld [vmem:[%s4600_s20 + $0x1a4] ss:$16 sps:$4 sm:$0xff]   ;;  %v3702_v24 = vld [vmem:[%s4600_s20 + $0x1ac] ss:$16 sps:$4 sm:$0xff]   ;;  %v3697_v25 = vld [vmem:[%s4600_s20 + $0x1a0] ss:$16 sps:$4 sm:$0xff]  }
  0xf7   : > { %2539 = vmatpush1.bf16.msra.mxu0 %v3625_v40  ;;  %v3700_v26 = vld [vmem:[%s4600_s20 + $0x1a8] ss:$16 sps:$4 sm:$0xff]   ;;  %v3705_v27 = vld [vmem:[%s4600_s20 + $0x1c4] ss:$16 sps:$4 sm:$0xff]   ;;  %v3708_v28 = vld [vmem:[%s4600_s20 + $0x1cc] ss:$16 sps:$4 sm:$0xff]  }
  0xf8   : > { %2540 = vmatprep.subr.bf16.mxu0 %v3633_v42  ;;  %2703 = vmatpush1.bf16.msra.mxu1 %v3628_v43  ;;  %v3703_v29 = vld [vmem:[%s4600_s20 + $0x1c0] ss:$16 sps:$4 sm:$0xff]   ;;  %v3706_v30 = vld [vmem:[%s4600_s20 + $0x1c8] ss:$16 sps:$4 sm:$0xff]   ;;  %v3711_v32 = vld [vmem:[%s4600_s20 + $0x1e4] ss:$16 sps:$4 sm:$0xff]  }
  0xf9   : > { %2704 = vmatprep.subr.bf16.mxu1 %v3636_v44  ;;  %v3709_v31 = vld [vmem:[%s4600_s20 + $0x1e0] ss:$16 sps:$4 sm:$0xff]   ;;  %v3712_v33 = vld [vmem:[%s4600_s20 + $0x1e8] ss:$16 sps:$4 sm:$0xff]   ;;  %v3714_v34 = vld [vmem:[%s4600_s20 + $0x1ec] ss:$16 sps:$4 sm:$0xff]  }
  0xfa   : > { %v3717_v35 = vld [vmem:[%s4600_s20 + $0x204] ss:$16 sps:$4 sm:$0xff]   ;;  %v3720_v36 = vld [vmem:[%s4600_s20 + $0x20c] ss:$16 sps:$4 sm:$0xff]  }
  0xfb   : > { %2541 = vmatpush1.bf16.msra.mxu0 %v3631_v45 }
  0xfc   : > { %2542 = vmatprep.subr.bf16.mxu0 %v3639_v46  ;;  %2705 = vmatpush1.bf16.msra.mxu1 %v3634_v47 }
  0xfd   : > { %2706 = vmatprep.subr.bf16.mxu1 %v3642_v48 }
  0xff   : > { %2543 = vmatpush1.bf16.msra.mxu0 %v3637_v49 }
 0x100   : > { %2544 = vmatprep.subr.bf16.mxu0 %v3645_v50  ;;  %2707 = vmatpush1.bf16.msra.mxu1 %v3640_v51 }
 0x101   : > { %2708 = vmatprep.subr.bf16.mxu1 %v3648_v52 }
 0x103   : > { %2545 = vmatpush1.bf16.msra.mxu0 %v3643_v53 }
 0x104   : > { %2709 = vmatpush1.bf16.msra.mxu1 %v3646_v54  ;;  %2546 = vmatprep.subr.bf16.mxu0 %v3651_v55 }
 0x105   : > { %2710 = vmatprep.subr.bf16.mxu1 %v3654_v56 }
 0x107   : > { %2547 = vmatpush1.bf16.msra.mxu0 %v3649_v57 }
 0x108   : > { %2711 = vmatpush1.bf16.msra.mxu1 %v3652_v58  ;;  %2548 = vmatprep.subr.bf16.mxu0 %v3657_v59 }
 0x109   : > { %2712 = vmatprep.subr.bf16.mxu1 %v3660_v60 }
 0x10b   : > { %2549 = vmatpush1.bf16.msra.mxu0 %v3655_v61 }
 0x10c   : > { %2713 = vmatpush1.bf16.msra.mxu1 %v3658_v62  ;;  %2550 = vmatprep.subr.bf16.mxu0 %v3663_v63 }
 0x10d   : > { %2714 = vmatprep.subr.bf16.mxu1 %v3666_v0 }
 0x10f   : > { %2551 = vmatpush1.bf16.msra.mxu0 %v3661_v1 }
 0x110   : > { %2715 = vmatpush1.bf16.msra.mxu1 %v3664_v2  ;;  %2552 = vmatprep.subr.bf16.mxu0 %v3669_v3 }
 0x111   : > { %2716 = vmatprep.subr.bf16.mxu1 %v3672_v4 }
 0x113   : > { %2553 = vmatpush1.bf16.msra.mxu0 %v3667_v5 }
 0x114   : > { %2717 = vmatpush1.bf16.msra.mxu1 %v3670_v6  ;;  %2554 = vmatprep.subr.bf16.mxu0 %v3675_v7 }
 0x115   : > { %2718 = vmatprep.subr.bf16.mxu1 %v3678_v8 }
 0x117   : > { %2555 = vmatpush1.bf16.msra.mxu0 %v3673_v9 }
 0x118   : > { %2719 = vmatpush1.bf16.msra.mxu1 %v3676_v10  ;;  %2556 = vmatprep.subr.bf16.mxu0 %v3681_v11 }
 0x119   : > { %2720 = vmatprep.subr.bf16.mxu1 %v3684_v12 }
 0x11b   : > { %2557 = vmatpush1.bf16.msra.mxu0 %v3679_v13 }
 0x11c   : > { %2721 = vmatpush1.bf16.msra.mxu1 %v3682_v14  ;;  %2558 = vmatprep.subr.bf16.mxu0 %v3687_v15 }
 0x11d   : > { %2722 = vmatprep.subr.bf16.mxu1 %v3690_v16 }
 0x11f   : > { %2559 = vmatpush1.bf16.msra.mxu0 %v3685_v17 }
 0x120   : > { %2723 = vmatpush1.bf16.msra.mxu1 %v3688_v18  ;;  %2560 = vmatprep.subr.bf16.mxu0 %v3693_v19 }
 0x121   : > { %2724 = vmatprep.subr.bf16.mxu1 %v3696_v20 }
 0x123   : > { %2561 = vmatpush1.bf16.msra.mxu0 %v3691_v21 }
 0x124   : > { %2725 = vmatpush1.bf16.msra.mxu1 %v3694_v22  ;;  %2562 = vmatprep.subr.bf16.mxu0 %v3699_v23 }
 0x125   : > { %2726 = vmatprep.subr.bf16.mxu1 %v3702_v24 }
 0x127   : > { %2563 = vmatpush1.bf16.msra.mxu0 %v3697_v25 }
 0x128   : > { %2727 = vmatpush1.bf16.msra.mxu1 %v3700_v26  ;;  %2564 = vmatprep.subr.bf16.mxu0 %v3705_v27 }
 0x129   : > { %2728 = vmatprep.subr.bf16.mxu1 %v3708_v28 }
 0x12b   : > { %2565 = vmatpush1.bf16.msra.mxu0 %v3703_v29 }
 0x12c   : > { %2729 = vmatpush1.bf16.msra.mxu1 %v3706_v30  ;;  %2566 = vmatprep.subr.bf16.mxu0 %v3711_v32  ;;  %v862_v30 = vlaneseq }
 0x12d   : > { %2730 = vmatprep.subr.bf16.mxu1 %v3714_v34 }
 0x12f   : > { %2567 = vmatpush1.bf16.msra.mxu0 %v3709_v31 }
 0x130   : > { %2731 = vmatpush1.bf16.msra.mxu1 %v3712_v33  ;;  %2577 = vmatprep.subr.bf16.mxu0 %v3717_v35 }
 0x131   : > { %2741 = vmatprep.subr.bf16.mxu1 %v3720_v36 }
 0x1bd   : > { %v4676_v37 = vpop.f32.mrb[0].mxu0  ;;  %v4688_v45 = vpop.f32.mrb[0].mxu1 }
 0x1be   : > { %v691_v38 = vsel %vm690_vm1, %v4676_v37, 0.0  ;;  %v756_v39 = vmul.f32 %v4676_v37, %v4676_v37  ;;  %v4682_v40 = vpop.f32.mrb[1].mxu0  ;;  %v4691_v49 = vpop.f32.mrb[1].mxu1 }
 0x1bf   : > { %v692_v41 = vrot.slane %v691_v38, 4  ;;  %v698_v42 = vsel %vm690_vm1, %v4682_v40, 0.0  ;;  %v757_v43 = vmul.f32 %v4682_v40, %v4682_v40  ;;  %v564_v44 = vpop.f32.mrb[2].mxu0  ;;  %v605_v53 = vpop.f32.mrb[2].mxu1  ;;  %v712_v56 = vsel %vm690_vm1, %v4691_v49, 0.0 }
 0x1c0   : > { %v764_v46 = vsel %vm690_vm1, %v756_v39, 0.0  ;;  %v699_v47 = vrot.slane %v698_v42, 4  ;;  %v565_v48 = vpop.f32.mrb[3].mxu0  ;;  %v606_v57 = vpop.f32.mrb[3].mxu1  ;;  %v713_v62 = vrot.slane %v712_v56, 4  ;;  %v759_v63 = vmul.f32 %v4691_v49, %v4691_v49 }
 0x1c1   : > { %v693_v50 = vadd.f32 %v692_v41, %v691_v38  ;;  %v765_v51 = vrot.slane %v764_v46, 4  ;;  %v771_v52 = vsel %vm690_vm1, %v757_v43, 0.0  ;;  %v4703_v39 = vshrl.u32 %v862_v30, 7 }
 0x1c2   : > { %v700_v54 = vadd.f32 %v699_v47, %v698_v42  ;;  %v772_v55 = vrot.slane %v771_v52, 4  ;;  %v714_v5 = vadd.f32 %v713_v62, %v712_v56  ;;  %v785_v6 = vsel %vm690_vm1, %v759_v63, 0.0 }
 0x1c3   : > { %v694_v58 = vrot.slane %v693_v50, 2  ;;  %v766_v59 = vadd.f32 %v765_v51, %v764_v46  ;;  %v786_v14 = vrot.slane %v785_v6, 4  ;;  %v4708_v51 = vld [vmem:[#allocation6] sm:$0xff] }
 0x1c4   : > { %v701_v60 = vrot.slane %v700_v54, 2  ;;  %v773_v61 = vadd.f32 %v772_v55, %v771_v52  ;;  %v715_v13 = vrot.slane %v714_v5, 2  ;;  %v4711_v52 = vsub.s32 1, %v4703_v39 }
 0x1c5   : > { %v695_v0 = vadd.f32 %v694_v58, %v693_v50  ;;  %v767_v1 = vrot.slane %v766_v59, 2  ;;  %v4698_v2 = vpop.f32.mrb[4].mxu0  ;;  %v787_v21 = vadd.f32 %v786_v14, %v785_v6  ;;  %v4706_v50 = vsub.s32 0, %v4703_v39 }
 0x1c6   : > { %v702_v3 = vadd.f32 %v701_v60, %v700_v54  ;;  %v774_v4 = vrot.slane %v773_v61, 2  ;;  %v4701_v7 = vpop.f32.mrb[5].mxu0  ;;  %v716_v20 = vadd.f32 %v715_v13, %v714_v5  ;;  %v869_v58 = vrot.slane %v4708_v51, %v4711_v52  ;;  %v4719_v60 = vld [vmem:[#allocation7] sm:$0xff] }
 0x1c7   : > { %v696_v8 = vrot.slane %v695_v0, 1  ;;  %v768_v9 = vadd.f32 %v767_v1, %v766_v59  ;;  %v646_v10 = vpop.f32.mrb[6].mxu0  ;;  %v788_v29 = vrot.slane %v787_v21, 2  ;;  %v865_v56 = vrot.slane %v4708_v51, %v4706_v50 }
 0x1c8   : > { %v703_v11 = vrot.slane %v702_v3, 1  ;;  %v775_v12 = vadd.f32 %v774_v4, %v773_v61  ;;  %v647_v15 = vpop.f32.mrb[7].mxu0  ;;  %v717_v26 = vrot.slane %v716_v20, 1  ;;  %v4721_v61 = vpop.f32.mrb[4].mxu1  ;;  %v943_v6 = vrot.slane %v4719_v60, %v4711_v52 }
 0x1c9   : > { %v697_v16 = vadd.f32 %v696_v8, %v695_v0  ;;  %v769_v17 = vrot.slane %v768_v9, 1  ;;  %v789_v38 = vadd.f32 %v788_v29, %v787_v21  ;;  %v4723_v62 = vpop.f32.mrb[5].mxu1  ;;  %v705_v10 = vsel %vm690_vm1, %v4688_v45, 0.0  ;;  %v3718_v29 = vld [vmem:[%s4600_s20 + $0x208] ss:$16 sps:$4 sm:$0xff]  }
 0x1ca   : > { %v704_v18 = vadd.f32 %v703_v11, %v702_v3  ;;  %v776_v19 = vrot.slane %v775_v12, 1  ;;  %v718_v35 = vadd.f32 %v717_v26, %v716_v20  ;;  %v687_v0 = vpop.f32.mrb[6].mxu1  ;;  %v939_v3 = vrot.slane %v4719_v60, %v4706_v50 }
 0x1cb   : > { %v748_v22 = vmul.f32 0.25, %v697_v16  ;;  %v770_v23 = vadd.f32 %v769_v17, %v768_v9  ;;  %v790_v44 = vrot.slane %v789_v38, 1  ;;  %v758_v11 = vmul.f32 %v4688_v45, %v4688_v45  ;;  %v3738_v0 = vld [vmem:[%s4600_s20 + $0x26c] ss:$16 sps:$4 sm:$0xff]  }
 0x1cc   : > { %v749_v24 = vmul.f32 0.25, %v704_v18  ;;  %v777_v25 = vadd.f32 %v776_v19, %v775_v12  ;;  %v751_v42 = vmul.f32 0.25, %v718_v35  ;;  %v726_v13 = vsel %vm690_vm1, %v4701_v7, 0.0 }
 0x1cd   : > { %v820_v27 = vmul.f32 0.25, %v770_v23  ;;  %v828_v28 = vmul.f32 %v748_v22, %v748_v22  ;;  %v791_v47 = vadd.f32 %v790_v44, %v789_v38  ;;  %v853_v55 = vsub.f32 %v4676_v37, %v748_v22  ;;  %v3724_v44 = vld [vmem:[%s4600_s20 + $0x228] ss:$16 sps:$4 sm:$0xff]  }
 0x1ce   : > { %v821_v31 = vmul.f32 0.25, %v777_v25  ;;  %v829_v32 = vmul.f32 %v749_v24, %v749_v24  ;;  %v831_v48 = vmul.f32 %v751_v42, %v751_v42  ;;  %v854_v57 = vsub.f32 %v4682_v40, %v749_v24  ;;  %v688_v40 = vpop.f32.mrb[7].mxu1 }
 0x1cf   : > { %v836_v33 = vsub.f32 %v820_v27, %v828_v28  ;;  %v823_v53 = vmul.f32 0.25, %v791_v47  ;;  %v902_v1 = vmul.f32 %v865_v56, %v853_v55  ;;  %v4726_v37 = vsub.s32 3, %v4703_v39  ;;  %v3732_v47 = vld [vmem:[%s4600_s20 + $0x24c] ss:$16 sps:$4 sm:$0xff]  }
 0x1d0   : > { %v837_v34 = vsub.f32 %v821_v31, %v829_v32  ;;  %v903_v5 = vmul.f32 %v869_v58, %v854_v57  ;;  %v761_v14 = vmul.f32 %v4701_v7, %v4701_v7  ;;  %v856_v15 = vsub.f32 %v4691_v49, %v751_v42  ;;  %v3715_v49 = vld [vmem:[%s4600_s20 + $0x200] ss:$16 sps:$4 sm:$0xff]   ;;  %v3723_v31 = vld [vmem:[%s4600_s20 + $0x224] ss:$16 sps:$4 sm:$0xff]   ;;  %v3726_v32 = vld [vmem:[%s4600_s20 + $0x22c] ss:$16 sps:$4 sm:$0xff]  }
 0x1d1   : > { %v844_v36 = vmax.f32 %v836_v33, 0.0  ;;  %v839_v54 = vsub.f32 %v823_v53, %v831_v48  ;;  %v877_v16 = vrot.slane %v4708_v51, %v4726_v37  ;;  %v706_v18 = vrot.slane %v705_v10, 4  ;;  %v3727_v58 = vld [vmem:[%s4600_s20 + $0x240] ss:$16 sps:$4 sm:$0xff]  }
 0x1d2   : > { %v845_v41 = vmax.f32 %v837_v34, 0.0  ;;  %v778_v20 = vsel %vm690_vm1, %v758_v11, 0.0  ;;  %v727_v22 = vrot.slane %v726_v13, 4  ;;  %v799_v24 = vsel %vm690_vm1, %v761_v14, 0.0 }
 0x1d3   : > { %v910_v43 = vadd.f32 1e-05, %v844_v36  ;;  %v847_v59 = vmax.f32 %v839_v54, 0.0  ;;  %v905_v25 = vmul.f32 %v877_v16, %v856_v15  ;;  %v707_v26 = vadd.f32 %v706_v18, %v705_v10  ;;  %v3744_v10 = vld [vmem:[%s4600_s20 + $0x28c] ss:$16 sps:$4 sm:$0xff]  }
 0x1d4   : > { %v911_v46 = vadd.f32 1e-05, %v845_v41  ;;  %v779_v27 = vrot.slane %v778_v20, 4  ;;  %v951_v33 = vrot.slane %v4719_v60, %v4726_v37  ;;  %v728_v34 = vadd.f32 %v727_v22, %v726_v13  ;;  %v3739_v15 = vld [vmem:[%s4600_s20 + $0x280] ss:$16 sps:$4 sm:$0xff]  }
 0x1d5   : > { %4003 = vrsqrt.f32 %v910_v43  ;;  %v913_v63 = vadd.f32 1e-05, %v847_v59  ;;  %v800_v35 = vrot.slane %v799_v24, 4  ;;  %v708_v41 = vrot.slane %v707_v26, 2  ;;  %v3721_v43 = vld [vmem:[%s4600_s20 + $0x220] ss:$16 sps:$4 sm:$0xff]  }
 0x1d6   : > { %4005 = vrsqrt.f32 %v911_v46  ;;  %v780_v42 = vadd.f32 %v779_v27, %v778_v20  ;;  %v3729_v46 = vld [vmem:[%s4600_s20 + $0x244] ss:$16 sps:$4 sm:$0xff]   ;;  %v729_v53 = vrot.slane %v728_v34, 2  ;;  %v3730_v59 = vld [vmem:[%s4600_s20 + $0x248] ss:$16 sps:$4 sm:$0xff]  }
 0x1d7   : > { %4007 = vrsqrt.f32 %v913_v63  ;;  %v801_v54 = vadd.f32 %v800_v35, %v799_v24  ;;  %v709_v56 = vadd.f32 %v708_v41, %v707_v26  ;;  %v3735_v63 = vld [vmem:[%s4600_s20 + $0x264] ss:$16 sps:$4 sm:$0xff]   ;;  %v3742_v16 = vld [vmem:[%s4600_s20 + $0x288] ss:$16 sps:$4 sm:$0xff]   ;;  %v3750_v18 = vld [vmem:[%s4600_s20 + $0x2ac] ss:$16 sps:$4 sm:$0xff]  }
 0x1d8   : > { %v781_v57 = vrot.slane %v780_v42, 2  ;;  %v3748_v24 = vld [vmem:[%s4600_s20 + $0x2a8] ss:$16 sps:$4 sm:$0xff]   ;;  %v3756_v26 = vld [vmem:[%s4600_s20 + $0x2cc] ss:$16 sps:$4 sm:$0xff]  }
 0x1d9   : > { %v802_v40 = vrot.slane %v801_v54, 2  ;;  %v3760_v41 = vld [vmem:[%s4600_s20 + $0x2e8] ss:$16 sps:$4 sm:$0xff]  }
 0x1df   : > { %v4004_v4 = vpop.eup %4003 }
 0x1e0   : > { %v4006_v8 = vpop.eup %4005  ;;  %v926_v9 = vmul.f32 %v4004_v4, %v902_v1  ;;  %v710_v4 = vrot.slane %v709_v56, 1 }
 0x1e1   : > { %v927_v12 = vmul.f32 %v4006_v8, %v903_v5  ;;  %v4008_v36 = vpop.eup %4007  ;;  %v782_v5 = vadd.f32 %v781_v57, %v780_v42  ;;  %v3736_v8 = vld [vmem:[%s4600_s20 + $0x268] ss:$16 sps:$4 sm:$0xff]   ;;  %v3765_v42 = vld [vmem:[%s4600_s20 + $0x304] ss:$16 sps:$4 sm:$0xff]   ;;  %v3769_v57 = vld [vmem:[%s4600_s20 + $0x320] ss:$16 sps:$4 sm:$0xff]  }
 0x1e2   : > { %v976_v17 = vadd.f32 %v939_v3, %v926_v9  ;;  %v929_v38 = vmul.f32 %v4008_v36, %v905_v25  ;;  %v730_v3 = vadd.f32 %v729_v53, %v728_v34  ;;  %v3741_v9 = vld [vmem:[%s4600_s20 + $0x284] ss:$16 sps:$4 sm:$0xff]   ;;  %v711_v13 = vadd.f32 %v710_v4, %v709_v56 }
 0x1e3   : > { %v977_v19 = vadd.f32 %v943_v6, %v927_v12  ;;  %v3733_v6 = vld [vmem:[%s4600_s20 + $0x260] ss:$16 sps:$4 sm:$0xff]   ;;  %v803_v12 = vadd.f32 %v802_v40, %v801_v54  ;;  %v783_v14 = vrot.slane %v782_v5, 1  ;;  %v3753_v25 = vld [vmem:[%s4600_s20 + $0x2c4] ss:$16 sps:$4 sm:$0xff]   ;;  %v4798_v40 = vsub.s32 2, %v4703_v39 }
 0x1e4   : > { %v984_v21 = vmax.f32 %v976_v17, 0.0  ;;  %v979_v48 = vadd.f32 %v951_v33, %v929_v38  ;;  %v731_v11 = vrot.slane %v730_v3, 1  ;;  %v3747_v17 = vld [vmem:[%s4600_s20 + $0x2a4] ss:$16 sps:$4 sm:$0xff]   ;;  %v3762_v33 = vld [vmem:[%s4600_s20 + $0x2ec] ss:$16 sps:$4 sm:$0xff]  }
 0x1e5   : > { %v985_v23 = vmax.f32 %v977_v19, 0.0  ;;  %v804_v20 = vrot.slane %v803_v12, 1  ;;  %v784_v22 = vadd.f32 %v783_v14, %v782_v5  ;;  %v3757_v38 = vld [vmem:[%s4600_s20 + $0x2e0] ss:$16 sps:$4 sm:$0xff]   ;;  %v3771_v53 = vld [vmem:[%s4600_s20 + $0x324] ss:$16 sps:$4 sm:$0xff]  }
 0x1e6   : > { %v992_v30 = vpack.c.bf16 %v984_v21, %v984_v21  ;;  %v987_v55 = vmax.f32 %v979_v48, 0.0  ;;  %v732_v19 = vadd.f32 %v731_v11, %v730_v3  ;;  %v4767_v21 = vmul.f32 0.25, %v711_v13  ;;  %v3766_v48 = vld [vmem:[%s4600_s20 + $0x308] ss:$16 sps:$4 sm:$0xff]   ;;  %v3774_v54 = vld [vmem:[%s4600_s20 + $0x32c] ss:$16 sps:$4 sm:$0xff]  }
 0x1e7   : > { %v993_v28 = vpack.c.bf16 %v985_v23, %v985_v23  ;;  %v3745_v23 = vld [vmem:[%s4600_s20 + $0x2a0] ss:$16 sps:$4 sm:$0xff]   ;;  %v3778_v3 = vld [vmem:[%s4600_s20 + $0x348] ss:$16 sps:$4 sm:$0xff]   ;;  %v3783_v4 = vld [vmem:[%s4600_s20 + $0x364] ss:$16 sps:$4 sm:$0xff]   ;;  %v873_v11 = vrot.slane %v4708_v51, %v4798_v40 }
 0x1e8   : > { %v995_v1 = vpack.c.bf16 %v987_v55, %v987_v55  ;;  %v4773_v27 = vmul.f32 0.25, %v732_v19  ;;  %v3786_v5 = vld [vmem:[%s4600_s20 + $0x36c] ss:$16 sps:$4 sm:$0xff]  }
 0x1e9   : > { %2568 = vmatprep.mubr.bf16.mxu0 %v993_v28  ;;  %2732 = vmatprep.mubr.bf16.mxu1 %v993_v28  ;;  %v805_v28 = vadd.f32 %v804_v20, %v803_v12  ;;  %v3789_v12 = vld [vmem:[%s4600_s20 + $0x384] ss:$16 sps:$4 sm:$0xff]   ;;  %v3792_v13 = vld [vmem:[%s4600_s20 + $0x38c] ss:$16 sps:$4 sm:$0xff]  }
 0x1ea   : > { %2569 = vmatmul.mubr.bf16.vlgmr.msra.gmra.mrb[8].mxu0 %v992_v30  ;;  %2733 = vmatmul.mubr.bf16.vlgmr.msra.gmra.mrb[8].mxu1 %v992_v30  ;;  %v3751_v30 = vld [vmem:[%s4600_s20 + $0x2c0] ss:$16 sps:$4 sm:$0xff]   ;;  %v833_v35 = vmul.f32 %v4773_v27, %v4773_v27  ;;  %v858_v14 = vsub.f32 %v4701_v7, %v4773_v27  ;;  %v3798_v19 = vld [vmem:[%s4600_s20 + $0x3ac] ss:$16 sps:$4 sm:$0xff]   ;;  %v947_v27 = vrot.slane %v4719_v60, %v4798_v40 }
 0x1eb   : > { %2578 = vmatpush1.bf16.msra.mxu0 %v3715_v49  ;;  %2742 = vmatpush1.bf16.msra.mxu1 %v3718_v29  ;;  %v822_v49 = vmul.f32 0.25, %v784_v22  ;;  %v830_v29 = vmul.f32 %v4767_v21, %v4767_v21  ;;  %v825_v34 = vmul.f32 0.25, %v805_v28  ;;  %v3793_v7 = vld [vmem:[%s4600_s20 + $0x3a0] ss:$16 sps:$4 sm:$0xff]  }
 0x1ec   : > { %2579 = vmatprep.subr.bf16.mxu0 %v3723_v31  ;;  %2743 = vmatprep.subr.bf16.mxu1 %v3726_v32  ;;  %v3754_v31 = vld [vmem:[%s4600_s20 + $0x2c8] ss:$16 sps:$4 sm:$0xff]   ;;  %v3759_v32 = vld [vmem:[%s4600_s20 + $0x2e4] ss:$16 sps:$4 sm:$0xff]  }
 0x1ed   : > { %2609 = vmatprep.mubr.bf16.mxu0 %v995_v1  ;;  %2773 = vmatprep.mubr.bf16.mxu1 %v995_v1  ;;  %v838_v36 = vsub.f32 %v822_v49, %v830_v29  ;;  %v3775_v1 = vld [vmem:[%s4600_s20 + $0x340] ss:$16 sps:$4 sm:$0xff]  }
 0x1ee   : > { %v3799_v29 = vld [vmem:[%s4600_s20 + $0x3c0] ss:$16 sps:$4 sm:$0xff]  }
 0x1ef   : > { %2580 = vmatpush1.bf16.msra.mxu0 %v3721_v43  ;;  %2744 = vmatpush1.bf16.msra.mxu1 %v3724_v44  ;;  %v3768_v43 = vld [vmem:[%s4600_s20 + $0x30c] ss:$16 sps:$4 sm:$0xff]   ;;  %v841_v44 = vsub.f32 %v825_v34, %v833_v35 }
 0x1f0   : > { %2581 = vmatprep.subr.bf16.mxu0 %v3729_v46  ;;  %2745 = vmatprep.subr.bf16.mxu1 %v3732_v47  ;;  %v846_v46 = vmax.f32 %v838_v36, 0.0  ;;  %v3763_v47 = vld [vmem:[%s4600_s20 + $0x300] ss:$16 sps:$4 sm:$0xff]   ;;  %v3810_v34 = vld [vmem:[%s4600_s20 + $0x3ec] ss:$16 sps:$4 sm:$0xff]  }
 0x1f1   : > { %v849_v55 = vmax.f32 %v841_v44, 0.0  ;;  %v3808_v44 = vld [vmem:[%s4600_s20 + $0x3e8] ss:$16 sps:$4 sm:$0xff]  }
 0x1f2   : > { %v912_v56 = vadd.f32 1e-05, %v846_v46  ;;  %v3813_v46 = vld [vmem:[%s4600_s20 + $0x404] ss:$16 sps:$4 sm:$0xff]  }
 0x1f3   : > { %2582 = vmatpush1.bf16.msra.mxu0 %v3727_v58  ;;  %2746 = vmatpush1.bf16.msra.mxu1 %v3730_v59  ;;  %v3772_v58 = vld [vmem:[%s4600_s20 + $0x328] ss:$16 sps:$4 sm:$0xff]   ;;  %v3777_v59 = vld [vmem:[%s4600_s20 + $0x344] ss:$16 sps:$4 sm:$0xff]  }
 0x1f4   : > { %2583 = vmatprep.subr.bf16.mxu0 %v3735_v63  ;;  %2747 = vmatprep.subr.bf16.mxu1 %v3738_v0  ;;  %v3780_v63 = vld [vmem:[%s4600_s20 + $0x34c] ss:$16 sps:$4 sm:$0xff]   ;;  %v915_v0 = vadd.f32 1e-05, %v849_v55  ;;  %4009 = vrsqrt.f32 %v912_v56 }
 0x1f6   : > { %4011 = vrsqrt.f32 %v915_v0 }
 0x1f7   : > { %2584 = vmatpush1.bf16.msra.mxu0 %v3733_v6  ;;  %2748 = vmatpush1.bf16.msra.mxu1 %v3736_v8  ;;  %v884_v6 = vsub.s32 5, %v4703_v39  ;;  %v3781_v8 = vld [vmem:[%s4600_s20 + $0x360] ss:$16 sps:$4 sm:$0xff]  }
 0x1f8   : > { %2585 = vmatprep.subr.bf16.mxu0 %v3741_v9  ;;  %2749 = vmatprep.subr.bf16.mxu1 %v3744_v10  ;;  %v3784_v9 = vld [vmem:[%s4600_s20 + $0x368] ss:$16 sps:$4 sm:$0xff]   ;;  %v855_v10 = vsub.f32 %v4688_v45, %v4767_v21 }
 0x1f9   : > { %v959_v49 = vrot.slane %v4719_v60, %v884_v6 }
 0x1fa   : > { %v904_v45 = vmul.f32 %v873_v11, %v855_v10  ;;  %v3817_v10 = vld [vmem:[%s4600_s20 + $0x420] ss:$16 sps:$4 sm:$0xff]   ;;  %v3820_v11 = vld [vmem:[%s4600_s20 + $0x428] ss:$16 sps:$4 sm:$0xff]  }
 0x1fb   : > { %2586 = vmatpush1.bf16.msra.mxu0 %v3739_v15  ;;  %2750 = vmatpush1.bf16.msra.mxu1 %v3742_v16  ;;  %v885_v15 = vrot.slane %v4708_v51, %v884_v6  ;;  %v3787_v16 = vld [vmem:[%s4600_s20 + $0x380] ss:$16 sps:$4 sm:$0xff]  }
 0x1fc   : > { %2587 = vmatprep.subr.bf16.mxu0 %v3747_v17  ;;  %2751 = vmatprep.subr.bf16.mxu1 %v3750_v18  ;;  %v3790_v17 = vld [vmem:[%s4600_s20 + $0x388] ss:$16 sps:$4 sm:$0xff]   ;;  %v3795_v18 = vld [vmem:[%s4600_s20 + $0x3a4] ss:$16 sps:$4 sm:$0xff]  }
 0x1fd   : > { %v907_v21 = vmul.f32 %v885_v15, %v858_v14 }
 0x1fe   : > { %v4010_v20 = vpop.eup %4009 }
 0x1ff   : > { %2588 = vmatpush1.bf16.msra.mxu0 %v3745_v23  ;;  %2752 = vmatpush1.bf16.msra.mxu1 %v3748_v24  ;;  %v3796_v23 = vld [vmem:[%s4600_s20 + $0x3a8] ss:$16 sps:$4 sm:$0xff]   ;;  %v928_v24 = vmul.f32 %v4010_v20, %v904_v45  ;;  %v3823_v45 = vld [vmem:[%s4600_s20 + $0x440] ss:$16 sps:$4 sm:$0xff]   ;;  %v3834_v20 = vld [vmem:[%s4600_s20 + $0x46c] ss:$16 sps:$4 sm:$0xff]  }
 0x200   : > { %2589 = vmatprep.subr.bf16.mxu0 %v3753_v25  ;;  %2753 = vmatprep.subr.bf16.mxu1 %v3756_v26  ;;  %v4012_v22 = vpop.eup %4011  ;;  %v3801_v25 = vld [vmem:[%s4600_s20 + $0x3c4] ss:$16 sps:$4 sm:$0xff]   ;;  %v3804_v26 = vld [vmem:[%s4600_s20 + $0x3cc] ss:$16 sps:$4 sm:$0xff]  }
 0x201   : > { %v931_v28 = vmul.f32 %v4012_v22, %v907_v21  ;;  %v978_v35 = vadd.f32 %v947_v27, %v928_v24  ;;  %v3829_v24 = vld [vmem:[%s4600_s20 + $0x460] ss:$16 sps:$4 sm:$0xff]   ;;  %v3840_v27 = vld [vmem:[%s4600_s20 + $0x48c] ss:$16 sps:$4 sm:$0xff]  }
 0x203   : > { %2590 = vmatpush1.bf16.msra.mxu0 %v3751_v30  ;;  %2754 = vmatpush1.bf16.msra.mxu1 %v3754_v31  ;;  %v3802_v30 = vld [vmem:[%s4600_s20 + $0x3c8] ss:$16 sps:$4 sm:$0xff]   ;;  %v719_v31 = vsel %vm690_vm1, %v4698_v2, 0.0  ;;  %v981_v36 = vadd.f32 %v959_v49, %v931_v28 }
 0x204   : > { %2591 = vmatprep.subr.bf16.mxu0 %v3759_v32  ;;  %2755 = vmatprep.subr.bf16.mxu1 %v3762_v33  ;;  %v760_v32 = vmul.f32 %v4698_v2, %v4698_v2  ;;  %v3807_v33 = vld [vmem:[%s4600_s20 + $0x3e4] ss:$16 sps:$4 sm:$0xff]  }
 0x205   : > { %v989_v55 = vmax.f32 %v981_v36, 0.0 }
 0x207   : > { %2592 = vmatpush1.bf16.msra.mxu0 %v3757_v38  ;;  %2756 = vmatpush1.bf16.msra.mxu1 %v3760_v41  ;;  %v740_v38 = vsel %vm690_vm1, %v4723_v62, 0.0  ;;  %v763_v41 = vmul.f32 %v4723_v62, %v4723_v62  ;;  %v997_v6 = vpack.c.bf16 %v989_v55, %v989_v55  ;;  %v3847_v55 = vld [vmem:[%s4600_s20 + $0x4c0] ss:$16 sps:$4 sm:$0xff]  }
 0x208   : > { %2593 = vmatprep.subr.bf16.mxu0 %v3765_v42  ;;  %2757 = vmatprep.subr.bf16.mxu1 %v3768_v43  ;;  %v3805_v42 = vld [vmem:[%s4600_s20 + $0x3e0] ss:$16 sps:$4 sm:$0xff]   ;;  %v720_v43 = vrot.slane %v719_v31, 4 }
 0x209   : > { %v813_v56 = vsel %vm690_vm1, %v763_v41, 0.0 }
 0x20b   : > { %2594 = vmatpush1.bf16.msra.mxu0 %v3763_v47  ;;  %2758 = vmatpush1.bf16.msra.mxu1 %v3766_v48  ;;  %v792_v47 = vsel %vm690_vm1, %v760_v32, 0.0  ;;  %v986_v48 = vmax.f32 %v978_v35, 0.0  ;;  %v3838_v32 = vld [vmem:[%s4600_s20 + $0x488] ss:$16 sps:$4 sm:$0xff]  }
 0x20c   : > { %2595 = vmatprep.subr.bf16.mxu0 %v3771_v53  ;;  %2759 = vmatprep.subr.bf16.mxu1 %v3774_v54  ;;  %v3816_v53 = vld [vmem:[%s4600_s20 + $0x40c] ss:$16 sps:$4 sm:$0xff]   ;;  %v741_v54 = vrot.slane %v740_v38, 4 }
 0x20d   : > { %v994_v0 = vpack.c.bf16 %v986_v48, %v986_v48 }
 0x20f   : > { %2596 = vmatpush1.bf16.msra.mxu0 %v3769_v57  ;;  %2760 = vmatpush1.bf16.msra.mxu1 %v3772_v58  ;;  %v721_v57 = vadd.f32 %v720_v43, %v719_v31  ;;  %v793_v58 = vrot.slane %v792_v47, 4  ;;  %v3835_v31 = vld [vmem:[%s4600_s20 + $0x480] ss:$16 sps:$4 sm:$0xff]   ;;  %v3844_v43 = vld [vmem:[%s4600_s20 + $0x4a8] ss:$16 sps:$4 sm:$0xff]  }
 0x210   : > { %2597 = vmatprep.subr.bf16.mxu0 %v3777_v59  ;;  %2761 = vmatprep.subr.bf16.mxu1 %v3780_v63  ;;  %v3811_v59 = vld [vmem:[%s4600_s20 + $0x400] ss:$16 sps:$4 sm:$0xff]   ;;  %v3814_v63 = vld [vmem:[%s4600_s20 + $0x408] ss:$16 sps:$4 sm:$0xff]  }
 0x213   : > { %2598 = vmatpush1.bf16.msra.mxu0 %v3775_v1  ;;  %2762 = vmatpush1.bf16.msra.mxu1 %v3778_v3  ;;  %v3819_v1 = vld [vmem:[%s4600_s20 + $0x424] ss:$16 sps:$4 sm:$0xff]   ;;  %v3822_v3 = vld [vmem:[%s4600_s20 + $0x42c] ss:$16 sps:$4 sm:$0xff]  }
 0x214   : > { %2599 = vmatprep.subr.bf16.mxu0 %v3783_v4  ;;  %2763 = vmatprep.subr.bf16.mxu1 %v3786_v5  ;;  %v742_v4 = vadd.f32 %v741_v54, %v740_v38  ;;  %v814_v5 = vrot.slane %v813_v56, 4 }
 0x216   : > { %v743_v14 = vrot.slane %v742_v4, 2  ;;  %v815_v15 = vadd.f32 %v814_v5, %v813_v56  ;;  %v3850_v56 = vld [vmem:[%s4600_s20 + $0x4c8] ss:$16 sps:$4 sm:$0xff]   ;;  %v3864_v5 = vld [vmem:[%s4600_s20 + $0x50c] ss:$16 sps:$4 sm:$0xff]  }
 0x217   : > { %2600 = vmatpush1.bf16.msra.mxu0 %v3781_v8  ;;  %2764 = vmatpush1.bf16.msra.mxu1 %v3784_v9  ;;  %v722_v8 = vrot.slane %v721_v57, 2  ;;  %v794_v9 = vadd.f32 %v793_v58, %v792_v47  ;;  %v3858_v58 = vld [vmem:[%s4600_s20 + $0x4ec] ss:$16 sps:$4 sm:$0xff]  }
 0x218   : > { %2601 = vmatprep.subr.bf16.mxu0 %v3789_v12  ;;  %2765 = vmatprep.subr.bf16.mxu1 %v3792_v13  ;;  %v3825_v12 = vld [vmem:[%s4600_s20 + $0x444] ss:$16 sps:$4 sm:$0xff]   ;;  %v3828_v13 = vld [vmem:[%s4600_s20 + $0x44c] ss:$16 sps:$4 sm:$0xff]   ;;  %v744_v21 = vadd.f32 %v743_v14, %v742_v4  ;;  %v816_v22 = vrot.slane %v815_v15, 2 }
 0x219   : > { %v3861_v4 = vld [vmem:[%s4600_s20 + $0x504] ss:$16 sps:$4 sm:$0xff]  }
 0x21a   : > { %v745_v28 = vrot.slane %v744_v21, 1  ;;  %v817_v49 = vadd.f32 %v816_v22, %v815_v15  ;;  %v3865_v15 = vld [vmem:[%s4600_s20 + $0x520] ss:$16 sps:$4 sm:$0xff]   ;;  %v3879_v22 = vld [vmem:[%s4600_s20 + $0x564] ss:$16 sps:$4 sm:$0xff]  }
 0x21b   : > { %2602 = vmatpush1.bf16.msra.mxu0 %v3787_v16  ;;  %2766 = vmatpush1.bf16.msra.mxu1 %v3790_v17  ;;  %v723_v16 = vadd.f32 %v722_v8, %v721_v57  ;;  %v795_v17 = vrot.slane %v794_v9, 2  ;;  %v3855_v57 = vld [vmem:[%s4600_s20 + $0x4e4] ss:$16 sps:$4 sm:$0xff]  }
 0x21c   : > { %2603 = vmatprep.subr.bf16.mxu0 %v3795_v18  ;;  %2767 = vmatprep.subr.bf16.mxu1 %v3798_v19  ;;  %v3826_v18 = vld [vmem:[%s4600_s20 + $0x448] ss:$16 sps:$4 sm:$0xff]   ;;  %v3831_v19 = vld [vmem:[%s4600_s20 + $0x464] ss:$16 sps:$4 sm:$0xff]   ;;  %v746_v35 = vadd.f32 %v745_v28, %v744_v21  ;;  %v818_v36 = vrot.slane %v817_v49, 1  ;;  %v880_v21 = vsub.s32 4, %v4703_v39 }
 0x21d   : > { %v3885_v28 = vld [vmem:[%s4600_s20 + $0x584] ss:$16 sps:$4 sm:$0xff]  }
 0x21e   : > { %v4869_v47 = vmul.f32 0.25, %v746_v35  ;;  %v819_v48 = vadd.f32 %v818_v36, %v817_v49  ;;  %v3888_v49 = vld [vmem:[%s4600_s20 + $0x58c] ss:$16 sps:$4 sm:$0xff]  }
 0x21f   : > { %2604 = vmatpush1.bf16.msra.mxu0 %v3793_v7  ;;  %2768 = vmatpush1.bf16.msra.mxu1 %v3796_v23  ;;  %v724_v7 = vrot.slane %v723_v16, 1  ;;  %v796_v23 = vadd.f32 %v795_v17, %v794_v9  ;;  %v3859_v9 = vld [vmem:[%s4600_s20 + $0x500] ss:$16 sps:$4 sm:$0xff]   ;;  %v3873_v17 = vld [vmem:[%s4600_s20 + $0x544] ss:$16 sps:$4 sm:$0xff]  }
 0x220   : > { %2605 = vmatprep.subr.bf16.mxu0 %v3801_v25  ;;  %2769 = vmatprep.subr.bf16.mxu1 %v3804_v26  ;;  %v3832_v25 = vld [vmem:[%s4600_s20 + $0x468] ss:$16 sps:$4 sm:$0xff]   ;;  %v3837_v26 = vld [vmem:[%s4600_s20 + $0x484] ss:$16 sps:$4 sm:$0xff]  }
 0x223   : > { %2606 = vmatpush1.bf16.msra.mxu0 %v3799_v29  ;;  %2770 = vmatpush1.bf16.msra.mxu1 %v3802_v30  ;;  %v725_v29 = vadd.f32 %v724_v7, %v723_v16  ;;  %v797_v30 = vrot.slane %v796_v23, 1  ;;  %v3868_v16 = vld [vmem:[%s4600_s20 + $0x528] ss:$16 sps:$4 sm:$0xff]   ;;  %v3882_v7 = vld [vmem:[%s4600_s20 + $0x56c] ss:$16 sps:$4 sm:$0xff]  }
 0x224   : > { %2607 = vmatprep.subr.bf16.mxu0 %v3807_v33  ;;  %2771 = vmatprep.subr.bf16.mxu1 %v3810_v34  ;;  %v3843_v33 = vld [vmem:[%s4600_s20 + $0x4a4] ss:$16 sps:$4 sm:$0xff]   ;;  %v3846_v34 = vld [vmem:[%s4600_s20 + $0x4ac] ss:$16 sps:$4 sm:$0xff]  }
 0x225   : > { %v4863_v38 = vmul.f32 0.25, %v725_v29  ;;  %v798_v41 = vadd.f32 %v797_v30, %v796_v23  ;;  %v892_v23 = vsub.s32 7, %v4703_v39  ;;  %v860_v29 = vsub.f32 %v4723_v62, %v4869_v47  ;;  %v3892_v62 = vld [vmem:[%s4600_s20 + $0x5a8] ss:$16 sps:$4 sm:$0xff]  }
 0x227   : > { %2608 = vmatpush1.bf16.msra.mxu0 %v3805_v42  ;;  %2772 = vmatpush1.bf16.msra.mxu1 %v3808_v44  ;;  %v3841_v42 = vld [vmem:[%s4600_s20 + $0x4a0] ss:$16 sps:$4 sm:$0xff]   ;;  %v3849_v44 = vld [vmem:[%s4600_s20 + $0x4c4] ss:$16 sps:$4 sm:$0xff]   ;;  %v832_v54 = vmul.f32 %v4863_v38, %v4863_v38  ;;  %v893_v30 = vrot.slane %v4708_v51, %v892_v23 }
 0x228   : > { %2618 = vmatprep.subr.bf16.mxu0 %v3813_v46  ;;  %2782 = vmatprep.subr.bf16.mxu1 %v3816_v53  ;;  %v3852_v46 = vld [vmem:[%s4600_s20 + $0x4cc] ss:$16 sps:$4 sm:$0xff]   ;;  %v824_v53 = vmul.f32 0.25, %v798_v41 }
 0x229   : > { %v909_v36 = vmul.f32 %v893_v30, %v860_v29  ;;  %v3933_v29 = vld [vmem:[%s4600_s20 + $0x684] ss:$16 sps:$4 sm:$0xff]   ;;  %v3936_v30 = vld [vmem:[%s4600_s20 + $0x68c] ss:$16 sps:$4 sm:$0xff]  }
 0x22a   : > { %2610 = vmatmul.mubr.bf16.vlgmr.msra.gmra.mrb[8].mxu0 %v994_v0  ;;  %2774 = vmatmul.mubr.bf16.vlgmr.msra.gmra.mrb[8].mxu1 %v994_v0  ;;  %v840_v0 = vsub.f32 %v824_v53, %v832_v54  ;;  %v3898_v53 = vld [vmem:[%s4600_s20 + $0x5c8] ss:$16 sps:$4 sm:$0xff]   ;;  %v733_v54 = vsel %vm690_vm1, %v4721_v61, 0.0 }
 0x22b   : > { %2619 = vmatpush1.bf16.msra.mxu0 %v3811_v59  ;;  %2783 = vmatpush1.bf16.msra.mxu1 %v3814_v63  ;;  %v827_v59 = vmul.f32 0.25, %v819_v48  ;;  %v835_v63 = vmul.f32 %v4869_v47, %v4869_v47  ;;  %v967_v47 = vrot.slane %v4719_v60, %v892_v23  ;;  %v3895_v48 = vld [vmem:[%s4600_s20 + $0x5c0] ss:$16 sps:$4 sm:$0xff]   ;;  %v3922_v23 = vld [vmem:[%s4600_s20 + $0x648] ss:$16 sps:$4 sm:$0xff]  }
 0x22c   : > { %2620 = vmatprep.subr.bf16.mxu0 %v3819_v1  ;;  %2784 = vmatprep.subr.bf16.mxu1 %v3822_v3  ;;  %v3853_v1 = vld [vmem:[%s4600_s20 + $0x4e0] ss:$16 sps:$4 sm:$0xff]   ;;  %v3856_v3 = vld [vmem:[%s4600_s20 + $0x4e8] ss:$16 sps:$4 sm:$0xff]   ;;  %v848_v8 = vmax.f32 %v840_v0, 0.0 }
 0x22d   : > { %2650 = vmatprep.mubr.bf16.mxu0 %v997_v6  ;;  %2814 = vmatprep.mubr.bf16.mxu1 %v997_v6  ;;  %v843_v6 = vsub.f32 %v827_v59, %v835_v63  ;;  %v734_v59 = vrot.slane %v733_v54, 4  ;;  %v3901_v63 = vld [vmem:[%s4600_s20 + $0x5e0] ss:$16 sps:$4 sm:$0xff]   ;;  %v3904_v0 = vld [vmem:[%s4600_s20 + $0x5e8] ss:$16 sps:$4 sm:$0xff]  }
 0x22e   : > { %v914_v14 = vadd.f32 1e-05, %v848_v8 }
 0x22f   : > { %2621 = vmatpush1.bf16.msra.mxu0 %v3817_v10  ;;  %2785 = vmatpush1.bf16.msra.mxu1 %v3820_v11  ;;  %v3862_v10 = vld [vmem:[%s4600_s20 + $0x508] ss:$16 sps:$4 sm:$0xff]   ;;  %v3867_v11 = vld [vmem:[%s4600_s20 + $0x524] ss:$16 sps:$4 sm:$0xff]   ;;  %v735_v8 = vadd.f32 %v734_v59, %v733_v54  ;;  %v3955_v59 = vld [vmem:[%s4600_s20 + $0x700] ss:$16 sps:$4 sm:$0xff]  }
 0x230   : > { %2622 = vmatprep.subr.bf16.mxu0 %v3825_v12  ;;  %2786 = vmatprep.subr.bf16.mxu1 %v3828_v13  ;;  %v3870_v12 = vld [vmem:[%s4600_s20 + $0x52c] ss:$16 sps:$4 sm:$0xff]   ;;  %v851_v13 = vmax.f32 %v843_v6, 0.0  ;;  %4013 = vrsqrt.f32 %v914_v14 }
 0x231   : > { %v3918_v14 = vld [vmem:[%s4600_s20 + $0x62c] ss:$16 sps:$4 sm:$0xff]  }
 0x233   : > { %2623 = vmatpush1.bf16.msra.mxu0 %v3823_v45  ;;  %2787 = vmatpush1.bf16.msra.mxu1 %v3826_v18  ;;  %v3876_v45 = vld [vmem:[%s4600_s20 + $0x54c] ss:$16 sps:$4 sm:$0xff]   ;;  %v917_v18 = vadd.f32 1e-05, %v851_v13  ;;  %v3915_v13 = vld [vmem:[%s4600_s20 + $0x624] ss:$16 sps:$4 sm:$0xff]  }
 0x234   : > { %2624 = vmatprep.subr.bf16.mxu0 %v3831_v19  ;;  %2788 = vmatprep.subr.bf16.mxu1 %v3834_v20  ;;  %v3871_v19 = vld [vmem:[%s4600_s20 + $0x540] ss:$16 sps:$4 sm:$0xff]   ;;  %v3874_v20 = vld [vmem:[%s4600_s20 + $0x548] ss:$16 sps:$4 sm:$0xff]  }
 0x235   : > { %4015 = vrsqrt.f32 %v917_v18  ;;  %v3916_v18 = vld [vmem:[%s4600_s20 + $0x628] ss:$16 sps:$4 sm:$0xff]  }
 0x237   : > { %2625 = vmatpush1.bf16.msra.mxu0 %v3829_v24  ;;  %2789 = vmatpush1.bf16.msra.mxu1 %v3832_v25  ;;  %v3877_v24 = vld [vmem:[%s4600_s20 + $0x560] ss:$16 sps:$4 sm:$0xff]   ;;  %v3880_v25 = vld [vmem:[%s4600_s20 + $0x568] ss:$16 sps:$4 sm:$0xff]  }
 0x238   : > { %2626 = vmatprep.subr.bf16.mxu0 %v3837_v26  ;;  %2790 = vmatprep.subr.bf16.mxu1 %v3840_v27  ;;  %v857_v26 = vsub.f32 %v4698_v2, %v4863_v38  ;;  %v881_v27 = vrot.slane %v4708_v51, %v880_v21  ;;  %v3889_v51 = vld [vmem:[%s4600_s20 + $0x5a0] ss:$16 sps:$4 sm:$0xff]  }
 0x23a   : > { %v906_v2 = vmul.f32 %v881_v27, %v857_v26  ;;  %v4014_v35 = vpop.eup %4013 }
 0x23b   : > { %2627 = vmatpush1.bf16.msra.mxu0 %v3835_v31  ;;  %2791 = vmatpush1.bf16.msra.mxu1 %v3838_v32  ;;  %v3883_v31 = vld [vmem:[%s4600_s20 + $0x580] ss:$16 sps:$4 sm:$0xff]   ;;  %v3886_v32 = vld [vmem:[%s4600_s20 + $0x588] ss:$16 sps:$4 sm:$0xff]  }
 0x23c   : > { %2628 = vmatprep.subr.bf16.mxu0 %v3843_v33  ;;  %2792 = vmatprep.subr.bf16.mxu1 %v3846_v34  ;;  %v3891_v33 = vld [vmem:[%s4600_s20 + $0x5a4] ss:$16 sps:$4 sm:$0xff]   ;;  %v3894_v34 = vld [vmem:[%s4600_s20 + $0x5ac] ss:$16 sps:$4 sm:$0xff]   ;;  %v930_v41 = vmul.f32 %v4014_v35, %v906_v2  ;;  %v3931_v2 = vld [vmem:[%s4600_s20 + $0x680] ss:$16 sps:$4 sm:$0xff]  }
 0x23d   : > { %v3942_v35 = vld [vmem:[%s4600_s20 + $0x6ac] ss:$16 sps:$4 sm:$0xff]  }
 0x23f   : > { %2629 = vmatpush1.bf16.msra.mxu0 %v3841_v42  ;;  %2793 = vmatpush1.bf16.msra.mxu1 %v3844_v43  ;;  %v4016_v38 = vpop.eup %4015  ;;  %v3897_v42 = vld [vmem:[%s4600_s20 + $0x5c4] ss:$16 sps:$4 sm:$0xff]   ;;  %v3900_v43 = vld [vmem:[%s4600_s20 + $0x5cc] ss:$16 sps:$4 sm:$0xff]  }
 0x240   : > { %2630 = vmatprep.subr.bf16.mxu0 %v3849_v44  ;;  %2794 = vmatprep.subr.bf16.mxu1 %v3852_v46  ;;  %v955_v44 = vrot.slane %v4719_v60, %v880_v21  ;;  %v933_v46 = vmul.f32 %v4016_v38, %v909_v36 }
 0x242   : > { %v983_v60 = vadd.f32 %v967_v47, %v933_v46  ;;  %v3943_v46 = vld [vmem:[%s4600_s20 + $0x6c0] ss:$16 sps:$4 sm:$0xff]   ;;  %v3946_v47 = vld [vmem:[%s4600_s20 + $0x6c8] ss:$16 sps:$4 sm:$0xff]  }
 0x243   : > { %2631 = vmatpush1.bf16.msra.mxu0 %v3847_v55  ;;  %2795 = vmatpush1.bf16.msra.mxu1 %v3850_v56  ;;  %v762_v55 = vmul.f32 %v4721_v61, %v4721_v61  ;;  %v3903_v56 = vld [vmem:[%s4600_s20 + $0x5e4] ss:$16 sps:$4 sm:$0xff]  }
 0x244   : > { %2632 = vmatprep.subr.bf16.mxu0 %v3855_v57  ;;  %2796 = vmatprep.subr.bf16.mxu1 %v3858_v58  ;;  %v3906_v57 = vld [vmem:[%s4600_s20 + $0x5ec] ss:$16 sps:$4 sm:$0xff]   ;;  %v980_v58 = vadd.f32 %v955_v44, %v930_v41  ;;  %v991_v6 = vmax.f32 %v983_v60, 0.0  ;;  %v3945_v41 = vld [vmem:[%s4600_s20 + $0x6c4] ss:$16 sps:$4 sm:$0xff]  }
 0x247   : > { %2633 = vmatpush1.bf16.msra.mxu0 %v3853_v1  ;;  %2797 = vmatpush1.bf16.msra.mxu1 %v3856_v3  ;;  %v806_v1 = vsel %vm690_vm1, %v762_v55, 0.0  ;;  %v988_v3 = vmax.f32 %v980_v58, 0.0  ;;  %v3949_v55 = vld [vmem:[%s4600_s20 + $0x6e0] ss:$16 sps:$4 sm:$0xff]   ;;  %v3960_v58 = vld [vmem:[%s4600_s20 + $0x70c] ss:$16 sps:$4 sm:$0xff]  }
 0x248   : > { %2634 = vmatprep.subr.bf16.mxu0 %v3861_v4  ;;  %2798 = vmatprep.subr.bf16.mxu1 %v3864_v5  ;;  %v3909_v4 = vld [vmem:[%s4600_s20 + $0x604] ss:$16 sps:$4 sm:$0xff]   ;;  %v3912_v5 = vld [vmem:[%s4600_s20 + $0x60c] ss:$16 sps:$4 sm:$0xff]  }
 0x24b   : > { %2635 = vmatpush1.bf16.msra.mxu0 %v3859_v9  ;;  %2799 = vmatpush1.bf16.msra.mxu1 %v3862_v10  ;;  %v807_v9 = vrot.slane %v806_v1, 4  ;;  %v3907_v10 = vld [vmem:[%s4600_s20 + $0x600] ss:$16 sps:$4 sm:$0xff]  }
 0x24c   : > { %2636 = vmatprep.subr.bf16.mxu0 %v3867_v11  ;;  %2800 = vmatprep.subr.bf16.mxu1 %v3870_v12  ;;  %v3910_v11 = vld [vmem:[%s4600_s20 + $0x608] ss:$16 sps:$4 sm:$0xff]   ;;  %v996_v12 = vpack.c.bf16 %v988_v3, %v988_v3 }
 0x24f   : > { %2637 = vmatpush1.bf16.msra.mxu0 %v3865_v15  ;;  %2801 = vmatpush1.bf16.msra.mxu1 %v3868_v16  ;;  %v999_v15 = vpack.c.bf16 %v991_v6, %v991_v6  ;;  %v736_v16 = vrot.slane %v735_v8, 2  ;;  %v3969_v6 = vld [vmem:[%s4600_s20 + $0x744] ss:$16 sps:$4 sm:$0xff]  }
 0x250   : > { %2638 = vmatprep.subr.bf16.mxu0 %v3873_v17  ;;  %2802 = vmatprep.subr.bf16.mxu1 %v3876_v45  ;;  %v808_v17 = vadd.f32 %v807_v9, %v806_v1  ;;  %v3913_v45 = vld [vmem:[%s4600_s20 + $0x620] ss:$16 sps:$4 sm:$0xff]   ;;  %v3966_v1 = vld [vmem:[%s4600_s20 + $0x72c] ss:$16 sps:$4 sm:$0xff]  }
 0x251   : > { %v737_v21 = vadd.f32 %v736_v16, %v735_v8  ;;  %v3972_v8 = vld [vmem:[%s4600_s20 + $0x74c] ss:$16 sps:$4 sm:$0xff]   ;;  %v3967_v9 = vld [vmem:[%s4600_s20 + $0x740] ss:$16 sps:$4 sm:$0xff]  }
 0x253   : > { %2639 = vmatpush1.bf16.msra.mxu0 %v3871_v19  ;;  %2803 = vmatpush1.bf16.msra.mxu1 %v3874_v20  ;;  %v3921_v19 = vld [vmem:[%s4600_s20 + $0x644] ss:$16 sps:$4 sm:$0xff]   ;;  %v3924_v20 = vld [vmem:[%s4600_s20 + $0x64c] ss:$16 sps:$4 sm:$0xff]   ;;  %v738_v26 = vrot.slane %v737_v21, 1 }
 0x254   : > { %2640 = vmatprep.subr.bf16.mxu0 %v3879_v22  ;;  %2804 = vmatprep.subr.bf16.mxu1 %v3882_v7  ;;  %v809_v22 = vrot.slane %v808_v17, 2  ;;  %v3919_v7 = vld [vmem:[%s4600_s20 + $0x640] ss:$16 sps:$4 sm:$0xff]  }
 0x256   : > { %v810_v27 = vadd.f32 %v809_v22, %v808_v17  ;;  %v4027_v17 = vld [vmem:[#allocation6] sm:$0xff] }
 0x257   : > { %2641 = vmatpush1.bf16.msra.mxu0 %v3877_v24  ;;  %2805 = vmatpush1.bf16.msra.mxu1 %v3880_v25  ;;  %v3927_v24 = vld [vmem:[%s4600_s20 + $0x664] ss:$16 sps:$4 sm:$0xff]   ;;  %v3930_v25 = vld [vmem:[%s4600_s20 + $0x66c] ss:$16 sps:$4 sm:$0xff]  }
 0x258   : > { %2642 = vmatprep.subr.bf16.mxu0 %v3885_v28  ;;  %2806 = vmatprep.subr.bf16.mxu1 %v3888_v49  ;;  %v3925_v28 = vld [vmem:[%s4600_s20 + $0x660] ss:$16 sps:$4 sm:$0xff]   ;;  %v3928_v49 = vld [vmem:[%s4600_s20 + $0x668] ss:$16 sps:$4 sm:$0xff]  }
 0x25b   : > { %2643 = vmatpush1.bf16.msra.mxu0 %v3883_v31  ;;  %2807 = vmatpush1.bf16.msra.mxu1 %v3886_v32  ;;  %v739_v31 = vadd.f32 %v738_v26, %v737_v21  ;;  %v811_v32 = vrot.slane %v810_v27, 1  ;;  %v3982_v21 = vld [vmem:[%s4600_s20 + $0x788] ss:$16 sps:$4 sm:$0xff]  }
 0x25c   : > { %2644 = vmatprep.subr.bf16.mxu0 %v3891_v33  ;;  %2808 = vmatprep.subr.bf16.mxu1 %v3894_v34  ;;  %v3934_v33 = vld [vmem:[%s4600_s20 + $0x688] ss:$16 sps:$4 sm:$0xff]   ;;  %v3939_v34 = vld [vmem:[%s4600_s20 + $0x6a4] ss:$16 sps:$4 sm:$0xff]  }
 0x25d   : > { %v4950_v36 = vmul.f32 0.25, %v739_v31  ;;  %v812_v38 = vadd.f32 %v811_v32, %v810_v27  ;;  %v3993_v27 = vld [vmem:[%s4600_s20 + $0x7c4] ss:$16 sps:$4 sm:$0xff]   ;;  %v3994_v31 = vld [vmem:[%s4600_s20 + $0x7c8] ss:$16 sps:$4 sm:$0xff]  }
 0x25e   : > { %v3999_v32 = vld [vmem:[%s4600_s20 + $0x7e4] ss:$16 sps:$4 sm:$0xff]  }
 0x25f   : > { %2645 = vmatpush1.bf16.msra.mxu0 %v3889_v51  ;;  %2809 = vmatpush1.bf16.msra.mxu1 %v3892_v62  ;;  %v3937_v51 = vld [vmem:[%s4600_s20 + $0x6a0] ss:$16 sps:$4 sm:$0xff]   ;;  %v3940_v62 = vld [vmem:[%s4600_s20 + $0x6a8] ss:$16 sps:$4 sm:$0xff]   ;;  %v834_v44 = vmul.f32 %v4950_v36, %v4950_v36  ;;  %v859_v16 = vsub.f32 %v4721_v61, %v4950_v36  ;;  %v3990_v61 = vld [vmem:[%s4600_s20 + $0x7ac] ss:$16 sps:$4 sm:$0xff]  }
 0x260   : > { %2646 = vmatprep.subr.bf16.mxu0 %v3897_v42  ;;  %2810 = vmatprep.subr.bf16.mxu1 %v3900_v43  ;;  %v3948_v42 = vld [vmem:[%s4600_s20 + $0x6cc] ss:$16 sps:$4 sm:$0xff]   ;;  %v826_v43 = vmul.f32 0.25, %v812_v38 }
 0x262   : > { %v842_v54 = vsub.f32 %v826_v43, %v834_v44 }
 0x263   : > { %2647 = vmatpush1.bf16.msra.mxu0 %v3895_v48  ;;  %2811 = vmatpush1.bf16.msra.mxu1 %v3898_v53  ;;  %v3951_v48 = vld [vmem:[%s4600_s20 + $0x6e4] ss:$16 sps:$4 sm:$0xff]   ;;  %v3954_v53 = vld [vmem:[%s4600_s20 + $0x6ec] ss:$16 sps:$4 sm:$0xff]  }
 0x264   : > { %2648 = vmatprep.subr.bf16.mxu0 %v3903_v56  ;;  %2812 = vmatprep.subr.bf16.mxu1 %v3906_v57  ;;  %v3952_v56 = vld [vmem:[%s4600_s20 + $0x6e8] ss:$16 sps:$4 sm:$0xff]   ;;  %v3957_v57 = vld [vmem:[%s4600_s20 + $0x704] ss:$16 sps:$4 sm:$0xff]   ;;  %v850_v60 = vmax.f32 %v842_v54, 0.0 }
 0x266   : > { %v916_v3 = vadd.f32 1e-05, %v850_v60 }
 0x267   : > { %2649 = vmatpush1.bf16.msra.mxu0 %v3901_v63  ;;  %2813 = vmatpush1.bf16.msra.mxu1 %v3904_v0  ;;  %v3958_v63 = vld [vmem:[%s4600_s20 + $0x708] ss:$16 sps:$4 sm:$0xff]   ;;  %v3963_v0 = vld [vmem:[%s4600_s20 + $0x724] ss:$16 sps:$4 sm:$0xff]  }
 0x268   : > { %2659 = vmatprep.subr.bf16.mxu0 %v3909_v4  ;;  %2823 = vmatprep.subr.bf16.mxu1 %v3912_v5  ;;  %v3961_v4 = vld [vmem:[%s4600_s20 + $0x720] ss:$16 sps:$4 sm:$0xff]   ;;  %v3964_v5 = vld [vmem:[%s4600_s20 + $0x728] ss:$16 sps:$4 sm:$0xff]   ;;  %4017 = vrsqrt.f32 %v916_v3 }
 0x26a   : > { %2651 = vmatmul.mubr.bf16.vlgmr.msra.gmra.mrb[8].mxu0 %v996_v12  ;;  %2815 = vmatmul.mubr.bf16.vlgmr.msra.gmra.mrb[8].mxu1 %v996_v12  ;;  %v3975_v12 = vld [vmem:[%s4600_s20 + $0x764] ss:$16 sps:$4 sm:$0xff]  }
 0x26b   : > { %2660 = vmatpush1.bf16.msra.mxu0 %v3907_v10  ;;  %2824 = vmatpush1.bf16.msra.mxu1 %v3910_v11  ;;  %v3970_v10 = vld [vmem:[%s4600_s20 + $0x748] ss:$16 sps:$4 sm:$0xff]   ;;  %v888_v11 = vsub.s32 6, %v4703_v39 }
 0x26c   : > { %2661 = vmatprep.subr.bf16.mxu0 %v3915_v13  ;;  %2825 = vmatprep.subr.bf16.mxu1 %v3918_v14  ;;  %v3978_v13 = vld [vmem:[%s4600_s20 + $0x76c] ss:$16 sps:$4 sm:$0xff]   ;;  %v3973_v14 = vld [vmem:[%s4600_s20 + $0x760] ss:$16 sps:$4 sm:$0xff]  }
 0x26d   : > { %2691 = vmatprep.mubr.bf16.mxu0 %v999_v15  ;;  %2855 = vmatprep.mubr.bf16.mxu1 %v999_v15  ;;  %v3976_v15 = vld [vmem:[%s4600_s20 + $0x768] ss:$16 sps:$4 sm:$0xff]  }
 0x26f   : > { %2662 = vmatpush1.bf16.msra.mxu0 %v3913_v45  ;;  %2826 = vmatpush1.bf16.msra.mxu1 %v3916_v18  ;;  %v889_v45 = vrot.slane %v4027_v17, %v888_v11  ;;  %v3981_v18 = vld [vmem:[%s4600_s20 + $0x784] ss:$16 sps:$4 sm:$0xff]  }
 0x270   : > { %2663 = vmatprep.subr.bf16.mxu0 %v3921_v19  ;;  %2827 = vmatprep.subr.bf16.mxu1 %v3924_v20  ;;  %v3984_v19 = vld [vmem:[%s4600_s20 + $0x78c] ss:$16 sps:$4 sm:$0xff]   ;;  %v3979_v20 = vld [vmem:[%s4600_s20 + $0x780] ss:$16 sps:$4 sm:$0xff]  }
 0x271   : > { %v908_v22 = vmul.f32 %v889_v45, %v859_v16 }
 0x273   : > { %2664 = vmatpush1.bf16.msra.mxu0 %v3919_v7  ;;  %2828 = vmatpush1.bf16.msra.mxu1 %v3922_v23  ;;  %v3987_v7 = vld [vmem:[%s4600_s20 + $0x7a4] ss:$16 sps:$4 sm:$0xff]   ;;  %v4018_v23 = vpop.eup %4017 }
 0x274   : > { %2665 = vmatprep.subr.bf16.mxu0 %v3927_v24  ;;  %2829 = vmatprep.subr.bf16.mxu1 %v3930_v25  ;;  %v3985_v24 = vld [vmem:[%s4600_s20 + $0x7a0] ss:$16 sps:$4 sm:$0xff]   ;;  %v3988_v25 = vld [vmem:[%s4600_s20 + $0x7a8] ss:$16 sps:$4 sm:$0xff]   ;;  %v932_v26 = vmul.f32 %v4018_v23, %v908_v22 }
 0x277   : > { %2666 = vmatpush1.bf16.msra.mxu0 %v3925_v28  ;;  %2830 = vmatpush1.bf16.msra.mxu1 %v3928_v49  ;;  %v3996_v28 = vld [vmem:[%s4600_s20 + $0x7cc] ss:$16 sps:$4 sm:$0xff]  }
 0x278   : > { %2667 = vmatprep.subr.bf16.mxu0 %v3933_v29  ;;  %2831 = vmatprep.subr.bf16.mxu1 %v3936_v30  ;;  %v4028_v49 = vld [vmem:[#allocation7] sm:$0xff]  ;;  %v3991_v30 = vld [vmem:[%s4600_s20 + $0x7c0] ss:$16 sps:$4 sm:$0xff]  }
 0x279   : > { %v963_v29 = vrot.slane %v4028_v49, %v888_v11 }
 0x27b   : > { %2668 = vmatpush1.bf16.msra.mxu0 %v3931_v2  ;;  %2832 = vmatpush1.bf16.msra.mxu1 %v3934_v33  ;;  %v4002_v2 = vld [vmem:[%s4600_s20 + $0x7ec] ss:$16 sps:$4 sm:$0xff]   ;;  %v982_v33 = vadd.f32 %v963_v29, %v932_v26 }
 0x27c   : > { %2669 = vmatprep.subr.bf16.mxu0 %v3939_v34  ;;  %2833 = vmatprep.subr.bf16.mxu1 %v3942_v35  ;;  %v3997_v34 = vld [vmem:[%s4600_s20 + $0x7e0] ss:$16 sps:$4 sm:$0xff]   ;;  %v4000_v35 = vld [vmem:[%s4600_s20 + $0x7e8] ss:$16 sps:$4 sm:$0xff]  }
 0x27d   : > { %v990_v36 = vmax.f32 %v982_v33, 0.0 }
 0x27f   : > { %2670 = vmatpush1.bf16.msra.mxu0 %v3937_v51  ;;  %2834 = vmatpush1.bf16.msra.mxu1 %v3940_v62  ;;  %v998_v38 = vpack.c.bf16 %v990_v36, %v990_v36 }
 0x280   : > { %2671 = vmatprep.subr.bf16.mxu0 %v3945_v41  ;;  %2835 = vmatprep.subr.bf16.mxu1 %v3948_v42 }
 0x283   : > { %2672 = vmatpush1.bf16.msra.mxu0 %v3943_v46  ;;  %2836 = vmatpush1.bf16.msra.mxu1 %v3946_v47 }
 0x284   : > { %2673 = vmatprep.subr.bf16.mxu0 %v3951_v48  ;;  %2837 = vmatprep.subr.bf16.mxu1 %v3954_v53 }
 0x287   : > { %2674 = vmatpush1.bf16.msra.mxu0 %v3949_v55  ;;  %2838 = vmatpush1.bf16.msra.mxu1 %v3952_v56 }
 0x288   : > { %2675 = vmatprep.subr.bf16.mxu0 %v3957_v57  ;;  %2839 = vmatprep.subr.bf16.mxu1 %v3960_v58 }
 0x28b   : > { %2676 = vmatpush1.bf16.msra.mxu0 %v3955_v59  ;;  %2840 = vmatpush1.bf16.msra.mxu1 %v3958_v63 }
 0x28c   : > { %2677 = vmatprep.subr.bf16.mxu0 %v3963_v0  ;;  %2841 = vmatprep.subr.bf16.mxu1 %v3966_v1 }
 0x28f   : > { %2678 = vmatpush1.bf16.msra.mxu0 %v3961_v4  ;;  %2842 = vmatpush1.bf16.msra.mxu1 %v3964_v5 }
 0x290   : > { %2679 = vmatprep.subr.bf16.mxu0 %v3969_v6  ;;  %2843 = vmatprep.subr.bf16.mxu1 %v3972_v8 }
 0x293   : > { %2680 = vmatpush1.bf16.msra.mxu0 %v3967_v9  ;;  %2844 = vmatpush1.bf16.msra.mxu1 %v3970_v10 }
 0x294   : > { %2681 = vmatprep.subr.bf16.mxu0 %v3975_v12  ;;  %2845 = vmatprep.subr.bf16.mxu1 %v3978_v13 }
 0x297   : > { %2682 = vmatpush1.bf16.msra.mxu0 %v3973_v14  ;;  %2846 = vmatpush1.bf16.msra.mxu1 %v3976_v15 }
 0x298   : > { %2683 = vmatprep.subr.bf16.mxu0 %v3981_v18  ;;  %2847 = vmatprep.subr.bf16.mxu1 %v3984_v19 }
 0x29b   : > { %2684 = vmatpush1.bf16.msra.mxu0 %v3979_v20  ;;  %2848 = vmatpush1.bf16.msra.mxu1 %v3982_v21 }
 0x29c   : > { %2685 = vmatprep.subr.bf16.mxu0 %v3987_v7  ;;  %2849 = vmatprep.subr.bf16.mxu1 %v3990_v61 }
 0x29f   : > { %2686 = vmatpush1.bf16.msra.mxu0 %v3985_v24  ;;  %2850 = vmatpush1.bf16.msra.mxu1 %v3988_v25 }
 0x2a0   : > { %2687 = vmatprep.subr.bf16.mxu0 %v3993_v27  ;;  %2851 = vmatprep.subr.bf16.mxu1 %v3996_v28 }
 0x2a3   : > { %2688 = vmatpush1.bf16.msra.mxu0 %v3991_v30  ;;  %2852 = vmatpush1.bf16.msra.mxu1 %v3994_v31 }
 0x2a4   : > { %2689 = vmatprep.subr.bf16.mxu0 %v3999_v32  ;;  %2853 = vmatprep.subr.bf16.mxu1 %v4002_v2 }
 0x2a7   : > { %2690 = vmatpush1.bf16.msra.mxu0 %v3997_v34  ;;  %2854 = vmatpush1.bf16.msra.mxu1 %v4000_v35 }
 0x2aa   : > { %2692 = vmatmul.mubr.bf16.vlgmr.msra.gmra.mrb[8].mxu0 %v998_v38  ;;  %2856 = vmatmul.mubr.bf16.vlgmr.msra.gmra.mrb[8].mxu1 %v998_v38 }
 0x37d   : > { %v4999_v51 = vpop.f32.mrb[8].mxu0  ;;  %v5001_v62 = vpop.f32.mrb[8].mxu1 }
 0x37e   : > { %v2864_v41 = vsel %vm690_vm1, %v4999_v51, 0.0  ;;  %v2896_v42 = vmul.f32 %v4999_v51, %v4999_v51  ;;  %v2878_v43 = vsel %vm690_vm1, %v5001_v62, 0.0  ;;  %v2898_v44 = vmul.f32 %v5001_v62, %v5001_v62  ;;  %v5011_v46 = vpop.f32.mrb[9].mxu0  ;;  %v5013_v47 = vpop.f32.mrb[9].mxu1 }
 0x37f   : > { %v2865_v48 = vrot.slane %v2864_v41, 4  ;;  %v2879_v53 = vrot.slane %v2878_v43, 4  ;;  %v2871_v54 = vsel %vm690_vm1, %v5011_v46, 0.0  ;;  %v2897_v55 = vmul.f32 %v5011_v46, %v5011_v46  ;;  %v2697_v56 = vpop.f32.mrb[10].mxu0  ;;  %v2861_v57 = vpop.f32.mrb[10].mxu1 }
 0x380   : > { %v2900_v58 = vsel %vm690_vm1, %v2896_v42, 0.0  ;;  %v2914_v60 = vsel %vm690_vm1, %v2898_v44, 0.0  ;;  %v2872_v59 = vrot.slane %v2871_v54, 4  ;;  %v2885_v63 = vsel %vm690_vm1, %v5013_v47, 0.0  ;;  %v2698_v0 = vpop.f32.mrb[11].mxu0  ;;  %v2862_v1 = vpop.f32.mrb[11].mxu1 }
 0x381   : > { %v2866_v3 = vadd.f32 %v2865_v48, %v2864_v41  ;;  %v2901_v4 = vrot.slane %v2900_v58, 4  ;;  %v2880_v5 = vadd.f32 %v2879_v53, %v2878_v43  ;;  %v2915_v6 = vrot.slane %v2914_v60, 4 }
 0x382   : > { %v2873_v8 = vadd.f32 %v2872_v59, %v2871_v54  ;;  %v2907_v9 = vsel %vm690_vm1, %v2897_v55, 0.0  ;;  %v2886_v10 = vrot.slane %v2885_v63, 4  ;;  %v2899_v11 = vmul.f32 %v5013_v47, %v5013_v47 }
 0x383   : > { %v2867_v12 = vrot.slane %v2866_v3, 2  ;;  %v2902_v13 = vadd.f32 %v2901_v4, %v2900_v58  ;;  %v2881_v14 = vrot.slane %v2880_v5, 2  ;;  %v2916_v15 = vadd.f32 %v2915_v6, %v2914_v60 }
 0x384   : > { %v2874_v16 = vrot.slane %v2873_v8, 2  ;;  %v2908_v17 = vrot.slane %v2907_v9, 4  ;;  %v2887_v45 = vadd.f32 %v2886_v10, %v2885_v63  ;;  %v2921_v18 = vsel %vm690_vm1, %v2899_v11, 0.0 }
 0x385   : > { %v2868_v19 = vadd.f32 %v2867_v12, %v2866_v3  ;;  %v2903_v20 = vrot.slane %v2902_v13, 2  ;;  %v2882_v21 = vadd.f32 %v2881_v14, %v2880_v5  ;;  %v2917_v22 = vrot.slane %v2916_v15, 2 }
 0x386   : > { %v2875_v7 = vadd.f32 %v2874_v16, %v2873_v8  ;;  %v2909_v61 = vadd.f32 %v2908_v17, %v2907_v9  ;;  %v2888_v23 = vrot.slane %v2887_v45, 2  ;;  %v2922_v24 = vrot.slane %v2921_v18, 4 }
 0x387   : > { %v2869_v25 = vrot.slane %v2868_v19, 1  ;;  %v2904_v26 = vadd.f32 %v2903_v20, %v2902_v13  ;;  %v2883_v27 = vrot.slane %v2882_v21, 1  ;;  %v2918_v28 = vadd.f32 %v2917_v22, %v2916_v15 }
 0x388   : > { %v2876_v49 = vrot.slane %v2875_v7, 1  ;;  %v2910_v29 = vrot.slane %v2909_v61, 2  ;;  %v2889_v30 = vadd.f32 %v2888_v23, %v2887_v45  ;;  %v2923_v31 = vadd.f32 %v2922_v24, %v2921_v18  ;;  %v2944_v18 = vld [vmem:[%s364_s18] sm:$0xf] }
 0x389   : > { %v2870_v32 = vadd.f32 %v2869_v25, %v2868_v19  ;;  %v2905_v2 = vrot.slane %v2904_v26, 1  ;;  %v2884_v33 = vadd.f32 %v2883_v27, %v2882_v21  ;;  %v2919_v34 = vrot.slane %v2918_v28, 1 }
 0x38a   : > { %v2877_v35 = vadd.f32 %v2876_v49, %v2875_v7  ;;  %v2911_v36 = vadd.f32 %v2910_v29, %v2909_v61  ;;  %v2890_v38 = vrot.slane %v2889_v30, 1  ;;  %v2924_v41 = vrot.slane %v2923_v31, 2  ;;  %v2986_v7 = vld [vmem:[%s373_s15] sm:$0xf] }
 0x38b   : > { %v2892_v42 = vmul.f32 0.25, %v2870_v32  ;;  %v2906_v43 = vadd.f32 %v2905_v2, %v2904_v26  ;;  %v2894_v44 = vmul.f32 0.25, %v2884_v33  ;;  %v2920_v48 = vadd.f32 %v2919_v34, %v2918_v28 }
 0x38c   : > { %v2893_v53 = vmul.f32 0.25, %v2877_v35  ;;  %v2912_v54 = vrot.slane %v2911_v36, 1  ;;  %v2891_v55 = vadd.f32 %v2890_v38, %v2889_v30  ;;  %v2925_v56 = vadd.f32 %v2924_v41, %v2923_v31 }
 0x38d   : > { %v2928_v57 = vmul.f32 0.25, %v2906_v43  ;;  %v2932_v58 = vmul.f32 %v2892_v42, %v2892_v42  ;;  %v2930_v60 = vmul.f32 0.25, %v2920_v48  ;;  %v2934_v59 = vmul.f32 %v2894_v44, %v2894_v44 }
 0x38e   : > { %v2913_v63 = vadd.f32 %v2912_v54, %v2911_v36  ;;  %v2933_v0 = vmul.f32 %v2893_v53, %v2893_v53  ;;  %v2895_v3 = vmul.f32 0.25, %v2891_v55  ;;  %v2926_v6 = vrot.slane %v2925_v56, 1 }
 0x38f   : > { %v2936_v1 = vsub.f32 %v2928_v57, %v2932_v58  ;;  %v2938_v4 = vsub.f32 %v2930_v60, %v2934_v59  ;;  %v2945_v20 = vsub.f32 %v4999_v51, %v2892_v42  ;;  %v2953_v21 = vrot.slane %v2944_v18, %v4706_v50 }
 0x390   : > { %v2929_v5 = vmul.f32 0.25, %v2913_v63  ;;  %v2927_v11 = vadd.f32 %v2926_v6, %v2925_v56  ;;  %v2935_v12 = vmul.f32 %v2895_v3, %v2895_v3  ;;  %v2947_v61 = vsub.f32 %v5001_v62, %v2894_v44 }
 0x391   : > { %v2940_v8 = vmax.f32 %v2936_v1, 0.0  ;;  %v2942_v9 = vmax.f32 %v2938_v4, 0.0  ;;  %v2961_v23 = vrot.slane %v2944_v18, %v4798_v40  ;;  %v2946_v24 = vsub.f32 %v5011_v46, %v2893_v53 }
 0x392   : > { %v2937_v10 = vsub.f32 %v2929_v5, %v2933_v0  ;;  %v2931_v16 = vmul.f32 0.25, %v2927_v11  ;;  %v2957_v25 = vrot.slane %v2944_v18, %v4711_v52  ;;  %v2970_v26 = vmul.f32 %v2953_v21, %v2945_v20 }
 0x393   : > { %v2974_v13 = vadd.f32 1e-05, %v2940_v8  ;;  %v2976_v14 = vadd.f32 1e-05, %v2942_v9  ;;  %v2991_v27 = vrot.slane %v2986_v7, %v4706_v50  ;;  %v2972_v51 = vmul.f32 %v2961_v23, %v2947_v61 }
 0x394   : > { %v2941_v15 = vmax.f32 %v2937_v10, 0.0  ;;  %v2939_v45 = vsub.f32 %v2931_v16, %v2935_v12  ;;  %v2999_v30 = vrot.slane %v2986_v7, %v4798_v40  ;;  %v4292_v31 = vmov 1983009808  }
 0x395   : > { %4019 = vrsqrt.f32 %v2974_v13  ;;  %v3027_v32 = vunpack.c.l.s4 %v4292_v31  ;;  %v2965_v62 = vrot.slane %v2944_v18, %v4726_v37  ;;  %v2971_v33 = vmul.f32 %v2957_v25, %v2946_v24 }
 0x396   : > { %4021 = vrsqrt.f32 %v2976_v14  ;;  %v2975_v17 = vadd.f32 1e-05, %v2941_v15  ;;  %v2943_v19 = vmax.f32 %v2939_v45, 0.0  ;;  %v2995_v46 = vrot.slane %v2986_v7, %v4711_v52 }
 0x397   : > { %v2948_v34 = vsub.f32 %v5013_v47, %v2895_v3  ;;  %v3028_v38 = vunpack.c.0.s8 %v3027_v32  ;;  %v3003_v41 = vrot.slane %v2986_v7, %v4726_v37 }
 0x398   : > { %4023 = vrsqrt.f32 %v2975_v17  ;;  %v2977_v22 = vadd.f32 1e-05, %v2943_v19 }
 0x399   : > { %v2973_v44 = vmul.f32 %v2965_v62, %v2948_v34  ;;  %v3031_v52 = vsub.s32 %v3028_v38, %v4703_v39 }
 0x39a   : > { %4025 = vrsqrt.f32 %v2977_v22 }
 0x39f   : > { %v4020_v28 = vpop.eup %4019 }
 0x3a0   : > { %v4022_v49 = vpop.eup %4021  ;;  %v2982_v29 = vmul.f32 %v4020_v28, %v2970_v26 }
 0x3a1   : > { %v2984_v2 = vmul.f32 %v4022_v49, %v2972_v51 }
 0x3a2   : > { %v4024_v35 = vpop.eup %4023  ;;  %v3008_v36 = vadd.f32 %v2991_v27, %v2982_v29 }
 0x3a3   : > { %v2983_v50 = vmul.f32 %v4024_v35, %v2971_v33  ;;  %v3010_v43 = vadd.f32 %v2999_v30, %v2984_v2 }
 0x3a4   : > { %v3012_v42 = vmax.f32 %v3008_v36, 0.0  ;;  %v4026_v48 = vpop.eup %4025 }
 0x3a5   : > { %v3009_v40 = vadd.f32 %v2995_v46, %v2983_v50  ;;  %v2985_v54 = vmul.f32 %v4026_v48, %v2973_v44  ;;  %v3014_v55 = vmax.f32 %v3010_v43, 0.0 }
 0x3a7   : > { %v3013_v53 = vmax.f32 %v3009_v40, 0.0  ;;  %v3011_v47 = vadd.f32 %v3003_v41, %v2985_v54 }
 0x3a9   : > { %v3491_v56 = vpack.c.bf16 %v3013_v53, %v3012_v42  ;;  %v3015_v57 = vmax.f32 %v3011_v47, 0.0 }
 0x3ab   : > { %v3032_v58 = vrot.slane %v3491_v56, %v3031_v52  ;;  %v3492_v60 = vpack.c.bf16 %v3015_v57, %v3014_v55 }
 0x3ad   : > { %v3039_v59 = vrot.slane %v3492_v60, %v3031_v52 }
 0x3af   : > { %v3040_v37 = vcombine.low %v3032_v58, %v3039_v59 }
 0x3b1   : > { %3042 = vst [vmem:[%s421_s30] sm:$0xff] %v3040_v37 }
 0x3b2 PF: > { %s5112_s27 = sld [smem:[#allocation16_spill]]  ;;  %s5113_s21 = sld [smem:[#allocation17_spill]] }
 0x3b3   : > { %s5114_s24 = smov %s4269_s25  ;;  %s5115_s25 = smov %s4273_s26 }
 0x3b8   : > { %p17_p7 = scmp.ge.s32.totalorder %s5112_s27, 6   ;;  %s5116_s26 = smov %s5113_s21 }
 0x3ba   :  { %19 = sbr.rel (!%p17_p7) target bundleno = 8 (0x8), region = 125 }
 0x3c1   :  { %3065 = vsyncpa [#allocation3], 1 }
 0x3c2   :  { %3067 = vsyncpa [#allocation3 + $0x1], 1 }
 0x3c3   :  { %3068 = vsyncpa [#allocation5], 1 }
 0x3c4   :  { %3069 = vsyncpa [#allocation8], 1 }

// kernel: generator_forward.3
= control target key start
LH: loop header
LB: loop body
LE: loop exit
PB: predicated region body
PF: predicated region fallthrough
CT: control target
= control target key end

     0   :  { %v7805_v3 = vmov 0   ;;  %v7806_v43 = vmov 1983009808   ;;  %v189_v45 = vlaneseq  ;;  %vm6877_vm0 = vcmask 130048   ;;  %s10406_s1 = inlined_call_operand.vmem [shape: bf16[128,2048], index: 1, kind: input, shape index: {}]   ;;  %s10407_s0 = inlined_call_operand.vmem [shape: bf16[4,4,4,128], index: 0, kind: input, shape index: {}]   ;;  %s10408_s4 = inlined_call_operand.vmem [shape: bf16[2048,16], index: 4, kind: input, shape index: {}]   ;;  %s10409_s2 = inlined_call_operand.vmem [shape: f32[1,128], index: 2, kind: input, shape index: {}]   ;;  %s10410_s3 = inlined_call_operand.vmem [shape: f32[1,128], index: 3, kind: input, shape index: {}]   ;;  %s10411_s5 = inlined_call_operand.vmem [shape: f32[1,16], index: 5, kind: input, shape index: {}]   ;;  %s10412_s6 = inlined_call_operand.vmem [shape: f32[64,16], index: 6, kind: output, shape index: {}]  }
   0x1   :  { %v40_v0 = vld [vmem:[%s10406_s1] sm:$0xff]  ;;  %v41_v2 = vld [vmem:[%s10406_s1 + $0x8] sm:$0xff]  ;;  %928 = vmatprep.mubr.bf16.mxu0 %v7805_v3  ;;  %1001 = vmatprep.mubr.bf16.mxu1 %v7805_v3  ;;  %v187_v44 = vunpack.c.l.s4 %v7806_v43  ;;  %v32_v43 = vld [vmem:[%s10407_s0 + $0x10] sm:$0x3] }
   0x2   :  { %v48_v1 = vld [vmem:[%s10406_s1 + $0x40] sm:$0xff]  ;;  %v49_v5 = vld [vmem:[%s10406_s1 + $0x48] sm:$0xff]  ;;  %v7932_v56 = vshrl.u32 %v189_v45, 7  ;;  %v33_v45 = vld [vmem:[%s10407_s0 + $0x12] sm:$0x3] }
   0x3   :  { %v6891_v4 = vcombine.high %v40_v0, %v48_v1  ;;  %v6890_v6 = vcombine.low %v40_v0, %v48_v1  ;;  %v56_v7 = vld [vmem:[%s10406_s1 + $0x80] sm:$0xff]  ;;  %v6893_v9 = vcombine.high %v41_v2, %v49_v5  ;;  %v6892_v10 = vcombine.low %v41_v2, %v49_v5  ;;  %v57_v12 = vld [vmem:[%s10406_s1 + $0x88] sm:$0xff] }
   0x4   :  { %v64_v8 = vld [vmem:[%s10406_s1 + $0xc0] sm:$0xff]  ;;  %v65_v13 = vld [vmem:[%s10406_s1 + $0xc8] sm:$0xff]  ;;  %v188_v55 = vunpack.c.0.s8 %v187_v44  ;;  %10440 = vst [vmem:[#allocation6_spill] sm:$0xff] %v7932_v56 }
   0x5   :  { %v6907_v11 = vcombine.high %v56_v7, %v64_v8  ;;  %v72_v14 = vld [vmem:[%s10406_s1 + $0x100] sm:$0xff]  ;;  %896 = vmatprep.subr.bf16.mxu0 %v6891_v4  ;;  %v6909_v15 = vcombine.high %v57_v12, %v65_v13  ;;  %v73_v17 = vld [vmem:[%s10406_s1 + $0x108] sm:$0xff]  ;;  %969 = vmatprep.subr.bf16.mxu1 %v6893_v9  ;;  %v6906_v19 = vcombine.low %v56_v7, %v64_v8 }
   0x6   :  { %v80_v16 = vld [vmem:[%s10406_s1 + $0x140] sm:$0xff]  ;;  %v81_v18 = vld [vmem:[%s10406_s1 + $0x148] sm:$0xff]  ;;  %897 = vmatpush1.bf16.msra.mxu0 %v6890_v6  ;;  %970 = vmatpush1.bf16.msra.mxu1 %v6892_v10  ;;  %v6908_v20 = vcombine.low %v57_v12, %v65_v13  ;;  %v7956_v7 = vsub.s32 %v188_v55, %v7932_v56  ;;  %v42_v12 = vld [vmem:[%s10406_s1 + $0x10] sm:$0xff] }
   0x7   :  { %898 = vmatprep.subr.bf16.mxu0 %v6907_v11  ;;  %v6923_v21 = vcombine.high %v72_v14, %v80_v16  ;;  %971 = vmatprep.subr.bf16.mxu1 %v6909_v15  ;;  %v6925_v22 = vcombine.high %v73_v17, %v81_v18  ;;  %v88_v23 = vld [vmem:[%s10406_s1 + $0x180] sm:$0xff]  ;;  %v89_v25 = vld [vmem:[%s10406_s1 + $0x188] sm:$0xff]  ;;  %v6922_v27 = vcombine.low %v72_v14, %v80_v16  ;;  %v50_v13 = vld [vmem:[%s10406_s1 + $0x50] sm:$0xff] }
   0x8   :  { %v96_v24 = vld [vmem:[%s10406_s1 + $0x1c0] sm:$0xff]  ;;  %v97_v26 = vld [vmem:[%s10406_s1 + $0x1c8] sm:$0xff]  ;;  %v6924_v28 = vcombine.low %v73_v17, %v81_v18  ;;  %10441 = vst [vmem:[#allocation7_spill] sm:$0xff] %v7956_v7  ;;  %v43_v16 = vld [vmem:[%s10406_s1 + $0x18] sm:$0xff] }
   0x9   :  { %v6939_v29 = vcombine.high %v88_v23, %v96_v24  ;;  %v6941_v30 = vcombine.high %v89_v25, %v97_v26  ;;  %v104_v31 = vld [vmem:[%s10406_s1 + $0x200] sm:$0xff]  ;;  %v105_v33 = vld [vmem:[%s10406_s1 + $0x208] sm:$0xff]  ;;  %v6938_v35 = vcombine.low %v88_v23, %v96_v24  ;;  %v6940_v36 = vcombine.low %v89_v25, %v97_v26  ;;  %v51_v17 = vld [vmem:[%s10406_s1 + $0x58] sm:$0xff] }
   0xa   :  { %899 = vmatpush1.bf16.msra.mxu0 %v6906_v19  ;;  %972 = vmatpush1.bf16.msra.mxu1 %v6908_v20  ;;  %v112_v32 = vld [vmem:[%s10406_s1 + $0x240] sm:$0xff]  ;;  %v113_v34 = vld [vmem:[%s10406_s1 + $0x248] sm:$0xff]  ;;  %v6895_v24 = vcombine.high %v42_v12, %v50_v13  ;;  %v6897_v25 = vcombine.high %v43_v16, %v51_v17  ;;  %v58_v26 = vld [vmem:[%s10406_s1 + $0x90] sm:$0xff] }
   0xb   :  { %900 = vmatprep.subr.bf16.mxu0 %v6923_v21  ;;  %973 = vmatprep.subr.bf16.mxu1 %v6925_v22  ;;  %v6955_v37 = vcombine.high %v104_v31, %v112_v32  ;;  %v6957_v38 = vcombine.high %v105_v33, %v113_v34  ;;  %v120_v39 = vld [vmem:[%s10406_s1 + $0x280] sm:$0xff]  ;;  %v121_v41 = vld [vmem:[%s10406_s1 + $0x288] sm:$0xff]  ;;  %v6954_v46 = vcombine.low %v104_v31, %v112_v32  ;;  %v99_v55 = vld [vmem:[%s10406_s1 + $0x1d8] sm:$0xff] }
   0xc   :  { %v128_v40 = vld [vmem:[%s10406_s1 + $0x2c0] sm:$0xff]  ;;  %v129_v42 = vld [vmem:[%s10406_s1 + $0x2c8] sm:$0xff]  ;;  %v6956_v47 = vcombine.low %v105_v33, %v113_v34  ;;  %v6894_v33 = vcombine.low %v42_v12, %v50_v13  ;;  %v6896_v34 = vcombine.low %v43_v16, %v51_v17  ;;  %v130_v16 = vld [vmem:[%s10406_s1 + $0x2d0] sm:$0xff] }
   0xd   :  { %v6971_v48 = vcombine.high %v120_v39, %v128_v40  ;;  %v6973_v49 = vcombine.high %v121_v41, %v129_v42  ;;  %v136_v50 = vld [vmem:[%s10406_s1 + $0x300] sm:$0xff]  ;;  %v137_v52 = vld [vmem:[%s10406_s1 + $0x308] sm:$0xff]  ;;  %v6970_v57 = vcombine.low %v120_v39, %v128_v40  ;;  %v6972_v61 = vcombine.low %v121_v41, %v129_v42  ;;  %v75_v41 = vld [vmem:[%s10406_s1 + $0x118] sm:$0xff] }
   0xe   :  { %901 = vmatpush1.bf16.msra.mxu0 %v6922_v27  ;;  %974 = vmatpush1.bf16.msra.mxu1 %v6924_v28  ;;  %v144_v51 = vld [vmem:[%s10406_s1 + $0x340] sm:$0xff]  ;;  %v145_v53 = vld [vmem:[%s10406_s1 + $0x348] sm:$0xff]  ;;  %v66_v27 = vld [vmem:[%s10406_s1 + $0xd0] sm:$0xff] }
   0xf   :  { %902 = vmatprep.subr.bf16.mxu0 %v6939_v29  ;;  %975 = vmatprep.subr.bf16.mxu1 %v6941_v30  ;;  %v24_v54 = vld [vmem:[%s10407_s0] sm:$0x3]  ;;  %v25_v58 = vld [vmem:[%s10407_s0 + $0x2] sm:$0x3]  ;;  %v26_v59 = vld [vmem:[%s10407_s0 + $0x4] sm:$0x3]  ;;  %v6987_v62 = vcombine.high %v136_v50, %v144_v51  ;;  %v6989_v63 = vcombine.high %v137_v52, %v145_v53  ;;  %v6986_v8 = vcombine.low %v136_v50, %v144_v51 }
  0x10   :  { %v27_v60 = vld [vmem:[%s10407_s0 + $0x6] sm:$0x3]  ;;  %v153_v2 = vld [vmem:[%s10406_s1 + $0x388] sm:$0xff]  ;;  %v184_v5 = vcombine.low %v24_v54, %v25_v58  ;;  %v6988_v9 = vcombine.low %v137_v52, %v145_v53  ;;  %v59_v29 = vld [vmem:[%s10406_s1 + $0x98] sm:$0xff]  ;;  %v6910_v44 = vcombine.low %v58_v26, %v66_v27 }
  0x11   :  { %v152_v0 = vld [vmem:[%s10406_s1 + $0x380] sm:$0xff]  ;;  %v161_v4 = vld [vmem:[%s10406_s1 + $0x3c8] sm:$0xff]  ;;  %v185_v6 = vcombine.low %v26_v59, %v27_v60  ;;  %v67_v30 = vld [vmem:[%s10406_s1 + $0xd8] sm:$0xff] }
  0x12   :  { %903 = vmatpush1.bf16.msra.mxu0 %v6938_v35  ;;  %976 = vmatpush1.bf16.msra.mxu1 %v6940_v36  ;;  %v160_v1 = vld [vmem:[%s10406_s1 + $0x3c0] sm:$0xff]  ;;  %v7005_v11 = vcombine.high %v153_v2, %v161_v4  ;;  %v192_v14 = vrot.slane %v184_v5, %v7956_v7  ;;  %v28_v18 = vld [vmem:[%s10407_s0 + $0x8] sm:$0x3]  ;;  %v29_v20 = vld [vmem:[%s10407_s0 + $0xa] sm:$0x3]  ;;  %v7004_v23 = vcombine.low %v153_v2, %v161_v4 }
  0x13   :  { %904 = vmatprep.subr.bf16.mxu0 %v6955_v37  ;;  %977 = vmatprep.subr.bf16.mxu1 %v6957_v38  ;;  %v7003_v10 = vcombine.high %v152_v0, %v160_v1  ;;  %v199_v15 = vrot.slane %v185_v6, %v7956_v7  ;;  %v7002_v19 = vcombine.low %v152_v0, %v160_v1  ;;  %v30_v21 = vld [vmem:[%s10407_s0 + $0xc] sm:$0x3]  ;;  %v31_v22 = vld [vmem:[%s10407_s0 + $0xe] sm:$0x3]  ;;  %v74_v37 = vld [vmem:[%s10406_s1 + $0x110] sm:$0xff] }
  0x14   :  { %v201_v31 = vcombine.low %v28_v18, %v29_v20  ;;  %v202_v32 = vcombine.low %v30_v21, %v31_v22  ;;  %v6911_v35 = vcombine.high %v58_v26, %v66_v27  ;;  %v6913_v36 = vcombine.high %v59_v29, %v67_v30  ;;  %v82_v38 = vld [vmem:[%s10406_s1 + $0x150] sm:$0xff]  ;;  %v83_v42 = vld [vmem:[%s10406_s1 + $0x158] sm:$0xff] }
  0x15   :  { %v7990_v28 = vcombine.low %v192_v14, %v199_v15  ;;  %v6929_v50 = vcombine.high %v75_v41, %v83_v42  ;;  %v90_v51 = vld [vmem:[%s10406_s1 + $0x190] sm:$0xff]  ;;  %v91_v54 = vld [vmem:[%s10406_s1 + $0x198] sm:$0xff]  ;;  %v6926_v59 = vcombine.low %v74_v37, %v82_v38  ;;  %v6928_v60 = vcombine.low %v75_v41, %v83_v42 }
  0x16   :  { %905 = vmatpush1.bf16.msra.mxu0 %v6954_v46  ;;  %978 = vmatpush1.bf16.msra.mxu1 %v6956_v47  ;;  %v209_v39 = vrot.slane %v201_v31, %v7956_v7  ;;  %v216_v40 = vrot.slane %v202_v32, %v7956_v7  ;;  %v34_v46 = vld [vmem:[%s10407_s0 + $0x14] sm:$0x3]  ;;  %v35_v47 = vld [vmem:[%s10407_s0 + $0x16] sm:$0x3]  ;;  %v107_v4 = vld [vmem:[%s10406_s1 + $0x218] sm:$0xff]  ;;  %v6944_v12 = vcombine.low %v91_v54, %v99_v55 }
  0x17   :  { %906 = vmatprep.subr.bf16.mxu0 %v6971_v48  ;;  %979 = vmatprep.subr.bf16.mxu1 %v6973_v49  ;;  %v6912_v48 = vcombine.low %v59_v29, %v67_v30  ;;  %v6927_v49 = vcombine.high %v74_v37, %v82_v38  ;;  %v98_v52 = vld [vmem:[%s10406_s1 + $0x1d0] sm:$0xff]  ;;  %v219_v58 = vcombine.low %v34_v46, %v35_v47  ;;  %v115_v5 = vld [vmem:[%s10406_s1 + $0x258] sm:$0xff]  ;;  %v44_v46 = vld [vmem:[%s10406_s1 + $0x20] sm:$0xff] }
  0x18   :  { %v8034_v53 = vcombine.low %v209_v39, %v216_v40  ;;  %v114_v0 = vld [vmem:[%s10406_s1 + $0x250] sm:$0xff]  ;;  %v36_v6 = vld [vmem:[%s10407_s0 + $0x18] sm:$0x3]  ;;  %v6961_v14 = vcombine.high %v107_v4, %v115_v5  ;;  %v52_v47 = vld [vmem:[%s10406_s1 + $0x60] sm:$0xff] }
  0x19   :  { %v233_v2 = vrot.slane %v219_v58, %v7956_v7  ;;  %v122_v15 = vld [vmem:[%s10406_s1 + $0x290] sm:$0xff]  ;;  %v123_v18 = vld [vmem:[%s10406_s1 + $0x298] sm:$0xff]  ;;  %v61_v58 = vld [vmem:[%s10406_s1 + $0xa8] sm:$0xff] }
  0x1a   :  { %907 = vmatpush1.bf16.msra.mxu0 %v6970_v57  ;;  %980 = vmatpush1.bf16.msra.mxu1 %v6972_v61  ;;  %v218_v57 = vcombine.low %v32_v43, %v33_v45  ;;  %v6943_v61 = vcombine.high %v90_v51, %v98_v52  ;;  %v138_v26 = vld [vmem:[%s10406_s1 + $0x310] sm:$0xff]  ;;  %v139_v31 = vld [vmem:[%s10406_s1 + $0x318] sm:$0xff] }
  0x1b   :  { %908 = vmatprep.subr.bf16.mxu0 %v6987_v62  ;;  %981 = vmatprep.subr.bf16.mxu1 %v6989_v63  ;;  %v6945_v62 = vcombine.high %v91_v54, %v99_v55  ;;  %v106_v63 = vld [vmem:[%s10406_s1 + $0x210] sm:$0xff]  ;;  %v147_v32 = vld [vmem:[%s10406_s1 + $0x358] sm:$0xff]  ;;  %v60_v55 = vld [vmem:[%s10406_s1 + $0xa0] sm:$0xff] }
  0x1c   :  { %v226_v1 = vrot.slane %v218_v57, %v7956_v7  ;;  %v6959_v13 = vcombine.high %v106_v63, %v114_v0  ;;  %v6958_v22 = vcombine.low %v106_v63, %v114_v0  ;;  %v146_v27 = vld [vmem:[%s10406_s1 + $0x350] sm:$0xff]  ;;  %v155_v40 = vld [vmem:[%s10406_s1 + $0x398] sm:$0xff]  ;;  %v6992_v43 = vcombine.low %v139_v31, %v147_v32  ;;  %v68_v57 = vld [vmem:[%s10406_s1 + $0xe0] sm:$0xff] }
  0x1d   :  { %v154_v37 = vld [vmem:[%s10406_s1 + $0x390] sm:$0xff]  ;;  %v163_v41 = vld [vmem:[%s10406_s1 + $0x3d8] sm:$0xff]  ;;  %v6990_v42 = vcombine.low %v138_v26, %v146_v27  ;;  %v76_v0 = vld [vmem:[%s10406_s1 + $0x120] sm:$0xff] }
  0x1e   :  { %909 = vmatpush1.bf16.msra.mxu0 %v6986_v8  ;;  %982 = vmatpush1.bf16.msra.mxu1 %v6988_v9  ;;  %v6942_v8 = vcombine.low %v90_v51, %v98_v52  ;;  %v37_v9 = vld [vmem:[%s10407_s0 + $0x1a] sm:$0x3]  ;;  %v8078_v17 = vcombine.low %v226_v1, %v233_v2  ;;  %v162_v38 = vld [vmem:[%s10406_s1 + $0x3d0] sm:$0xff]  ;;  %v7009_v45 = vcombine.high %v155_v40, %v163_v41  ;;  %v84_v1 = vld [vmem:[%s10406_s1 + $0x160] sm:$0xff] }
  0x1f   :  { %910 = vmatprep.subr.bf16.mxu0 %v7003_v10  ;;  %983 = vmatprep.subr.bf16.mxu1 %v7005_v11  ;;  %v38_v10 = vld [vmem:[%s10407_s0 + $0x1c] sm:$0x3]  ;;  %v39_v11 = vld [vmem:[%s10407_s0 + $0x1e] sm:$0x3]  ;;  %v235_v20 = vcombine.low %v36_v6, %v37_v9  ;;  %v7008_v51 = vcombine.low %v155_v40, %v163_v41  ;;  %v6899_v52 = vcombine.high %v44_v46, %v52_v47  ;;  %v77_v2 = vld [vmem:[%s10406_s1 + $0x128] sm:$0xff] }
  0x20   :  { %v236_v21 = vcombine.low %v38_v10, %v39_v11  ;;  %v92_v10 = vld [vmem:[%s10406_s1 + $0x1a0] sm:$0xff]  ;;  %v149_v40 = vld [vmem:[%s10406_s1 + $0x368] sm:$0xff] }
  0x21   :  { %v243_v29 = vrot.slane %v235_v20, %v7956_v7  ;;  %v100_v11 = vld [vmem:[%s10406_s1 + $0x1e0] sm:$0xff] }
  0x22   :  { %911 = vmatpush1.bf16.msra.mxu0 %v7002_v19  ;;  %984 = vmatpush1.bf16.msra.mxu1 %v7004_v23  ;;  %v131_v19 = vld [vmem:[%s10406_s1 + $0x2d8] sm:$0xff]  ;;  %v6960_v23 = vcombine.low %v107_v4, %v115_v5  ;;  %v250_v30 = vrot.slane %v236_v21, %v7956_v7  ;;  %v85_v4 = vld [vmem:[%s10406_s1 + $0x168] sm:$0xff]  ;;  %v6914_v5 = vcombine.low %v60_v55, %v68_v57  ;;  %v116_v20 = vld [vmem:[%s10406_s1 + $0x260] sm:$0xff] }
  0x23   :  { %1042 = vmatprep.subr.bf16.mxu0 %v6895_v24  ;;  %1115 = vmatprep.subr.bf16.mxu1 %v6897_v25  ;;  %v6975_v24 = vcombine.high %v122_v15, %v130_v16  ;;  %v6977_v25 = vcombine.high %v123_v18, %v131_v19  ;;  %v6933_v9 = vcombine.high %v77_v2, %v85_v4  ;;  %v109_v21 = vld [vmem:[%s10406_s1 + $0x228] sm:$0xff] }
  0x24   :  { %v8110_v39 = vcombine.low %v243_v29, %v250_v30  ;;  %v132_v29 = vld [vmem:[%s10406_s1 + $0x2e0] sm:$0xff]  ;;  %v125_v30 = vld [vmem:[%s10406_s1 + $0x2a8] sm:$0xff] }
  0x25   :  { %929 = vmatmul.mubr.bf16.vlgmr.msra.gmra.mrb[0].mxu0 %v7990_v28  ;;  %1002 = vmatmul.mubr.bf16.vlgmr.msra.gmra.mrb[0].mxu1 %v7990_v28 }
  0x26   :  { %1043 = vmatpush1.bf16.msra.mxu0 %v6894_v33  ;;  %1116 = vmatpush1.bf16.msra.mxu1 %v6896_v34  ;;  %v6974_v33 = vcombine.low %v122_v15, %v130_v16  ;;  %v6976_v34 = vcombine.low %v123_v18, %v131_v19  ;;  %v6932_v15 = vcombine.low %v77_v2, %v85_v4  ;;  %v108_v19 = vld [vmem:[%s10406_s1 + $0x220] sm:$0xff]  ;;  %v70_v2 = vld [vmem:[%s10406_s1 + $0xf0] sm:$0xff] }
  0x27   :  { %1044 = vmatprep.subr.bf16.mxu0 %v6911_v35  ;;  %1117 = vmatprep.subr.bf16.mxu1 %v6913_v36  ;;  %v6991_v35 = vcombine.high %v138_v26, %v146_v27  ;;  %v6993_v36 = vcombine.high %v139_v31, %v147_v32  ;;  %v6947_v16 = vcombine.high %v92_v10, %v100_v11  ;;  %v124_v27 = vld [vmem:[%s10406_s1 + $0x2a0] sm:$0xff]  ;;  %v133_v31 = vld [vmem:[%s10406_s1 + $0x2e8] sm:$0xff] }
  0x28   :  { %938 = vmatprep.mubr.bf16.mxu0 %v7805_v3  ;;  %1011 = vmatprep.mubr.bf16.mxu1 %v7805_v3  ;;  %v6962_v32 = vcombine.low %v108_v19, %v116_v20  ;;  %v6978_v41 = vcombine.low %v124_v27, %v132_v29 }
  0x2a   :  { %1045 = vmatpush1.bf16.msra.mxu0 %v6910_v44  ;;  %1118 = vmatpush1.bf16.msra.mxu1 %v6912_v48  ;;  %v7007_v44 = vcombine.high %v154_v37, %v162_v38  ;;  %v45_v48 = vld [vmem:[%s10406_s1 + $0x28] sm:$0xff] }
  0x2b   :  { %1046 = vmatprep.subr.bf16.mxu0 %v6927_v49  ;;  %1119 = vmatprep.subr.bf16.mxu1 %v6929_v50  ;;  %v53_v49 = vld [vmem:[%s10406_s1 + $0x68] sm:$0xff]  ;;  %v7006_v50 = vcombine.low %v154_v37, %v162_v38  ;;  %v148_v37 = vld [vmem:[%s10406_s1 + $0x360] sm:$0xff] }
  0x2c   :  { %v6901_v54 = vcombine.high %v45_v48, %v53_v49  ;;  %v141_v38 = vld [vmem:[%s10406_s1 + $0x328] sm:$0xff] }
  0x2d   :  { %939 = vmatmul.mubr.bf16.gmra.mrb[4].mxu0 %v8034_v53  ;;  %1012 = vmatmul.mubr.bf16.gmra.mrb[4].mxu1 %v8034_v53 }
  0x2e   :  { %1047 = vmatpush1.bf16.msra.mxu0 %v6926_v59  ;;  %1120 = vmatpush1.bf16.msra.mxu1 %v6928_v60  ;;  %v69_v59 = vld [vmem:[%s10406_s1 + $0xe8] sm:$0xff]  ;;  %v6898_v60 = vcombine.low %v44_v46, %v52_v47  ;;  %v164_v46 = vld [vmem:[%s10406_s1 + $0x3e0] sm:$0xff] }
  0x2f   :  { %1048 = vmatprep.subr.bf16.mxu0 %v6943_v61  ;;  %1121 = vmatprep.subr.bf16.mxu1 %v6945_v62  ;;  %v6900_v61 = vcombine.low %v45_v48, %v53_v49  ;;  %v6915_v62 = vcombine.high %v60_v55, %v68_v57  ;;  %v6917_v63 = vcombine.high %v61_v58, %v69_v59  ;;  %v157_v47 = vld [vmem:[%s10406_s1 + $0x3a8] sm:$0xff]  ;;  %v54_v55 = vld [vmem:[%s10406_s1 + $0x70] sm:$0xff]  ;;  %v47_v57 = vld [vmem:[%s10406_s1 + $0x38] sm:$0xff] }
  0x30   :  { %948 = vmatprep.mubr.bf16.mxu0 %v7805_v3  ;;  %1021 = vmatprep.mubr.bf16.mxu1 %v7805_v3  ;;  %v6916_v6 = vcombine.low %v61_v58, %v69_v59  ;;  %v165_v48 = vld [vmem:[%s10406_s1 + $0x3e8] sm:$0xff]  ;;  %v55_v58 = vld [vmem:[%s10406_s1 + $0x78] sm:$0xff] }
  0x31   :  { %v6904_v4 = vcombine.low %v47_v57, %v55_v58 }
  0x32   :  { %1049 = vmatpush1.bf16.msra.mxu0 %v6942_v8  ;;  %1122 = vmatpush1.bf16.msra.mxu1 %v6944_v12  ;;  %v6931_v8 = vcombine.high %v76_v0, %v84_v1  ;;  %v93_v12 = vld [vmem:[%s10406_s1 + $0x1a8] sm:$0xff] }
  0x33   :  { %1050 = vmatprep.subr.bf16.mxu0 %v6959_v13  ;;  %1123 = vmatprep.subr.bf16.mxu1 %v6961_v14  ;;  %v101_v13 = vld [vmem:[%s10406_s1 + $0x1e8] sm:$0xff]  ;;  %v6930_v14 = vcombine.low %v76_v0, %v84_v1  ;;  %v71_v0 = vld [vmem:[%s10406_s1 + $0xf8] sm:$0xff]  ;;  %v62_v1 = vld [vmem:[%s10406_s1 + $0xb0] sm:$0xff] }
  0x34   :  { %v6949_v18 = vcombine.high %v93_v12, %v101_v13 }
  0x35   :  { %949 = vmatmul.mubr.bf16.gmra.mrb[8].mxu0 %v8078_v17  ;;  %1022 = vmatmul.mubr.bf16.gmra.mrb[8].mxu1 %v8078_v17 }
  0x36   :  { %1051 = vmatpush1.bf16.msra.mxu0 %v6958_v22  ;;  %1124 = vmatpush1.bf16.msra.mxu1 %v6960_v23  ;;  %v117_v22 = vld [vmem:[%s10406_s1 + $0x268] sm:$0xff]  ;;  %v6946_v23 = vcombine.low %v92_v10, %v100_v11  ;;  %v6919_v10 = vcombine.high %v62_v1, %v70_v2  ;;  %v78_v11 = vld [vmem:[%s10406_s1 + $0x130] sm:$0xff] }
  0x37   :  { %1052 = vmatprep.subr.bf16.mxu0 %v6975_v24  ;;  %1125 = vmatprep.subr.bf16.mxu1 %v6977_v25  ;;  %v6948_v24 = vcombine.low %v93_v12, %v101_v13  ;;  %v6963_v25 = vcombine.high %v108_v19, %v116_v20  ;;  %v6965_v26 = vcombine.high %v109_v21, %v117_v22  ;;  %v86_v12 = vld [vmem:[%s10406_s1 + $0x170] sm:$0xff] }
  0x38   :  { %958 = vmatprep.mubr.bf16.mxu0 %v7805_v3  ;;  %1031 = vmatprep.mubr.bf16.mxu1 %v7805_v3  ;;  %v6935_v19 = vcombine.high %v78_v11, %v86_v12  ;;  %v94_v20 = vld [vmem:[%s10406_s1 + $0x1b0] sm:$0xff] }
  0x3a   :  { %1053 = vmatpush1.bf16.msra.mxu0 %v6974_v33  ;;  %1126 = vmatpush1.bf16.msra.mxu1 %v6976_v34  ;;  %v6964_v33 = vcombine.low %v109_v21, %v117_v22  ;;  %v6979_v34 = vcombine.high %v124_v27, %v132_v29  ;;  %v102_v21 = vld [vmem:[%s10406_s1 + $0x1f0] sm:$0xff] }
  0x3b   :  { %1054 = vmatprep.subr.bf16.mxu0 %v6991_v35  ;;  %1127 = vmatprep.subr.bf16.mxu1 %v6993_v36  ;;  %v6981_v35 = vcombine.high %v125_v30, %v133_v31  ;;  %v140_v36 = vld [vmem:[%s10406_s1 + $0x320] sm:$0xff]  ;;  %v6951_v27 = vcombine.high %v94_v20, %v102_v21  ;;  %v110_v29 = vld [vmem:[%s10406_s1 + $0x230] sm:$0xff] }
  0x3c   :  { %v6994_v49 = vcombine.low %v140_v36, %v148_v37 }
  0x3d   :  { %959 = vmatmul.mubr.bf16.gmra.mrb[12].mxu0 %v8110_v39  ;;  %1032 = vmatmul.mubr.bf16.gmra.mrb[12].mxu1 %v8110_v39 }
  0x3e   :  { %1055 = vmatpush1.bf16.msra.mxu0 %v6990_v42  ;;  %1128 = vmatpush1.bf16.msra.mxu1 %v6992_v43  ;;  %v6980_v42 = vcombine.low %v125_v30, %v133_v31  ;;  %v6995_v43 = vcombine.high %v140_v36, %v148_v37  ;;  %v118_v30 = vld [vmem:[%s10406_s1 + $0x270] sm:$0xff] }
  0x3f   :  { %1056 = vmatprep.subr.bf16.mxu0 %v7007_v44  ;;  %1129 = vmatprep.subr.bf16.mxu1 %v7009_v45  ;;  %v6997_v44 = vcombine.high %v141_v38, %v149_v40  ;;  %v156_v45 = vld [vmem:[%s10406_s1 + $0x3a0] sm:$0xff]  ;;  %v6967_v36 = vcombine.high %v110_v29, %v118_v30  ;;  %v126_v37 = vld [vmem:[%s10406_s1 + $0x2b0] sm:$0xff] }
  0x40   :  { %1074 = vmatprep.mubr.bf16.mxu0 %v7805_v3  ;;  %1147 = vmatprep.mubr.bf16.mxu1 %v7805_v3  ;;  %v7010_v59 = vcombine.low %v156_v45, %v164_v46 }
  0x42   :  { %1057 = vmatpush1.bf16.msra.mxu0 %v7006_v50  ;;  %1130 = vmatpush1.bf16.msra.mxu1 %v7008_v51  ;;  %v6996_v50 = vcombine.low %v141_v38, %v149_v40  ;;  %v7011_v51 = vcombine.high %v156_v45, %v164_v46  ;;  %v134_v38 = vld [vmem:[%s10406_s1 + $0x2f0] sm:$0xff] }
  0x43   :  { %1188 = vmatprep.subr.bf16.mxu0 %v6899_v52  ;;  %1261 = vmatprep.subr.bf16.mxu1 %v6901_v54  ;;  %v7013_v52 = vcombine.high %v157_v47, %v165_v48  ;;  %v46_v54 = vld [vmem:[%s10406_s1 + $0x30] sm:$0xff]  ;;  %v6983_v45 = vcombine.high %v126_v37, %v134_v38 }
  0x44   :  { %v142_v46 = vld [vmem:[%s10406_s1 + $0x330] sm:$0xff] }
  0x45   :  { %1075 = vmatmul.mubr.bf16.vlgmr.msra.gmra.mrb[16].mxu0 %v7990_v28  ;;  %1148 = vmatmul.mubr.bf16.vlgmr.msra.gmra.mrb[16].mxu1 %v7990_v28 }
  0x46   :  { %1189 = vmatpush1.bf16.msra.mxu0 %v6898_v60  ;;  %1262 = vmatpush1.bf16.msra.mxu1 %v6900_v61  ;;  %v7012_v60 = vcombine.low %v157_v47, %v165_v48  ;;  %v6903_v61 = vcombine.high %v46_v54, %v54_v55  ;;  %v150_v47 = vld [vmem:[%s10406_s1 + $0x370] sm:$0xff] }
  0x47   :  { %1190 = vmatprep.subr.bf16.mxu0 %v6915_v62  ;;  %1263 = vmatprep.subr.bf16.mxu1 %v6917_v63  ;;  %v6905_v62 = vcombine.high %v47_v57, %v55_v58  ;;  %v63_v63 = vld [vmem:[%s10406_s1 + $0xb8] sm:$0xff]  ;;  %v166_v57 = vld [vmem:[%s10406_s1 + $0x3f0] sm:$0xff] }
  0x48   :  { %1084 = vmatprep.mubr.bf16.mxu0 %v7805_v3  ;;  %1157 = vmatprep.mubr.bf16.mxu1 %v7805_v3  ;;  %v6920_v13 = vcombine.low %v63_v63, %v71_v0 }
  0x4a   :  { %1191 = vmatpush1.bf16.msra.mxu0 %v6914_v5  ;;  %1264 = vmatpush1.bf16.msra.mxu1 %v6916_v6  ;;  %v6921_v5 = vcombine.high %v63_v63, %v71_v0  ;;  %v6902_v6 = vcombine.low %v46_v54, %v54_v55  ;;  %v6999_v54 = vcombine.high %v142_v46, %v150_v47  ;;  %v158_v55 = vld [vmem:[%s10406_s1 + $0x3b0] sm:$0xff] }
  0x4b   :  { %1192 = vmatprep.subr.bf16.mxu0 %v6931_v8  ;;  %1265 = vmatprep.subr.bf16.mxu1 %v6933_v9  ;;  %v79_v8 = vld [vmem:[%s10406_s1 + $0x138] sm:$0xff]  ;;  %v7014_v63 = vcombine.low %v158_v55, %v166_v57 }
  0x4c   :  { %v87_v9 = vld [vmem:[%s10406_s1 + $0x178] sm:$0xff] }
  0x4d   :  { %1085 = vmatmul.mubr.bf16.gmra.mrb[20].mxu0 %v8034_v53  ;;  %1158 = vmatmul.mubr.bf16.gmra.mrb[20].mxu1 %v8034_v53  ;;  %v6936_v22 = vcombine.low %v79_v8, %v87_v9 }
  0x4e   :  { %1193 = vmatpush1.bf16.msra.mxu0 %v6930_v14  ;;  %1266 = vmatpush1.bf16.msra.mxu1 %v6932_v15  ;;  %v6937_v14 = vcombine.high %v79_v8, %v87_v9  ;;  %v6918_v15 = vcombine.low %v62_v1, %v70_v2 }
  0x4f   :  { %1194 = vmatprep.subr.bf16.mxu0 %v6947_v16  ;;  %1267 = vmatprep.subr.bf16.mxu1 %v6949_v18  ;;  %v95_v16 = vld [vmem:[%s10406_s1 + $0x1b8] sm:$0xff] }
  0x50   :  { %1094 = vmatprep.mubr.bf16.mxu0 %v7805_v3  ;;  %1167 = vmatprep.mubr.bf16.mxu1 %v7805_v3  ;;  %v103_v18 = vld [vmem:[%s10406_s1 + $0x1f8] sm:$0xff] }
  0x51   :  { %v6952_v31 = vcombine.low %v95_v16, %v103_v18 }
  0x52   :  { %1195 = vmatpush1.bf16.msra.mxu0 %v6946_v23  ;;  %1268 = vmatpush1.bf16.msra.mxu1 %v6948_v24  ;;  %v6953_v23 = vcombine.high %v95_v16, %v103_v18  ;;  %v6934_v24 = vcombine.low %v78_v11, %v86_v12 }
  0x53   :  { %1196 = vmatprep.subr.bf16.mxu0 %v6963_v25  ;;  %1269 = vmatprep.subr.bf16.mxu1 %v6965_v26  ;;  %v111_v25 = vld [vmem:[%s10406_s1 + $0x238] sm:$0xff] }
  0x54   :  { %v119_v26 = vld [vmem:[%s10406_s1 + $0x278] sm:$0xff] }
  0x55   :  { %1095 = vmatmul.mubr.bf16.gmra.mrb[24].mxu0 %v8078_v17  ;;  %1168 = vmatmul.mubr.bf16.gmra.mrb[24].mxu1 %v8078_v17  ;;  %v6968_v40 = vcombine.low %v111_v25, %v119_v26 }
  0x56   :  { %1197 = vmatpush1.bf16.msra.mxu0 %v6962_v32  ;;  %1270 = vmatpush1.bf16.msra.mxu1 %v6964_v33  ;;  %v6969_v32 = vcombine.high %v111_v25, %v119_v26  ;;  %v6950_v33 = vcombine.low %v94_v20, %v102_v21 }
  0x57   :  { %1198 = vmatprep.subr.bf16.mxu0 %v6979_v34  ;;  %1271 = vmatprep.subr.bf16.mxu1 %v6981_v35  ;;  %v127_v34 = vld [vmem:[%s10406_s1 + $0x2b8] sm:$0xff] }
  0x58   :  { %1104 = vmatprep.mubr.bf16.mxu0 %v7805_v3  ;;  %1177 = vmatprep.mubr.bf16.mxu1 %v7805_v3  ;;  %v135_v35 = vld [vmem:[%s10406_s1 + $0x2f8] sm:$0xff] }
  0x59   :  { %v6984_v48 = vcombine.low %v127_v34, %v135_v35 }
  0x5a   :  { %1199 = vmatpush1.bf16.msra.mxu0 %v6978_v41  ;;  %1272 = vmatpush1.bf16.msra.mxu1 %v6980_v42  ;;  %v6985_v41 = vcombine.high %v127_v34, %v135_v35  ;;  %v6966_v42 = vcombine.low %v110_v29, %v118_v30 }
  0x5b   :  { %1200 = vmatprep.subr.bf16.mxu0 %v6995_v43  ;;  %1273 = vmatprep.subr.bf16.mxu1 %v6997_v44  ;;  %v143_v43 = vld [vmem:[%s10406_s1 + $0x338] sm:$0xff] }
  0x5c   :  { %v151_v44 = vld [vmem:[%s10406_s1 + $0x378] sm:$0xff] }
  0x5d   :  { %1105 = vmatmul.mubr.bf16.gmra.mrb[28].mxu0 %v8110_v39  ;;  %1178 = vmatmul.mubr.bf16.gmra.mrb[28].mxu1 %v8110_v39  ;;  %v7000_v58 = vcombine.low %v143_v43, %v151_v44 }
  0x5e   :  { %1201 = vmatpush1.bf16.msra.mxu0 %v6994_v49  ;;  %1274 = vmatpush1.bf16.msra.mxu1 %v6996_v50  ;;  %v7001_v49 = vcombine.high %v143_v43, %v151_v44  ;;  %v6982_v50 = vcombine.low %v126_v37, %v134_v38 }
  0x5f   :  { %1202 = vmatprep.subr.bf16.mxu0 %v7011_v51  ;;  %1275 = vmatprep.subr.bf16.mxu1 %v7013_v52  ;;  %v159_v51 = vld [vmem:[%s10406_s1 + $0x3b8] sm:$0xff] }
  0x60   :  { %1220 = vmatprep.mubr.bf16.mxu0 %v7805_v3  ;;  %1293 = vmatprep.mubr.bf16.mxu1 %v7805_v3  ;;  %v167_v52 = vld [vmem:[%s10406_s1 + $0x3f8] sm:$0xff] }
  0x62   :  { %1203 = vmatpush1.bf16.msra.mxu0 %v7010_v59  ;;  %1276 = vmatpush1.bf16.msra.mxu1 %v7012_v60  ;;  %v7017_v59 = vcombine.high %v159_v51, %v167_v52  ;;  %v6998_v60 = vcombine.low %v142_v46, %v150_v47 }
  0x63   :  { %1334 = vmatprep.subr.bf16.mxu0 %v6903_v61  ;;  %1407 = vmatprep.subr.bf16.mxu1 %v6905_v62  ;;  %v7015_v61 = vcombine.high %v158_v55, %v166_v57  ;;  %v7016_v62 = vcombine.low %v159_v51, %v167_v52 }
  0x65   :  { %1221 = vmatmul.mubr.bf16.vlgmr.msra.gmra.mrb[32].mxu0 %v7990_v28  ;;  %1294 = vmatmul.mubr.bf16.vlgmr.msra.gmra.mrb[32].mxu1 %v7990_v28 }
  0x66   :  { %1230 = vmatprep.mubr.bf16.mxu0 %v7805_v3  ;;  %1408 = vmatpush1.bf16.msra.mxu1 %v6904_v4 }
  0x67   :  { %1303 = vmatprep.mubr.bf16.mxu1 %v7805_v3  ;;  %1409 = vmatprep.subr.bf16.mxu1 %v6921_v5 }
  0x68   :  { %1335 = vmatpush1.bf16.msra.mxu0 %v6902_v6 }
  0x69   :  { %1336 = vmatprep.subr.bf16.mxu0 %v6919_v10 }
  0x6a   :  { %1410 = vmatpush1.bf16.msra.mxu1 %v6920_v13 }
  0x6b   :  { %1411 = vmatprep.subr.bf16.mxu1 %v6937_v14 }
  0x6c   :  { %1337 = vmatpush1.bf16.msra.mxu0 %v6918_v15 }
  0x6d   :  { %1231 = vmatmul.mubr.bf16.gmra.mrb[36].mxu0 %v8034_v53  ;;  %1338 = vmatprep.subr.bf16.mxu0 %v6935_v19 }
  0x6e   :  { %1304 = vmatmul.mubr.bf16.gmra.mrb[36].mxu1 %v8034_v53  ;;  %1240 = vmatprep.mubr.bf16.mxu0 %v7805_v3 }
  0x6f   :  { %1412 = vmatpush1.bf16.msra.mxu1 %v6936_v22  ;;  %1313 = vmatprep.mubr.bf16.mxu1 %v7805_v3 }
  0x70   :  { %1413 = vmatprep.subr.bf16.mxu1 %v6953_v23  ;;  %1339 = vmatpush1.bf16.msra.mxu0 %v6934_v24 }
  0x71   :  { %1340 = vmatprep.subr.bf16.mxu0 %v6951_v27 }
  0x73   :  { %1414 = vmatpush1.bf16.msra.mxu1 %v6952_v31 }
  0x74   :  { %1415 = vmatprep.subr.bf16.mxu1 %v6969_v32  ;;  %1341 = vmatpush1.bf16.msra.mxu0 %v6950_v33 }
  0x75   :  { %1241 = vmatmul.mubr.bf16.gmra.mrb[40].mxu0 %v8078_v17  ;;  %1342 = vmatprep.subr.bf16.mxu0 %v6967_v36 }
  0x76   :  { %1314 = vmatmul.mubr.bf16.gmra.mrb[40].mxu1 %v8078_v17  ;;  %1250 = vmatprep.mubr.bf16.mxu0 %v7805_v3 }
  0x77   :  { %1416 = vmatpush1.bf16.msra.mxu1 %v6968_v40  ;;  %1323 = vmatprep.mubr.bf16.mxu1 %v7805_v3 }
  0x78   :  { %1417 = vmatprep.subr.bf16.mxu1 %v6985_v41  ;;  %1343 = vmatpush1.bf16.msra.mxu0 %v6966_v42 }
  0x79   :  { %1344 = vmatprep.subr.bf16.mxu0 %v6983_v45 }
  0x7b   :  { %1418 = vmatpush1.bf16.msra.mxu1 %v6984_v48 }
  0x7c   :  { %1419 = vmatprep.subr.bf16.mxu1 %v7001_v49  ;;  %1345 = vmatpush1.bf16.msra.mxu0 %v6982_v50 }
  0x7d   :  { %1251 = vmatmul.mubr.bf16.gmra.mrb[44].mxu0 %v8110_v39  ;;  %1346 = vmatprep.subr.bf16.mxu0 %v6999_v54 }
  0x7e   :  { %1324 = vmatmul.mubr.bf16.gmra.mrb[44].mxu1 %v8110_v39  ;;  %1366 = vmatprep.mubr.bf16.mxu0 %v7805_v3 }
  0x7f   :  { %1420 = vmatpush1.bf16.msra.mxu1 %v7000_v58  ;;  %1439 = vmatprep.mubr.bf16.mxu1 %v7805_v3 }
  0x80   :  { %1421 = vmatprep.subr.bf16.mxu1 %v7017_v59  ;;  %1347 = vmatpush1.bf16.msra.mxu0 %v6998_v60 }
  0x81   :  { %1348 = vmatprep.subr.bf16.mxu0 %v7015_v61 }
  0x83   :  { %1422 = vmatpush1.bf16.msra.mxu1 %v7016_v62 }
  0x84   :  { %1349 = vmatpush1.bf16.msra.mxu0 %v7014_v63 }
  0x86   :  { %1440 = vmatmul.mubr.bf16.vlgmr.msra.gmra.mrb[48].mxu1 %v7990_v28 }
  0x87   :  { %1367 = vmatmul.mubr.bf16.vlgmr.msra.gmra.mrb[48].mxu0 %v7990_v28  ;;  %1449 = vmatprep.mubr.bf16.mxu1 %v7805_v3 }
  0x88   :  { %1376 = vmatprep.mubr.bf16.mxu0 %v7805_v3 }
  0x8e   :  { %1450 = vmatmul.mubr.bf16.gmra.mrb[52].mxu1 %v8034_v53 }
  0x8f   :  { %1377 = vmatmul.mubr.bf16.gmra.mrb[52].mxu0 %v8034_v53  ;;  %1459 = vmatprep.mubr.bf16.mxu1 %v7805_v3 }
  0x90   :  { %1386 = vmatprep.mubr.bf16.mxu0 %v7805_v3 }
  0x96   :  { %1460 = vmatmul.mubr.bf16.gmra.mrb[56].mxu1 %v8078_v17 }
  0x97   :  { %1387 = vmatmul.mubr.bf16.gmra.mrb[56].mxu0 %v8078_v17  ;;  %1469 = vmatprep.mubr.bf16.mxu1 %v7805_v3 }
  0x98   :  { %1396 = vmatprep.mubr.bf16.mxu0 %v7805_v3 }
  0x9e   :  { %1470 = vmatmul.mubr.bf16.gmra.mrb[60].mxu1 %v8110_v39 }
  0x9f   :  { %1397 = vmatmul.mubr.bf16.gmra.mrb[60].mxu0 %v8110_v39 }
  0xf8   :  { %v8360_v28 = vpop.f32.mrb[0].mxu0  ;;  %v8362_v0 = vpop.f32.mrb[0].mxu1 }
  0xf9   :  { %v8364_v53 = vpop.f32.mrb[1].mxu0  ;;  %v8366_v1 = vpop.f32.mrb[1].mxu1 }
  0xfa   :  { %v8368_v2 = vpop.f32.mrb[2].mxu0  ;;  %v8370_v4 = vpop.f32.mrb[2].mxu1 }
  0xfb   :  { %v8372_v17 = vpop.f32.mrb[3].mxu0  ;;  %v8374_v5 = vpop.f32.mrb[3].mxu1 }
 0x100   :  { %v8376_v3 = vpop.f32.mrb[4].mxu0  ;;  %v8378_v6 = vpop.f32.mrb[4].mxu1 }
 0x101   :  { %v8380_v39 = vpop.f32.mrb[5].mxu0  ;;  %v8382_v8 = vpop.f32.mrb[5].mxu1 }
 0x102   :  { %v8384_v9 = vpop.f32.mrb[6].mxu0  ;;  %v8386_v10 = vpop.f32.mrb[6].mxu1 }
 0x103   :  { %v8388_v11 = vpop.f32.mrb[7].mxu0  ;;  %v8390_v12 = vpop.f32.mrb[7].mxu1 }
 0x108   :  { %v8392_v13 = vpop.f32.mrb[8].mxu0  ;;  %v8394_v14 = vpop.f32.mrb[8].mxu1 }
 0x109   :  { %v8396_v15 = vpop.f32.mrb[9].mxu0  ;;  %v8398_v16 = vpop.f32.mrb[9].mxu1 }
 0x10a   :  { %v8400_v18 = vpop.f32.mrb[10].mxu0  ;;  %v8402_v19 = vpop.f32.mrb[10].mxu1 }
 0x10b   :  { %v8404_v20 = vpop.f32.mrb[11].mxu0  ;;  %v8406_v21 = vpop.f32.mrb[11].mxu1 }
 0x110   :  { %v8408_v22 = vpop.f32.mrb[12].mxu0  ;;  %v8410_v23 = vpop.f32.mrb[12].mxu1 }
 0x111   :  { %v8412_v24 = vpop.f32.mrb[13].mxu0  ;;  %v8414_v25 = vpop.f32.mrb[13].mxu1 }
 0x112   :  { %10442 = vst [vmem:[#allocation8_spill] sm:$0xff] %v8412_v24  ;;  %v8416_v26 = vpop.f32.mrb[14].mxu0  ;;  %v8418_v27 = vpop.f32.mrb[14].mxu1 }
 0x113   :  { %v8420_v29 = vpop.f32.mrb[15].mxu0  ;;  %v8422_v30 = vpop.f32.mrb[15].mxu1 }
 0x114   :  { %10443 = vst [vmem:[#allocation9_spill] sm:$0xff] %v8420_v29  ;;  %10444 = vst [vmem:[#allocation10_spill] sm:$0xff] %v8422_v30 }
 0x118   :  { %v8424_v31 = vpop.f32.mrb[16].mxu0  ;;  %v1149_v32 = vpop.f32.mrb[16].mxu1 }
 0x119   :  { %v1078_v33 = vpop.f32.mrb[17].mxu0  ;;  %v1781_v34 = vcombine.high %v1149_v32, %v1149_v32  ;;  %1797 = vst [vmem:[#allocation3 + $0x9] sm:$0xf] %v1149_v32  ;;  %v8426_v36 = vpop.f32.mrb[17].mxu1  ;;  %v1966_v44 = vrot.slane %v8424_v31, 1 }
 0x11a   :  { %v1530_v35 = vcombine.high %v1078_v33, %v1078_v33  ;;  %1546 = vst [vmem:[#allocation2 + $0x9] sm:$0xf] %v1078_v33  ;;  %10445 = vst [vmem:[#allocation11_spill] sm:$0xff] %v8426_v36  ;;  %v8428_v37 = vpop.f32.mrb[18].mxu0  ;;  %v1153_v38 = vpop.f32.mrb[18].mxu1 }
 0x11b   :  { %v1082_v40 = vpop.f32.mrb[19].mxu0  ;;  %1798 = vst [vmem:[#allocation3 + $0x11] sm:$0xf] %v1781_v34  ;;  %v1782_v41 = vcombine.high %v1153_v38, %v1153_v38  ;;  %1799 = vst [vmem:[#allocation3 + $0x19] sm:$0xf] %v1153_v38  ;;  %v8430_v42 = vpop.f32.mrb[19].mxu1 }
 0x11c   :  { %1547 = vst [vmem:[#allocation2 + $0x11] sm:$0xf] %v1530_v35  ;;  %10446 = vst [vmem:[#allocation12_spill] sm:$0xff] %v8430_v42  ;;  %v1531_v43 = vcombine.high %v1082_v40, %v1082_v40 }
 0x11d   :  { %1548 = vst [vmem:[#allocation2 + $0x19] sm:$0xf] %v1082_v40  ;;  %1800 = vst [vmem:[#allocation3 + $0x21] sm:$0xf] %v1782_v41 }
 0x11e   :  { %1549 = vst [vmem:[#allocation2 + $0x21] sm:$0xf] %v1531_v43 }
 0x120   :  { %v8433_v45 = vpop.f32.mrb[20].mxu0  ;;  %v1950_v46 = vld [vmem:[#allocation3 + $0x9] sm:$0x7]  ;;  %v1159_v48 = vpop.f32.mrb[20].mxu1 }
 0x121   :  { %v1683_v47 = vld [vmem:[#allocation2 + $0xa] sm:$0x7]  ;;  %v1998_v49 = vadd.f32 %v1966_v44, %v1950_v46  ;;  %v1783_v51 = vcombine.high %v1159_v48, %v1159_v48  ;;  %1801 = vst [vmem:[#allocation3 + $0x39] sm:$0xf] %v1159_v48  ;;  %v1088_v52 = vpop.f32.mrb[21].mxu0  ;;  %v8436_v54 = vpop.f32.mrb[21].mxu1 }
 0x122   :  { %v1699_v50 = vadd.f32 %v1683_v47, %v8426_v36  ;;  %10447 = vst [vmem:[#allocation13_spill] sm:$0xff] %v8436_v54  ;;  %v1532_v55 = vcombine.high %v1088_v52, %v1088_v52  ;;  %1550 = vst [vmem:[#allocation2 + $0x39] sm:$0xf] %v1088_v52  ;;  %v1163_v57 = vpop.f32.mrb[22].mxu1  ;;  %v8438_v58 = vpop.f32.mrb[22].mxu0  ;;  %v1970_v63 = vrot.slane %v8433_v45, 1 }
 0x123   :  { %10448 = vst [vmem:[#allocation14_spill] sm:$0xff] %v8438_v58  ;;  %2014 = vst [vmem:[#allocation3 + $0x9] sm:$0x7] %v1998_v49  ;;  %v1784_v59 = vcombine.high %v1163_v57, %v1163_v57  ;;  %v8440_v60 = vpop.f32.mrb[23].mxu1  ;;  %v1092_v61 = vpop.f32.mrb[23].mxu0 }
 0x124   :  { %1715 = vst [vmem:[#allocation2 + $0xa] sm:$0x7] %v1699_v50  ;;  %1802 = vst [vmem:[#allocation3 + $0x41] sm:$0xf] %v1783_v51  ;;  %v1533_v62 = vcombine.high %v1092_v61, %v1092_v61 }
 0x125   :  { %1803 = vst [vmem:[#allocation3 + $0x49] sm:$0xf] %v1163_v57  ;;  %10449 = vst [vmem:[#allocation15_spill] sm:$0xff] %v8440_v60 }
 0x126   :  { %1551 = vst [vmem:[#allocation2 + $0x41] sm:$0xf] %v1532_v55  ;;  %1552 = vst [vmem:[#allocation2 + $0x49] sm:$0xf] %v1092_v61 }
 0x127   :  { %1804 = vst [vmem:[#allocation3 + $0x51] sm:$0xf] %v1784_v59  ;;  %1553 = vst [vmem:[#allocation2 + $0x51] sm:$0xf] %v1533_v62 }
 0x128   :  { %v8443_v32 = vpop.f32.mrb[24].mxu0  ;;  %v1954_v33 = vld [vmem:[#allocation3 + $0x39] sm:$0x7]  ;;  %v1169_v34 = vpop.f32.mrb[24].mxu1 }
 0x129   :  { %10450 = vst [vmem:[#allocation16_spill] sm:$0xff] %v8443_v32  ;;  %v1098_v35 = vpop.f32.mrb[25].mxu0  ;;  %v2002_v38 = vadd.f32 %v1970_v63, %v1954_v33  ;;  %v1687_v40 = vld [vmem:[#allocation2 + $0x3a] sm:$0x7]  ;;  %v1785_v41 = vcombine.high %v1169_v34, %v1169_v34  ;;  %1805 = vst [vmem:[#allocation3 + $0x69] sm:$0xf] %v1169_v34 }
 0x12a   :  { %v1534_v43 = vcombine.high %v1098_v35, %v1098_v35  ;;  %1554 = vst [vmem:[#allocation2 + $0x69] sm:$0xf] %v1098_v35  ;;  %v8445_v44 = vpop.f32.mrb[25].mxu1  ;;  %v8447_v46 = vpop.f32.mrb[26].mxu0  ;;  %v1703_v47 = vadd.f32 %v1687_v40, %v8436_v54  ;;  %v1974_v55 = vrot.slane %v8443_v32, 1 }
 0x12b   :  { %10451 = vst [vmem:[#allocation17_spill] sm:$0xff] %v8445_v44  ;;  %10452 = vst [vmem:[#allocation18_spill] sm:$0xff] %v8447_v46  ;;  %v1173_v48 = vpop.f32.mrb[26].mxu1  ;;  %v1102_v51 = vpop.f32.mrb[27].mxu0 }
 0x12c   :  { %2018 = vst [vmem:[#allocation3 + $0x39] sm:$0x7] %v2002_v38  ;;  %1806 = vst [vmem:[#allocation3 + $0x71] sm:$0xf] %v1785_v41  ;;  %v1786_v49 = vcombine.high %v1173_v48, %v1173_v48  ;;  %v8450_v50 = vpop.f32.mrb[27].mxu1  ;;  %v1535_v52 = vcombine.high %v1102_v51, %v1102_v51 }
 0x12d   :  { %1555 = vst [vmem:[#allocation2 + $0x71] sm:$0xf] %v1534_v43  ;;  %1807 = vst [vmem:[#allocation3 + $0x79] sm:$0xf] %v1173_v48 }
 0x12e   :  { %10453 = vst [vmem:[#allocation19_spill] sm:$0xff] %v8450_v50  ;;  %1719 = vst [vmem:[#allocation2 + $0x3a] sm:$0x7] %v1703_v47 }
 0x12f   :  { %1556 = vst [vmem:[#allocation2 + $0x79] sm:$0xf] %v1102_v51  ;;  %1808 = vst [vmem:[#allocation3 + $0x81] sm:$0xf] %v1786_v49 }
 0x130   :  { %1557 = vst [vmem:[#allocation2 + $0x81] sm:$0xf] %v1535_v52  ;;  %v8453_v57 = vpop.f32.mrb[28].mxu0  ;;  %v1958_v59 = vld [vmem:[#allocation3 + $0x69] sm:$0x7]  ;;  %v1179_v62 = vpop.f32.mrb[28].mxu1 }
 0x131   :  { %10454 = vst [vmem:[#allocation20_spill] sm:$0xff] %v8453_v57  ;;  %v1691_v61 = vld [vmem:[#allocation2 + $0x6a] sm:$0x7]  ;;  %v2006_v63 = vadd.f32 %v1974_v55, %v1958_v59  ;;  %v1787_v34 = vcombine.high %v1179_v62, %v1179_v62  ;;  %1809 = vst [vmem:[#allocation3 + $0x99] sm:$0xf] %v1179_v62  ;;  %v1108_v35 = vpop.f32.mrb[29].mxu0 }
 0x132   :  { %v1707_v33 = vadd.f32 %v1691_v61, %v8445_v44  ;;  %v8456_v38 = vpop.f32.mrb[29].mxu1  ;;  %v1536_v40 = vcombine.high %v1108_v35, %v1108_v35  ;;  %1558 = vst [vmem:[#allocation2 + $0x99] sm:$0xf] %v1108_v35  ;;  %v8458_v43 = vpop.f32.mrb[30].mxu0  ;;  %v1978_v52 = vrot.slane %v8453_v57, 1 }
 0x133   :  { %10455 = vst [vmem:[#allocation21_spill] sm:$0xff] %v8456_v38  ;;  %v1183_v41 = vpop.f32.mrb[30].mxu1  ;;  %10456 = vst [vmem:[#allocation22_spill] sm:$0xff] %v8458_v43  ;;  %v1112_v49 = vpop.f32.mrb[31].mxu0 }
 0x134   :  { %2022 = vst [vmem:[#allocation3 + $0x69] sm:$0x7] %v2006_v63  ;;  %1723 = vst [vmem:[#allocation2 + $0x6a] sm:$0x7] %v1707_v33  ;;  %v1788_v47 = vcombine.high %v1183_v41, %v1183_v41  ;;  %v8460_v48 = vpop.f32.mrb[31].mxu1  ;;  %v1537_v51 = vcombine.high %v1112_v49, %v1112_v49 }
 0x135   :  { %1810 = vst [vmem:[#allocation3 + $0xa1] sm:$0xf] %v1787_v34  ;;  %1811 = vst [vmem:[#allocation3 + $0xa9] sm:$0xf] %v1183_v41 }
 0x136   :  { %10457 = vst [vmem:[#allocation23_spill] sm:$0xff] %v8460_v48  ;;  %1559 = vst [vmem:[#allocation2 + $0xa1] sm:$0xf] %v1536_v40 }
 0x137   :  { %1560 = vst [vmem:[#allocation2 + $0xa9] sm:$0xf] %v1112_v49  ;;  %1812 = vst [vmem:[#allocation3 + $0xb1] sm:$0xf] %v1788_v47 }
 0x138   :  { %1561 = vst [vmem:[#allocation2 + $0xb1] sm:$0xf] %v1537_v51  ;;  %v1222_v55 = vpop.f32.mrb[32].mxu0  ;;  %v1962_v59 = vld [vmem:[#allocation3 + $0x99] sm:$0x7]  ;;  %v1295_v61 = vpop.f32.mrb[32].mxu1 }
 0x139   :  { %v1224_v62 = vpop.f32.mrb[33].mxu0  ;;  %v2010_v35 = vadd.f32 %v1978_v52, %v1962_v59  ;;  %v1695_v63 = vld [vmem:[#allocation2 + $0x9a] sm:$0x7]  ;;  %v2354_v33 = vcombine.high %v1295_v61, %v1295_v61  ;;  %2370 = vst [vmem:[#allocation5 + $0x9] sm:$0xf] %v1295_v61  ;;  %v1297_v41 = vpop.f32.mrb[33].mxu1  ;;  %v2394_v49 = vcombine.high %v1222_v55, %v1222_v55 }
 0x13a   :  { %v2080_v34 = vcombine.high %v1224_v62, %v1224_v62  ;;  %2096 = vst [vmem:[#allocation4 + $0x9] sm:$0xf] %v1224_v62  ;;  %v1226_v7 = vpop.f32.mrb[34].mxu0  ;;  %v1711_v40 = vadd.f32 %v1695_v63, %v8456_v38  ;;  %v1299_v56 = vpop.f32.mrb[34].mxu1  ;;  %v2418_v59 = vrot.slane %v1222_v55, 1  ;;  %v2550_v63 = vcombine.high %v8360_v28, %v8360_v28 }
 0x13b   :  { %2026 = vst [vmem:[#allocation3 + $0x99] sm:$0x7] %v2010_v35  ;;  %2371 = vst [vmem:[#allocation5 + $0x11] sm:$0xf] %v2354_v33  ;;  %v2355_v47 = vcombine.high %v1299_v56, %v1299_v56  ;;  %v1228_v51 = vpop.f32.mrb[35].mxu0  ;;  %v1301_v48 = vpop.f32.mrb[35].mxu1  ;;  %v2395_v61 = vcombine.high %v1226_v7, %v1226_v7  ;;  %v2551_v28 = vcombine.high %v8368_v2, %v8368_v2 }
 0x13c   :  { %2097 = vst [vmem:[#allocation4 + $0x11] sm:$0xf] %v2080_v34  ;;  %2372 = vst [vmem:[#allocation5 + $0x19] sm:$0xf] %v1299_v56  ;;  %v2081_v52 = vcombine.high %v1228_v51, %v1228_v51  ;;  %v2419_v62 = vrot.slane %v2394_v49, 1  ;;  %v2120_v56 = vcombine.high %v1297_v41, %v1297_v41  ;;  %v2420_v38 = vrot.slane %v1226_v7, 1 }
 0x13d   :  { %1727 = vst [vmem:[#allocation2 + $0x9a] sm:$0x7] %v1711_v40  ;;  %2098 = vst [vmem:[#allocation4 + $0x19] sm:$0xf] %v1228_v51  ;;  %v2421_v55 = vrot.slane %v2395_v61, 1  ;;  %v8482_v35 = vrot.slane %v2550_v63, 1  ;;  %v2121_v36 = vcombine.high %v1301_v48, %v1301_v48 }
 0x13e   :  { %2373 = vst [vmem:[#allocation5 + $0x21] sm:$0xf] %v2355_v47  ;;  %2099 = vst [vmem:[#allocation4 + $0x21] sm:$0xf] %v2081_v52 }
 0x140   :  { %v8464_v43 = vpop.f32.mrb[36].mxu0  ;;  %v2402_v33 = vld [vmem:[#allocation5 + $0x9] sm:$0x7] }
 0x141   :  { %v2136_v34 = vld [vmem:[#allocation4 + $0xa] sm:$0x7]  ;;  %v1305_v40 = vpop.f32.mrb[36].mxu1  ;;  %v2450_v50 = vadd.f32 %v2418_v59, %v2402_v33  ;;  %v1234_v47 = vpop.f32.mrb[37].mxu0 }
 0x142   :  { %v2152_v51 = vadd.f32 %v2136_v34, %v1297_v41  ;;  %v2356_v44 = vcombine.high %v1305_v40, %v1305_v40  ;;  %2374 = vst [vmem:[#allocation5 + $0x39] sm:$0xf] %v1305_v40  ;;  %v8470_v49 = vpop.f32.mrb[37].mxu1  ;;  %v2403_v60 = vld [vmem:[#allocation5 + $0x11] sm:$0x7]  ;;  %v2082_v54 = vcombine.high %v1234_v47, %v1234_v47  ;;  %v2552_v41 = vcombine.high %v8376_v3, %v8376_v3 }
 0x143   :  { %v2137_v7 = vld [vmem:[#allocation4 + $0x12] sm:$0x7]  ;;  %2100 = vst [vmem:[#allocation4 + $0x39] sm:$0xf] %v1234_v47  ;;  %v2451_v59 = vadd.f32 %v2419_v62, %v2403_v60  ;;  %2466 = vst [vmem:[#allocation5 + $0x9] sm:$0x7] %v2450_v50  ;;  %v2396_v40 = vcombine.high %v8464_v43, %v8464_v43 }
 0x144   :  { %v2153_v61 = vadd.f32 %v2137_v7, %v2120_v56  ;;  %2168 = vst [vmem:[#allocation4 + $0xa] sm:$0x7] %v2152_v51  ;;  %v2404_v33 = vld [vmem:[#allocation5 + $0x19] sm:$0x7]  ;;  %2375 = vst [vmem:[#allocation5 + $0x41] sm:$0xf] %v2356_v44 }
 0x145   :  { %v2138_v34 = vld [vmem:[#allocation4 + $0x1a] sm:$0x7]  ;;  %v2405_v52 = vld [vmem:[#allocation5 + $0x21] sm:$0x7]  ;;  %v2452_v42 = vadd.f32 %v2420_v38, %v2404_v33  ;;  %2101 = vst [vmem:[#allocation4 + $0x41] sm:$0xf] %v2082_v54  ;;  %v2193_v33 = vcombine.high %v8374_v5, %v8374_v5 }
 0x146   :  { %v2154_v29 = vadd.f32 %v2138_v34, %v1301_v48  ;;  %v8484_v47 = vpop.f32.mrb[38].mxu0  ;;  %v1309_v3 = vpop.f32.mrb[38].mxu1  ;;  %2467 = vst [vmem:[#allocation5 + $0x11] sm:$0x7] %v2451_v59  ;;  %2169 = vst [vmem:[#allocation4 + $0x12] sm:$0x7] %v2153_v61  ;;  %v2453_v60 = vadd.f32 %v2421_v55, %v2405_v52 }
 0x147   :  { %v2139_v50 = vld [vmem:[#allocation4 + $0x22] sm:$0x7]  ;;  %v2422_v62 = vrot.slane %v8464_v43, 1  ;;  %v2397_v56 = vcombine.high %v8484_v47, %v8484_v47  ;;  %v2357_v44 = vcombine.high %v1309_v3, %v1309_v3  ;;  %2376 = vst [vmem:[#allocation5 + $0x49] sm:$0xf] %v1309_v3  ;;  %v1238_v63 = vpop.f32.mrb[39].mxu0 }
 0x148   :  { %v8489_v51 = vpop.f32.mrb[39].mxu1  ;;  %2468 = vst [vmem:[#allocation5 + $0x19] sm:$0x7] %v2452_v42  ;;  %v2155_v48 = vadd.f32 %v2139_v50, %v2121_v36  ;;  %2170 = vst [vmem:[#allocation4 + $0x1a] sm:$0x7] %v2154_v29  ;;  %v2083_v55 = vcombine.high %v1238_v63, %v1238_v63  ;;  %v8494_v52 = vrot.slane %v2551_v28, 1 }
 0x149   :  { %2102 = vst [vmem:[#allocation4 + $0x49] sm:$0xf] %v1238_v63  ;;  %v8498_v7 = vrot.slane %v2552_v41, 1  ;;  %2469 = vst [vmem:[#allocation5 + $0x21] sm:$0x7] %v2453_v60  ;;  %v2423_v59 = vrot.slane %v2396_v40, 1 }
 0x14a   :  { %2377 = vst [vmem:[#allocation5 + $0x51] sm:$0xf] %v2357_v44  ;;  %v8500_v61 = vpop.f32.mrb[40].mxu0  ;;  %2171 = vst [vmem:[#allocation4 + $0x22] sm:$0x7] %v2155_v48  ;;  %v2424_v28 = vrot.slane %v8484_v47, 1  ;;  %v2553_v48 = vcombine.high %v8384_v9, %v8384_v9 }
 0x14b   :  { %v2406_v42 = vld [vmem:[#allocation5 + $0x39] sm:$0x7]  ;;  %2103 = vst [vmem:[#allocation4 + $0x51] sm:$0xf] %v2083_v55  ;;  %v1315_v41 = vpop.f32.mrb[40].mxu1  ;;  %v1244_v34 = vpop.f32.mrb[41].mxu0  ;;  %v2122_v55 = vcombine.high %v8470_v49, %v8470_v49 }
 0x14c   :  { %v2454_v3 = vadd.f32 %v2422_v62, %v2406_v42  ;;  %v2140_v40 = vld [vmem:[#allocation4 + $0x3a] sm:$0x7]  ;;  %v2425_v60 = vrot.slane %v2397_v56, 1  ;;  %v2358_v50 = vcombine.high %v1315_v41, %v1315_v41  ;;  %2378 = vst [vmem:[#allocation5 + $0x69] sm:$0xf] %v1315_v41  ;;  %v2084_v44 = vcombine.high %v1244_v34, %v1244_v34  ;;  %v8508_v63 = vpop.f32.mrb[41].mxu1 }
 0x14d   :  { %2104 = vst [vmem:[#allocation4 + $0x69] sm:$0xf] %v1244_v34  ;;  %v8510_v43 = vpop.f32.mrb[42].mxu0  ;;  %v2506_v36 = vld [vmem:[#allocation5 + $0x9] sm:$0xf]  ;;  %v2156_v62 = vadd.f32 %v2140_v40, %v8470_v49  ;;  %v2398_v56 = vcombine.high %v8500_v61, %v8500_v61  ;;  %v10458_v42 = vcombine.high %v8362_v0, %v8362_v0  ;;  %v10459_v34 = vcombine.high %v8366_v1, %v8366_v1  ;;  %v1319_v46 = vpop.f32.mrb[42].mxu1 }
 0x14e   :  { %v2208_v38 = vld [vmem:[#allocation4 + $0xa] sm:$0x7]  ;;  %v2407_v47 = vld [vmem:[#allocation5 + $0x41] sm:$0x7]  ;;  %2470 = vst [vmem:[#allocation5 + $0x39] sm:$0x7] %v2454_v3  ;;  %v2399_v0 = vcombine.high %v8510_v43, %v8510_v43 }
 0x14f   :  { %v2518_v41 = vadd.f32 %v2506_v36, %v10458_v42  ;;  %v2220_v29 = vadd.f32 %v2208_v38, %v10459_v34  ;;  %v2455_v54 = vadd.f32 %v2423_v59, %v2407_v47  ;;  %v2141_v24 = vld [vmem:[#allocation4 + $0x42] sm:$0x7]  ;;  %v2426_v57 = vrot.slane %v8500_v61, 1  ;;  %2379 = vst [vmem:[#allocation5 + $0x71] sm:$0xf] %v2358_v50  ;;  %v1248_v49 = vpop.f32.mrb[43].mxu0 }
 0x150   :  { %2105 = vst [vmem:[#allocation4 + $0x71] sm:$0xf] %v2084_v44  ;;  %v2507_v40 = vld [vmem:[#allocation5 + $0x11] sm:$0xf]  ;;  %v2157_v30 = vadd.f32 %v2141_v24, %v2122_v55  ;;  %2172 = vst [vmem:[#allocation4 + $0x3a] sm:$0x7] %v2156_v62  ;;  %v2359_v36 = vcombine.high %v1319_v46, %v1319_v46  ;;  %v2085_v1 = vcombine.high %v1248_v49, %v1248_v49 }
 0x151   :  { %v2209_v32 = vld [vmem:[#allocation4 + $0x12] sm:$0x7]  ;;  %v2408_v58 = vld [vmem:[#allocation5 + $0x49] sm:$0x7]  ;;  %2380 = vst [vmem:[#allocation5 + $0x79] sm:$0xf] %v1319_v46  ;;  %v2254_v38 = vcombine.high %v8380_v39, %v8380_v39  ;;  %v2519_v59 = vadd.f32 %v2507_v40, %v8370_v4  ;;  %v10460_v47 = vcombine.high %v8370_v4, %v8370_v4  ;;  %v2123_v42 = vcombine.high %v8489_v51, %v8489_v51 }
 0x152   :  { %2106 = vst [vmem:[#allocation4 + $0x79] sm:$0xf] %v1248_v49  ;;  %2530 = vst [vmem:[#allocation5 + $0x9] sm:$0xf] %v2518_v41  ;;  %v2221_v61 = vadd.f32 %v2209_v32, %v8374_v5  ;;  %v2508_v3 = vld [vmem:[#allocation5 + $0x19] sm:$0xf]  ;;  %v2456_v50 = vadd.f32 %v2424_v28, %v2408_v58 }
 0x153   :  { %2232 = vst [vmem:[#allocation4 + $0xa] sm:$0x7] %v2220_v29  ;;  %v2210_v24 = vld [vmem:[#allocation4 + $0x1a] sm:$0x7]  ;;  %2471 = vst [vmem:[#allocation5 + $0x41] sm:$0x7] %v2455_v54  ;;  %v2520_v46 = vadd.f32 %v2508_v3, %v10460_v47  ;;  %v2194_v29 = vcombine.high %v8382_v8, %v8382_v8 }
 0x154   :  { %v2142_v44 = vld [vmem:[#allocation4 + $0x4a] sm:$0x7]  ;;  %v2222_v55 = vadd.f32 %v2210_v24, %v2193_v33  ;;  %2173 = vst [vmem:[#allocation4 + $0x42] sm:$0x7] %v2157_v30  ;;  %v2409_v62 = vld [vmem:[#allocation5 + $0x51] sm:$0x7] }
 0x155   :  { %v2158_v41 = vadd.f32 %v2142_v44, %v8489_v51  ;;  %2381 = vst [vmem:[#allocation5 + $0x81] sm:$0xf] %v2359_v36  ;;  %2107 = vst [vmem:[#allocation4 + $0x81] sm:$0xf] %v2085_v1  ;;  %v8538_v5 = vpop.f32.mrb[43].mxu1  ;;  %v8540_v32 = vrot.slane %v2553_v48, 1  ;;  %v2457_v58 = vadd.f32 %v2425_v60, %v2409_v62  ;;  %v2124_v48 = vcombine.high %v8508_v63, %v8508_v63 }
 0x156   :  { %2531 = vst [vmem:[#allocation5 + $0x11] sm:$0xf] %v2519_v59  ;;  %2233 = vst [vmem:[#allocation4 + $0x12] sm:$0x7] %v2221_v61  ;;  %v2143_v4 = vld [vmem:[#allocation4 + $0x52] sm:$0x7]  ;;  %v2493_v59 = vcombine.high %v8386_v10, %v8386_v10  ;;  %v2195_v61 = vcombine.high %v8390_v12, %v8390_v12 }
 0x157   :  { %2472 = vst [vmem:[#allocation5 + $0x49] sm:$0x7] %v2456_v50  ;;  %v2427_v54 = vrot.slane %v2398_v56, 1  ;;  %v2428_v30 = vrot.slane %v8510_v43, 1  ;;  %v8543_v33 = vpop.f32.mrb[44].mxu0  ;;  %v2159_v51 = vadd.f32 %v2143_v4, %v2123_v42  ;;  %v2429_v60 = vrot.slane %v2399_v0, 1 }
 0x158   :  { %2532 = vst [vmem:[#allocation5 + $0x19] sm:$0xf] %v2520_v46  ;;  %2234 = vst [vmem:[#allocation4 + $0x1a] sm:$0x7] %v2222_v55  ;;  %v2410_v28 = vld [vmem:[#allocation5 + $0x69] sm:$0x7]  ;;  %v2255_v0 = vcombine.high %v8388_v11, %v8388_v11  ;;  %v10461_v50 = vcombine.high %v8378_v6, %v8378_v6  ;;  %v2125_v42 = vcombine.high %v8538_v5, %v8538_v5 }
 0x159   :  { %2174 = vst [vmem:[#allocation4 + $0x4a] sm:$0x7] %v2158_v41  ;;  %v2144_v34 = vld [vmem:[#allocation4 + $0x6a] sm:$0x7]  ;;  %v1325_v49 = vpop.f32.mrb[44].mxu1  ;;  %v2458_v56 = vadd.f32 %v2426_v57, %v2410_v28  ;;  %v2430_v40 = vrot.slane %v8543_v33, 1  ;;  %v2400_v6 = vcombine.high %v8543_v33, %v8543_v33  ;;  %v2557_v33 = vcombine.high %v8416_v26, %v8416_v26 }
 0x15a   :  { %2473 = vst [vmem:[#allocation5 + $0x51] sm:$0x7] %v2457_v58  ;;  %v2160_v43 = vadd.f32 %v2144_v34, %v8508_v63  ;;  %v2360_v36 = vcombine.high %v1325_v49, %v1325_v49  ;;  %2382 = vst [vmem:[#allocation5 + $0x99] sm:$0xf] %v1325_v49  ;;  %v1254_v8 = vpop.f32.mrb[45].mxu0  ;;  %v8551_v1 = vpop.f32.mrb[45].mxu1 }
 0x15b   :  { %v2509_v3 = vld [vmem:[#allocation5 + $0x39] sm:$0xf]  ;;  %2175 = vst [vmem:[#allocation4 + $0x52] sm:$0x7] %v2159_v51  ;;  %v2411_v57 = vld [vmem:[#allocation5 + $0x71] sm:$0x7]  ;;  %v2086_v24 = vcombine.high %v1254_v8, %v1254_v8 }
 0x15c   :  { %v2145_v63 = vld [vmem:[#allocation4 + $0x72] sm:$0x7]  ;;  %2108 = vst [vmem:[#allocation4 + $0x99] sm:$0xf] %v1254_v8  ;;  %v2521_v44 = vadd.f32 %v2509_v3, %v10461_v50  ;;  %v2211_v47 = vld [vmem:[#allocation4 + $0x3a] sm:$0x7]  ;;  %v2459_v46 = vadd.f32 %v2427_v54, %v2411_v57  ;;  %v2554_v54 = vcombine.high %v8392_v13, %v8392_v13  ;;  %v2494_v8 = vcombine.high %v8394_v14, %v8394_v14 }
 0x15d   :  { %2474 = vst [vmem:[#allocation5 + $0x69] sm:$0x7] %v2458_v56  ;;  %v2161_v55 = vadd.f32 %v2145_v63, %v2124_v48  ;;  %2176 = vst [vmem:[#allocation4 + $0x6a] sm:$0x7] %v2160_v43  ;;  %v2412_v62 = vld [vmem:[#allocation5 + $0x79] sm:$0x7]  ;;  %v2223_v28 = vadd.f32 %v2211_v47, %v2194_v29  ;;  %v10462_v56 = vcombine.high %v8364_v53, %v8364_v53 }
 0x15e   :  { %v2146_v41 = vld [vmem:[#allocation4 + $0x7a] sm:$0x7]  ;;  %2383 = vst [vmem:[#allocation5 + $0xa1] sm:$0xf] %v2360_v36  ;;  %v2558_v58 = vld [vmem:[#allocation5 + $0x9] sm:$0x7]  ;;  %v2460_v34 = vadd.f32 %v2428_v30, %v2412_v62  ;;  %v10464_v62 = vcombine.high %v8372_v17, %v8372_v17 }
 0x15f   :  { %v2268_v4 = vld [vmem:[#allocation4 + $0x9] sm:$0xf]  ;;  %v2510_v51 = vld [vmem:[#allocation5 + $0x41] sm:$0xf]  ;;  %v2162_v49 = vadd.f32 %v2146_v41, %v8538_v5  ;;  %2109 = vst [vmem:[#allocation4 + $0xa1] sm:$0xf] %v2086_v24  ;;  %v2594_v48 = vadd.f32 %v8482_v35, %v2558_v58 }
 0x160   :  { %v2280_v43 = vadd.f32 %v2268_v4, %v10462_v56  ;;  %v2522_v36 = vadd.f32 %v2510_v51, %v8386_v10  ;;  %2533 = vst [vmem:[#allocation5 + $0x39] sm:$0xf] %v2521_v44  ;;  %v2212_v29 = vld [vmem:[#allocation4 + $0x42] sm:$0x7]  ;;  %2475 = vst [vmem:[#allocation5 + $0x71] sm:$0x7] %v2459_v46  ;;  %v2196_v10 = vcombine.high %v8398_v16, %v8398_v16 }
 0x161   :  { %2177 = vst [vmem:[#allocation4 + $0x72] sm:$0x7] %v2161_v55  ;;  %v2413_v5 = vld [vmem:[#allocation5 + $0x81] sm:$0x7]  ;;  %v2559_v3 = vld [vmem:[#allocation5 + $0x11] sm:$0x7]  ;;  %v2224_v63 = vadd.f32 %v2212_v29, %v8390_v12  ;;  %v2495_v4 = vcombine.high %v8402_v19, %v8402_v19 }
 0x162   :  { %v2147_v30 = vld [vmem:[#allocation4 + $0x82] sm:$0x7]  ;;  %v2269_v57 = vld [vmem:[#allocation4 + $0x11] sm:$0xf]  ;;  %2235 = vst [vmem:[#allocation4 + $0x3a] sm:$0x7] %v2223_v28  ;;  %v2461_v24 = vadd.f32 %v2429_v60, %v2413_v5  ;;  %v2556_v28 = vcombine.high %v8408_v22, %v8408_v22 }
 0x163   :  { %v2511_v35 = vld [vmem:[#allocation5 + $0x49] sm:$0xf]  ;;  %2476 = vst [vmem:[#allocation5 + $0x79] sm:$0x7] %v2460_v34  ;;  %v2163_v53 = vadd.f32 %v2147_v30, %v2125_v42  ;;  %2178 = vst [vmem:[#allocation4 + $0x7a] sm:$0x7] %v2162_v49  ;;  %v2281_v47 = vadd.f32 %v2269_v57, %v8372_v17  ;;  %v1943_v57 = vcombine.high %v8428_v37, %v8428_v37 }
 0x164   :  { %v10463_v50 = vrot.slane %v8368_v2, 1  ;;  %2606 = vst [vmem:[#allocation5 + $0x9] sm:$0x7] %v2594_v48  ;;  %2292 = vst [vmem:[#allocation4 + $0x9] sm:$0xf] %v2280_v43  ;;  %v2523_v12 = vadd.f32 %v2511_v35, %v2493_v59  ;;  %v2431_v2 = vrot.slane %v2400_v6, 1  ;;  %v2197_v59 = vcombine.high %v8406_v21, %v8406_v21 }
 0x165   :  { %v2560_v14 = vld [vmem:[#allocation5 + $0x19] sm:$0x7]  ;;  %2534 = vst [vmem:[#allocation5 + $0x41] sm:$0xf] %v2522_v36  ;;  %v2213_v55 = vld [vmem:[#allocation4 + $0x4a] sm:$0x7]  ;;  %v2126_v48 = vcombine.high %v8551_v1, %v8551_v1 }
 0x166   :  { %v2595_v44 = vadd.f32 %v10463_v50, %v2559_v3  ;;  %v2270_v46 = vld [vmem:[#allocation4 + $0x19] sm:$0xf]  ;;  %v2596_v60 = vadd.f32 %v8494_v52, %v2560_v14  ;;  %2236 = vst [vmem:[#allocation4 + $0x42] sm:$0x7] %v2224_v63  ;;  %v2225_v16 = vadd.f32 %v2213_v55, %v2195_v61  ;;  %2477 = vst [vmem:[#allocation5 + $0x81] sm:$0x7] %v2461_v24 }
 0x167   :  { %v2282_v42 = vadd.f32 %v2270_v46, %v10464_v62  ;;  %2179 = vst [vmem:[#allocation4 + $0x82] sm:$0x7] %v2163_v53  ;;  %v2414_v41 = vld [vmem:[#allocation5 + $0x99] sm:$0x7]  ;;  %v8586_v58 = vpop.f32.mrb[46].mxu0  ;;  %v2555_v52 = vcombine.high %v8400_v18, %v8400_v18  ;;  %v1329_v51 = vpop.f32.mrb[46].mxu1  ;;  %v1942_v3 = vcombine.high %v8424_v31, %v8424_v31  ;;  %v1944_v53 = vcombine.high %v8433_v45, %v8433_v45 }
 0x168   :  { %2607 = vst [vmem:[#allocation5 + $0x11] sm:$0x7] %v2595_v44  ;;  %2293 = vst [vmem:[#allocation4 + $0x11] sm:$0xf] %v2281_v47  ;;  %v2462_v17 = vadd.f32 %v2430_v40, %v2414_v41  ;;  %v2148_v61 = vld [vmem:[#allocation4 + $0x9a] sm:$0x7]  ;;  %v2361_v43 = vcombine.high %v1329_v51, %v1329_v51  ;;  %v2401_v45 = vcombine.high %v8586_v58, %v8586_v58 }
 0x169   :  { %2535 = vst [vmem:[#allocation5 + $0x49] sm:$0xf] %v2523_v12  ;;  %2608 = vst [vmem:[#allocation5 + $0x19] sm:$0x7] %v2596_v60  ;;  %v2512_v34 = vld [vmem:[#allocation5 + $0x69] sm:$0xf]  ;;  %v2164_v56 = vadd.f32 %v2148_v61, %v8551_v1 }
 0x16a   :  { %2294 = vst [vmem:[#allocation4 + $0x19] sm:$0xf] %v2282_v42  ;;  %2237 = vst [vmem:[#allocation4 + $0x4a] sm:$0x7] %v2225_v16  ;;  %v2214_v49 = vld [vmem:[#allocation4 + $0x6a] sm:$0x7]  ;;  %v2524_v40 = vadd.f32 %v2512_v34, %v2494_v8  ;;  %v2256_v34 = vcombine.high %v8396_v15, %v8396_v15 }
 0x16b   :  { %v2415_v6 = vld [vmem:[#allocation5 + $0xa1] sm:$0x7]  ;;  %2384 = vst [vmem:[#allocation5 + $0xa9] sm:$0xf] %v1329_v51  ;;  %v2226_v36 = vadd.f32 %v2214_v49, %v2196_v10  ;;  %2478 = vst [vmem:[#allocation5 + $0x99] sm:$0x7] %v2462_v17  ;;  %v2496_v49 = vcombine.high %v8410_v23, %v8410_v23 }
 0x16c   :  { %v2463_v29 = vadd.f32 %v2431_v2, %v2415_v6  ;;  %v2149_v22 = vld [vmem:[#allocation4 + $0xa2] sm:$0x7]  ;;  %v1258_v5 = vpop.f32.mrb[47].mxu0  ;;  %v8603_v30 = vpop.f32.mrb[47].mxu1  ;;  %v2561_v1 = vld [vmem:[#allocation5 + $0x39] sm:$0x7] }
 0x16d   :  { %v2513_v63 = vld [vmem:[#allocation5 + $0x71] sm:$0xf]  ;;  %v2165_v24 = vadd.f32 %v2149_v22, %v2126_v48  ;;  %2180 = vst [vmem:[#allocation4 + $0x9a] sm:$0x7] %v2164_v56  ;;  %2385 = vst [vmem:[#allocation5 + $0xb1] sm:$0xf] %v2361_v43  ;;  %v2087_v8 = vcombine.high %v1258_v5, %v1258_v5  ;;  %v2597_v10 = vadd.f32 %v8498_v7, %v2561_v1 }
 0x16e   :  { %v2215_v35 = vld [vmem:[#allocation4 + $0x72] sm:$0x7]  ;;  %2110 = vst [vmem:[#allocation4 + $0xa9] sm:$0xf] %v1258_v5  ;;  %v2271_v50 = vld [vmem:[#allocation4 + $0x39] sm:$0xf]  ;;  %v2525_v44 = vadd.f32 %v2513_v63, %v8402_v19 }
 0x16f   :  { %2536 = vst [vmem:[#allocation5 + $0x69] sm:$0xf] %v2524_v40  ;;  %v2227_v31 = vadd.f32 %v2215_v35, %v8406_v21  ;;  %2238 = vst [vmem:[#allocation4 + $0x6a] sm:$0x7] %v2226_v36  ;;  %v2514_v47 = vld [vmem:[#allocation5 + $0x79] sm:$0xf]  ;;  %v2283_v12 = vadd.f32 %v2271_v50, %v2254_v38 }
 0x170   :  { %v2216_v14 = vld [vmem:[#allocation4 + $0x7a] sm:$0x7]  ;;  %2479 = vst [vmem:[#allocation5 + $0xa1] sm:$0x7] %v2463_v29  ;;  %v2562_v46 = vld [vmem:[#allocation5 + $0x41] sm:$0x7]  ;;  %v2526_v55 = vadd.f32 %v2514_v47, %v2495_v4 }
 0x171   :  { %v2228_v60 = vadd.f32 %v2216_v14, %v2197_v59  ;;  %2181 = vst [vmem:[#allocation4 + $0xa2] sm:$0x7] %v2165_v24  ;;  %2111 = vst [vmem:[#allocation4 + $0xb1] sm:$0xf] %v2087_v8  ;;  %v2576_v19 = vrot.slane %v2554_v54, 1  ;;  %v2577_v21 = vrot.slane %v8400_v18, 1 }
 0x172   :  { %v8623_v7 = vrot.slane %v2555_v52, 1  ;;  %v10465_v62 = vrot.slane %v8384_v9, 1  ;;  %2609 = vst [vmem:[#allocation5 + $0x39] sm:$0x7] %v2597_v10  ;;  %v2272_v39 = vld [vmem:[#allocation4 + $0x41] sm:$0xf] }
 0x173   :  { %2537 = vst [vmem:[#allocation5 + $0x71] sm:$0xf] %v2525_v44  ;;  %2239 = vst [vmem:[#allocation4 + $0x72] sm:$0x7] %v2227_v31  ;;  %v8627_v38 = vrot.slane %v2556_v28, 1  ;;  %v2580_v16 = vrot.slane %v8416_v26, 1  ;;  %v2284_v13 = vadd.f32 %v2272_v39, %v8388_v11 }
 0x174   :  { %v2598_v42 = vadd.f32 %v10465_v62, %v2562_v46  ;;  %v8630_v2 = vrot.slane %v2557_v33, 1  ;;  %2295 = vst [vmem:[#allocation4 + $0x39] sm:$0xf] %v2283_v12  ;;  %v2563_v54 = vld [vmem:[#allocation5 + $0x49] sm:$0x7]  ;;  %v8633_v18 = vrot.slane %v1942_v3, 1  ;;  %v2198_v33 = vcombine.high %v8414_v25, %v8414_v25 }
 0x175   :  { %2538 = vst [vmem:[#allocation5 + $0x79] sm:$0xf] %v2526_v55  ;;  %2240 = vst [vmem:[#allocation4 + $0x7a] sm:$0x7] %v2228_v60  ;;  %v8636_v41 = vrot.slane %v1943_v57, 1  ;;  %v8638_v4 = vrot.slane %v1944_v53, 1  ;;  %v2599_v6 = vadd.f32 %v8540_v32, %v2563_v54  ;;  %v2257_v57 = vcombine.high %v8404_v20, %v8404_v20 }
 0x176   :  { %2610 = vst [vmem:[#allocation5 + $0x41] sm:$0x7] %v2598_v42  ;;  %v2273_v59 = vld [vmem:[#allocation4 + $0x49] sm:$0xf]  ;;  %2296 = vst [vmem:[#allocation4 + $0x41] sm:$0xf] %v2284_v13  ;;  %v2127_v46 = vcombine.high %v8603_v30, %v8603_v30 }
 0x177   :  { %10466 = vst [vmem:[#allocation24_spill] sm:$0xff] %v8638_v4  ;;  %v2515_v52 = vld [vmem:[#allocation5 + $0x99] sm:$0xf]  ;;  %v2432_v17 = vrot.slane %v8586_v58, 1  ;;  %v2433_v61 = vrot.slane %v2401_v45, 1  ;;  %v8641_v51 = vpop.f32.mrb[48].mxu1  ;;  %v2285_v48 = vadd.f32 %v2273_v59, %v2255_v0 }
 0x178   :  { %v8643_v28 = vpop.f32.mrb[48].mxu0  ;;  %v2217_v56 = vld [vmem:[#allocation4 + $0x9a] sm:$0x7]  ;;  %v2416_v43 = vld [vmem:[#allocation5 + $0xa9] sm:$0x7]  ;;  %v2527_v23 = vadd.f32 %v2515_v52, %v2496_v49  ;;  %v8656_v11 = vpop.f32.mrb[49].mxu1 }
 0x179   :  { %v2417_v58 = vld [vmem:[#allocation5 + $0xb1] sm:$0x7]  ;;  %v2564_v40 = vld [vmem:[#allocation5 + $0x69] sm:$0x7]  ;;  %v2516_v29 = vld [vmem:[#allocation5 + $0xa1] sm:$0xf]  ;;  %v2229_v24 = vadd.f32 %v2217_v56, %v2198_v33  ;;  %v2464_v14 = vadd.f32 %v2432_v17, %v2416_v43 }
 0x17a   :  { %v2274_v36 = vld [vmem:[#allocation4 + $0x69] sm:$0xf]  ;;  %2611 = vst [vmem:[#allocation5 + $0x49] sm:$0x7] %v2599_v6  ;;  %2297 = vst [vmem:[#allocation4 + $0x49] sm:$0xf] %v2285_v48  ;;  %v2600_v15 = vadd.f32 %v2576_v19, %v2564_v40  ;;  %v2528_v32 = vadd.f32 %v2516_v29, %v8418_v27  ;;  %v2465_v19 = vadd.f32 %v2433_v61, %v2417_v58 }
 0x17b   :  { %v2286_v22 = vadd.f32 %v2274_v36, %v2256_v34  ;;  %v2218_v5 = vld [vmem:[#allocation4 + $0xa2] sm:$0x7]  ;;  %v2150_v3 = vld [vmem:[#allocation4 + $0xaa] sm:$0x7]  ;;  %v8658_v0 = vpop.f32.mrb[49].mxu0  ;;  %v10469_v12 = vld [vmem:[#allocation16_spill] sm:$0xff]  ;;  %v1817_v48 = vcombine.high %v8641_v51, %v8641_v51  ;;  %v1566_v40 = vcombine.high %v8656_v11, %v8656_v11 }
 0x17c   :  { %v10467_v25 = vld [vmem:[#allocation14_spill] sm:$0xff]  ;;  %v2565_v63 = vld [vmem:[#allocation5 + $0x71] sm:$0x7]  ;;  %2612 = vst [vmem:[#allocation5 + $0x69] sm:$0x7] %v2600_v15  ;;  %v1946_v55 = vcombine.high %v10469_v12, %v10469_v12  ;;  %v8671_v62 = vpop.f32.mrb[50].mxu0  ;;  %v2166_v59 = vadd.f32 %v2150_v3, %v8603_v30 }
 0x17d   :  { %v1945_v1 = vcombine.high %v10467_v25, %v10467_v25  ;;  %v2275_v35 = vld [vmem:[#allocation4 + $0x71] sm:$0xf]  ;;  %v10468_v8 = vld [vmem:[#allocation10_spill] sm:$0xff]  ;;  %v2601_v50 = vadd.f32 %v2577_v21, %v2565_v63  ;;  %2298 = vst [vmem:[#allocation4 + $0x69] sm:$0xf] %v2286_v22  ;;  %v8678_v61 = vpop.f32.mrb[51].mxu0 }
 0x17e   :  { %v2230_v53 = vadd.f32 %v2218_v5, %v10468_v8  ;;  %v2151_v10 = vld [vmem:[#allocation4 + $0xb2] sm:$0x7]  ;;  %v2287_v44 = vadd.f32 %v2275_v35, %v8404_v20  ;;  %v2566_v31 = vld [vmem:[#allocation5 + $0x79] sm:$0x7]  ;;  %2539 = vst [vmem:[#allocation5 + $0x99] sm:$0xf] %v2527_v23 }
 0x17f   :  { %v2276_v47 = vld [vmem:[#allocation4 + $0x79] sm:$0xf]  ;;  %2540 = vst [vmem:[#allocation5 + $0xa1] sm:$0xf] %v2528_v32  ;;  %v2602_v60 = vadd.f32 %v8623_v7, %v2566_v31  ;;  %2241 = vst [vmem:[#allocation4 + $0x9a] sm:$0x7] %v2229_v24  ;;  %v2167_v7 = vadd.f32 %v2151_v10, %v2127_v46 }
 0x180   :  { %v2288_v45 = vadd.f32 %v2276_v47, %v2257_v57  ;;  %2242 = vst [vmem:[#allocation4 + $0xa2] sm:$0x7] %v2230_v53  ;;  %v1826_v21 = vld [vmem:[#allocation3 + $0x11] sm:$0xf]  ;;  %v1445_v20 = vpop.f32.mrb[50].mxu1  ;;  %v10470_v42 = vld [vmem:[#allocation18_spill] sm:$0xff] }
 0x181   :  { %v1947_v39 = vcombine.high %v10470_v42, %v10470_v42  ;;  %v10471_v13 = vld [vmem:[#allocation20_spill] sm:$0xff]  ;;  %2613 = vst [vmem:[#allocation5 + $0x71] sm:$0x7] %v2601_v50  ;;  %2299 = vst [vmem:[#allocation4 + $0x71] sm:$0xf] %v2287_v44  ;;  %v1447_v34 = vpop.f32.mrb[51].mxu1  ;;  %v1838_v56 = vadd.f32 %v1826_v21, %v8641_v51  ;;  %v10493_v42 = vcombine.high %v8418_v27, %v8418_v27 }
 0x182   :  { %v1948_v54 = vcombine.high %v10471_v13, %v10471_v13  ;;  %2480 = vst [vmem:[#allocation5 + $0xa9] sm:$0x7] %v2464_v14  ;;  %v1827_v52 = vld [vmem:[#allocation3 + $0x19] sm:$0xf]  ;;  %v1575_v17 = vld [vmem:[#allocation2 + $0x12] sm:$0x7]  ;;  %v1870_v27 = vcombine.high %v8643_v28, %v8643_v28 }
 0x183   :  { %v8681_v6 = vrot.slane %v1945_v1, 1  ;;  %2614 = vst [vmem:[#allocation5 + $0x79] sm:$0x7] %v2602_v60  ;;  %2300 = vst [vmem:[#allocation4 + $0x79] sm:$0xf] %v2288_v45  ;;  %v8686_v30 = vpop.f32.mrb[52].mxu1  ;;  %v1587_v29 = vadd.f32 %v1575_v17, %v8656_v11  ;;  %v1839_v3 = vadd.f32 %v1827_v52, %v1817_v48 }
 0x184   :  { %2481 = vst [vmem:[#allocation5 + $0xb1] sm:$0x7] %v2465_v19  ;;  %v1828_v43 = vld [vmem:[#allocation3 + $0x21] sm:$0xf]  ;;  %v8688_v58 = vpop.f32.mrb[52].mxu0  ;;  %v8693_v22 = vpop.f32.mrb[53].mxu1 }
 0x185   :  { %10472 = vst [vmem:[#allocation10_spill] sm:$0xff] %v8681_v6  ;;  %v2742_v33 = vld [vmem:[#allocation3 + $0x9] sm:$0xf]  ;;  %2182 = vst [vmem:[#allocation4 + $0xaa] sm:$0x7] %v2166_v59  ;;  %v8695_v23 = vpop.f32.mrb[53].mxu0  ;;  %v1840_v57 = vadd.f32 %v1828_v43, %v1445_v20 }
 0x186   :  { %2183 = vst [vmem:[#allocation4 + $0xb2] sm:$0x7] %v2167_v7  ;;  %v1576_v36 = vld [vmem:[#allocation2 + $0x1a] sm:$0x7]  ;;  %v1577_v15 = vld [vmem:[#allocation2 + $0x22] sm:$0x7]  ;;  %v8734_v43 = vmul.f32 %v2742_v33, %v2742_v33 }
 0x187   :  { %v2618_v51 = vld [vmem:[#allocation2 + $0x9] sm:$0xf]  ;;  %v8697_v32 = vrot.slane %v1946_v55, 1  ;;  %1850 = vst [vmem:[#allocation3 + $0x11] sm:$0xf] %v1838_v56  ;;  %v8700_v1 = vpop.f32.mrb[54].mxu1  ;;  %v1588_v45 = vadd.f32 %v1576_v36, %v1566_v40  ;;  %v1589_v19 = vadd.f32 %v1577_v15, %v1447_v34 }
 0x188   :  { %v8702_v63 = vpop.f32.mrb[54].mxu0  ;;  %v10474_v35 = vld [vmem:[#allocation8_spill] sm:$0xff]  ;;  %v2746_v53 = vld [vmem:[#allocation3 + $0x39] sm:$0xf]  ;;  %v8708_v10 = vrot.slane %v1947_v39, 1  ;;  %v8710_v50 = vrot.slane %v1948_v54, 1 }
 0x189   :  { %10473 = vst [vmem:[#allocation16_spill] sm:$0xff] %v8697_v32  ;;  %v2258_v24 = vcombine.high %v10474_v35, %v10474_v35  ;;  %1599 = vst [vmem:[#allocation2 + $0x12] sm:$0x7] %v1587_v29  ;;  %v8712_v44 = vpop.f32.mrb[55].mxu1  ;;  %v8714_v31 = vpop.f32.mrb[55].mxu0  ;;  %v10477_v14 = vld [vmem:[#allocation9_spill] sm:$0xff]  ;;  %v8747_v35 = vmul.f32 %v2618_v51, %v2618_v51  ;;  %v8749_v33 = vmul.f32 %v2746_v53, %v2746_v53 }
 0x18a   :  { %10475 = vst [vmem:[#allocation20_spill] sm:$0xff] %v8708_v10  ;;  %10476 = vst [vmem:[#allocation8_spill] sm:$0xff] %v8710_v50  ;;  %v8720_v12 = vld [vmem:[#allocation5 + $0x21] sm:$0xf]  ;;  %v2567_v60 = vld [vmem:[#allocation5 + $0x99] sm:$0x7] }
 0x18b   :  { %v8722_v55 = vld [vmem:[#allocation4 + $0x21] sm:$0xf]  ;;  %1851 = vst [vmem:[#allocation3 + $0x19] sm:$0xf] %v1839_v3  ;;  %1852 = vst [vmem:[#allocation3 + $0x21] sm:$0xf] %v1840_v57  ;;  %v2603_v3 = vadd.f32 %v8627_v38, %v2567_v60  ;;  %v8765_v53 = vmul.f32 %v8720_v12, %v8720_v12 }
 0x18c   :  { %v10478_v21 = vld [vmem:[#allocation11_spill] sm:$0xff]  ;;  %v10479_v39 = vld [vmem:[#allocation12_spill] sm:$0xff]  ;;  %v2992_v48 = vld [vmem:[#allocation5 + $0x19] sm:$0xf]  ;;  %10482 = vst [vmem:[#allocation9_spill] sm:$0xff] %v8734_v43  ;;  %v8779_v38 = vmul.f32 %v8722_v55, %v8722_v55 }
 0x18d   :  { %v8732_v17 = vld [vmem:[#allocation5 + $0x11] sm:$0xf]  ;;  %v2568_v56 = vld [vmem:[#allocation5 + $0xa1] sm:$0x7]  ;;  %1600 = vst [vmem:[#allocation2 + $0x1a] sm:$0x7] %v1588_v45  ;;  %v8761_v51 = vmul.f32 %v2992_v48, %v2992_v48  ;;  %v3023_v59 = vcombine.low %v2992_v48, %v8720_v12 }
 0x18e   :  { %v8738_v36 = vld [vmem:[#allocation4 + $0x11] sm:$0xf]  ;;  %v2604_v57 = vadd.f32 %v2580_v16, %v2568_v56  ;;  %1601 = vst [vmem:[#allocation2 + $0x22] sm:$0x7] %v1589_v19  ;;  %10484 = vst [vmem:[#allocation11_spill] sm:$0xff] %v8747_v35  ;;  %v10488_v20 = vld [vmem:[#allocation22_spill] sm:$0xff]  ;;  %v8759_v16 = vmul.f32 %v8732_v17, %v8732_v17 }
 0x18f   :  { %v8740_v29 = vld [vmem:[#allocation5 + $0x51] sm:$0xf]  ;;  %10485 = vst [vmem:[#allocation12_spill] sm:$0xff] %v8749_v33  ;;  %v2990_v49 = vld [vmem:[#allocation5 + $0x9] sm:$0xf]  ;;  %v8767_v45 = vpop.f32.mrb[56].mxu1  ;;  %v8775_v34 = vmul.f32 %v8738_v36, %v8738_v36  ;;  %v3085_v35 = vcombine.low %v8761_v51, %v8765_v53 }
 0x190   :  { %v8742_v15 = vld [vmem:[#allocation4 + $0x51] sm:$0xf]  ;;  %v2868_v13 = vld [vmem:[#allocation4 + $0x19] sm:$0xf]  ;;  %v2866_v26 = vld [vmem:[#allocation4 + $0x9] sm:$0xf]  ;;  %v3022_v56 = vcombine.low %v2990_v49, %v8732_v17  ;;  %v3052_v47 = vmul.f32 %v2990_v49, %v2990_v49  ;;  %v8797_v40 = vmul.f32 %v8740_v29, %v8740_v29 }
 0x191   :  { %v2277_v9 = vld [vmem:[#allocation4 + $0x99] sm:$0xf]  ;;  %2615 = vst [vmem:[#allocation5 + $0x99] sm:$0x7] %v2603_v3  ;;  %2616 = vst [vmem:[#allocation5 + $0xa1] sm:$0x7] %v2604_v57  ;;  %v2898_v11 = vcombine.low %v2866_v26, %v8738_v36  ;;  %v2899_v17 = vcombine.low %v2868_v13, %v8722_v55  ;;  %v8791_v10 = vmul.f32 %v2866_v26, %v2866_v26 }
 0x192   :  { %v2278_v60 = vld [vmem:[#allocation4 + $0xa1] sm:$0xf]  ;;  %v8769_v19 = vpop.f32.mrb[56].mxu0  ;;  %v2517_v46 = vld [vmem:[#allocation5 + $0xa9] sm:$0xf]  ;;  %v8781_v3 = vpop.f32.mrb[57].mxu1  ;;  %v2289_v52 = vadd.f32 %v2277_v9, %v2258_v24  ;;  %v8801_v49 = vmul.f32 %v8742_v15, %v8742_v15  ;;  %v3084_v26 = vcombine.low %v3052_v47, %v8759_v16  ;;  %v8811_v43 = vmul.f32 %v2868_v13, %v2868_v13 }
 0x193   :  { %v8783_v57 = vpop.f32.mrb[57].mxu0  ;;  %v2219_v12 = vld [vmem:[#allocation4 + $0xaa] sm:$0x7]  ;;  %v8787_v48 = vpop.f32.mrb[58].mxu1  ;;  %v8793_v5 = vld [vmem:[#allocation5 + $0x41] sm:$0xf]  ;;  %v2290_v55 = vadd.f32 %v2278_v60, %v10477_v14  ;;  %v2529_v32 = vadd.f32 %v2517_v46, %v10493_v42  ;;  %v2960_v47 = vcombine.low %v8791_v10, %v8775_v34  ;;  %v10495_v13 = vcombine.high %v10468_v8, %v10468_v8 }
 0x194   :  { %10489 = vst [vmem:[#allocation22_spill] sm:$0xff] %v8783_v57  ;;  %v8789_v50 = vpop.f32.mrb[58].mxu0  ;;  %10491 = vst [vmem:[#allocation26_spill] sm:$0xff] %v8801_v49  ;;  %v1874_v9 = vld [vmem:[#allocation3 + $0x11] sm:$0x7]  ;;  %v8804_v36 = vpop.f32.mrb[59].mxu1 }
 0x195   :  { %10490 = vst [vmem:[#allocation25_spill] sm:$0xff] %v8789_v50  ;;  %v1623_v24 = vld [vmem:[#allocation2 + $0x11] sm:$0xf]  ;;  %v8806_v33 = vpop.f32.mrb[59].mxu0  ;;  %2301 = vst [vmem:[#allocation4 + $0x99] sm:$0xf] %v2289_v52  ;;  %v3038_v50 = vadd.f32 %v3023_v59, %v3022_v56  ;;  %v2231_v52 = vadd.f32 %v2219_v12, %v10495_v13  ;;  %v1615_v59 = vcombine.high %v8658_v0, %v8658_v0 }
 0x196   :  { %10492 = vst [vmem:[#allocation27_spill] sm:$0xff] %v8806_v33  ;;  %v1875_v57 = vld [vmem:[#allocation3 + $0x19] sm:$0x7]  ;;  %v1829_v60 = vld [vmem:[#allocation3 + $0x41] sm:$0xf]  ;;  %v8816_v6 = vpop.f32.mrb[60].mxu1  ;;  %v8831_v33 = vadd.f32 %v2899_v17, %v2898_v11  ;;  %v1635_v8 = vadd.f32 %v1623_v24, %v8658_v0  ;;  %v8849_v24 = vadd.f32 %v3085_v35, %v3084_v26  ;;  %v8860_v35 = vmul.f32 %v8793_v5, %v8793_v5 }
 0x197   :  { %v8818_v7 = vpop.f32.mrb[60].mxu0  ;;  %v2994_v16 = vld [vmem:[#allocation5 + $0x39] sm:$0xf]  ;;  %2302 = vst [vmem:[#allocation4 + $0xa1] sm:$0xf] %v2290_v55  ;;  %v8827_v51 = vpop.f32.mrb[61].mxu1 }
 0x198   :  { %10494 = vst [vmem:[#allocation28_spill] sm:$0xff] %v8818_v7  ;;  %v1624_v42 = vld [vmem:[#allocation2 + $0x19] sm:$0xf]  ;;  %v1876_v46 = vld [vmem:[#allocation3 + $0x21] sm:$0x7]  ;;  %v8829_v53 = vpop.f32.mrb[61].mxu0  ;;  %v3024_v7 = vcombine.low %v2994_v16, %v8793_v5 }
 0x199   :  { %10496 = vst [vmem:[#allocation29_spill] sm:$0xff] %v8829_v53  ;;  %2541 = vst [vmem:[#allocation5 + $0xa9] sm:$0xf] %v2529_v32  ;;  %v1886_v10 = vrot.slane %v8643_v28, 1  ;;  %v1830_v34 = vld [vmem:[#allocation3 + $0x49] sm:$0xf]  ;;  %v1818_v32 = vcombine.high %v8686_v30, %v8686_v30  ;;  %v1841_v28 = vadd.f32 %v1829_v60, %v8686_v30  ;;  %v1636_v60 = vadd.f32 %v1624_v42, %v1615_v59 }
 0x19a   :  { %v8837_v56 = vpop.f32.mrb[62].mxu1  ;;  %v8839_v12 = vpop.f32.mrb[62].mxu0  ;;  %v8841_v55 = vld [vmem:[#allocation4 + $0x39] sm:$0xf]  ;;  %v8843_v13 = vld [vmem:[#allocation4 + $0x41] sm:$0xf] }
 0x19b   :  { %10497 = vst [vmem:[#allocation30_spill] sm:$0xff] %v8839_v12  ;;  %2243 = vst [vmem:[#allocation4 + $0xaa] sm:$0x7] %v2231_v52  ;;  %v1887_v11 = vrot.slane %v1870_v27, 1  ;;  %v1888_v17 = vrot.slane %v8671_v62, 1  ;;  %v2961_v12 = vcombine.low %v8811_v43, %v8779_v38  ;;  %v1910_v54 = vadd.f32 %v1886_v10, %v1874_v9  ;;  %v8854_v25 = vpop.f32.mrb[63].mxu1 }
 0x19c   :  { %v1578_v53 = vld [vmem:[#allocation2 + $0x42] sm:$0x7]  ;;  %1647 = vst [vmem:[#allocation2 + $0x11] sm:$0xf] %v1635_v8  ;;  %v1831_v52 = vld [vmem:[#allocation3 + $0x51] sm:$0xf]  ;;  %v1842_v62 = vadd.f32 %v1830_v34, %v1818_v32  ;;  %v2900_v43 = vcombine.low %v8841_v55, %v8843_v13  ;;  %v1567_v38 = vcombine.high %v8693_v22, %v8693_v22  ;;  %v8876_v10 = vmul.f32 %v8841_v55, %v8841_v55 }
 0x19d   :  { %v1625_v0 = vld [vmem:[#allocation2 + $0x21] sm:$0xf]  ;;  %v1580_v27 = vld [vmem:[#allocation2 + $0x52] sm:$0x7]  ;;  %v8856_v49 = vpop.f32.mrb[63].mxu0  ;;  %v1911_v30 = vadd.f32 %v1887_v11, %v1875_v57  ;;  %v1912_v4 = vadd.f32 %v1888_v17, %v1876_v46  ;;  %v1590_v9 = vadd.f32 %v1578_v53, %v8693_v22  ;;  %v1843_v42 = vadd.f32 %v1831_v52, %v8700_v1 }
 0x19e   :  { %1853 = vst [vmem:[#allocation3 + $0x41] sm:$0xf] %v1841_v28  ;;  %1922 = vst [vmem:[#allocation3 + $0x11] sm:$0x7] %v1910_v54  ;;  %v1579_v57 = vld [vmem:[#allocation2 + $0x4a] sm:$0x7]  ;;  %v1637_v26 = vadd.f32 %v1625_v0, %v8678_v61  ;;  %v1592_v5 = vadd.f32 %v1580_v27, %v8712_v44  ;;  %v1871_v46 = vcombine.high %v8688_v58, %v8688_v58 }
 0x19f   :  { %1923 = vst [vmem:[#allocation3 + $0x19] sm:$0x7] %v1911_v30  ;;  %1648 = vst [vmem:[#allocation2 + $0x19] sm:$0xf] %v1636_v60  ;;  %v8872_v54 = vadd.f32 %v2961_v12, %v2960_v47  ;;  %v8878_v22 = vmul.f32 %v2994_v16, %v2994_v16  ;;  %v1591_v53 = vadd.f32 %v1579_v57, %v1567_v38  ;;  %v1889_v47 = vrot.slane %v8688_v58, 1 }
 0x1a0   :  { %1854 = vst [vmem:[#allocation3 + $0x49] sm:$0xf] %v1842_v62  ;;  %1924 = vst [vmem:[#allocation3 + $0x21] sm:$0x7] %v1912_v4  ;;  %v1832_v4 = vld [vmem:[#allocation3 + $0x71] sm:$0xf]  ;;  %v8882_v61 = vmul.f32 %v8843_v13, %v8843_v13  ;;  %v8884_v1 = vadd.f32 %v3038_v50, %v3024_v7  ;;  %v1819_v13 = vcombine.high %v8767_v45, %v8767_v45 }
 0x1a1   :  { %1602 = vst [vmem:[#allocation2 + $0x42] sm:$0x7] %v1590_v9  ;;  %v2569_v44 = vld [vmem:[#allocation5 + $0xa9] sm:$0x7]  ;;  %1649 = vst [vmem:[#allocation2 + $0x21] sm:$0xf] %v1637_v26  ;;  %v1844_v50 = vadd.f32 %v1832_v4, %v8767_v45  ;;  %v3086_v58 = vcombine.low %v8878_v22, %v8860_v35  ;;  %v8895_v28 = vadd.f32 %v8831_v33, %v2900_v43 }
 0x1a2   :  { %1855 = vst [vmem:[#allocation3 + $0x51] sm:$0xf] %v1843_v42  ;;  %1604 = vst [vmem:[#allocation2 + $0x52] sm:$0x7] %v1592_v5  ;;  %v1890_v59 = vrot.slane %v1871_v46, 1  ;;  %v2605_v12 = vadd.f32 %v8630_v2, %v2569_v44  ;;  %v1891_v7 = vrot.slane %v8702_v63, 1  ;;  %v10498_v2 = vcombine.high %v10477_v14, %v10477_v14 }
 0x1a3   :  { %v1833_v8 = vld [vmem:[#allocation3 + $0x79] sm:$0xf]  ;;  %v1581_v34 = vld [vmem:[#allocation2 + $0x72] sm:$0x7]  ;;  %v1834_v16 = vld [vmem:[#allocation3 + $0x81] sm:$0xf]  ;;  %v1568_v52 = vcombine.high %v8781_v3, %v8781_v3  ;;  %v10499_v45 = vcombine.high %v10478_v21, %v10478_v21  ;;  %v2962_v14 = vcombine.low %v8876_v10, %v8882_v61  ;;  %v1872_v44 = vcombine.high %v8769_v19, %v8769_v19 }
 0x1a4   :  { %v2279_v55 = vld [vmem:[#allocation4 + $0xa9] sm:$0xf]  ;;  %1603 = vst [vmem:[#allocation2 + $0x4a] sm:$0x7] %v1591_v53  ;;  %v1582_v11 = vld [vmem:[#allocation2 + $0x7a] sm:$0x7]  ;;  %v1845_v62 = vadd.f32 %v1833_v8, %v1819_v13  ;;  %v1593_v33 = vadd.f32 %v1581_v34, %v8781_v3  ;;  %v1846_v43 = vadd.f32 %v1834_v16, %v8787_v48  ;;  %v1616_v48 = vcombine.high %v8695_v23, %v8695_v23 }
 0x1a5   :  { %v1583_v32 = vld [vmem:[#allocation2 + $0x82] sm:$0x7]  ;;  %v2291_v17 = vadd.f32 %v2279_v55, %v10498_v2  ;;  %v1684_v0 = vld [vmem:[#allocation2 + $0x12] sm:$0x7]  ;;  %v8902_v27 = vld [vmem:[#allocation5 + $0x49] sm:$0xf]  ;;  %v1594_v57 = vadd.f32 %v1582_v11, %v1568_v52 }
 0x1a6   :  { %2617 = vst [vmem:[#allocation5 + $0xa9] sm:$0x7] %v2605_v12  ;;  %v1700_v30 = vadd.f32 %v1684_v0, %v10499_v45  ;;  %v1877_v60 = vld [vmem:[#allocation3 + $0x41] sm:$0x7]  ;;  %1856 = vst [vmem:[#allocation3 + $0x71] sm:$0xf] %v1844_v50  ;;  %v1595_v26 = vadd.f32 %v1583_v32, %v8804_v36  ;;  %v1820_v36 = vcombine.high %v8816_v6, %v8816_v6 }
 0x1a7   :  { %2303 = vst [vmem:[#allocation4 + $0xa9] sm:$0xf] %v2291_v17  ;;  %v1951_v38 = vld [vmem:[#allocation3 + $0x11] sm:$0x7]  ;;  %v1913_v9 = vadd.f32 %v1889_v47, %v1877_v60  ;;  %v1835_v42 = vld [vmem:[#allocation3 + $0xa1] sm:$0xf]  ;;  %v3025_v60 = vcombine.low %v8902_v27, %v8740_v29 }
 0x1a8   :  { %v1836_v5 = vld [vmem:[#allocation3 + $0xa9] sm:$0xf]  ;;  %v8912_v21 = vld [vmem:[#allocation5 + $0x71] sm:$0xf]  ;;  %v1952_v46 = vld [vmem:[#allocation3 + $0x19] sm:$0x7]  ;;  %v1999_v53 = vadd.f32 %v8633_v18, %v1951_v38  ;;  %v1847_v52 = vadd.f32 %v1835_v42, %v8816_v6  ;;  %v8944_v38 = vmul.f32 %v8902_v27, %v8902_v27 }
 0x1a9   :  { %v1685_v4 = vld [vmem:[#allocation2 + $0x1a] sm:$0x7]  ;;  %1716 = vst [vmem:[#allocation2 + $0x12] sm:$0x7] %v1700_v30  ;;  %v1953_v3 = vld [vmem:[#allocation3 + $0x21] sm:$0x7] }
 0x1aa   :  { %1857 = vst [vmem:[#allocation3 + $0x79] sm:$0xf] %v1845_v62  ;;  %1605 = vst [vmem:[#allocation2 + $0x72] sm:$0x7] %v1593_v33  ;;  %v8921_v47 = vld [vmem:[#allocation4 + $0x49] sm:$0xf]  ;;  %v1701_v34 = vadd.f32 %v1685_v4, %v10479_v39  ;;  %v2001_v16 = vadd.f32 %v8636_v41, %v1953_v3  ;;  %v1848_v41 = vadd.f32 %v1836_v5, %v1820_v36 }
 0x1ab   :  { %1858 = vst [vmem:[#allocation3 + $0x81] sm:$0xf] %v1846_v43  ;;  %v10500_v8 = vrot.slane %v8428_v37, 1  ;;  %v1878_v12 = vld [vmem:[#allocation3 + $0x49] sm:$0x7]  ;;  %v1892_v13 = vrot.slane %v8769_v19, 1  ;;  %v10501_v19 = vcombine.high %v10479_v39, %v10479_v39  ;;  %v1569_v39 = vcombine.high %v8827_v51, %v8827_v51 }
 0x1ac   :  { %1925 = vst [vmem:[#allocation3 + $0x41] sm:$0x7] %v1913_v9  ;;  %v1626_v55 = vld [vmem:[#allocation2 + $0x41] sm:$0xf]  ;;  %1606 = vst [vmem:[#allocation2 + $0x7a] sm:$0x7] %v1594_v57  ;;  %v1914_v2 = vadd.f32 %v1890_v59, %v1878_v12  ;;  %v2934_v4 = vmul.f32 %v8921_v47, %v8921_v47  ;;  %v2977_v12 = vadd.f32 %v8872_v54, %v2962_v14 }
 0x1ad   :  { %v2000_v18 = vadd.f32 %v10500_v8, %v1952_v46  ;;  %1607 = vst [vmem:[#allocation2 + $0x82] sm:$0x7] %v1595_v26  ;;  %v1584_v50 = vld [vmem:[#allocation2 + $0xa2] sm:$0x7]  ;;  %v8928_v11 = vld [vmem:[#allocation5 + $0x69] sm:$0xf]  ;;  %v1638_v37 = vadd.f32 %v1626_v55, %v8695_v23  ;;  %v8959_v26 = vmul.f32 %v8912_v21, %v8912_v21  ;;  %v3101_v8 = vadd.f32 %v8849_v24, %v3086_v58 }
 0x1ae   :  { %2015 = vst [vmem:[#allocation3 + $0x11] sm:$0x7] %v1999_v53  ;;  %v1686_v32 = vld [vmem:[#allocation2 + $0x22] sm:$0x7]  ;;  %v1879_v17 = vld [vmem:[#allocation3 + $0x51] sm:$0x7]  ;;  %v1596_v57 = vadd.f32 %v1584_v50, %v8827_v51  ;;  %v3087_v54 = vcombine.low %v8944_v38, %v8797_v40  ;;  %v3040_v50 = vadd.f32 %v8884_v1, %v3025_v60 }
 0x1af   :  { %v1628_v0 = vld [vmem:[#allocation2 + $0x51] sm:$0xf]  ;;  %2016 = vst [vmem:[#allocation3 + $0x19] sm:$0x7] %v2000_v18  ;;  %1717 = vst [vmem:[#allocation2 + $0x1a] sm:$0x7] %v1701_v34  ;;  %v1702_v59 = vadd.f32 %v1686_v32, %v10501_v19  ;;  %v1915_v33 = vadd.f32 %v1891_v7, %v1879_v17  ;;  %v2901_v18 = vcombine.low %v8921_v47, %v8742_v15 }
 0x1b0   :  { %v1837_v45 = vld [vmem:[#allocation3 + $0xb1] sm:$0xf]  ;;  %2017 = vst [vmem:[#allocation3 + $0x21] sm:$0x7] %v2001_v16  ;;  %v1627_v23 = vld [vmem:[#allocation2 + $0x49] sm:$0xf]  ;;  %v1640_v6 = vadd.f32 %v1628_v0, %v8714_v31  ;;  %v3060_v34 = vmul.f32 %v8928_v11, %v8928_v11  ;;  %v3026_v15 = vcombine.low %v8928_v11, %v8912_v21  ;;  %v3102_v29 = vadd.f32 %v3101_v8, %v3087_v54 }
 0x1b1   :  { %v1586_v30 = vld [vmem:[#allocation2 + $0xb2] sm:$0x7]  ;;  %v1585_v43 = vld [vmem:[#allocation2 + $0xaa] sm:$0x7]  ;;  %1926 = vst [vmem:[#allocation3 + $0x49] sm:$0x7] %v1914_v2  ;;  %v1639_v9 = vadd.f32 %v1627_v23, %v1616_v48  ;;  %v1849_v51 = vadd.f32 %v1837_v45, %v8837_v56  ;;  %v2916_v11 = vadd.f32 %v8895_v28, %v2901_v18 }
 0x1b2   :  { %v8934_v62 = vld [vmem:[#allocation4 + $0x71] sm:$0xf]  ;;  %1650 = vst [vmem:[#allocation2 + $0x41] sm:$0xf] %v1638_v37  ;;  %1859 = vst [vmem:[#allocation3 + $0xa1] sm:$0xf] %v1847_v52  ;;  %v1598_v46 = vadd.f32 %v1586_v30, %v8854_v25  ;;  %v1597_v36 = vadd.f32 %v1585_v43, %v1569_v39  ;;  %v3088_v10 = vcombine.low %v3060_v34, %v8959_v26 }
 0x1b3   :  { %1860 = vst [vmem:[#allocation3 + $0xa9] sm:$0xf] %v1848_v41  ;;  %v7614_v63 = vld [vmem:[%s10408_s4 + $0x40] sm:$0xff]   ;;  %v8955_v7 = vld [vmem:[#allocation4 + $0x69] sm:$0xf]  ;;  %v1893_v5 = vrot.slane %v1872_v44, 1  ;;  %v8970_v3 = vmul.f32 %v8934_v62, %v8934_v62  ;;  %v3041_v60 = vadd.f32 %v3040_v50, %v3026_v15 }
 0x1b4   :  { %v7615_v31 = vld [vmem:[%s10408_s4 + $0xc0] sm:$0xff]   ;;  %1718 = vst [vmem:[#allocation2 + $0x22] sm:$0x7] %v1702_v59  ;;  %1927 = vst [vmem:[#allocation3 + $0x51] sm:$0x7] %v1915_v33  ;;  %7275 = vmatprep.subr.bf16.mxu0 %v7614_v63  ;;  %v1980_v44 = vrot.slane %v10488_v20, 1  ;;  %v2936_v35 = vmul.f32 %v8955_v7, %v8955_v7  ;;  %v2902_v22 = vcombine.low %v8955_v7, %v8934_v62 }
 0x1b5   :  { %1652 = vst [vmem:[#allocation2 + $0x51] sm:$0xf] %v1640_v6  ;;  %v1880_v42 = vld [vmem:[#allocation3 + $0x71] sm:$0x7]  ;;  %v7616_v53 = vld [vmem:[%s10408_s4] sm:$0xff]   ;;  %7315 = vmatprep.subr.bf16.mxu1 %v7615_v31  ;;  %v7618_v21 = vld [vmem:[%s10408_s4 + $0x48] sm:$0xff]   ;;  %v3103_v43 = vadd.f32 %v3102_v29, %v3088_v10 }
 0x1b6   :  { %1651 = vst [vmem:[#allocation2 + $0x49] sm:$0xf] %v1639_v9  ;;  %v1916_v48 = vadd.f32 %v1892_v13, %v1880_v42  ;;  %1608 = vst [vmem:[#allocation2 + $0xa2] sm:$0x7] %v1596_v57  ;;  %v7617_v25 = vld [vmem:[%s10408_s4 + $0x80] sm:$0xff]   ;;  %7276 = vmatpush3.bf16.msra.mxu0 %v7616_v53  ;;  %v10502_v14 = vld [vmem:[#allocation24_spill] sm:$0xff]  ;;  %v2964_v37 = vcombine.low %v2936_v35, %v8970_v3  ;;  %v2917_v62 = vadd.f32 %v2916_v11, %v2902_v22 }
 0x1b7   :  { %v8975_v56 = vld [vmem:[#allocation2 + $0x39] sm:$0xf]  ;;  %1861 = vst [vmem:[#allocation3 + $0xb1] sm:$0xf] %v1849_v51  ;;  %1610 = vst [vmem:[#allocation2 + $0xb2] sm:$0x7] %v1598_v46  ;;  %7316 = vmatpush3.bf16.msra.mxu1 %v7617_v25  ;;  %7277 = vmatprep.subr.bf16.mxu0 %v7618_v21  ;;  %v10505_v46 = vcombine.high %v10488_v20, %v10488_v20 }
 0x1b8   :  { %v1881_v16 = vld [vmem:[#allocation3 + $0x79] sm:$0x7]  ;;  %v8998_v58 = vld [vmem:[#allocation5 + $0xa1] sm:$0xf]  ;;  %1928 = vst [vmem:[#allocation3 + $0x71] sm:$0x7] %v1916_v48  ;;  %v9021_v52 = vmul.f32 %v8975_v56, %v8975_v56 }
 0x1b9   :  { %v8992_v24 = vld [vmem:[#allocation5 + $0x79] sm:$0xf]  ;;  %v1955_v47 = vld [vmem:[#allocation3 + $0x41] sm:$0x7]  ;;  %1609 = vst [vmem:[#allocation2 + $0xaa] sm:$0x7] %v1597_v36  ;;  %v1917_v13 = vadd.f32 %v1893_v5, %v1881_v16  ;;  %v9027_v27 = vmul.f32 %v8998_v58, %v8998_v58 }
 0x1ba   :  { %v2876_v61 = vld [vmem:[#allocation4 + $0x79] sm:$0xf]  ;;  %v2003_v55 = vadd.f32 %v10502_v14, %v1955_v47  ;;  %v10503_v32 = vld [vmem:[#allocation26_spill] sm:$0xff]  ;;  %v7619_v0 = vld [vmem:[%s10408_s4 + $0xc8] sm:$0xff]   ;;  %v3062_v1 = vmul.f32 %v8992_v24, %v8992_v24  ;;  %v9057_v53 = vrot.slane %v10505_v46, 1 }
 0x1bb   :  { %v2963_v2 = vcombine.low %v2934_v4, %v10503_v32  ;;  %v3001_v40 = vld [vmem:[#allocation5 + $0x81] sm:$0xf]  ;;  %v9014_v17 = vld [vmem:[#allocation5 + $0x99] sm:$0xf]  ;;  %1929 = vst [vmem:[#allocation3 + $0x79] sm:$0x7] %v1917_v13  ;;  %v2938_v19 = vmul.f32 %v2876_v61, %v2876_v61  ;;  %7317 = vmatprep.subr.bf16.mxu1 %v7619_v0 }
 0x1bc   :  { %v2877_v28 = vld [vmem:[#allocation4 + $0x81] sm:$0xf]  ;;  %2019 = vst [vmem:[#allocation3 + $0x41] sm:$0x7] %v2003_v55  ;;  %v7620_v41 = vld [vmem:[%s10408_s4 + $0x8] sm:$0xff]   ;;  %v3063_v6 = vmul.f32 %v3001_v40, %v3001_v40  ;;  %v3064_v9 = vmul.f32 %v9014_v17, %v9014_v17  ;;  %v7622_v57 = vld [vmem:[%s10408_s4 + $0x50] sm:$0xff]   ;;  %v3027_v63 = vcombine.low %v8992_v24, %v3001_v40  ;;  %v3028_v48 = vcombine.low %v9014_v17, %v8998_v58 }
 0x1bd   :  { %v9032_v45 = vld [vmem:[#allocation3 + $0x69] sm:$0xf]  ;;  %v2978_v30 = vadd.f32 %v2977_v12, %v2963_v2  ;;  %v9039_v38 = vld [vmem:[#allocation5 + $0xb1] sm:$0xf]  ;;  %7278 = vmatpush3.bf16.msra.mxu0 %v7620_v41  ;;  %v2903_v31 = vcombine.low %v2876_v61, %v2877_v28  ;;  %v2939_v7 = vmul.f32 %v2877_v28, %v2877_v28  ;;  %v9049_v42 = vld [vmem:[#allocation4 + $0xa1] sm:$0xf] }
 0x1be   :  { %v7621_v59 = vld [vmem:[%s10408_s4 + $0x88] sm:$0xff]   ;;  %v9043_v39 = vld [vmem:[#allocation4 + $0xb1] sm:$0xf]  ;;  %v3089_v4 = vcombine.low %v3062_v1, %v3063_v6  ;;  %v2878_v3 = vld [vmem:[#allocation4 + $0x99] sm:$0xf]  ;;  %v3090_v36 = vcombine.low %v3064_v9, %v9027_v27  ;;  %7279 = vmatprep.subr.bf16.mxu0 %v7622_v57  ;;  %v9067_v18 = vmul.f32 %v9032_v45, %v9032_v45  ;;  %v3042_v34 = vadd.f32 %v3041_v60, %v3027_v63 }
 0x1bf   :  { %v10504_v23 = vld [vmem:[#allocation23_spill] sm:$0xff]  ;;  %v2979_v26 = vadd.f32 %v2978_v30, %v2964_v37  ;;  %7318 = vmatpush3.bf16.msra.mxu1 %v7621_v59  ;;  %v7623_v51 = vld [vmem:[%s10408_s4 + $0xd0] sm:$0xff]   ;;  %v1688_v25 = vld [vmem:[#allocation2 + $0x42] sm:$0x7]  ;;  %v2918_v16 = vadd.f32 %v2917_v62, %v2903_v31  ;;  %v2965_v12 = vcombine.low %v2938_v19, %v2939_v7  ;;  %v9076_v58 = vmul.f32 %v9049_v42, %v9049_v42 }
 0x1c0   :  { %v1674_v33 = vcombine.high %v10504_v23, %v10504_v23  ;;  %v1956_v5 = vld [vmem:[#allocation3 + $0x49] sm:$0x7]  ;;  %v7624_v8 = vld [vmem:[%s10408_s4 + $0x10] sm:$0xff]   ;;  %7319 = vmatprep.subr.bf16.mxu1 %v7623_v51  ;;  %v3104_v22 = vadd.f32 %v3103_v43, %v3089_v4  ;;  %v2904_v47 = vcombine.low %v2878_v3, %v9049_v42  ;;  %v10506_v54 = vld [vmem:[#allocation14_spill] sm:$0xff]  ;;  %v9088_v50 = vmul.f32 %v9039_v38, %v9039_v38 }
 0x1c1   :  { %v9069_v35 = vld [vmem:[#allocation5 + $0xa9] sm:$0xf]  ;;  %v7625_v15 = vld [vmem:[%s10408_s4 + $0x90] sm:$0xff]   ;;  %v10507_v10 = vrot.slane %v10506_v54, 1  ;;  %7280 = vmatpush3.bf16.msra.mxu0 %v7624_v8  ;;  %v7626_v13 = vld [vmem:[%s10408_s4 + $0x58] sm:$0xff]   ;;  %v9084_v21 = vadd.f32 %v2979_v26, %v2965_v12  ;;  %v9092_v11 = vmul.f32 %v9043_v39, %v9043_v39  ;;  %v9104_v41 = vmul.f32 %v2878_v3, %v2878_v3 }
 0x1c2   :  { %v1689_v24 = vld [vmem:[#allocation2 + $0x4a] sm:$0x7]  ;;  %v1957_v14 = vld [vmem:[#allocation3 + $0x51] sm:$0x7]  ;;  %v9094_v32 = vld [vmem:[#allocation3 + $0x19] sm:$0xf]  ;;  %v3043_v30 = vadd.f32 %v3042_v34, %v3028_v48  ;;  %v9106_v60 = vadd.f32 %v3104_v22, %v3090_v36  ;;  %7281 = vmatprep.subr.bf16.mxu0 %v7626_v13  ;;  %v3029_v48 = vcombine.low %v9069_v35, %v9039_v38 }
 0x1c3   :  { %v2004_v61 = vadd.f32 %v10507_v10, %v1956_v5  ;;  %v1690_v55 = vld [vmem:[#allocation2 + $0x52] sm:$0x7]  ;;  %v9096_v2 = vld [vmem:[#allocation3 + $0x21] sm:$0xf]  ;;  %v10508_v40 = vld [vmem:[#allocation13_spill] sm:$0xff]  ;;  %7320 = vmatpush3.bf16.msra.mxu1 %v7625_v15  ;;  %v2966_v8 = vcombine.low %v9104_v41, %v9076_v58 }
 0x1c4   :  { %v10509_v37 = vcombine.high %v10508_v40, %v10508_v40  ;;  %v1959_v0 = vld [vmem:[#allocation3 + $0x71] sm:$0x7]  ;;  %v1960_v29 = vld [vmem:[#allocation3 + $0x79] sm:$0x7]  ;;  %v1882_v62 = vld [vmem:[#allocation3 + $0x81] sm:$0x7] }
 0x1c5   :  { %v1629_v1 = vld [vmem:[#allocation2 + $0x71] sm:$0xf]  ;;  %v1630_v28 = vld [vmem:[#allocation2 + $0x79] sm:$0xf]  ;;  %2020 = vst [vmem:[#allocation3 + $0x49] sm:$0x7] %v2004_v61 }
 0x1c6   :  { %v1704_v17 = vadd.f32 %v1688_v25, %v10509_v37  ;;  %v7627_v27 = vld [vmem:[%s10408_s4 + $0xd8] sm:$0xff]   ;;  %v1631_v6 = vld [vmem:[#allocation2 + $0x81] sm:$0xf]  ;;  %v10511_v57 = vld [vmem:[#allocation15_spill] sm:$0xff]  ;;  %v9124_v25 = vadd.f32 %v2918_v16, %v2904_v47 }
 0x1c7   :  { %v10510_v19 = vld [vmem:[#allocation25_spill] sm:$0xff]  ;;  %v1883_v43 = vld [vmem:[#allocation3 + $0xa1] sm:$0x7]  ;;  %v1705_v63 = vadd.f32 %v1689_v24, %v10511_v57  ;;  %v10513_v26 = vld [vmem:[#allocation28_spill] sm:$0xff]  ;;  %7321 = vmatprep.subr.bf16.mxu1 %v7627_v27  ;;  %v10515_v38 = vcombine.high %v10511_v57, %v10511_v57 }
 0x1c8   :  { %v1894_v59 = vrot.slane %v10510_v19, 1  ;;  %v7628_v9 = vld [vmem:[%s10408_s4 + $0x18] sm:$0xff]   ;;  %1720 = vst [vmem:[#allocation2 + $0x42] sm:$0x7] %v1704_v17  ;;  %v10512_v31 = vld [vmem:[#allocation10_spill] sm:$0xff]  ;;  %v1873_v42 = vcombine.high %v10513_v26, %v10513_v26  ;;  %v1895_v5 = vrot.slane %v10513_v26, 1  ;;  %v9145_v17 = vmul.f32 %v9094_v32, %v9094_v32 }
 0x1c9   :  { %v2005_v7 = vadd.f32 %v10512_v31, %v1957_v14  ;;  %v1632_v51 = vld [vmem:[#allocation2 + $0xa1] sm:$0xf]  ;;  %v1633_v46 = vld [vmem:[#allocation2 + $0xa9] sm:$0xf]  ;;  %v1634_v4 = vld [vmem:[#allocation2 + $0xb1] sm:$0xf]  ;;  %7282 = vmatpush3.bf16.msra.mxu0 %v7628_v9  ;;  %v1706_v16 = vadd.f32 %v1690_v55, %v10515_v38  ;;  %v9153_v55 = vmul.f32 %v9096_v2, %v9096_v2 }
 0x1ca   :  { %v7629_v3 = vld [vmem:[%s10408_s4 + $0x98] sm:$0xff]   ;;  %v9122_v36 = vld [vmem:[#allocation4 + $0xa9] sm:$0xf]  ;;  %v10514_v34 = vld [vmem:[#allocation22_spill] sm:$0xff]  ;;  %1721 = vst [vmem:[#allocation2 + $0x4a] sm:$0x7] %v1705_v63  ;;  %v1918_v63 = vadd.f32 %v1894_v59, %v1882_v62  ;;  %v9171_v59 = vadd.f32 %v3043_v30, %v3029_v48 }
 0x1cb   :  { %v1617_v12 = vcombine.high %v10514_v34, %v10514_v34  ;;  %v1884_v24 = vld [vmem:[#allocation3 + $0xa9] sm:$0x7]  ;;  %v7630_v15 = vld [vmem:[%s10408_s4 + $0x60] sm:$0xff]   ;;  %v9133_v22 = vld [vmem:[#allocation3 + $0x11] sm:$0xf]  ;;  %7322 = vmatpush3.bf16.msra.mxu1 %v7629_v3  ;;  %v1896_v26 = vrot.slane %v1873_v42, 1  ;;  %v1919_v3 = vadd.f32 %v1895_v5, %v1883_v43  ;;  %v2905_v43 = vcombine.low %v9122_v36, %v9043_v39 }
 0x1cc   :  { %2021 = vst [vmem:[#allocation3 + $0x51] sm:$0x7] %v2005_v7  ;;  %v10516_v47 = vld [vmem:[#allocation16_spill] sm:$0xff]  ;;  %v10517_v10 = vld [vmem:[#allocation18_spill] sm:$0xff]  ;;  %v10519_v13 = vld [vmem:[#allocation29_spill] sm:$0xff]  ;;  %7283 = vmatprep.subr.bf16.mxu0 %v7630_v15  ;;  %v1646_v15 = vadd.f32 %v1634_v4, %v8856_v49  ;;  %v9186_v30 = vmul.f32 %v9133_v22, %v9133_v22  ;;  %v9201_v48 = vmul.f32 %v9122_v36, %v9122_v36 }
 0x1cd   :  { %v2007_v54 = vadd.f32 %v10516_v47, %v1959_v0  ;;  %v10518_v61 = vrot.slane %v10517_v10, 1  ;;  %v1618_v40 = vcombine.high %v10519_v13, %v10519_v13  ;;  %v1885_v37 = vld [vmem:[#allocation3 + $0xb1] sm:$0x7]  ;;  %v9149_v19 = vld [vmem:[#allocation2 + $0x19] sm:$0xf]  ;;  %v1642_v9 = vadd.f32 %v1630_v28, %v1617_v12  ;;  %v7631_v57 = vld [vmem:[%s10408_s4 + $0xe0] sm:$0xff]  }
 0x1ce   :  { %v9147_v27 = vld [vmem:[#allocation2 + $0x11] sm:$0xf]  ;;  %v9155_v0 = vld [vmem:[#allocation2 + $0x21] sm:$0xf]  ;;  %1722 = vst [vmem:[#allocation2 + $0x52] sm:$0x7] %v1706_v16  ;;  %7323 = vmatprep.subr.bf16.mxu1 %v7631_v57  ;;  %v1920_v5 = vadd.f32 %v1896_v26, %v1884_v24  ;;  %v9209_v16 = vmul.f32 %v9149_v19, %v9149_v19  ;;  %v2967_v39 = vcombine.low %v9201_v48, %v9092_v11 }
 0x1cf   :  { %v2008_v14 = vadd.f32 %v10518_v61, %v1960_v29  ;;  %v1641_v29 = vadd.f32 %v1629_v1, %v10514_v34  ;;  %2023 = vst [vmem:[#allocation3 + $0x71] sm:$0x7] %v2007_v54  ;;  %v10520_v31 = vld [vmem:[#allocation27_spill] sm:$0xff]  ;;  %v7632_v38 = vld [vmem:[%s10408_s4 + $0x20] sm:$0xff]   ;;  %1654 = vst [vmem:[#allocation2 + $0x79] sm:$0xf] %v1642_v9  ;;  %v1644_v1 = vadd.f32 %v1632_v51, %v10519_v13 }
 0x1d0   :  { %v1643_v7 = vadd.f32 %v1631_v6, %v10520_v31  ;;  %v1645_v28 = vadd.f32 %v1633_v46, %v1618_v40  ;;  %v10521_v34 = vld [vmem:[#allocation30_spill] sm:$0xff]  ;;  %v9175_v6 = vmul.f32 %v9069_v35, %v9069_v35  ;;  %1930 = vst [vmem:[#allocation3 + $0x81] sm:$0x7] %v1918_v63  ;;  %1931 = vst [vmem:[#allocation3 + $0xa1] sm:$0x7] %v1919_v3  ;;  %7284 = vmatpush3.bf16.msra.mxu0 %v7632_v38  ;;  %v7634_v49 = vld [vmem:[%s10408_s4 + $0x68] sm:$0xff]  }
 0x1d1   :  { %2024 = vst [vmem:[#allocation3 + $0x79] sm:$0x7] %v2008_v14  ;;  %1653 = vst [vmem:[#allocation2 + $0x71] sm:$0xf] %v1641_v29  ;;  %v1897_v12 = vrot.slane %v10521_v34, 1  ;;  %v7633_v62 = vld [vmem:[%s10408_s4 + $0xa0] sm:$0xff]   ;;  %v2775_v35 = vcombine.low %v9094_v32, %v9096_v2  ;;  %v9205_v24 = vmul.f32 %v9147_v27, %v9147_v27  ;;  %v9213_v47 = vmul.f32 %v9155_v0, %v9155_v0 }
 0x1d2   :  { %v9179_v42 = vld [vmem:[#allocation3 + $0x41] sm:$0xf]  ;;  %1655 = vst [vmem:[#allocation2 + $0x81] sm:$0xf] %v1643_v7  ;;  %1656 = vst [vmem:[#allocation2 + $0xa1] sm:$0xf] %v1644_v1  ;;  %7324 = vmatpush3.bf16.msra.mxu1 %v7633_v62  ;;  %7285 = vmatprep.subr.bf16.mxu0 %v7634_v49  ;;  %v2837_v13 = vcombine.low %v9145_v17, %v9153_v55  ;;  %v3091_v17 = vcombine.low %v9175_v6, %v9088_v50 }
 0x1d3   :  { %v9190_v51 = vld [vmem:[#allocation2 + $0x41] sm:$0xf]  ;;  %1657 = vst [vmem:[#allocation2 + $0xa9] sm:$0xf] %v1645_v28  ;;  %v9192_v46 = vadd.f32 %v1897_v12, %v1885_v37  ;;  %1658 = vst [vmem:[#allocation2 + $0xb1] sm:$0xf] %v1646_v15  ;;  %v9314_v9 = vmul.f32 %v9179_v42, %v9179_v42  ;;  %v2981_v55 = vadd.f32 %v9084_v21, %v2966_v8 }
 0x1d4   :  { %v9197_v4 = vld [vmem:[%s10408_s4 + $0xe8] sm:$0xff]   ;;  %1932 = vst [vmem:[#allocation3 + $0xa9] sm:$0x7] %v1920_v5  ;;  %v7807_v10 = vmov 0.0   ;;  %v9308_v37 = vld [vmem:[#allocation3 + $0x39] sm:$0xf]  ;;  %v9337_v50 = vadd.f32 %v9124_v25, %v2905_v43  ;;  %v2651_v32 = vcombine.low %v9149_v19, %v9155_v0  ;;  %v2713_v2 = vcombine.low %v9209_v16, %v9213_v47 }
 0x1d5   :  { %v9218_v54 = vld [vmem:[%s10408_s4 + $0x28] sm:$0xff]   ;;  %1506 = vst [vmem:[#allocation2 + $0xd] sm:$0x1] %v7807_v10  ;;  %1507 = vst [vmem:[#allocation2 + $0x15] sm:$0x1] %v7807_v10  ;;  %v2776_v29 = vcombine.low %v9308_v37, %v9179_v42  ;;  %7325 = vmatprep.subr.bf16.mxu1 %v9197_v4  ;;  %v10522_v58 = vld [vmem:[#allocation9_spill] sm:$0xff]  ;;  %v2652_v6 = vcombine.low %v8975_v56, %v9190_v51 }
 0x1d6   :  { %1508 = vst [vmem:[#allocation2 + $0x1d] sm:$0x1] %v7807_v10  ;;  %1509 = vst [vmem:[#allocation2 + $0x25] sm:$0x1] %v7807_v10  ;;  %v9300_v61 = vld [vmem:[#allocation3 + $0x9] sm:$0xf]  ;;  %7286 = vmatpush3.bf16.msra.mxu0 %v9218_v54  ;;  %v2836_v21 = vcombine.low %v10522_v58, %v9186_v30 }
 0x1d7   :  { %1485 = vst [vmem:[#allocation2 + $0x28] sm:$0x3f] %v7807_v10  ;;  %1486 = vst [vmem:[#allocation2 + $0x58] sm:$0x3f] %v7807_v10  ;;  %v2774_v14 = vcombine.low %v9300_v61, %v9133_v22  ;;  %v9306_v40 = vld [vmem:[#allocation3 + $0x49] sm:$0xf] }
 0x1d8   :  { %1487 = vst [vmem:[#allocation2 + $0x88] sm:$0x3f] %v7807_v10  ;;  %1488 = vst [vmem:[#allocation2 + $0xb8] sm:$0x3f] %v7807_v10  ;;  %v3045_v22 = vrot.slane %v9171_v59, 4  ;;  %v7637_v31 = vld [vmem:[%s10408_s4 + $0xa8] sm:$0xff]   ;;  %v2852_v28 = vadd.f32 %v2837_v13, %v2836_v21  ;;  %v9368_v11 = vmul.f32 %v9306_v40, %v9306_v40 }
 0x1d9   :  { %1510 = vst [vmem:[#allocation2 + $0x3d] sm:$0x1] %v7807_v10  ;;  %1511 = vst [vmem:[#allocation2 + $0x45] sm:$0x1] %v7807_v10  ;;  %v9325_v57 = vld [vmem:[#allocation2 + $0x9] sm:$0xf]  ;;  %v2790_v41 = vadd.f32 %v2775_v35, %v2774_v14  ;;  %7326 = vmatpush3.bf16.msra.mxu1 %v7637_v31 }
 0x1da   :  { %1512 = vst [vmem:[#allocation2 + $0x4d] sm:$0x1] %v7807_v10  ;;  %1513 = vst [vmem:[#allocation2 + $0x55] sm:$0x1] %v7807_v10  ;;  %v2650_v63 = vcombine.low %v9325_v57, %v9147_v27  ;;  %v9344_v8 = vld [vmem:[#allocation2 + $0x49] sm:$0xf]  ;;  %v9348_v27 = vmul.f32 %v9190_v51, %v9190_v51 }
 0x1db   :  { %1514 = vst [vmem:[#allocation2 + $0x6d] sm:$0x1] %v7807_v10  ;;  %1515 = vst [vmem:[#allocation2 + $0x75] sm:$0x1] %v7807_v10  ;;  %v9350_v7 = vld [vmem:[#allocation3 + $0x51] sm:$0xf]  ;;  %v9364_v34 = vadd.f32 %v2790_v41, %v2776_v29  ;;  %v9376_v43 = vmul.f32 %v9344_v8, %v9344_v8 }
 0x1dc   :  { %1516 = vst [vmem:[#allocation2 + $0x7d] sm:$0x1] %v7807_v10  ;;  %1517 = vst [vmem:[#allocation2 + $0x85] sm:$0x1] %v7807_v10  ;;  %v9352_v26 = vld [vmem:[#allocation2 + $0x51] sm:$0xf]  ;;  %v2777_v16 = vcombine.low %v9306_v40, %v9350_v7  ;;  %v2811_v56 = vmul.f32 %v9350_v7, %v9350_v7 }
 0x1dd   :  { %1518 = vst [vmem:[#allocation2 + $0x9d] sm:$0x1] %v7807_v10  ;;  %1519 = vst [vmem:[#allocation2 + $0xa5] sm:$0x1] %v7807_v10  ;;  %v10523_v36 = vld [vmem:[#allocation11_spill] sm:$0xff]  ;;  %v10524_v12 = vld [vmem:[#allocation12_spill] sm:$0xff]  ;;  %v9394_v14 = vmul.f32 %v9352_v26, %v9352_v26 }
 0x1de   :  { %1520 = vst [vmem:[#allocation2 + $0xad] sm:$0x1] %v7807_v10  ;;  %1521 = vst [vmem:[#allocation2 + $0xb5] sm:$0x1] %v7807_v10  ;;  %v2712_v25 = vcombine.low %v10523_v36, %v9205_v24  ;;  %v9362_v3 = vld [vmem:[#allocation3 + $0x71] sm:$0xf]  ;;  %v2838_v15 = vcombine.low %v10524_v12, %v9314_v9  ;;  %v2714_v24 = vcombine.low %v9021_v52, %v9348_v27 }
 0x1df   :  { %1736 = vst [vmem:[#allocation3 + $0x28] sm:$0x3f] %v7807_v10  ;;  %1737 = vst [vmem:[#allocation3 + $0x58] sm:$0x3f] %v7807_v10  ;;  %v1692_v38 = vld [vmem:[#allocation2 + $0x72] sm:$0x7] }
 0x1e0   :  { %1738 = vst [vmem:[#allocation3 + $0x88] sm:$0x3f] %v7807_v10  ;;  %1739 = vst [vmem:[#allocation3 + $0xb8] sm:$0x3f] %v7807_v10  ;;  %v1693_v1 = vld [vmem:[#allocation2 + $0x7a] sm:$0x7] }
 0x1e1   :  { %1741 = vst [vmem:[#allocation3 + $0x8] sm:$0x1] %v7807_v10  ;;  %1742 = vst [vmem:[#allocation3 + $0x10] sm:$0x1] %v7807_v10  ;;  %v1961_v62 = vld [vmem:[#allocation3 + $0x81] sm:$0x7] }
 0x1e2   :  { %1743 = vst [vmem:[#allocation3 + $0x18] sm:$0x1] %v7807_v10  ;;  %1744 = vst [vmem:[#allocation3 + $0x20] sm:$0x1] %v7807_v10  ;;  %v1694_v19 = vld [vmem:[#allocation2 + $0x82] sm:$0x7] }
 0x1e3   :  { %1745 = vst [vmem:[#allocation3 + $0x38] sm:$0x1] %v7807_v10  ;;  %1746 = vst [vmem:[#allocation3 + $0x40] sm:$0x1] %v7807_v10  ;;  %v1963_v0 = vld [vmem:[#allocation3 + $0xa1] sm:$0x7] }
 0x1e4   :  { %1747 = vst [vmem:[#allocation3 + $0x48] sm:$0x1] %v7807_v10  ;;  %1748 = vst [vmem:[#allocation3 + $0x50] sm:$0x1] %v7807_v10  ;;  %v10525_v42 = vld [vmem:[#allocation17_spill] sm:$0xff]  ;;  %v10527_v30 = vld [vmem:[#allocation19_spill] sm:$0xff] }
 0x1e5   :  { %1749 = vst [vmem:[#allocation3 + $0x68] sm:$0x1] %v7807_v10  ;;  %1750 = vst [vmem:[#allocation3 + $0x70] sm:$0x1] %v7807_v10  ;;  %v10526_v5 = vcombine.high %v10525_v42, %v10525_v42  ;;  %v1709_v35 = vadd.f32 %v1693_v1, %v10527_v30  ;;  %v1697_v4 = vld [vmem:[#allocation2 + $0xaa] sm:$0x7]  ;;  %v10529_v52 = vcombine.high %v10527_v30, %v10527_v30 }
 0x1e6   :  { %1751 = vst [vmem:[#allocation3 + $0x78] sm:$0x1] %v7807_v10  ;;  %1752 = vst [vmem:[#allocation3 + $0x80] sm:$0x1] %v7807_v10  ;;  %v1698_v48 = vld [vmem:[#allocation2 + $0xb2] sm:$0x7]  ;;  %v9424_v42 = vadd.f32 %v2981_v55, %v2967_v39  ;;  %v2778_v55 = vcombine.low %v9032_v45, %v9362_v3  ;;  %v2653_v39 = vcombine.low %v9344_v8, %v9352_v26 }
 0x1e7   :  { %1753 = vst [vmem:[#allocation3 + $0x98] sm:$0x1] %v7807_v10  ;;  %1754 = vst [vmem:[#allocation3 + $0xa0] sm:$0x1] %v7807_v10  ;;  %v1708_v49 = vadd.f32 %v1692_v38, %v10526_v5  ;;  %v10528_v51 = vld [vmem:[#allocation20_spill] sm:$0xff]  ;;  %v1710_v13 = vadd.f32 %v1694_v19, %v10529_v52  ;;  %v2813_v38 = vmul.f32 %v9362_v3, %v9362_v3  ;;  %v10531_v1 = vld [vmem:[#allocation21_spill] sm:$0xff] }
 0x1e8   :  { %1755 = vst [vmem:[#allocation3 + $0xa8] sm:$0x1] %v7807_v10  ;;  %1756 = vst [vmem:[#allocation3 + $0xb0] sm:$0x1] %v7807_v10  ;;  %v2009_v47 = vadd.f32 %v10528_v51, %v1961_v62  ;;  %v1964_v54 = vld [vmem:[#allocation3 + $0xa9] sm:$0x7]  ;;  %v10532_v12 = vcombine.high %v10531_v1, %v10531_v1  ;;  %v2666_v5 = vadd.f32 %v2651_v32, %v2650_v63 }
 0x1e9   :  { %2030 = vst [vmem:[#allocation4] sm:$0x3f] %v7807_v10  ;;  %2031 = vst [vmem:[#allocation4 + $0x30] sm:$0x3f] %v7807_v10  ;;  %v10530_v29 = vld [vmem:[#allocation8_spill] sm:$0xff]  ;;  %v2012_v31 = vadd.f32 %v1980_v44, %v1964_v54  ;;  %v1713_v44 = vadd.f32 %v1697_v4, %v10504_v23  ;;  %v7642_v23 = vld [vmem:[%s10408_s4 + $0x78] sm:$0xff]   ;;  %v2792_v32 = vadd.f32 %v9364_v34, %v2777_v16 }
 0x1ea   :  { %2032 = vst [vmem:[#allocation4 + $0x60] sm:$0x3f] %v7807_v10  ;;  %2033 = vst [vmem:[#allocation4 + $0x90] sm:$0x3f] %v7807_v10  ;;  %v2011_v9 = vadd.f32 %v10530_v29, %v1963_v0  ;;  %v7639_v21 = vld [vmem:[%s10408_s4 + $0xf0] sm:$0xff]   ;;  %v9422_v0 = vadd.f32 %v9106_v60, %v3091_v17  ;;  %v2853_v60 = vadd.f32 %v2852_v28, %v2838_v15  ;;  %v7643_v45 = vld [vmem:[%s10408_s4 + $0xf8] sm:$0xff]  }
 0x1eb   :  { %2056 = vst [vmem:[#allocation4 + $0xd] sm:$0x1] %v7807_v10  ;;  %2057 = vst [vmem:[#allocation4 + $0x15] sm:$0x1] %v7807_v10  ;;  %v9405_v41 = vld [vmem:[#allocation2 + $0x69] sm:$0xf]  ;;  %7327 = vmatprep.subr.bf16.mxu1 %v7639_v21  ;;  %v2839_v17 = vcombine.low %v9368_v11, %v2811_v56  ;;  %v2667_v63 = vadd.f32 %v2666_v5, %v2652_v6  ;;  %v2840_v28 = vcombine.low %v9067_v18, %v2813_v38 }
 0x1ec   :  { %2058 = vst [vmem:[#allocation4 + $0x1d] sm:$0x1] %v7807_v10  ;;  %2059 = vst [vmem:[#allocation4 + $0x25] sm:$0x1] %v7807_v10  ;;  %v9407_v27 = vld [vmem:[#allocation3 + $0x99] sm:$0xf]  ;;  %v2688_v15 = vmul.f32 %v9405_v41, %v9405_v41 }
 0x1ed   :  { %2060 = vst [vmem:[#allocation4 + $0x3d] sm:$0x1] %v7807_v10  ;;  %2061 = vst [vmem:[#allocation4 + $0x45] sm:$0x1] %v7807_v10  ;;  %v9409_v36 = vld [vmem:[#allocation2 + $0x99] sm:$0xf]  ;;  %v2816_v6 = vmul.f32 %v9407_v27, %v9407_v27  ;;  %v2854_v4 = vadd.f32 %v2853_v60, %v2839_v17  ;;  %v2668_v51 = vadd.f32 %v2667_v63, %v2653_v39 }
 0x1ee   :  { %2062 = vst [vmem:[#allocation4 + $0x4d] sm:$0x1] %v7807_v10  ;;  %2063 = vst [vmem:[#allocation4 + $0x55] sm:$0x1] %v7807_v10  ;;  %v7640_v19 = vld [vmem:[%s10408_s4 + $0x30] sm:$0xff]   ;;  %v7644_v11 = vld [vmem:[%s10408_s4 + $0x38] sm:$0xff]  }
 0x1ef   :  { %2064 = vst [vmem:[#allocation4 + $0x6d] sm:$0x1] %v7807_v10  ;;  %2065 = vst [vmem:[#allocation4 + $0x75] sm:$0x1] %v7807_v10  ;;  %v7641_v30 = vld [vmem:[%s10408_s4 + $0xb0] sm:$0xff]   ;;  %v3107_v34 = vrot.slane %v9422_v0, 4 }
 0x1f0   :  { %2066 = vst [vmem:[#allocation4 + $0x7d] sm:$0x1] %v7807_v10  ;;  %2067 = vst [vmem:[#allocation4 + $0x85] sm:$0x1] %v7807_v10  ;;  %7328 = vmatpush3.bf16.msra.mxu1 %v7641_v30  ;;  %v7645_v18 = vld [vmem:[%s10408_s4 + $0xb8] sm:$0xff]   ;;  %v7646_v17 = vld [vmem:[%s10408_s4 + $0x140] sm:$0xff]  }
 0x1f1   :  { %2068 = vst [vmem:[#allocation4 + $0x9d] sm:$0x1] %v7807_v10  ;;  %2069 = vst [vmem:[#allocation4 + $0xa5] sm:$0x1] %v7807_v10  ;;  %7329 = vmatprep.subr.bf16.mxu1 %v7643_v45  ;;  %v7647_v45 = vld [vmem:[%s10408_s4 + $0x1c0] sm:$0xff]  }
 0x1f2   :  { %2070 = vst [vmem:[#allocation4 + $0xad] sm:$0x1] %v7807_v10  ;;  %2071 = vst [vmem:[#allocation4 + $0xb5] sm:$0x1] %v7807_v10 }
 0x1f3   :  { %2304 = vst [vmem:[#allocation5] sm:$0x3f] %v7807_v10  ;;  %2305 = vst [vmem:[#allocation5 + $0x30] sm:$0x3f] %v7807_v10 }
 0x1f4   :  { %2306 = vst [vmem:[#allocation5 + $0x60] sm:$0x3f] %v7807_v10  ;;  %2307 = vst [vmem:[#allocation5 + $0x90] sm:$0x3f] %v7807_v10  ;;  %7330 = vmatpush3.bf16.msra.mxu1 %v7645_v18 }
 0x1f5   :  { %2314 = vst [vmem:[#allocation5 + $0x8] sm:$0x1] %v7807_v10  ;;  %2315 = vst [vmem:[#allocation5 + $0x10] sm:$0x1] %v7807_v10  ;;  %7395 = vmatprep.subr.bf16.mxu1 %v7647_v45 }
 0x1f6   :  { %2316 = vst [vmem:[#allocation5 + $0x18] sm:$0x1] %v7807_v10  ;;  %2317 = vst [vmem:[#allocation5 + $0x20] sm:$0x1] %v7807_v10 }
 0x1f7   :  { %2318 = vst [vmem:[#allocation5 + $0x38] sm:$0x1] %v7807_v10  ;;  %2319 = vst [vmem:[#allocation5 + $0x40] sm:$0x1] %v7807_v10 }
 0x1f8   :  { %2320 = vst [vmem:[#allocation5 + $0x48] sm:$0x1] %v7807_v10  ;;  %2321 = vst [vmem:[#allocation5 + $0x50] sm:$0x1] %v7807_v10 }
 0x1f9   :  { %2322 = vst [vmem:[#allocation5 + $0x68] sm:$0x1] %v7807_v10  ;;  %2323 = vst [vmem:[#allocation5 + $0x70] sm:$0x1] %v7807_v10 }
 0x1fa   :  { %2324 = vst [vmem:[#allocation5 + $0x78] sm:$0x1] %v7807_v10  ;;  %2325 = vst [vmem:[#allocation5 + $0x80] sm:$0x1] %v7807_v10 }
 0x1fb   :  { %2326 = vst [vmem:[#allocation5 + $0x98] sm:$0x1] %v7807_v10  ;;  %2327 = vst [vmem:[#allocation5 + $0xa0] sm:$0x1] %v7807_v10 }
 0x1fc   :  { %2328 = vst [vmem:[#allocation5 + $0xa8] sm:$0x1] %v7807_v10  ;;  %2329 = vst [vmem:[#allocation5 + $0xb0] sm:$0x1] %v7807_v10  ;;  %v7638_v10 = vld [vmem:[%s10408_s4 + $0x70] sm:$0xff]  }
 0x1fd   :  { %1933 = vst [vmem:[#allocation3 + $0xb1] sm:$0x7] %v9192_v46  ;;  %v1696_v46 = vld [vmem:[#allocation2 + $0xa2] sm:$0x7]  ;;  %1724 = vst [vmem:[#allocation2 + $0x72] sm:$0x7] %v1708_v49  ;;  %7287 = vmatprep.subr.bf16.mxu0 %v7638_v10 }
 0x1fe   :  { %1725 = vst [vmem:[#allocation2 + $0x7a] sm:$0x7] %v1709_v35  ;;  %2025 = vst [vmem:[#allocation3 + $0x81] sm:$0x7] %v2009_v47  ;;  %v1712_v20 = vadd.f32 %v1696_v46, %v10532_v12  ;;  %v9426_v49 = vld [vmem:[#allocation3 + $0x79] sm:$0xf]  ;;  %v2728_v35 = vadd.f32 %v2713_v2, %v2712_v25  ;;  %7288 = vmatpush3.bf16.msra.mxu0 %v7640_v19  ;;  %v2715_v2 = vcombine.low %v9376_v43, %v9394_v14 }
 0x1ff   :  { %1726 = vst [vmem:[#allocation2 + $0x82] sm:$0x7] %v1710_v13  ;;  %2027 = vst [vmem:[#allocation3 + $0xa1] sm:$0x7] %v2011_v9  ;;  %7289 = vmatprep.subr.bf16.mxu0 %v7642_v23  ;;  %v9459_v46 = vmul.f32 %v9409_v36, %v9409_v36  ;;  %v2983_v43 = vrot.slane %v9424_v42, 4  ;;  %v2855_v13 = vadd.f32 %v2854_v4, %v2840_v28 }
 0x200   :  { %2028 = vst [vmem:[#allocation3 + $0xa9] sm:$0x7] %v2012_v31  ;;  %1728 = vst [vmem:[#allocation2 + $0xa2] sm:$0x7] %v1712_v20  ;;  %v2729_v25 = vadd.f32 %v2728_v35, %v2714_v24  ;;  %v2814_v24 = vmul.f32 %v9426_v49, %v9426_v49 }
 0x201   :  { %1729 = vst [vmem:[#allocation2 + $0xaa] sm:$0x7] %v1713_v44 }
 0x202   :  { %7290 = vmatpush3.bf16.msra.mxu0 %v7644_v11  ;;  %v2730_v52 = vadd.f32 %v2729_v25, %v2715_v2 }
 0x203   :  { %7355 = vmatprep.subr.bf16.mxu0 %v7646_v17 }
 0x204   :  { %v1965_v58 = vld [vmem:[#allocation3 + $0xb1] sm:$0x7] }
 0x205   :  { %v2013_v62 = vadd.f32 %v9057_v53, %v1965_v58  ;;  %v1714_v53 = vadd.f32 %v1698_v48, %v1674_v33  ;;  %v2921_v33 = vrot.slane %v9337_v50, 4  ;;  %v2793_v48 = vadd.f32 %v2792_v32, %v2778_v55  ;;  %v9468_v16 = vld [vmem:[#allocation2 + $0x71] sm:$0xf]  ;;  %v9470_v56 = vld [vmem:[#allocation2 + $0x79] sm:$0xf] }
 0x206   :  { %v2654_v47 = vcombine.low %v9405_v41, %v9468_v16  ;;  %v2689_v54 = vmul.f32 %v9468_v16, %v9468_v16  ;;  %v2690_v10 = vmul.f32 %v9470_v56, %v9470_v56  ;;  %v9478_v14 = vld [vmem:[#allocation3 + $0x81] sm:$0xf] }
 0x207   :  { %2029 = vst [vmem:[#allocation3 + $0xb1] sm:$0x7] %v2013_v62  ;;  %1730 = vst [vmem:[#allocation2 + $0xb2] sm:$0x7] %v1714_v53  ;;  %v2779_v29 = vcombine.low %v9426_v49, %v9478_v14  ;;  %v2815_v9 = vmul.f32 %v9478_v14, %v9478_v14  ;;  %v9484_v31 = vld [vmem:[#allocation2 + $0x81] sm:$0xf]  ;;  %v2922_v11 = vadd.f32 %v2921_v33, %v9337_v50 }
 0x208   :  { %v9486_v58 = vld [vmem:[#allocation3 + $0xa1] sm:$0xf]  ;;  %v9488_v21 = vld [vmem:[#allocation3 + $0xa9] sm:$0xf]  ;;  %v2669_v38 = vadd.f32 %v2668_v51, %v2654_v47  ;;  %v2716_v1 = vcombine.low %v2688_v15, %v2689_v54  ;;  %v2655_v12 = vcombine.low %v9470_v56, %v9484_v31  ;;  %v2691_v20 = vmul.f32 %v9484_v31, %v9484_v31 }
 0x209   :  { %v9494_v44 = vld [vmem:[#allocation2 + $0xa1] sm:$0xf]  ;;  %v9496_v62 = vld [vmem:[#allocation2 + $0xa9] sm:$0xf]  ;;  %v2794_v5 = vadd.f32 %v2793_v48, %v2779_v29  ;;  %v2841_v53 = vcombine.low %v2814_v24, %v2815_v9  ;;  %v2780_v30 = vcombine.low %v9407_v27, %v9486_v58  ;;  %v2817_v35 = vmul.f32 %v9486_v58, %v9486_v58 }
 0x20a   :  { %v2731_v55 = vadd.f32 %v2730_v52, %v2716_v1  ;;  %v2670_v23 = vadd.f32 %v2669_v38, %v2655_v12  ;;  %v2717_v63 = vcombine.low %v2690_v10, %v2691_v20  ;;  %v2818_v39 = vmul.f32 %v9488_v21, %v9488_v21 }
 0x20b   :  { %v2856_v25 = vadd.f32 %v2855_v13, %v2841_v53  ;;  %v2795_v32 = vadd.f32 %v2794_v5, %v2780_v30  ;;  %v2842_v2 = vcombine.low %v2816_v6, %v2817_v35  ;;  %v2656_v28 = vcombine.low %v9409_v36, %v9494_v44 }
 0x20c   :  { %v2693_v15 = vmul.f32 %v9494_v44, %v9494_v44  ;;  %v2694_v18 = vmul.f32 %v9496_v62, %v9496_v62  ;;  %v2732_v47 = vadd.f32 %v2731_v55, %v2717_v63  ;;  %v3046_v10 = vadd.f32 %v3045_v22, %v9171_v59 }
 0x20d   :  { %v2857_v48 = vadd.f32 %v2856_v25, %v2842_v2  ;;  %v2671_v24 = vadd.f32 %v2670_v23, %v2656_v28  ;;  %v2984_v52 = vadd.f32 %v2983_v43, %v9424_v42  ;;  %v2923_v12 = vrot.slane %v2922_v11, 2 }
 0x20e   :  { %v9498_v19 = vld [vmem:[#allocation3 + $0xb1] sm:$0xf]  ;;  %v2718_v50 = vcombine.low %v9459_v46, %v2693_v15  ;;  %v3108_v46 = vadd.f32 %v3107_v34, %v9422_v0  ;;  %v3047_v35 = vrot.slane %v3046_v10, 2 }
 0x20f   :  { %v9504_v60 = vld [vmem:[#allocation2 + $0xb1] sm:$0xf]  ;;  %v2781_v4 = vcombine.low %v9488_v21, %v9498_v19  ;;  %v2819_v6 = vmul.f32 %v9498_v19, %v9498_v19  ;;  %v2985_v17 = vrot.slane %v2984_v52, 2  ;;  %v2924_v43 = vadd.f32 %v2923_v12, %v2922_v11 }
 0x210   :  { %v2657_v51 = vcombine.low %v9496_v62, %v9504_v60  ;;  %v2695_v54 = vmul.f32 %v9504_v60, %v9504_v60  ;;  %v2733_v9 = vadd.f32 %v2732_v47, %v2718_v50 }
 0x211   :  { %v2796_v33 = vadd.f32 %v2795_v32, %v2781_v4  ;;  %v2843_v13 = vcombine.low %v2818_v39, %v2819_v6  ;;  %v3109_v39 = vrot.slane %v3108_v46, 2  ;;  %v3048_v32 = vadd.f32 %v3047_v35, %v3046_v10 }
 0x212   :  { %v2672_v29 = vadd.f32 %v2671_v24, %v2657_v51  ;;  %v2719_v1 = vcombine.low %v2694_v18, %v2695_v54  ;;  %v2986_v15 = vadd.f32 %v2985_v17, %v2984_v52  ;;  %v2925_v34 = vrot.slane %v2924_v43, 1 }
 0x213   :  { %v2797_v38 = vrot.slane %v2796_v33, 4  ;;  %v2858_v20 = vadd.f32 %v2857_v48, %v2843_v13  ;;  %v3110_v24 = vadd.f32 %v3109_v39, %v3108_v46  ;;  %v3049_v47 = vrot.slane %v3048_v32, 1 }
 0x214   :  { %v2673_v5 = vrot.slane %v2672_v29, 4  ;;  %v2734_v30 = vadd.f32 %v2733_v9, %v2719_v1  ;;  %v2926_v13 = vadd.f32 %v2925_v34, %v2924_v43  ;;  %v3119_v43 = vld [vmem:[%s10409_s2] sm:$0x1] }
 0x215   :  { %v2798_v53 = vadd.f32 %v2797_v38, %v2796_v33  ;;  %v2859_v55 = vrot.slane %v2858_v20, 4  ;;  %v2987_v33 = vrot.slane %v2986_v15, 1  ;;  %v3111_v10 = vrot.slane %v3110_v24, 1 }
 0x216   :  { %v2674_v59 = vadd.f32 %v2673_v5, %v2672_v29  ;;  %v2735_v42 = vrot.slane %v2734_v30, 4  ;;  %v3050_v1 = vadd.f32 %v3049_v47, %v3048_v32 }
 0x217   :  { %v2799_v22 = vrot.slane %v2798_v53, 2  ;;  %v2860_v23 = vadd.f32 %v2859_v55, %v2858_v20  ;;  %v2988_v12 = vadd.f32 %v2987_v33, %v2986_v15  ;;  %v7766_v33 = vld [vmem:[#allocation2 + $0x21] sm:$0xf] }
 0x218   :  { %v2675_v63 = vrot.slane %v2674_v59, 2  ;;  %v2736_v25 = vadd.f32 %v2735_v42, %v2734_v30 }
 0x219   :  { %v2800_v45 = vadd.f32 %v2799_v22, %v2798_v53  ;;  %v2861_v2 = vrot.slane %v2860_v23, 2  ;;  %v3112_v53 = vadd.f32 %v3111_v10, %v3110_v24  ;;  %v7768_v10 = vld [vmem:[#allocation3 + $0x11] sm:$0xf] }
 0x21a   :  { %v2676_v28 = vadd.f32 %v2675_v63, %v2674_v59  ;;  %v2737_v0 = vrot.slane %v2736_v25, 2 }
 0x21b   :  { %v2801_v18 = vrot.slane %v2800_v45, 1  ;;  %v2862_v4 = vadd.f32 %v2861_v2, %v2860_v23  ;;  %v10533_v23 = vld [vmem:[#allocation6_spill] sm:$0xff] }
 0x21c   :  { %v2677_v48 = vrot.slane %v2676_v28, 1  ;;  %v2738_v51 = vadd.f32 %v2737_v0, %v2736_v25  ;;  %v3129_v63 = vsub.s32 0, %v10533_v23  ;;  %v3123_v25 = vld [vmem:[%s10410_s3] sm:$0x1]  ;;  %v7763_v0 = vld [vmem:[#allocation2 + $0x19] sm:$0xf] }
 0x21d   :  { %v2802_v6 = vadd.f32 %v2801_v18, %v2800_v45  ;;  %v2863_v50 = vrot.slane %v2862_v4, 1  ;;  %v7777_v23 = vld [vmem:[#allocation4 + $0x39] sm:$0xf] }
 0x21e   :  { %v2678_v11 = vadd.f32 %v2677_v48, %v2676_v28  ;;  %v2739_v54 = vrot.slane %v2738_v51, 1 }
 0x21f   :  { %v2864_v29 = vadd.f32 %v2863_v50, %v2862_v4  ;;  %v7764_v4 = vld [vmem:[#allocation2 + $0x39] sm:$0xf]  ;;  %v7765_v50 = vld [vmem:[#allocation2 + $0x11] sm:$0xf] }
 0x220   :  { %v2803_v9 = vadd.f32 %v2802_v6, %v2678_v11  ;;  %v2740_v38 = vadd.f32 %v2739_v54, %v2738_v51  ;;  %v7767_v54 = vld [vmem:[#allocation2 + $0x41] sm:$0xf] }
 0x222   :  { %v2927_v52 = vadd.f32 %v2926_v13, %v2803_v9  ;;  %v2865_v20 = vadd.f32 %v2864_v29, %v2740_v38 }
 0x224   :  { %v3051_v5 = vadd.f32 %v3050_v1, %v2927_v52  ;;  %v2989_v30 = vadd.f32 %v2988_v12, %v2865_v20  ;;  %v7769_v1 = vld [vmem:[#allocation3 + $0x19] sm:$0xf]  ;;  %v7770_v52 = vld [vmem:[#allocation3 + $0x21] sm:$0xf] }
 0x226   :  { %v3114_v46 = vmul.f32 0.00390625, %v3051_v5  ;;  %v3113_v35 = vadd.f32 %v3112_v53, %v2989_v30  ;;  %v7772_v30 = vld [vmem:[#allocation3 + $0x69] sm:$0xf] }
 0x228   :  { %v3116_v17 = vmul.f32 %v3114_v46, %v3114_v46  ;;  %v3115_v55 = vmul.f32 0.00390625, %v3113_v35 }
 0x22a   :  { %v3117_v59 = vsub.f32 %v3115_v55, %v3116_v17 }
 0x22c   :  { %v3118_v22 = vmax.f32 %v3117_v59, 0.0  ;;  %v7773_v59 = vld [vmem:[#allocation4 + $0x9] sm:$0xf] }
 0x22e   :  { %v3120_v42 = vadd.f32 1e-05, %v3118_v22  ;;  %v7774_v22 = vld [vmem:[#allocation4 + $0x11] sm:$0xf] }
 0x230   :  { %7742 = vrsqrt.f32 %v3120_v42  ;;  %v7775_v42 = vld [vmem:[#allocation4 + $0x19] sm:$0xf] }
 0x23a   :  { %v7743_v39 = vpop.eup %7742 }
 0x23b   :  { %v3122_v45 = vmul.f32 %v7743_v39, %v3119_v43  ;;  %v7776_v43 = vld [vmem:[#allocation4 + $0x21] sm:$0xf] }
 0x23d   :  { %v3124_v32 = vmul.f32 %v3122_v45, %v3114_v46  ;;  %v9544_v2 = vrot.slane %v3122_v45, %v3129_v63  ;;  %v7779_v45 = vld [vmem:[#allocation4 + $0x49] sm:$0xf] }
 0x23f   :  { %v3125_v28 = vsub.f32 %v3123_v25, %v3124_v32  ;;  %v9548_v15 = vcombine.high %v9544_v2, %v9544_v2  ;;  %v9552_v18 = vmul.f32 %v9325_v57, %v9544_v2  ;;  %v9555_v34 = vmul.f32 %v7763_v0, %v9544_v2  ;;  %v7780_v32 = vld [vmem:[#allocation4 + $0x51] sm:$0xf]  ;;  %v7781_v0 = vld [vmem:[#allocation4 + $0x69] sm:$0xf] }
 0x240   :  { %v9558_v48 = vmul.f32 %v7764_v4, %v9544_v2  ;;  %v9562_v24 = vmul.f32 %v9544_v2, %v9344_v8  ;;  %v9566_v6 = vmul.f32 %v9544_v2, %v9405_v41  ;;  %v9570_v57 = vmul.f32 %v9544_v2, %v9470_v56 }
 0x241   :  { %v3149_v51 = vmul.f32 %v9548_v15, %v9504_v60  ;;  %v9574_v47 = vrot.slane %v3125_v28, %v3129_v63  ;;  %v9577_v11 = vmul.f32 %v7765_v50, %v9548_v15  ;;  %v9580_v8 = vmul.f32 %v7766_v33, %v9548_v15  ;;  %v7778_v63 = vld [vmem:[#allocation4 + $0x41] sm:$0xf]  ;;  %v7783_v33 = vld [vmem:[#allocation4 + $0x79] sm:$0xf] }
 0x242   :  { %v9583_v41 = vmul.f32 %v7767_v54, %v9548_v15  ;;  %v9587_v56 = vmul.f32 %v9548_v15, %v9352_v26  ;;  %v9591_v60 = vmul.f32 %v9548_v15, %v9468_v16  ;;  %v9595_v13 = vmul.f32 %v9548_v15, %v9484_v31 }
 0x243   :  { %v9599_v29 = vcombine.high %v9574_v47, %v9574_v47  ;;  %v9603_v9 = vmul.f32 %v9544_v2, %v9409_v36  ;;  %v9607_v26 = vmul.f32 %v9548_v15, %v9494_v44  ;;  %v9611_v16 = vmul.f32 %v9544_v2, %v9496_v62 }
 0x244   :  { %v9615_v31 = vmul.f32 %v9300_v61, %v9544_v2  ;;  %v9618_v38 = vmul.f32 %v7768_v10, %v9548_v15  ;;  %v9621_v36 = vmul.f32 %v7769_v1, %v9544_v2  ;;  %v9624_v44 = vmul.f32 %v7770_v52, %v9548_v15  ;;  %v7771_v61 = vld [vmem:[#allocation3 + $0x41] sm:$0xf]  ;;  %v7785_v52 = vld [vmem:[#allocation4 + $0x99] sm:$0xf] }
 0x245   :  { %v3173_v12 = vadd.f32 %v9599_v29, %v3149_v51  ;;  %v9629_v62 = vmul.f32 %v9308_v37, %v9544_v2  ;;  %v9632_v20 = vmul.f32 %v7771_v61, %v9548_v15  ;;  %v9636_v5 = vmul.f32 %v9544_v2, %v9306_v40  ;;  %v7782_v51 = vld [vmem:[#allocation4 + $0x71] sm:$0xf]  ;;  %v7784_v10 = vld [vmem:[#allocation4 + $0x81] sm:$0xf] }
 0x246   :  { %v9640_v53 = vmul.f32 %v9548_v15, %v9350_v7  ;;  %v9643_v46 = vmul.f32 %v7772_v30, %v9544_v2  ;;  %v9647_v37 = vmul.f32 %v9548_v15, %v9362_v3  ;;  %v9651_v35 = vmul.f32 %v9544_v2, %v9426_v49  ;;  %v7786_v61 = vld [vmem:[#allocation4 + $0xa1] sm:$0xf] }
 0x247   :  { %v3189_v17 = vmax.f32 %v3173_v12, 0.0  ;;  %v9655_v40 = vmul.f32 %v9548_v15, %v9478_v14  ;;  %v9659_v7 = vmul.f32 %v9544_v2, %v9407_v27  ;;  %v9663_v55 = vmul.f32 %v9548_v15, %v9486_v58 }
 0x248   :  { %v9667_v3 = vmul.f32 %v9544_v2, %v9488_v21  ;;  %v9671_v49 = vmul.f32 %v9548_v15, %v9498_v19  ;;  %v9674_v14 = vmul.f32 %v7773_v59, %v9544_v2  ;;  %v9677_v27 = vmul.f32 %v7774_v22, %v9548_v15  ;;  %v7788_v22 = vld [vmem:[#allocation4 + $0xb1] sm:$0xf] }
 0x249   :  { %3205 = vst [vmem:[#allocation2 + $0xb1] sm:$0xf] %v3189_v17  ;;  %v9680_v58 = vmul.f32 %v7775_v42, %v9544_v2  ;;  %v9683_v21 = vmul.f32 %v7776_v43, %v9548_v15  ;;  %v9686_v19 = vmul.f32 %v7777_v23, %v9544_v2  ;;  %v9689_v39 = vmul.f32 %v7778_v63, %v9548_v15  ;;  %v7787_v17 = vld [vmem:[#allocation4 + $0xa9] sm:$0xf]  ;;  %v7790_v63 = vld [vmem:[#allocation5 + $0x11] sm:$0xf] }
 0x24a   :  { %v9692_v25 = vmul.f32 %v7779_v45, %v9544_v2  ;;  %v9695_v28 = vmul.f32 %v7780_v32, %v9548_v15  ;;  %v9698_v4 = vmul.f32 %v7781_v0, %v9544_v2  ;;  %v9701_v50 = vmul.f32 %v7782_v51, %v9548_v15  ;;  %v7789_v43 = vld [vmem:[#allocation5 + $0x9] sm:$0xf]  ;;  %v7791_v32 = vld [vmem:[#allocation5 + $0x19] sm:$0xf]  ;;  %v7792_v51 = vld [vmem:[#allocation5 + $0x21] sm:$0xf] }
 0x24b   :  { %v9704_v54 = vmul.f32 %v7783_v33, %v9544_v2  ;;  %v9707_v1 = vmul.f32 %v7784_v10, %v9548_v15  ;;  %v9710_v12 = vmul.f32 %v7785_v52, %v9544_v2  ;;  %v9713_v30 = vmul.f32 %v7786_v61, %v9548_v15  ;;  %v7793_v10 = vld [vmem:[#allocation5 + $0x39] sm:$0xf]  ;;  %v7794_v61 = vld [vmem:[#allocation5 + $0x41] sm:$0xf] }
 0x24c   :  { %v9716_v59 = vmul.f32 %v7787_v17, %v9544_v2  ;;  %v9719_v42 = vmul.f32 %v7788_v22, %v9548_v15  ;;  %v9722_v23 = vmul.f32 %v7789_v43, %v9544_v2  ;;  %v9725_v45 = vmul.f32 %v7790_v63, %v9548_v15  ;;  %v7795_v22 = vld [vmem:[#allocation5 + $0x49] sm:$0xf]  ;;  %v7796_v63 = vld [vmem:[#allocation5 + $0x51] sm:$0xf] }
 0x24d   :  { %v9728_v0 = vmul.f32 %v7791_v32, %v9544_v2  ;;  %v9731_v33 = vmul.f32 %v7792_v51, %v9548_v15  ;;  %v9734_v52 = vmul.f32 %v7793_v10, %v9544_v2  ;;  %v9737_v17 = vmul.f32 %v7794_v61, %v9548_v15 }
 0x24e   :  { %10534 = vst [vmem:[#allocation24_spill] sm:$0xff] %v9719_v42  ;;  %10535 = vst [vmem:[#allocation26_spill] sm:$0xff] %v9722_v23  ;;  %v9740_v43 = vmul.f32 %v7795_v22, %v9544_v2  ;;  %v9743_v32 = vmul.f32 %v7796_v63, %v9548_v15 }
 0x24f   :  { %10536 = vst [vmem:[#allocation23_spill] sm:$0xff] %v9725_v45  ;;  %10537 = vst [vmem:[#allocation14_spill] sm:$0xff] %v9728_v0  ;;  %v7797_v0 = vld [vmem:[#allocation5 + $0x69] sm:$0xf] }
 0x250   :  { %10538 = vst [vmem:[#allocation13_spill] sm:$0xff] %v9731_v33  ;;  %10539 = vst [vmem:[#allocation25_spill] sm:$0xff] %v9734_v52  ;;  %v9746_v51 = vmul.f32 %v7797_v0, %v9544_v2  ;;  %v7798_v33 = vld [vmem:[#allocation5 + $0x71] sm:$0xf]  ;;  %v7799_v52 = vld [vmem:[#allocation5 + $0x79] sm:$0xf] }
 0x251   :  { %10540 = vst [vmem:[#allocation15_spill] sm:$0xff] %v9737_v17  ;;  %10541 = vst [vmem:[#allocation10_spill] sm:$0xff] %v9740_v43  ;;  %v9749_v10 = vmul.f32 %v7798_v33, %v9548_v15  ;;  %v9752_v61 = vmul.f32 %v7799_v52, %v9544_v2  ;;  %v7800_v17 = vld [vmem:[#allocation5 + $0x81] sm:$0xf]  ;;  %v7801_v43 = vld [vmem:[#allocation5 + $0x99] sm:$0xf] }
 0x252   :  { %10542 = vst [vmem:[#allocation28_spill] sm:$0xff] %v9743_v32  ;;  %10543 = vst [vmem:[#allocation22_spill] sm:$0xff] %v9746_v51  ;;  %v9755_v22 = vmul.f32 %v7800_v17, %v9548_v15  ;;  %v9758_v63 = vmul.f32 %v7801_v43, %v9544_v2  ;;  %v7802_v32 = vld [vmem:[#allocation5 + $0xa1] sm:$0xf]  ;;  %v7803_v51 = vld [vmem:[#allocation5 + $0xa9] sm:$0xf]  ;;  %v3158_v17 = vadd.f32 %v9574_v47, %v9552_v18 }
 0x253   :  { %10544 = vst [vmem:[#allocation16_spill] sm:$0xff] %v9749_v10  ;;  %10545 = vst [vmem:[#allocation18_spill] sm:$0xff] %v9752_v61  ;;  %v9761_v0 = vmul.f32 %v7802_v32, %v9548_v15  ;;  %v9764_v33 = vmul.f32 %v7803_v51, %v9544_v2  ;;  %v7804_v10 = vld [vmem:[#allocation5 + $0xb1] sm:$0xf]  ;;  %v3160_v43 = vadd.f32 %v9574_v47, %v9555_v34 }
 0x254   :  { %10546 = vst [vmem:[#allocation29_spill] sm:$0xff] %v9755_v22  ;;  %10547 = vst [vmem:[#allocation27_spill] sm:$0xff] %v9758_v63  ;;  %v9767_v52 = vmul.f32 %v7804_v10, %v9548_v15  ;;  %v3159_v22 = vadd.f32 %v9599_v29, %v9577_v11  ;;  %v3161_v32 = vadd.f32 %v9599_v29, %v9580_v8  ;;  %v3174_v10 = vmax.f32 %v3158_v17, 0.0 }
 0x255   :  { %10548 = vst [vmem:[#allocation30_spill] sm:$0xff] %v9761_v0  ;;  %10549 = vst [vmem:[#allocation9_spill] sm:$0xff] %v9764_v33  ;;  %v3162_v2 = vadd.f32 %v9574_v47, %v9558_v48  ;;  %v3163_v51 = vadd.f32 %v9599_v29, %v9583_v41  ;;  %v3164_v15 = vadd.f32 %v9574_v47, %v9562_v24 }
 0x256   :  { %10550 = vst [vmem:[#allocation11_spill] sm:$0xff] %v9767_v52  ;;  %v3165_v18 = vadd.f32 %v9599_v29, %v9587_v56  ;;  %v3166_v11 = vadd.f32 %v9574_v47, %v9566_v6  ;;  %v3167_v34 = vadd.f32 %v9599_v29, %v9591_v60  ;;  %v3168_v8 = vadd.f32 %v9574_v47, %v9570_v57 }
 0x257   :  { %v3169_v48 = vadd.f32 %v9599_v29, %v9595_v13  ;;  %v3170_v41 = vadd.f32 %v9574_v47, %v9603_v9  ;;  %v3171_v24 = vadd.f32 %v9599_v29, %v9607_v26  ;;  %v3172_v56 = vadd.f32 %v9574_v47, %v9611_v16  ;;  %3190 = vst [vmem:[#allocation2 + $0x9] sm:$0xf] %v3174_v10 }
 0x258   :  { %v3175_v6 = vmax.f32 %v3159_v22, 0.0  ;;  %v3176_v52 = vmax.f32 %v3160_v43, 0.0  ;;  %v3177_v33 = vmax.f32 %v3161_v32, 0.0  ;;  %v3178_v60 = vmax.f32 %v3162_v2, 0.0 }
 0x259   :  { %v3179_v0 = vmax.f32 %v3163_v51, 0.0  ;;  %v3180_v63 = vmax.f32 %v3164_v15, 0.0  ;;  %v3181_v57 = vmax.f32 %v3165_v18, 0.0  ;;  %v3182_v61 = vmax.f32 %v3166_v11, 0.0 }
 0x25a   :  { %v3183_v45 = vmax.f32 %v3167_v34, 0.0  ;;  %v3184_v13 = vmax.f32 %v3168_v8, 0.0  ;;  %3191 = vst [vmem:[#allocation2 + $0x11] sm:$0xf] %v3175_v6  ;;  %3192 = vst [vmem:[#allocation2 + $0x19] sm:$0xf] %v3176_v52  ;;  %v3222_v16 = vadd.f32 %v9615_v31, %v9574_v47  ;;  %v3223_v22 = vadd.f32 %v9618_v38, %v9599_v29 }
 0x25b   :  { %v3185_v9 = vmax.f32 %v3169_v48, 0.0  ;;  %v3186_v23 = vmax.f32 %v3170_v41, 0.0  ;;  %v3187_v26 = vmax.f32 %v3171_v24, 0.0  ;;  %v3188_v42 = vmax.f32 %v3172_v56, 0.0  ;;  %3193 = vst [vmem:[#allocation2 + $0x21] sm:$0xf] %v3177_v33 }
 0x25c   :  { %3194 = vst [vmem:[#allocation2 + $0x39] sm:$0xf] %v3178_v60  ;;  %3195 = vst [vmem:[#allocation2 + $0x41] sm:$0xf] %v3179_v0  ;;  %v3224_v52 = vadd.f32 %v9621_v36, %v9574_v47  ;;  %v3225_v17 = vadd.f32 %v9624_v44, %v9599_v29  ;;  %v3228_v31 = vadd.f32 %v9636_v5, %v9574_v47 }
 0x25d   :  { %3196 = vst [vmem:[#allocation2 + $0x49] sm:$0xf] %v3180_v63  ;;  %3197 = vst [vmem:[#allocation2 + $0x51] sm:$0xf] %v3181_v57  ;;  %v3229_v38 = vadd.f32 %v9640_v53, %v9599_v29  ;;  %v3230_v36 = vadd.f32 %v9643_v46, %v9574_v47  ;;  %v3231_v44 = vadd.f32 %v9647_v37, %v9599_v29  ;;  %v3239_v37 = vmax.f32 %v3223_v22, 0.0 }
 0x25e   :  { %3198 = vst [vmem:[#allocation2 + $0x69] sm:$0xf] %v3182_v61  ;;  %3199 = vst [vmem:[#allocation2 + $0x71] sm:$0xf] %v3183_v45  ;;  %v3226_v45 = vadd.f32 %v9629_v62, %v9574_v47  ;;  %v3227_v61 = vadd.f32 %v9632_v20, %v9599_v29  ;;  %v3233_v62 = vadd.f32 %v9655_v40, %v9599_v29  ;;  %v3240_v63 = vmax.f32 %v3224_v52, 0.0 }
 0x25f   :  { %3200 = vst [vmem:[#allocation2 + $0x79] sm:$0xf] %v3184_v13  ;;  %3201 = vst [vmem:[#allocation2 + $0x81] sm:$0xf] %v3185_v9  ;;  %v3234_v20 = vadd.f32 %v9659_v7, %v9574_v47  ;;  %v3235_v5 = vadd.f32 %v9663_v55, %v9599_v29  ;;  %v3236_v53 = vadd.f32 %v9667_v3, %v9574_v47  ;;  %v3241_v0 = vmax.f32 %v3225_v17, 0.0  ;;  %v10552_v17 = vld [vmem:[#allocation26_spill] sm:$0xff] }
 0x260   :  { %3202 = vst [vmem:[#allocation2 + $0x99] sm:$0xf] %v3186_v23  ;;  %3203 = vst [vmem:[#allocation2 + $0xa1] sm:$0xf] %v3187_v26  ;;  %v3237_v46 = vadd.f32 %v9671_v49, %v9599_v29  ;;  %v3238_v23 = vmax.f32 %v3222_v16, 0.0  ;;  %v3243_v33 = vmax.f32 %v3227_v61, 0.0  ;;  %v3286_v18 = vadd.f32 %v9674_v14, %v9574_v47 }
 0x261   :  { %3204 = vst [vmem:[#allocation2 + $0xa9] sm:$0xf] %v3188_v42  ;;  %v3232_v42 = vadd.f32 %v9651_v35, %v9574_v47  ;;  %v3242_v35 = vmax.f32 %v3226_v45, 0.0  ;;  %v3244_v43 = vmax.f32 %v3228_v31, 0.0  ;;  %v3245_v40 = vmax.f32 %v3229_v38, 0.0  ;;  %v10553_v61 = vld [vmem:[#allocation23_spill] sm:$0xff] }
 0x262   :  { %v3246_v32 = vmax.f32 %v3230_v36, 0.0  ;;  %v3247_v2 = vmax.f32 %v3231_v44, 0.0  ;;  %v3249_v51 = vmax.f32 %v3233_v62, 0.0  ;;  %3254 = vst [vmem:[#allocation3 + $0x9] sm:$0xf] %v3238_v23  ;;  %v3250_v55 = vmax.f32 %v3234_v20, 0.0 }
 0x263   :  { %v3248_v7 = vmax.f32 %v3232_v42, 0.0  ;;  %3255 = vst [vmem:[#allocation3 + $0x11] sm:$0xf] %v3239_v37  ;;  %3256 = vst [vmem:[#allocation3 + $0x19] sm:$0xf] %v3240_v63  ;;  %v3251_v3 = vmax.f32 %v3235_v5, 0.0  ;;  %v3287_v11 = vadd.f32 %v9677_v27, %v9599_v29  ;;  %v3288_v34 = vadd.f32 %v9680_v58, %v9574_v47 }
 0x264   :  { %3257 = vst [vmem:[#allocation3 + $0x21] sm:$0xf] %v3241_v0  ;;  %v3252_v15 = vmax.f32 %v3236_v53, 0.0  ;;  %v3253_v49 = vmax.f32 %v3237_v46, 0.0  ;;  %3258 = vst [vmem:[#allocation3 + $0x39] sm:$0xf] %v3242_v35  ;;  %v3289_v8 = vadd.f32 %v9683_v21, %v9599_v29  ;;  %v3290_v48 = vadd.f32 %v9686_v19, %v9574_v47 }
 0x265   :  { %3259 = vst [vmem:[#allocation3 + $0x41] sm:$0xf] %v3243_v33  ;;  %3260 = vst [vmem:[#allocation3 + $0x49] sm:$0xf] %v3244_v43  ;;  %v3291_v41 = vadd.f32 %v9689_v39, %v9599_v29  ;;  %v3292_v14 = vadd.f32 %v9692_v25, %v9574_v47  ;;  %v3293_v27 = vadd.f32 %v9695_v28, %v9599_v29  ;;  %v3302_v10 = vmax.f32 %v3286_v18, 0.0  ;;  %v10554_v38 = vld [vmem:[#allocation14_spill] sm:$0xff] }
 0x266   :  { %3261 = vst [vmem:[#allocation3 + $0x51] sm:$0xf] %v3245_v40  ;;  %3262 = vst [vmem:[#allocation3 + $0x69] sm:$0xf] %v3246_v32  ;;  %v3294_v58 = vadd.f32 %v9698_v4, %v9574_v47  ;;  %v3295_v21 = vadd.f32 %v9701_v50, %v9599_v29  ;;  %v3296_v24 = vadd.f32 %v9704_v54, %v9574_v47  ;;  %v10551_v4 = vld [vmem:[#allocation24_spill] sm:$0xff]  ;;  %v3303_v50 = vmax.f32 %v3287_v11, 0.0 }
 0x267   :  { %3263 = vst [vmem:[#allocation3 + $0x71] sm:$0xf] %v3247_v2  ;;  %3264 = vst [vmem:[#allocation3 + $0x79] sm:$0xf] %v3248_v7  ;;  %v3297_v19 = vadd.f32 %v9707_v1, %v9599_v29  ;;  %v3298_v39 = vadd.f32 %v9710_v12, %v9574_v47  ;;  %v3299_v25 = vadd.f32 %v9713_v30, %v9599_v29  ;;  %v3304_v6 = vmax.f32 %v3288_v34, 0.0  ;;  %v10555_v44 = vld [vmem:[#allocation13_spill] sm:$0xff] }
 0x268   :  { %3265 = vst [vmem:[#allocation3 + $0x81] sm:$0xf] %v3249_v51  ;;  %3266 = vst [vmem:[#allocation3 + $0x99] sm:$0xf] %v3250_v55  ;;  %v3300_v28 = vadd.f32 %v9716_v59, %v9574_v47  ;;  %v3301_v56 = vadd.f32 %v10551_v4, %v9599_v29  ;;  %v3305_v60 = vmax.f32 %v3289_v8, 0.0  ;;  %v3306_v54 = vmax.f32 %v3290_v48, 0.0 }
 0x269   :  { %3267 = vst [vmem:[#allocation3 + $0xa1] sm:$0xf] %v3251_v3  ;;  %3268 = vst [vmem:[#allocation3 + $0xa9] sm:$0xf] %v3252_v15  ;;  %v3307_v57 = vmax.f32 %v3291_v41, 0.0  ;;  %v3308_v13 = vmax.f32 %v3292_v14, 0.0  ;;  %v3350_v45 = vadd.f32 %v10552_v17, %v9574_v47  ;;  %v3351_v31 = vadd.f32 %v10553_v61, %v9599_v29 }
 0x26a   :  { %3269 = vst [vmem:[#allocation3 + $0xb1] sm:$0xf] %v3253_v49  ;;  %v3309_v1 = vmax.f32 %v3293_v27, 0.0  ;;  %v3310_v9 = vmax.f32 %v3294_v58, 0.0  ;;  %v3311_v26 = vmax.f32 %v3295_v21, 0.0  ;;  %v3312_v12 = vmax.f32 %v3296_v24, 0.0 }
 0x26b   :  { %v3313_v16 = vmax.f32 %v3297_v19, 0.0  ;;  %3318 = vst [vmem:[#allocation4 + $0x9] sm:$0xf] %v3302_v10  ;;  %3319 = vst [vmem:[#allocation4 + $0x11] sm:$0xf] %v3303_v50  ;;  %v3314_v30 = vmax.f32 %v3298_v39, 0.0  ;;  %v3352_v36 = vadd.f32 %v10554_v38, %v9574_v47  ;;  %v3353_v42 = vadd.f32 %v10555_v44, %v9599_v29 }
 0x26c   :  { %3320 = vst [vmem:[#allocation4 + $0x19] sm:$0xf] %v3304_v6  ;;  %3321 = vst [vmem:[#allocation4 + $0x21] sm:$0xf] %v3305_v60  ;;  %v3315_v59 = vmax.f32 %v3299_v25, 0.0  ;;  %v3316_v22 = vmax.f32 %v3300_v28, 0.0 }
 0x26d   :  { %v3317_v52 = vmax.f32 %v3301_v56, 0.0  ;;  %3322 = vst [vmem:[#allocation4 + $0x39] sm:$0xf] %v3306_v54  ;;  %3323 = vst [vmem:[#allocation4 + $0x41] sm:$0xf] %v3307_v57  ;;  %v10556_v62 = vld [vmem:[#allocation25_spill] sm:$0xff] }
 0x26e   :  { %3324 = vst [vmem:[#allocation4 + $0x49] sm:$0xf] %v3308_v13  ;;  %3325 = vst [vmem:[#allocation4 + $0x51] sm:$0xf] %v3309_v1  ;;  %v3354_v20 = vadd.f32 %v10556_v62, %v9574_v47  ;;  %v10557_v5 = vld [vmem:[#allocation15_spill] sm:$0xff]  ;;  %v10558_v46 = vld [vmem:[#allocation10_spill] sm:$0xff] }
 0x26f   :  { %3326 = vst [vmem:[#allocation4 + $0x69] sm:$0xf] %v3310_v9  ;;  %3327 = vst [vmem:[#allocation4 + $0x71] sm:$0xf] %v3311_v26  ;;  %v3355_v53 = vadd.f32 %v10557_v5, %v9599_v29  ;;  %v3356_v23 = vadd.f32 %v10558_v46, %v9574_v47  ;;  %v10559_v37 = vld [vmem:[#allocation28_spill] sm:$0xff]  ;;  %v10560_v0 = vld [vmem:[#allocation22_spill] sm:$0xff] }
 0x270   :  { %3328 = vst [vmem:[#allocation4 + $0x79] sm:$0xf] %v3312_v12  ;;  %3329 = vst [vmem:[#allocation4 + $0x81] sm:$0xf] %v3313_v16  ;;  %v3357_v63 = vadd.f32 %v10559_v37, %v9599_v29  ;;  %v3358_v35 = vadd.f32 %v10560_v0, %v9574_v47  ;;  %v10561_v33 = vld [vmem:[#allocation16_spill] sm:$0xff]  ;;  %v10562_v40 = vld [vmem:[#allocation18_spill] sm:$0xff] }
 0x271   :  { %3330 = vst [vmem:[#allocation4 + $0x99] sm:$0xf] %v3314_v30  ;;  %3331 = vst [vmem:[#allocation4 + $0xa1] sm:$0xf] %v3315_v59  ;;  %v3359_v43 = vadd.f32 %v10561_v33, %v9599_v29  ;;  %v3360_v32 = vadd.f32 %v10562_v40, %v9574_v47  ;;  %v10563_v2 = vld [vmem:[#allocation29_spill] sm:$0xff]  ;;  %v10564_v51 = vld [vmem:[#allocation27_spill] sm:$0xff] }
 0x272   :  { %3332 = vst [vmem:[#allocation4 + $0xa9] sm:$0xf] %v3316_v22  ;;  %3333 = vst [vmem:[#allocation4 + $0xb1] sm:$0xf] %v3317_v52  ;;  %v3361_v7 = vadd.f32 %v10563_v2, %v9599_v29  ;;  %v3362_v55 = vadd.f32 %v10564_v51, %v9574_v47  ;;  %v10565_v3 = vld [vmem:[#allocation30_spill] sm:$0xff]  ;;  %v10566_v49 = vld [vmem:[#allocation9_spill] sm:$0xff] }
 0x273   :  { %v3363_v15 = vadd.f32 %v10565_v3, %v9599_v29  ;;  %v3364_v18 = vadd.f32 %v10566_v49, %v9574_v47  ;;  %v10567_v11 = vld [vmem:[#allocation11_spill] sm:$0xff]  ;;  %v3431_v8 = vld [vmem:[#allocation2 + $0x12] sm:$0xf]  ;;  %v3433_v48 = vld [vmem:[#allocation2 + $0x22] sm:$0xf]  ;;  %v3366_v58 = vmax.f32 %v3350_v45, 0.0 }
 0x274   :  { %v3365_v34 = vadd.f32 %v10567_v11, %v9599_v29  ;;  %v3494_v41 = vld [vmem:[#allocation2 + $0x12] sm:$0xf]  ;;  %v3496_v14 = vld [vmem:[#allocation2 + $0x22] sm:$0xf]  ;;  %v3497_v27 = vld [vmem:[#allocation2 + $0x2a] sm:$0xf] }
 0x275   :  { %v3367_v21 = vmax.f32 %v3351_v31, 0.0  ;;  %v3368_v24 = vmax.f32 %v3352_v36, 0.0  ;;  %v3369_v19 = vmax.f32 %v3353_v42, 0.0  ;;  %v3399_v39 = vld [vmem:[#allocation2 + $0x11] sm:$0xf]  ;;  %v3370_v4 = vmax.f32 %v3354_v20, 0.0 }
 0x276   :  { %v3401_v25 = vld [vmem:[#allocation2 + $0x21] sm:$0xf]  ;;  %v3465_v28 = vld [vmem:[#allocation2 + $0x29] sm:$0xf]  ;;  %v3371_v56 = vmax.f32 %v3355_v53, 0.0  ;;  %v3372_v10 = vmax.f32 %v3356_v23, 0.0  ;;  %v7043_v17 = vpack.c.bf16 %v3497_v27, %v3496_v14 }
 0x277   :  { %v3373_v50 = vmax.f32 %v3357_v63, 0.0  ;;  %v3430_v47 = vld [vmem:[#allocation2 + $0xa] sm:$0xf]  ;;  %v3432_v6 = vld [vmem:[#allocation2 + $0x1a] sm:$0xf]  ;;  %v3374_v29 = vmax.f32 %v3358_v35, 0.0 }
 0x278   :  { %v3462_v60 = vld [vmem:[#allocation2 + $0x11] sm:$0xf]  ;;  %v3375_v54 = vmax.f32 %v3359_v43, 0.0  ;;  %v3376_v57 = vmax.f32 %v3360_v32, 0.0  ;;  %v3377_v13 = vmax.f32 %v3361_v7, 0.0  ;;  %v3378_v9 = vmax.f32 %v3362_v55, 0.0 }
 0x279   :  { %3382 = vst [vmem:[#allocation5 + $0x9] sm:$0xf] %v3366_v58  ;;  %3383 = vst [vmem:[#allocation5 + $0x11] sm:$0xf] %v3367_v21  ;;  %v3464_v1 = vld [vmem:[#allocation2 + $0x21] sm:$0xf]  ;;  %v7026_v59 = vpack.c.bf16 %v3431_v8, %v3430_v47  ;;  %v7027_v22 = vpack.c.bf16 %v3433_v48, %v3432_v6 }
 0x27a   :  { %3384 = vst [vmem:[#allocation5 + $0x19] sm:$0xf] %v3368_v24  ;;  %3385 = vst [vmem:[#allocation5 + $0x21] sm:$0xf] %v3369_v19  ;;  %v3379_v26 = vmax.f32 %v3363_v15, 0.0  ;;  %v3380_v12 = vmax.f32 %v3364_v18, 0.0  ;;  %v7035_v42 = vpack.c.bf16 %v3465_v28, %v3464_v1 }
 0x27b   :  { %v3381_v16 = vmax.f32 %v3365_v34, 0.0  ;;  %3386 = vst [vmem:[#allocation5 + $0x39] sm:$0xf] %v3370_v4  ;;  %3387 = vst [vmem:[#allocation5 + $0x41] sm:$0xf] %v3371_v56  ;;  %v10568_v53 = vld [vmem:[#allocation7_spill] sm:$0xff] }
 0x27c   :  { %3388 = vst [vmem:[#allocation5 + $0x49] sm:$0xf] %v3372_v10  ;;  %3389 = vst [vmem:[#allocation5 + $0x51] sm:$0xf] %v3373_v50  ;;  %v3495_v30 = vld [vmem:[#allocation2 + $0x1a] sm:$0xf]  ;;  %v4022_v46 = vrot.slane %v7026_v59, %v10568_v53  ;;  %v4029_v23 = vrot.slane %v7027_v22, %v10568_v53  ;;  %v4205_v63 = vrot.slane %v7043_v17, %v10568_v53 }
 0x27d   :  { %3390 = vst [vmem:[#allocation5 + $0x69] sm:$0xf] %v3374_v29  ;;  %3391 = vst [vmem:[#allocation5 + $0x71] sm:$0xf] %v3375_v54  ;;  %v7042_v52 = vpack.c.bf16 %v3495_v30, %v3494_v41  ;;  %v3398_v45 = vld [vmem:[#allocation2 + $0x9] sm:$0xf]  ;;  %v4117_v7 = vrot.slane %v7035_v42, %v10568_v53 }
 0x27e   :  { %3392 = vst [vmem:[#allocation5 + $0x79] sm:$0xf] %v3376_v57  ;;  %3393 = vst [vmem:[#allocation5 + $0x81] sm:$0xf] %v3377_v13  ;;  %v3400_v61 = vld [vmem:[#allocation2 + $0x19] sm:$0xf]  ;;  %v7018_v38 = vpack.c.bf16 %v3399_v39, %v3398_v45  ;;  %v4030_v49 = vcombine.low %v4022_v46, %v4029_v23 }
 0x27f   :  { %v3463_v31 = vld [vmem:[#allocation2 + $0x19] sm:$0xf]  ;;  %3394 = vst [vmem:[#allocation5 + $0x99] sm:$0xf] %v3378_v9  ;;  %3395 = vst [vmem:[#allocation5 + $0xa1] sm:$0xf] %v3379_v26  ;;  %v7019_v36 = vpack.c.bf16 %v3401_v25, %v3400_v61  ;;  %v4198_v37 = vrot.slane %v7042_v52, %v10568_v53 }
 0x280   :  { %3396 = vst [vmem:[#allocation5 + $0xa9] sm:$0xf] %v3380_v12  ;;  %3397 = vst [vmem:[#allocation5 + $0xb1] sm:$0xf] %v3381_v16  ;;  %v7034_v44 = vpack.c.bf16 %v3463_v31, %v3462_v60  ;;  %v3435_v62 = vld [vmem:[#allocation2 + $0x42] sm:$0xf]  ;;  %v3934_v40 = vrot.slane %v7018_v38, %v10568_v53  ;;  %6381 = vmatprep.mubr.bf16.mxu0 %v4030_v49 }
 0x281   :  { %v3437_v20 = vld [vmem:[#allocation2 + $0x52] sm:$0xf]  ;;  %v3501_v5 = vld [vmem:[#allocation2 + $0x5a] sm:$0xf]  ;;  %v3498_v0 = vld [vmem:[#allocation2 + $0x42] sm:$0xf]  ;;  %v3941_v32 = vrot.slane %v7019_v36, %v10568_v53  ;;  %v4206_v18 = vcombine.low %v4198_v37, %v4205_v63 }
 0x282   :  { %v3500_v35 = vld [vmem:[#allocation2 + $0x52] sm:$0xf]  ;;  %v7648_v33 = vld [vmem:[%s10408_s4 + $0x100] sm:$0xff]   ;;  %v4110_v2 = vrot.slane %v7034_v44, %v10568_v53  ;;  %v3434_v51 = vld [vmem:[#allocation2 + $0x3a] sm:$0xf] }
 0x283   :  { %v7649_v43 = vld [vmem:[%s10408_s4 + $0x180] sm:$0xff]   ;;  %v3436_v55 = vld [vmem:[#allocation2 + $0x4a] sm:$0xf]  ;;  %v7028_v11 = vpack.c.bf16 %v3435_v62, %v3434_v51  ;;  %v3405_v41 = vld [vmem:[#allocation2 + $0x51] sm:$0xf]  ;;  %v3942_v14 = vcombine.low %v3934_v40, %v3941_v32  ;;  %v7045_v21 = vpack.c.bf16 %v3501_v5, %v3500_v35  ;;  %6446 = vmatprep.mubr.bf16.mxu1 %v4206_v18 }
 0x284   :  { %v7650_v3 = vld [vmem:[%s10408_s4 + $0x148] sm:$0xff]   ;;  %v3403_v15 = vld [vmem:[#allocation2 + $0x41] sm:$0xf]  ;;  %v7029_v34 = vpack.c.bf16 %v3437_v20, %v3436_v55  ;;  %v4118_v27 = vcombine.low %v4110_v2, %v4117_v7  ;;  %v3402_v24 = vld [vmem:[#allocation2 + $0x39] sm:$0xf] }
 0x285   :  { %v3499_v8 = vld [vmem:[#allocation2 + $0x4a] sm:$0xf]  ;;  %v3466_v19 = vld [vmem:[#allocation2 + $0x41] sm:$0xf]  ;;  %v3469_v39 = vld [vmem:[#allocation2 + $0x59] sm:$0xf]  ;;  %v4039_v25 = vrot.slane %v7028_v11, %v10568_v53  ;;  %v7020_v50 = vpack.c.bf16 %v3403_v15, %v3402_v24  ;;  %6382 = vmatmul.mubr.bf16.vlgmr.msra.gmra.mrb[64].mxu0 %v3942_v14  ;;  %v4222_v29 = vrot.slane %v7045_v21, %v10568_v53 }
 0x286   :  { %v7651_v48 = vld [vmem:[%s10408_s4 + $0x1c8] sm:$0xff]   ;;  %v7044_v58 = vpack.c.bf16 %v3499_v8, %v3498_v0  ;;  %v4046_v28 = vrot.slane %v7029_v34, %v10568_v53  ;;  %v3468_v6 = vld [vmem:[#allocation2 + $0x51] sm:$0xf]  ;;  %6447 = vmatmul.mubr.bf16.vlgmr.msra.gmra.mrb[64].mxu1 %v4118_v27  ;;  %v3441_v9 = vld [vmem:[#allocation2 + $0x82] sm:$0xf]  ;;  %7356 = vmatpush3.bf16.msra.mxu0 %v7648_v33 }
 0x287   :  { %v7652_v4 = vld [vmem:[%s10408_s4 + $0x108] sm:$0xff]   ;;  %v7654_v57 = vld [vmem:[%s10408_s4 + $0x150] sm:$0xff]   ;;  %7396 = vmatpush3.bf16.msra.mxu1 %v7649_v43  ;;  %v3951_v16 = vrot.slane %v7020_v50, %v10568_v53  ;;  %v3504_v59 = vld [vmem:[#allocation2 + $0x82] sm:$0xf]  ;;  %7357 = vmatprep.subr.bf16.mxu0 %v7650_v3  ;;  %v7037_v61 = vpack.c.bf16 %v3469_v39, %v3468_v6 }
 0x288   :  { %v7653_v56 = vld [vmem:[%s10408_s4 + $0x188] sm:$0xff]   ;;  %v4215_v60 = vrot.slane %v7044_v58, %v10568_v53  ;;  %v7655_v13 = vld [vmem:[%s10408_s4 + $0x1d0] sm:$0xff]   ;;  %v4047_v12 = vcombine.low %v4039_v25, %v4046_v28  ;;  %7397 = vmatprep.subr.bf16.mxu1 %v7651_v48  ;;  %v3440_v38 = vld [vmem:[#allocation2 + $0x7a] sm:$0xf] }
 0x289   :  { %v3404_v10 = vld [vmem:[#allocation2 + $0x49] sm:$0xf]  ;;  %v3439_v1 = vld [vmem:[#allocation2 + $0x72] sm:$0xf]  ;;  %v3503_v36 = vld [vmem:[#allocation2 + $0x7a] sm:$0xf]  ;;  %v7031_v62 = vpack.c.bf16 %v3441_v9, %v3440_v38  ;;  %v4134_v63 = vrot.slane %v7037_v61, %v10568_v53 }
 0x28a   :  { %v3467_v47 = vld [vmem:[#allocation2 + $0x49] sm:$0xf]  ;;  %v7021_v54 = vpack.c.bf16 %v3405_v41, %v3404_v10  ;;  %v3502_v26 = vld [vmem:[#allocation2 + $0x72] sm:$0xf]  ;;  %v4223_v17 = vcombine.low %v4215_v60, %v4222_v29  ;;  %6389 = vmatprep.mubr.bf16.mxu0 %v4047_v12  ;;  %v3409_v23 = vld [vmem:[#allocation2 + $0x81] sm:$0xf]  ;;  %7358 = vmatpush3.bf16.msra.mxu0 %v7652_v4 }
 0x28b   :  { %v7036_v30 = vpack.c.bf16 %v3467_v47, %v3466_v19  ;;  %v3505_v22 = vld [vmem:[#allocation2 + $0x8a] sm:$0xf]  ;;  %v3407_v52 = vld [vmem:[#allocation2 + $0x71] sm:$0xf]  ;;  %v7046_v20 = vpack.c.bf16 %v3503_v36, %v3502_v26  ;;  %v3472_v40 = vld [vmem:[#allocation2 + $0x81] sm:$0xf]  ;;  %7398 = vmatpush3.bf16.msra.mxu1 %v7653_v56  ;;  %v4063_v7 = vrot.slane %v7031_v62, %v10568_v53  ;;  %7359 = vmatprep.subr.bf16.mxu0 %v7654_v57 }
 0x28c   :  { %v3958_v45 = vrot.slane %v7021_v54, %v10568_v53  ;;  %v3438_v31 = vld [vmem:[#allocation2 + $0x6a] sm:$0xf]  ;;  %v7656_v5 = vld [vmem:[%s10408_s4 + $0x110] sm:$0xff]   ;;  %6454 = vmatprep.mubr.bf16.mxu1 %v4223_v17  ;;  %v7047_v0 = vpack.c.bf16 %v3505_v22, %v3504_v59  ;;  %v7658_v55 = vld [vmem:[%s10408_s4 + $0x158] sm:$0xff]   ;;  %7399 = vmatprep.subr.bf16.mxu1 %v7655_v13 }
 0x28d   :  { %v4127_v44 = vrot.slane %v7036_v30, %v10568_v53  ;;  %v7030_v42 = vpack.c.bf16 %v3439_v1, %v3438_v31  ;;  %v3406_v46 = vld [vmem:[#allocation2 + $0x69] sm:$0xf]  ;;  %v7657_v35 = vld [vmem:[%s10408_s4 + $0x190] sm:$0xff]   ;;  %v4232_v51 = vrot.slane %v7046_v20, %v10568_v53  ;;  %v3408_v3 = vld [vmem:[#allocation2 + $0x79] sm:$0xf] }
 0x28e   :  { %v3959_v37 = vcombine.low %v3951_v16, %v3958_v45  ;;  %v7022_v33 = vpack.c.bf16 %v3407_v52, %v3406_v46  ;;  %v3470_v43 = vld [vmem:[#allocation2 + $0x71] sm:$0xf]  ;;  %v3473_v32 = vld [vmem:[#allocation2 + $0x89] sm:$0xf]  ;;  %v3443_v15 = vld [vmem:[#allocation2 + $0xa2] sm:$0xf]  ;;  %v4239_v18 = vrot.slane %v7047_v0, %v10568_v53  ;;  %v7023_v34 = vpack.c.bf16 %v3409_v23, %v3408_v3  ;;  %7360 = vmatpush3.bf16.msra.mxu0 %v7656_v5 }
 0x28f   :  { %v4056_v2 = vrot.slane %v7030_v42, %v10568_v53  ;;  %v4135_v49 = vcombine.low %v4127_v44, %v4134_v63  ;;  %v7659_v11 = vld [vmem:[%s10408_s4 + $0x1d8] sm:$0xff]   ;;  %v3445_v48 = vld [vmem:[#allocation2 + $0xb2] sm:$0xf]  ;;  %v7039_v21 = vpack.c.bf16 %v3473_v32, %v3472_v40  ;;  %v3506_v19 = vld [vmem:[#allocation2 + $0xa2] sm:$0xf]  ;;  %7400 = vmatpush3.bf16.msra.mxu1 %v7657_v35  ;;  %7361 = vmatprep.subr.bf16.mxu0 %v7658_v55 }
 0x290   :  { %v3471_v8 = vld [vmem:[#allocation2 + $0x79] sm:$0xf]  ;;  %v9955_v27 = vrot.slane %v7022_v33, %v10568_v53  ;;  %6390 = vmatmul.mubr.bf16.gmra.mrb[68].mxu0 %v3959_v37  ;;  %v4240_v39 = vcombine.low %v4232_v51, %v4239_v18  ;;  %v3975_v28 = vrot.slane %v7023_v34, %v10568_v53  ;;  %v7662_v4 = vld [vmem:[%s10408_s4 + $0x160] sm:$0xff]   ;;  %v3444_v56 = vld [vmem:[#allocation2 + $0xaa] sm:$0xf]  ;;  %7401 = vmatprep.subr.bf16.mxu1 %v7659_v11 }
 0x291   :  { %v4064_v41 = vcombine.low %v4056_v2, %v4063_v7  ;;  %v7660_v14 = vld [vmem:[%s10408_s4 + $0x118] sm:$0xff]   ;;  %v7038_v58 = vpack.c.bf16 %v3471_v8, %v3470_v43  ;;  %6455 = vmatmul.mubr.bf16.gmra.mrb[68].mxu1 %v4135_v49  ;;  %v3508_v50 = vld [vmem:[#allocation2 + $0xb2] sm:$0xf]  ;;  %v7663_v6 = vld [vmem:[%s10408_s4 + $0x1e0] sm:$0xff]   ;;  %v7033_v60 = vpack.c.bf16 %v3445_v48, %v3444_v56  ;;  %v4151_v13 = vrot.slane %v7039_v21, %v10568_v53 }
 0x292   :  { %v3442_v24 = vld [vmem:[#allocation2 + $0x9a] sm:$0xf]  ;;  %v3507_v29 = vld [vmem:[#allocation2 + $0xaa] sm:$0xf]  ;;  %6462 = vmatprep.mubr.bf16.mxu1 %v4240_v39  ;;  %v3411_v9 = vld [vmem:[#allocation2 + $0xa1] sm:$0xf]  ;;  %v3976_v61 = vcombine.low %v9955_v27, %v3975_v28  ;;  %7362 = vmatpush3.bf16.msra.mxu0 %v7660_v14 }
 0x293   :  { %v7661_v25 = vld [vmem:[%s10408_s4 + $0x198] sm:$0xff]   ;;  %v7032_v10 = vpack.c.bf16 %v3443_v15, %v3442_v24  ;;  %6397 = vmatprep.mubr.bf16.mxu0 %v4064_v41  ;;  %v4144_v57 = vrot.slane %v7038_v58, %v10568_v53  ;;  %v7048_v1 = vpack.c.bf16 %v3507_v29, %v3506_v19  ;;  %v3413_v26 = vld [vmem:[#allocation2 + $0xb1] sm:$0xf]  ;;  %v3474_v12 = vld [vmem:[#allocation2 + $0xa1] sm:$0xf]  ;;  %v4080_v30 = vrot.slane %v7033_v60, %v10568_v53 }
 0x294   :  { %v3509_v47 = vld [vmem:[#allocation2 + $0xba] sm:$0xf]  ;;  %v3476_v52 = vld [vmem:[#allocation2 + $0xb1] sm:$0xf]  ;;  %v3625_v45 = vld [vmem:[#allocation3 + $0x29] sm:$0xf]  ;;  %7402 = vmatpush3.bf16.msra.mxu1 %v7661_v25  ;;  %7363 = vmatprep.subr.bf16.mxu0 %v7662_v4 }
 0x295   :  { %v9967_v54 = vld [vmem:[#allocation2 + $0xb9] sm:$0xf]  ;;  %v4073_v16 = vrot.slane %v7032_v10, %v10568_v53  ;;  %v7049_v59 = vpack.c.bf16 %v3509_v47, %v3508_v50  ;;  %v3559_v17 = vld [vmem:[#allocation3 + $0x11] sm:$0xf]  ;;  %v4249_v31 = vrot.slane %v7048_v1, %v10568_v53  ;;  %v3412_v38 = vld [vmem:[#allocation2 + $0xa9] sm:$0xf]  ;;  %v4152_v63 = vcombine.low %v4144_v57, %v4151_v13  ;;  %7403 = vmatprep.subr.bf16.mxu1 %v7663_v6 }
 0x296   :  { %v3410_v22 = vld [vmem:[#allocation2 + $0x99] sm:$0xf]  ;;  %v3475_v36 = vld [vmem:[#allocation2 + $0xa9] sm:$0xf]  ;;  %v3561_v44 = vld [vmem:[#allocation3 + $0x21] sm:$0xf]  ;;  %v7025_v20 = vpack.c.bf16 %v3413_v26, %v3412_v38  ;;  %v7041_v33 = vpack.c.bf16 %v9967_v54, %v3476_v52 }
 0x297   :  { %v4256_v42 = vrot.slane %v7049_v59, %v10568_v53  ;;  %v7024_v62 = vpack.c.bf16 %v3411_v9, %v3410_v22  ;;  %v7040_v5 = vpack.c.bf16 %v3475_v36, %v3474_v12  ;;  %v3558_v46 = vld [vmem:[#allocation3 + $0x9] sm:$0xf]  ;;  %v3622_v23 = vld [vmem:[#allocation3 + $0x11] sm:$0xf]  ;;  %v3624_v37 = vld [vmem:[#allocation3 + $0x21] sm:$0xf]  ;;  %v4081_v32 = vcombine.low %v4073_v16, %v4080_v30 }
 0x298   :  { %v7664_v0 = vld [vmem:[%s10408_s4 + $0x120] sm:$0xff]   ;;  %v3560_v43 = vld [vmem:[#allocation3 + $0x19] sm:$0xf]  ;;  %v7058_v40 = vpack.c.bf16 %v3559_v17, %v3558_v46  ;;  %v7666_v7 = vld [vmem:[%s10408_s4 + $0x168] sm:$0xff]   ;;  %6398 = vmatmul.mubr.bf16.gmra.mrb[72].mxu0 %v3976_v61  ;;  %v7075_v18 = vpack.c.bf16 %v3625_v45, %v3624_v37  ;;  %v3992_v48 = vrot.slane %v7025_v20, %v10568_v53  ;;  %v4168_v58 = vrot.slane %v7041_v33, %v10568_v53 }
 0x299   :  { %v7665_v35 = vld [vmem:[%s10408_s4 + $0x1a0] sm:$0xff]   ;;  %v4257_v2 = vcombine.low %v4249_v31, %v4256_v42  ;;  %v7667_v51 = vld [vmem:[%s10408_s4 + $0x1e8] sm:$0xff]   ;;  %v7059_v55 = vpack.c.bf16 %v3561_v44, %v3560_v43  ;;  %v3623_v3 = vld [vmem:[#allocation3 + $0x19] sm:$0xf]  ;;  %6463 = vmatmul.mubr.bf16.gmra.mrb[72].mxu1 %v4152_v63  ;;  %6405 = vmatprep.mubr.bf16.mxu0 %v4081_v32  ;;  %v3985_v8 = vrot.slane %v7024_v62, %v10568_v53 }
 0x29a   :  { %v7668_v15 = vld [vmem:[%s10408_s4 + $0x128] sm:$0xff]   ;;  %v7074_v49 = vpack.c.bf16 %v3623_v3, %v3622_v23  ;;  %v3527_v11 = vld [vmem:[#allocation3 + $0x10] sm:$0xf]  ;;  %v4161_v41 = vrot.slane %v7040_v5, %v10568_v53  ;;  %7364 = vmatpush3.bf16.msra.mxu0 %v7664_v0  ;;  %7404 = vmatpush3.bf16.msra.mxu1 %v7665_v35  ;;  %v4374_v21 = vrot.slane %v7058_v40, %v10568_v53  ;;  %v3529_v19 = vld [vmem:[#allocation3 + $0x20] sm:$0xf] }
 0x29b   :  { %6470 = vmatprep.mubr.bf16.mxu1 %v4257_v2  ;;  %v7669_v34 = vld [vmem:[%s10408_s4 + $0x1a8] sm:$0xff]   ;;  %v4381_v24 = vrot.slane %v7059_v55, %v10568_v53  ;;  %v3590_v39 = vld [vmem:[#allocation3 + $0x10] sm:$0xf]  ;;  %v3592_v25 = vld [vmem:[#allocation3 + $0x20] sm:$0xf]  ;;  %7365 = vmatprep.subr.bf16.mxu0 %v7666_v7  ;;  %v4557_v10 = vrot.slane %v7075_v18, %v10568_v53  ;;  %v3993_v16 = vcombine.low %v3985_v8, %v3992_v48 }
 0x29c   :  { %v3526_v14 = vld [vmem:[#allocation3 + $0x8] sm:$0xf]  ;;  %7405 = vmatprep.subr.bf16.mxu1 %v7667_v51  ;;  %v7670_v28 = vld [vmem:[%s10408_s4 + $0x170] sm:$0xff]   ;;  %v4550_v56 = vrot.slane %v7074_v49, %v10568_v53  ;;  %v3629_v47 = vld [vmem:[#allocation3 + $0x59] sm:$0xf]  ;;  %v4169_v30 = vcombine.low %v4161_v41, %v4168_v58 }
 0x29d   :  { %v3593_v27 = vld [vmem:[#allocation3 + $0x28] sm:$0xf]  ;;  %v7671_v4 = vld [vmem:[%s10408_s4 + $0x1f0] sm:$0xff]   ;;  %v7050_v50 = vpack.c.bf16 %v3527_v11, %v3526_v14  ;;  %v3528_v60 = vld [vmem:[#allocation3 + $0x18] sm:$0xf]  ;;  %v4382_v59 = vcombine.low %v4374_v21, %v4381_v24 }
 0x29e   :  { %v7672_v6 = vld [vmem:[%s10408_s4 + $0x130] sm:$0xff]   ;;  %v3591_v29 = vld [vmem:[#allocation3 + $0x18] sm:$0xf]  ;;  %v3563_v54 = vld [vmem:[#allocation3 + $0x41] sm:$0xf]  ;;  %v7051_v57 = vpack.c.bf16 %v3529_v19, %v3528_v60  ;;  %v7067_v1 = vpack.c.bf16 %v3593_v27, %v3592_v25  ;;  %7366 = vmatpush3.bf16.msra.mxu0 %v7668_v15  ;;  %7406 = vmatpush3.bf16.msra.mxu1 %v7669_v34  ;;  %v4558_v45 = vcombine.low %v4550_v56, %v4557_v10 }
 0x29f   :  { %v7066_v13 = vpack.c.bf16 %v3591_v29, %v3590_v39  ;;  %v3565_v9 = vld [vmem:[#allocation3 + $0x51] sm:$0xf]  ;;  %v3626_v26 = vld [vmem:[#allocation3 + $0x41] sm:$0xf]  ;;  %v7674_v52 = vld [vmem:[%s10408_s4 + $0x178] sm:$0xff]   ;;  %7367 = vmatprep.subr.bf16.mxu0 %v7670_v28  ;;  %7407 = vmatprep.subr.bf16.mxu1 %v7671_v4  ;;  %v10022_v31 = vrot.slane %v7050_v50, %v10568_v53 }
 0x2a0   :  { %v3628_v12 = vld [vmem:[#allocation3 + $0x51] sm:$0xf]  ;;  %v3562_v17 = vld [vmem:[#allocation3 + $0x39] sm:$0xf]  ;;  %v3564_v38 = vld [vmem:[#allocation3 + $0x49] sm:$0xf]  ;;  %6406 = vmatmul.mubr.bf16.gmra.mrb[76].mxu0 %v3993_v16  ;;  %v4293_v23 = vrot.slane %v7051_v57, %v10568_v53  ;;  %v4469_v63 = vrot.slane %v7067_v1, %v10568_v53 }
 0x2a1   :  { %v7673_v22 = vld [vmem:[%s10408_s4 + $0x1b0] sm:$0xff]   ;;  %v7675_v61 = vld [vmem:[%s10408_s4 + $0x1f8] sm:$0xff]   ;;  %v7060_v36 = vpack.c.bf16 %v3563_v54, %v3562_v17  ;;  %v3627_v44 = vld [vmem:[#allocation3 + $0x49] sm:$0xf]  ;;  %6471 = vmatmul.mubr.bf16.gmra.mrb[76].mxu1 %v4169_v30  ;;  %v7061_v20 = vpack.c.bf16 %v3565_v9, %v3564_v38  ;;  %v7077_v46 = vpack.c.bf16 %v3629_v47, %v3628_v12  ;;  %6511 = vmatprep.mubr.bf16.mxu0 %v4382_v59 }
 0x2a2   :  { %v7676_v42 = vld [vmem:[%s10408_s4 + $0x138] sm:$0xff]   ;;  %v7076_v5 = vpack.c.bf16 %v3627_v44, %v3626_v26  ;;  %6576 = vmatprep.mubr.bf16.mxu1 %v4558_v45  ;;  %v4462_v37 = vrot.slane %v7066_v13, %v10568_v53  ;;  %v7678_v0 = vld [vmem:[%s10408_s4 + $0x240] sm:$0xff]   ;;  %7368 = vmatpush3.bf16.msra.mxu0 %v7672_v6  ;;  %v3533_v43 = vld [vmem:[#allocation3 + $0x50] sm:$0xf]  ;;  %v4294_v8 = vcombine.low %v10022_v31, %v4293_v23 }
 0x2a3   :  { %v7677_v62 = vld [vmem:[%s10408_s4 + $0x1b8] sm:$0xff]   ;;  %v7679_v35 = vld [vmem:[%s10408_s4 + $0x2c0] sm:$0xff]   ;;  %7408 = vmatpush3.bf16.msra.mxu1 %v7673_v22  ;;  %v3596_v32 = vld [vmem:[#allocation3 + $0x50] sm:$0xf]  ;;  %7369 = vmatprep.subr.bf16.mxu0 %v7674_v52  ;;  %v4391_v15 = vrot.slane %v7060_v36, %v10568_v53  ;;  %v4398_v49 = vrot.slane %v7061_v20, %v10568_v53  ;;  %v4574_v11 = vrot.slane %v7077_v46, %v10568_v53 }
 0x2a4   :  { %v3531_v33 = vld [vmem:[#allocation3 + $0x40] sm:$0xf]  ;;  %v3597_v2 = vld [vmem:[#allocation3 + $0x58] sm:$0xf]  ;;  %7409 = vmatprep.subr.bf16.mxu1 %v7675_v61  ;;  %v3532_v51 = vld [vmem:[#allocation3 + $0x48] sm:$0xf]  ;;  %v4567_v18 = vrot.slane %v7076_v5, %v10568_v53  ;;  %v4470_v48 = vcombine.low %v4462_v37, %v4469_v63 }
 0x2a5   :  { %v3594_v40 = vld [vmem:[#allocation3 + $0x40] sm:$0xf]  ;;  %v3530_v7 = vld [vmem:[#allocation3 + $0x38] sm:$0xf]  ;;  %v3567_v55 = vld [vmem:[#allocation3 + $0x71] sm:$0xf]  ;;  %v7053_v19 = vpack.c.bf16 %v3533_v43, %v3532_v51  ;;  %v7069_v10 = vpack.c.bf16 %v3597_v2, %v3596_v32  ;;  %v4399_v60 = vcombine.low %v4391_v15, %v4398_v49 }
 0x2a6   :  { %v10039_v3 = vld [vmem:[#allocation3 + $0x89] sm:$0xf]  ;;  %v3569_v34 = vld [vmem:[#allocation3 + $0x81] sm:$0xf]  ;;  %v3630_v27 = vld [vmem:[#allocation3 + $0x71] sm:$0xf]  ;;  %7370 = vmatpush3.bf16.msra.mxu0 %v7676_v42  ;;  %v7052_v24 = vpack.c.bf16 %v3531_v33, %v3530_v7  ;;  %v4575_v29 = vcombine.low %v4567_v18, %v4574_v11 }
 0x2a7   :  { %v7680_v41 = vld [vmem:[%s10408_s4 + $0x200] sm:$0xff]   ;;  %v3595_v14 = vld [vmem:[#allocation3 + $0x48] sm:$0xf]  ;;  %7410 = vmatpush3.bf16.msra.mxu1 %v7677_v62  ;;  %v3568_v28 = vld [vmem:[#allocation3 + $0x79] sm:$0xf]  ;;  %7435 = vmatprep.subr.bf16.mxu0 %v7678_v0  ;;  %v4310_v22 = vrot.slane %v7053_v19, %v10568_v53  ;;  %v4486_v44 = vrot.slane %v7069_v10, %v10568_v53 }
 0x2a8   :  { %v3632_v58 = vld [vmem:[#allocation3 + $0x81] sm:$0xf]  ;;  %v7068_v39 = vpack.c.bf16 %v3595_v14, %v3594_v40  ;;  %v3566_v25 = vld [vmem:[#allocation3 + $0x69] sm:$0xf]  ;;  %7475 = vmatprep.subr.bf16.mxu1 %v7679_v35  ;;  %v7063_v47 = vpack.c.bf16 %v3569_v34, %v3568_v28  ;;  %v3631_v6 = vld [vmem:[#allocation3 + $0x79] sm:$0xf]  ;;  %v4303_v59 = vrot.slane %v7052_v24, %v10568_v53 }
 0x2a9   :  { %v7681_v21 = vld [vmem:[%s10408_s4 + $0x280] sm:$0xff]   ;;  %v7682_v4 = vld [vmem:[%s10408_s4 + $0x248] sm:$0xff]   ;;  %v7062_v50 = vpack.c.bf16 %v3567_v55, %v3566_v25  ;;  %v7078_v54 = vpack.c.bf16 %v3631_v6, %v3630_v27  ;;  %v7079_v57 = vpack.c.bf16 %v10039_v3, %v3632_v58  ;;  %v3535_v13 = vld [vmem:[#allocation3 + $0x70] sm:$0xf]  ;;  %6512 = vmatmul.mubr.bf16.vlgmr.msra.gmra.mrb[80].mxu0 %v4294_v8 }
 0x2aa   :  { %v7683_v56 = vld [vmem:[%s10408_s4 + $0x2c8] sm:$0xff]   ;;  %v3537_v1 = vld [vmem:[#allocation3 + $0x80] sm:$0xf]  ;;  %v3598_v9 = vld [vmem:[#allocation3 + $0x70] sm:$0xf]  ;;  %6577 = vmatmul.mubr.bf16.vlgmr.msra.gmra.mrb[80].mxu1 %v4470_v48  ;;  %6519 = vmatprep.mubr.bf16.mxu0 %v4399_v60  ;;  %v4479_v52 = vrot.slane %v7068_v39, %v10568_v53  ;;  %v4415_v62 = vrot.slane %v7063_v47, %v10568_v53  ;;  %v4311_v51 = vcombine.low %v4303_v59, %v4310_v22 }
 0x2ab   :  { %v7684_v26 = vld [vmem:[%s10408_s4 + $0x208] sm:$0xff]   ;;  %v3600_v16 = vld [vmem:[#allocation3 + $0x80] sm:$0xf]  ;;  %6584 = vmatprep.mubr.bf16.mxu1 %v4575_v29  ;;  %v7686_v17 = vld [vmem:[%s10408_s4 + $0x250] sm:$0xff]   ;;  %7436 = vmatpush3.bf16.msra.mxu0 %v7680_v41  ;;  %v4408_v42 = vrot.slane %v7062_v50, %v10568_v53  ;;  %v4584_v37 = vrot.slane %v7078_v54, %v10568_v53  ;;  %v4591_v63 = vrot.slane %v7079_v57, %v10568_v53 }
 0x2ac   :  { %v7685_v12 = vld [vmem:[%s10408_s4 + $0x288] sm:$0xff]   ;;  %v7687_v45 = vld [vmem:[%s10408_s4 + $0x2d0] sm:$0xff]   ;;  %v3536_v31 = vld [vmem:[#allocation3 + $0x78] sm:$0xf]  ;;  %7476 = vmatpush3.bf16.msra.mxu1 %v7681_v21  ;;  %7437 = vmatprep.subr.bf16.mxu0 %v7682_v4  ;;  %v4487_v55 = vcombine.low %v4479_v52, %v4486_v44 }
 0x2ad   :  { %v3601_v30 = vld [vmem:[#allocation3 + $0x88] sm:$0xf]  ;;  %v3599_v38 = vld [vmem:[#allocation3 + $0x78] sm:$0xf]  ;;  %v3571_v36 = vld [vmem:[#allocation3 + $0xa1] sm:$0xf]  ;;  %7477 = vmatprep.subr.bf16.mxu1 %v7683_v56  ;;  %v7055_v33 = vpack.c.bf16 %v3537_v1, %v3536_v31  ;;  %v4416_v3 = vcombine.low %v4408_v42, %v4415_v62  ;;  %v4592_v11 = vcombine.low %v4584_v37, %v4591_v63 }
 0x2ae   :  { %v3534_v61 = vld [vmem:[#allocation3 + $0x68] sm:$0xf]  ;;  %v3570_v20 = vld [vmem:[#allocation3 + $0x99] sm:$0xf]  ;;  %v3573_v46 = vld [vmem:[#allocation3 + $0xb1] sm:$0xf]  ;;  %v7070_v43 = vpack.c.bf16 %v3599_v38, %v3598_v9  ;;  %v7071_v32 = vpack.c.bf16 %v3601_v30, %v3600_v16 }
 0x2af   :  { %v3572_v5 = vld [vmem:[#allocation3 + $0xa9] sm:$0xf]  ;;  %v3637_v23 = vld [vmem:[#allocation3 + $0xb9] sm:$0xf]  ;;  %v3634_v0 = vld [vmem:[#allocation3 + $0xa1] sm:$0xf]  ;;  %v7054_v35 = vpack.c.bf16 %v3535_v13, %v3534_v61  ;;  %v7064_v2 = vpack.c.bf16 %v3571_v36, %v3570_v20  ;;  %7438 = vmatpush3.bf16.msra.mxu0 %v7684_v26  ;;  %v4327_v21 = vrot.slane %v7055_v33, %v10568_v53 }
 0x2b0   :  { %v3636_v40 = vld [vmem:[#allocation3 + $0xb1] sm:$0xf]  ;;  %v7065_v7 = vpack.c.bf16 %v3573_v46, %v3572_v5  ;;  %7478 = vmatpush3.bf16.msra.mxu1 %v7685_v12  ;;  %v3635_v18 = vld [vmem:[#allocation3 + $0xa9] sm:$0xf]  ;;  %7439 = vmatprep.subr.bf16.mxu0 %v7686_v17  ;;  %v7690_v34 = vld [vmem:[%s10408_s4 + $0x258] sm:$0xff]   ;;  %v4496_v24 = vrot.slane %v7070_v43, %v10568_v53  ;;  %v4503_v19 = vrot.slane %v7071_v32, %v10568_v53 }
 0x2b1   :  { %v7688_v15 = vld [vmem:[%s10408_s4 + $0x210] sm:$0xff]   ;;  %7479 = vmatprep.subr.bf16.mxu1 %v7687_v45  ;;  %v7691_v8 = vld [vmem:[%s10408_s4 + $0x2d8] sm:$0xff]   ;;  %v7080_v48 = vpack.c.bf16 %v3635_v18, %v3634_v0  ;;  %v7081_v41 = vpack.c.bf16 %v3637_v23, %v3636_v40  ;;  %6520 = vmatmul.mubr.bf16.gmra.mrb[84].mxu0 %v4311_v51  ;;  %v4320_v58 = vrot.slane %v7054_v35, %v10568_v53  ;;  %v7694_v39 = vld [vmem:[%s10408_s4 + $0x260] sm:$0xff]  }
 0x2b2   :  { %v7689_v49 = vld [vmem:[%s10408_s4 + $0x290] sm:$0xff]   ;;  %6585 = vmatmul.mubr.bf16.gmra.mrb[84].mxu1 %v4487_v55  ;;  %v7692_v14 = vld [vmem:[%s10408_s4 + $0x218] sm:$0xff]   ;;  %6527 = vmatprep.mubr.bf16.mxu0 %v4416_v3  ;;  %v7695_v25 = vld [vmem:[%s10408_s4 + $0x2e0] sm:$0xff]   ;;  %v4425_v28 = vrot.slane %v7064_v2, %v10568_v53  ;;  %v4432_v4 = vrot.slane %v7065_v7, %v10568_v53  ;;  %v4504_v17 = vcombine.low %v4496_v24, %v4503_v19 }
 0x2b3   :  { %v7693_v27 = vld [vmem:[%s10408_s4 + $0x298] sm:$0xff]   ;;  %6592 = vmatprep.mubr.bf16.mxu1 %v4592_v11  ;;  %v3539_v56 = vld [vmem:[#allocation3 + $0xa0] sm:$0xf]  ;;  %7440 = vmatpush3.bf16.msra.mxu0 %v7688_v15  ;;  %v3540_v47 = vld [vmem:[#allocation3 + $0xa8] sm:$0xf]  ;;  %v4601_v54 = vrot.slane %v7080_v48, %v10568_v53  ;;  %v4608_v57 = vrot.slane %v7081_v41, %v10568_v53  ;;  %v4328_v30 = vcombine.low %v4320_v58, %v4327_v21 }
 0x2b4   :  { %v3605_v10 = vld [vmem:[#allocation3 + $0xb8] sm:$0xf]  ;;  %7480 = vmatpush3.bf16.msra.mxu1 %v7689_v49  ;;  %v3541_v6 = vld [vmem:[#allocation3 + $0xb0] sm:$0xf]  ;;  %v3602_v60 = vld [vmem:[#allocation3 + $0xa0] sm:$0xf]  ;;  %7441 = vmatprep.subr.bf16.mxu0 %v7690_v34  ;;  %v4433_v45 = vcombine.low %v4425_v28, %v4432_v4 }
 0x2b5   :  { %v3538_v50 = vld [vmem:[#allocation3 + $0x98] sm:$0xf]  ;;  %v3604_v29 = vld [vmem:[#allocation3 + $0xb0] sm:$0xf]  ;;  %7481 = vmatprep.subr.bf16.mxu1 %v7691_v8  ;;  %v3603_v13 = vld [vmem:[#allocation3 + $0xa8] sm:$0xf]  ;;  %v7057_v38 = vpack.c.bf16 %v3541_v6, %v3540_v47  ;;  %v4609_v5 = vcombine.low %v4601_v54, %v4608_v57 }
 0x2b6   :  { %v3686_v1 = vld [vmem:[#allocation4 + $0x2] sm:$0xf]  ;;  %v3687_v9 = vld [vmem:[#allocation4 + $0xa] sm:$0xf]  ;;  %v3688_v26 = vld [vmem:[#allocation4 + $0x12] sm:$0xf]  ;;  %v7056_v31 = vpack.c.bf16 %v3539_v56, %v3538_v50  ;;  %v7072_v44 = vpack.c.bf16 %v3603_v13, %v3602_v60  ;;  %v7073_v42 = vpack.c.bf16 %v3605_v10, %v3604_v29 }
 0x2b7   :  { %v3689_v12 = vld [vmem:[#allocation4 + $0x1a] sm:$0xf]  ;;  %v3751_v16 = vld [vmem:[#allocation4 + $0x12] sm:$0xf]  ;;  %v7696_v59 = vld [vmem:[%s10408_s4 + $0x220] sm:$0xff]   ;;  %7442 = vmatpush3.bf16.msra.mxu0 %v7692_v14  ;;  %v7090_v35 = vpack.c.bf16 %v3687_v9, %v3686_v1  ;;  %v4344_v43 = vrot.slane %v7057_v38, %v10568_v53 }
 0x2b8   :  { %v7697_v22 = vld [vmem:[%s10408_s4 + $0x2a0] sm:$0xff]   ;;  %v7698_v61 = vld [vmem:[%s10408_s4 + $0x268] sm:$0xff]   ;;  %7482 = vmatpush3.bf16.msra.mxu1 %v7693_v27  ;;  %v7091_v62 = vpack.c.bf16 %v3689_v12, %v3688_v26  ;;  %v3752_v20 = vld [vmem:[#allocation4 + $0x1a] sm:$0xf]  ;;  %7443 = vmatprep.subr.bf16.mxu0 %v7694_v39  ;;  %v4337_v33 = vrot.slane %v7056_v31, %v10568_v53  ;;  %v4513_v2 = vrot.slane %v7072_v44, %v10568_v53 }
 0x2b9   :  { %v3753_v52 = vld [vmem:[#allocation4 + $0x22] sm:$0xf]  ;;  %v3750_v36 = vld [vmem:[#allocation4 + $0xa] sm:$0xf]  ;;  %7483 = vmatprep.subr.bf16.mxu1 %v7695_v25  ;;  %6528 = vmatmul.mubr.bf16.gmra.mrb[88].mxu0 %v4328_v30  ;;  %v7702_v40 = vld [vmem:[%s10408_s4 + $0x270] sm:$0xff]   ;;  %v4520_v7 = vrot.slane %v7073_v42, %v10568_v53  ;;  %v4726_v41 = vrot.slane %v7090_v35, %v10568_v53 }
 0x2ba   :  { %v7699_v46 = vld [vmem:[%s10408_s4 + $0x2e8] sm:$0xff]   ;;  %v7106_v23 = vpack.c.bf16 %v3751_v16, %v3750_v36  ;;  %v7107_v37 = vpack.c.bf16 %v3753_v52, %v3752_v20  ;;  %6593 = vmatmul.mubr.bf16.gmra.mrb[88].mxu1 %v4504_v17  ;;  %6535 = vmatprep.mubr.bf16.mxu0 %v4433_v45  ;;  %v7703_v32 = vld [vmem:[%s10408_s4 + $0x2f0] sm:$0xff]   ;;  %v4733_v51 = vrot.slane %v7091_v62, %v10568_v53  ;;  %v3654_v55 = vld [vmem:[#allocation4 + $0x1] sm:$0xf] }
 0x2bb   :  { %v7700_v63 = vld [vmem:[%s10408_s4 + $0x228] sm:$0xff]   ;;  %6600 = vmatprep.mubr.bf16.mxu1 %v4609_v5  ;;  %7444 = vmatpush3.bf16.msra.mxu0 %v7696_v59  ;;  %v3656_v15 = vld [vmem:[#allocation4 + $0x11] sm:$0xf]  ;;  %v3657_v11 = vld [vmem:[#allocation4 + $0x19] sm:$0xf]  ;;  %v4345_v25 = vcombine.low %v4337_v33, %v4344_v43  ;;  %v4521_v47 = vcombine.low %v4513_v2, %v4520_v7 }
 0x2bc   :  { %v7701_v0 = vld [vmem:[%s10408_s4 + $0x2a8] sm:$0xff]   ;;  %7484 = vmatpush3.bf16.msra.mxu1 %v7697_v22  ;;  %7445 = vmatprep.subr.bf16.mxu0 %v7698_v61  ;;  %v4902_v49 = vrot.slane %v7106_v23, %v10568_v53  ;;  %v4909_v18 = vrot.slane %v7107_v37, %v10568_v53  ;;  %v3719_v34 = vld [vmem:[#allocation4 + $0x11] sm:$0xf]  ;;  %v3721_v8 = vld [vmem:[#allocation4 + $0x21] sm:$0xf]  ;;  %v7083_v56 = vpack.c.bf16 %v3657_v11, %v3656_v15 }
 0x2bd   :  { %v3655_v3 = vld [vmem:[#allocation4 + $0x9] sm:$0xf]  ;;  %7485 = vmatprep.subr.bf16.mxu1 %v7699_v46  ;;  %v7704_v48 = vld [vmem:[%s10408_s4 + $0x230] sm:$0xff]   ;;  %v3720_v58 = vld [vmem:[#allocation4 + $0x19] sm:$0xf]  ;;  %v4734_v6 = vcombine.low %v4726_v41, %v4733_v51 }
 0x2be   :  { %v7705_v14 = vld [vmem:[%s10408_s4 + $0x2b0] sm:$0xff]   ;;  %v3718_v27 = vld [vmem:[#allocation4 + $0x9] sm:$0xf]  ;;  %v3691_v24 = vld [vmem:[#allocation4 + $0x3a] sm:$0xf]  ;;  %v7082_v60 = vpack.c.bf16 %v3655_v3, %v3654_v55  ;;  %v4910_v54 = vcombine.low %v4902_v49, %v4909_v18  ;;  %v7099_v13 = vpack.c.bf16 %v3721_v8, %v3720_v58  ;;  %v4645_v59 = vrot.slane %v7083_v56, %v10568_v53 }
 0x2bf   :  { %v3690_v21 = vld [vmem:[#allocation4 + $0x32] sm:$0xf]  ;;  %v3692_v19 = vld [vmem:[#allocation4 + $0x42] sm:$0xf]  ;;  %v7706_v28 = vld [vmem:[%s10408_s4 + $0x278] sm:$0xff]   ;;  %7446 = vmatpush3.bf16.msra.mxu0 %v7700_v63  ;;  %v7098_v57 = vpack.c.bf16 %v3719_v34, %v3718_v27 }
 0x2c0   :  { %v3755_v39 = vld [vmem:[#allocation4 + $0x42] sm:$0xf]  ;;  %v7707_v4 = vld [vmem:[%s10408_s4 + $0x2f8] sm:$0xff]   ;;  %v3693_v10 = vld [vmem:[#allocation4 + $0x4a] sm:$0xf]  ;;  %7486 = vmatpush3.bf16.msra.mxu1 %v7701_v0  ;;  %7447 = vmatprep.subr.bf16.mxu0 %v7702_v40  ;;  %v7092_v17 = vpack.c.bf16 %v3691_v24, %v3690_v21  ;;  %v4638_v36 = vrot.slane %v7082_v60, %v10568_v53  ;;  %v4821_v42 = vrot.slane %v7099_v13, %v10568_v53 }
 0x2c1   :  { %v3757_v50 = vld [vmem:[#allocation4 + $0x52] sm:$0xf]  ;;  %v3754_v29 = vld [vmem:[#allocation4 + $0x3a] sm:$0xf]  ;;  %7487 = vmatprep.subr.bf16.mxu1 %v7703_v32  ;;  %v3756_v1 = vld [vmem:[#allocation4 + $0x4a] sm:$0xf]  ;;  %6536 = vmatmul.mubr.bf16.gmra.mrb[92].mxu0 %v4345_v25  ;;  %v7093_v12 = vpack.c.bf16 %v3693_v10, %v3692_v19  ;;  %v4814_v44 = vrot.slane %v7098_v57, %v10568_v53 }
 0x2c2   :  { %6601 = vmatmul.mubr.bf16.gmra.mrb[92].mxu1 %v4521_v47  ;;  %v7708_v9 = vld [vmem:[%s10408_s4 + $0x238] sm:$0xff]   ;;  %v7108_v16 = vpack.c.bf16 %v3755_v39, %v3754_v29  ;;  %v7109_v30 = vpack.c.bf16 %v3757_v50, %v3756_v1  ;;  %6641 = vmatprep.mubr.bf16.mxu0 %v4734_v6  ;;  %v7710_v22 = vld [vmem:[%s10408_s4 + $0x340] sm:$0xff]   ;;  %v10168_v45 = vld [vmem:[#allocation4 + $0x31] sm:$0xf]  ;;  %v4646_v40 = vcombine.low %v4638_v36, %v4645_v59 }
 0x2c3   :  { %v7709_v26 = vld [vmem:[%s10408_s4 + $0x2b8] sm:$0xff]   ;;  %6706 = vmatprep.mubr.bf16.mxu1 %v4910_v54  ;;  %v7711_v52 = vld [vmem:[%s10408_s4 + $0x3c0] sm:$0xff]   ;;  %7448 = vmatpush3.bf16.msra.mxu0 %v7704_v48  ;;  %v3661_v62 = vld [vmem:[#allocation4 + $0x49] sm:$0xf]  ;;  %v4750_v37 = vrot.slane %v7093_v12, %v10568_v53  ;;  %v4743_v32 = vrot.slane %v7092_v17, %v10568_v53  ;;  %v4822_v18 = vcombine.low %v4814_v44, %v4821_v42 }
 0x2c4   :  { %7488 = vmatpush3.bf16.msra.mxu1 %v7705_v14  ;;  %v10170_v61 = vld [vmem:[#allocation4 + $0x39] sm:$0xf]  ;;  %v3660_v31 = vld [vmem:[#allocation4 + $0x41] sm:$0xf]  ;;  %7449 = vmatprep.subr.bf16.mxu0 %v7706_v28  ;;  %v3724_v5 = vld [vmem:[#allocation4 + $0x49] sm:$0xf]  ;;  %v4919_v63 = vrot.slane %v7108_v16, %v10568_v53  ;;  %v4926_v0 = vrot.slane %v7109_v30, %v10568_v53 }
 0x2c5   :  { %v3723_v38 = vld [vmem:[#allocation4 + $0x41] sm:$0xf]  ;;  %7489 = vmatprep.subr.bf16.mxu1 %v7707_v4  ;;  %v3722_v20 = vld [vmem:[#allocation4 + $0x39] sm:$0xf]  ;;  %v3725_v46 = vld [vmem:[#allocation4 + $0x51] sm:$0xf]  ;;  %v7085_v55 = vpack.c.bf16 %v3661_v62, %v3660_v31  ;;  %v7084_v11 = vpack.c.bf16 %v10170_v61, %v10168_v45  ;;  %v4751_v41 = vcombine.low %v4743_v32, %v4750_v37 }
 0x2c6   :  { %v3696_v23 = vld [vmem:[#allocation4 + $0x72] sm:$0xf]  ;;  %v3694_v35 = vld [vmem:[#allocation4 + $0x62] sm:$0xf]  ;;  %v3695_v33 = vld [vmem:[#allocation4 + $0x6a] sm:$0xf]  ;;  %v7100_v3 = vpack.c.bf16 %v3723_v38, %v3722_v20  ;;  %v7101_v15 = vpack.c.bf16 %v3725_v46, %v3724_v5  ;;  %v4927_v14 = vcombine.low %v4919_v63, %v4926_v0 }
 0x2c7   :  { %v3759_v43 = vld [vmem:[#allocation4 + $0x72] sm:$0xf]  ;;  %v7712_v2 = vld [vmem:[%s10408_s4 + $0x300] sm:$0xff]   ;;  %7450 = vmatpush3.bf16.msra.mxu0 %v7708_v9  ;;  %v3697_v49 = vld [vmem:[#allocation4 + $0x7a] sm:$0xf]  ;;  %v7094_v25 = vpack.c.bf16 %v3695_v33, %v3694_v35  ;;  %v4662_v28 = vrot.slane %v7085_v55, %v10568_v53  ;;  %v4655_v13 = vrot.slane %v7084_v11, %v10568_v53 }
 0x2c8   :  { %v7713_v7 = vld [vmem:[%s10408_s4 + $0x380] sm:$0xff]   ;;  %7490 = vmatpush3.bf16.msra.mxu1 %v7709_v26  ;;  %7515 = vmatprep.subr.bf16.mxu0 %v7710_v22  ;;  %v7095_v34 = vpack.c.bf16 %v3697_v49, %v3696_v23  ;;  %v3758_v8 = vld [vmem:[#allocation4 + $0x6a] sm:$0xf]  ;;  %v3760_v48 = vld [vmem:[#allocation4 + $0x7a] sm:$0xf]  ;;  %v4831_v4 = vrot.slane %v7100_v3, %v10568_v53  ;;  %v4838_v56 = vrot.slane %v7101_v15, %v10568_v53 }
 0x2c9   :  { %v3761_v51 = vld [vmem:[#allocation4 + $0x82] sm:$0xf]  ;;  %7555 = vmatprep.subr.bf16.mxu1 %v7711_v52  ;;  %v7714_v27 = vld [vmem:[%s10408_s4 + $0x348] sm:$0xff]   ;;  %v7110_v21 = vpack.c.bf16 %v3759_v43, %v3758_v8  ;;  %v7718_v10 = vld [vmem:[%s10408_s4 + $0x350] sm:$0xff]   ;;  %v4760_v30 = vrot.slane %v7094_v25, %v10568_v53  ;;  %v4663_v61 = vcombine.low %v4655_v13, %v4662_v28 }
 0x2ca   :  { %v7715_v58 = vld [vmem:[%s10408_s4 + $0x3c8] sm:$0xff]   ;;  %v7111_v24 = vpack.c.bf16 %v3761_v51, %v3760_v48  ;;  %6642 = vmatmul.mubr.bf16.vlgmr.msra.gmra.mrb[96].mxu0 %v4646_v40  ;;  %v7719_v50 = vld [vmem:[%s10408_s4 + $0x3d0] sm:$0xff]   ;;  %v3662_v47 = vld [vmem:[#allocation4 + $0x61] sm:$0xf]  ;;  %v4767_v60 = vrot.slane %v7095_v34, %v10568_v53  ;;  %v4839_v31 = vcombine.low %v4831_v4, %v4838_v56 }
 0x2cb   :  { %6707 = vmatmul.mubr.bf16.vlgmr.msra.gmra.mrb[96].mxu1 %v4822_v18  ;;  %v7716_v19 = vld [vmem:[%s10408_s4 + $0x308] sm:$0xff]   ;;  %6649 = vmatprep.mubr.bf16.mxu0 %v4751_v41  ;;  %v3664_v6 = vld [vmem:[#allocation4 + $0x71] sm:$0xf]  ;;  %v3729_v57 = vld [vmem:[#allocation4 + $0x81] sm:$0xf]  ;;  %v4936_v1 = vrot.slane %v7110_v21, %v10568_v53 }
 0x2cc   :  { %v7717_v39 = vld [vmem:[%s10408_s4 + $0x388] sm:$0xff]   ;;  %6714 = vmatprep.mubr.bf16.mxu1 %v4927_v14  ;;  %7516 = vmatpush3.bf16.msra.mxu0 %v7712_v2  ;;  %v3727_v54 = vld [vmem:[#allocation4 + $0x71] sm:$0xf]  ;;  %v4943_v9 = vrot.slane %v7111_v24, %v10568_v53  ;;  %v3665_v26 = vld [vmem:[#allocation4 + $0x79] sm:$0xf]  ;;  %v4768_v20 = vcombine.low %v4760_v30, %v4767_v60 }
 0x2cd   :  { %7556 = vmatpush3.bf16.msra.mxu1 %v7713_v7  ;;  %v3663_v29 = vld [vmem:[#allocation4 + $0x69] sm:$0xf]  ;;  %7517 = vmatprep.subr.bf16.mxu0 %v7714_v27  ;;  %v3700_v16 = vld [vmem:[#allocation4 + $0xa2] sm:$0xf]  ;;  %v7720_v59 = vld [vmem:[%s10408_s4 + $0x310] sm:$0xff]   ;;  %v7087_v22 = vpack.c.bf16 %v3665_v26, %v3664_v6 }
 0x2ce   :  { %7557 = vmatprep.subr.bf16.mxu1 %v7715_v58  ;;  %v3726_v12 = vld [vmem:[#allocation4 + $0x69] sm:$0xf]  ;;  %v3728_v52 = vld [vmem:[#allocation4 + $0x79] sm:$0xf]  ;;  %v3763_v17 = vld [vmem:[#allocation4 + $0xa2] sm:$0xf]  ;;  %v7086_v46 = vpack.c.bf16 %v3663_v29, %v3662_v47  ;;  %v4944_v0 = vcombine.low %v4936_v1, %v4943_v9 }
 0x2cf   :  { %v3765_v45 = vld [vmem:[#allocation4 + $0xb2] sm:$0xf]  ;;  %v7102_v38 = vpack.c.bf16 %v3727_v54, %v3726_v12  ;;  %v7103_v36 = vpack.c.bf16 %v3729_v57, %v3728_v52  ;;  %v3699_v42 = vld [vmem:[#allocation4 + $0x9a] sm:$0xf]  ;;  %v3701_v62 = vld [vmem:[#allocation4 + $0xaa] sm:$0xf]  ;;  %v4679_v7 = vrot.slane %v7087_v22, %v10568_v53 }
 0x2d0   :  { %v3698_v44 = vld [vmem:[#allocation4 + $0x92] sm:$0xf]  ;;  %7518 = vmatpush3.bf16.msra.mxu0 %v7716_v19  ;;  %v7097_v23 = vpack.c.bf16 %v3701_v62, %v3700_v16  ;;  %v3762_v37 = vld [vmem:[#allocation4 + $0x9a] sm:$0xf]  ;;  %v3764_v63 = vld [vmem:[#allocation4 + $0xaa] sm:$0xf]  ;;  %v4672_v34 = vrot.slane %v7086_v46, %v10568_v53 }
 0x2d1   :  { %7558 = vmatpush3.bf16.msra.mxu1 %v7717_v39  ;;  %v7721_v5 = vld [vmem:[%s10408_s4 + $0x390] sm:$0xff]   ;;  %7519 = vmatprep.subr.bf16.mxu0 %v7718_v10  ;;  %v7722_v35 = vld [vmem:[%s10408_s4 + $0x358] sm:$0xff]   ;;  %v7112_v43 = vpack.c.bf16 %v3763_v17, %v3762_v37  ;;  %v7113_v40 = vpack.c.bf16 %v3765_v45, %v3764_v63  ;;  %v7096_v51 = vpack.c.bf16 %v3699_v42, %v3698_v44  ;;  %v7726_v15 = vld [vmem:[%s10408_s4 + $0x360] sm:$0xff]  }
 0x2d2   :  { %7559 = vmatprep.subr.bf16.mxu1 %v7719_v50  ;;  %v7723_v33 = vld [vmem:[%s10408_s4 + $0x3d8] sm:$0xff]   ;;  %6650 = vmatmul.mubr.bf16.gmra.mrb[100].mxu0 %v4663_v61  ;;  %v4848_v55 = vrot.slane %v7102_v38, %v10568_v53  ;;  %v4855_v3 = vrot.slane %v7103_v36, %v10568_v53  ;;  %v7727_v49 = vld [vmem:[%s10408_s4 + $0x3e0] sm:$0xff]   ;;  %v10240_v18 = vld [vmem:[#allocation4 + $0x91] sm:$0xf]  ;;  %v4784_v8 = vrot.slane %v7097_v23, %v10568_v53 }
 0x2d3   :  { %6715 = vmatmul.mubr.bf16.gmra.mrb[100].mxu1 %v4839_v31  ;;  %v7724_v32 = vld [vmem:[%s10408_s4 + $0x318] sm:$0xff]   ;;  %6657 = vmatprep.mubr.bf16.mxu0 %v4768_v20  ;;  %v3668_v48 = vld [vmem:[#allocation4 + $0xa1] sm:$0xf]  ;;  %v3669_v41 = vld [vmem:[#allocation4 + $0xa9] sm:$0xf]  ;;  %v4953_v27 = vrot.slane %v7112_v43, %v10568_v53  ;;  %v4960_v58 = vrot.slane %v7113_v40, %v10568_v53  ;;  %v4680_v39 = vcombine.low %v4672_v34, %v4679_v7 }
 0x2d4   :  { %v7725_v2 = vld [vmem:[%s10408_s4 + $0x398] sm:$0xff]   ;;  %6722 = vmatprep.mubr.bf16.mxu1 %v4944_v0  ;;  %7520 = vmatpush3.bf16.msra.mxu0 %v7720_v59  ;;  %v3731_v14 = vld [vmem:[#allocation4 + $0xa1] sm:$0xf]  ;;  %v3733_v24 = vld [vmem:[#allocation4 + $0xb1] sm:$0xf]  ;;  %v4777_v25 = vrot.slane %v7096_v51, %v10568_v53  ;;  %v4856_v50 = vcombine.low %v4848_v55, %v4855_v3  ;;  %v7089_v6 = vpack.c.bf16 %v3669_v41, %v3668_v48 }
 0x2d5   :  { %v3667_v11 = vld [vmem:[#allocation4 + $0x99] sm:$0xf]  ;;  %7560 = vmatpush3.bf16.msra.mxu1 %v7721_v5  ;;  %7521 = vmatprep.subr.bf16.mxu0 %v7722_v35  ;;  %v3816_v19 = vld [vmem:[#allocation5 + $0x11] sm:$0xf]  ;;  %v7728_v28 = vld [vmem:[%s10408_s4 + $0x320] sm:$0xff]   ;;  %v4961_v30 = vcombine.low %v4953_v27, %v4960_v58 }
 0x2d6   :  { %7561 = vmatprep.subr.bf16.mxu1 %v7723_v33  ;;  %v3730_v21 = vld [vmem:[#allocation4 + $0x99] sm:$0xf]  ;;  %v3732_v4 = vld [vmem:[#allocation4 + $0xa9] sm:$0xf]  ;;  %v3879_v56 = vld [vmem:[#allocation5 + $0x11] sm:$0xf]  ;;  %v7088_v47 = vpack.c.bf16 %v3667_v11, %v10240_v18  ;;  %v4785_v13 = vcombine.low %v4777_v25, %v4784_v8  ;;  %v4696_v38 = vrot.slane %v7089_v6, %v10568_v53 }
 0x2d7   :  { %v3881_v10 = vld [vmem:[#allocation5 + $0x21] sm:$0xf]  ;;  %v7104_v60 = vpack.c.bf16 %v3731_v14, %v3730_v21  ;;  %v3815_v54 = vld [vmem:[#allocation5 + $0x9] sm:$0xf]  ;;  %v3817_v57 = vld [vmem:[#allocation5 + $0x19] sm:$0xf]  ;;  %v7105_v9 = vpack.c.bf16 %v3733_v24, %v3732_v4 }
 0x2d8   :  { %v3814_v29 = vld [vmem:[#allocation5 + $0x1] sm:$0xf]  ;;  %7522 = vmatpush3.bf16.msra.mxu0 %v7724_v32  ;;  %v7123_v26 = vpack.c.bf16 %v3817_v57, %v3816_v19  ;;  %v3878_v12 = vld [vmem:[#allocation5 + $0x9] sm:$0xf]  ;;  %v3880_v16 = vld [vmem:[#allocation5 + $0x19] sm:$0xf]  ;;  %v4689_v46 = vrot.slane %v7088_v47, %v10568_v53 }
 0x2d9   :  { %7562 = vmatpush3.bf16.msra.mxu1 %v7725_v2  ;;  %v7729_v1 = vld [vmem:[%s10408_s4 + $0x3a0] sm:$0xff]   ;;  %7523 = vmatprep.subr.bf16.mxu0 %v7726_v15  ;;  %v7730_v59 = vld [vmem:[%s10408_s4 + $0x368] sm:$0xff]   ;;  %v7138_v52 = vpack.c.bf16 %v3879_v56, %v3878_v12  ;;  %v7139_v17 = vpack.c.bf16 %v3881_v10, %v3880_v16  ;;  %v7122_v45 = vpack.c.bf16 %v3815_v54, %v3814_v29  ;;  %v7734_v42 = vld [vmem:[%s10408_s4 + $0x370] sm:$0xff]  }
 0x2da   :  { %7563 = vmatprep.subr.bf16.mxu1 %v7727_v49  ;;  %v7731_v22 = vld [vmem:[%s10408_s4 + $0x3e8] sm:$0xff]   ;;  %6658 = vmatmul.mubr.bf16.gmra.mrb[104].mxu0 %v4680_v39  ;;  %v4865_v36 = vrot.slane %v7104_v60, %v10568_v53  ;;  %v4872_v44 = vrot.slane %v7105_v9, %v10568_v53  ;;  %v7735_v62 = vld [vmem:[%s10408_s4 + $0x3f0] sm:$0xff]   ;;  %v5085_v20 = vrot.slane %v7123_v26, %v10568_v53  ;;  %v3782_v63 = vld [vmem:[#allocation5] sm:$0xf] }
 0x2db   :  { %6723 = vmatmul.mubr.bf16.gmra.mrb[104].mxu1 %v4856_v50  ;;  %6665 = vmatprep.mubr.bf16.mxu0 %v4785_v13  ;;  %v7732_v61 = vld [vmem:[%s10408_s4 + $0x328] sm:$0xff]   ;;  %v3784_v5 = vld [vmem:[#allocation5 + $0x10] sm:$0xf]  ;;  %v5254_v23 = vrot.slane %v7138_v52, %v10568_v53  ;;  %v5261_v37 = vrot.slane %v7139_v17, %v10568_v53  ;;  %v3785_v35 = vld [vmem:[#allocation5 + $0x18] sm:$0xf]  ;;  %v5078_v43 = vrot.slane %v7122_v45, %v10568_v53 }
 0x2dc   :  { %6730 = vmatprep.mubr.bf16.mxu1 %v4961_v30  ;;  %v7733_v31 = vld [vmem:[%s10408_s4 + $0x3a8] sm:$0xff]   ;;  %7524 = vmatpush3.bf16.msra.mxu0 %v7728_v28  ;;  %v7736_v33 = vld [vmem:[%s10408_s4 + $0x330] sm:$0xff]   ;;  %v3849_v7 = vld [vmem:[#allocation5 + $0x20] sm:$0xf]  ;;  %v4697_v51 = vcombine.low %v4689_v46, %v4696_v38  ;;  %v7115_v15 = vpack.c.bf16 %v3785_v35, %v3784_v5  ;;  %v4873_v34 = vcombine.low %v4865_v36, %v4872_v44 }
 0x2dd   :  { %7564 = vmatpush3.bf16.msra.mxu1 %v7729_v1  ;;  %7525 = vmatprep.subr.bf16.mxu0 %v7730_v59  ;;  %v3783_v0 = vld [vmem:[#allocation5 + $0x8] sm:$0xf]  ;;  %v7737_v40 = vld [vmem:[%s10408_s4 + $0x3b0] sm:$0xff]   ;;  %v7738_v55 = vld [vmem:[%s10408_s4 + $0x378] sm:$0xff]   ;;  %v5086_v8 = vcombine.low %v5078_v43, %v5085_v20  ;;  %v5262_v58 = vcombine.low %v5254_v23, %v5261_v37 }
 0x2de   :  { %7565 = vmatprep.subr.bf16.mxu1 %v7731_v22  ;;  %v3846_v32 = vld [vmem:[#allocation5 + $0x8] sm:$0xf]  ;;  %v3847_v2 = vld [vmem:[#allocation5 + $0x10] sm:$0xf]  ;;  %v7739_v3 = vld [vmem:[%s10408_s4 + $0x3f8] sm:$0xff]   ;;  %v7114_v48 = vpack.c.bf16 %v3783_v0, %v3782_v63  ;;  %v4997_v10 = vrot.slane %v7115_v15, %v10568_v53 }
 0x2df   :  { %v3820_v49 = vld [vmem:[#allocation5 + $0x41] sm:$0xf]  ;;  %v3885_v11 = vld [vmem:[#allocation5 + $0x51] sm:$0xf]  ;;  %v3848_v41 = vld [vmem:[#allocation5 + $0x18] sm:$0xf]  ;;  %v7130_v21 = vpack.c.bf16 %v3847_v2, %v3846_v32 }
 0x2e0   :  { %v3883_v18 = vld [vmem:[#allocation5 + $0x41] sm:$0xf]  ;;  %7526 = vmatpush3.bf16.msra.mxu0 %v7732_v61  ;;  %v3818_v14 = vld [vmem:[#allocation5 + $0x31] sm:$0xf]  ;;  %v3819_v27 = vld [vmem:[#allocation5 + $0x39] sm:$0xf]  ;;  %v7131_v24 = vpack.c.bf16 %v3849_v7, %v3848_v41  ;;  %v4990_v29 = vrot.slane %v7114_v48, %v10568_v53 }
 0x2e1   :  { %7566 = vmatpush3.bf16.msra.mxu1 %v7733_v31  ;;  %7527 = vmatprep.subr.bf16.mxu0 %v7734_v42  ;;  %v3821_v19 = vld [vmem:[#allocation5 + $0x49] sm:$0xf]  ;;  %v3882_v39 = vld [vmem:[#allocation5 + $0x39] sm:$0xf]  ;;  %v7124_v6 = vpack.c.bf16 %v3819_v27, %v3818_v14  ;;  %v3786_v60 = vld [vmem:[#allocation5 + $0x30] sm:$0xf]  ;;  %v5166_v54 = vrot.slane %v7130_v21, %v10568_v53 }
 0x2e2   :  { %7567 = vmatprep.subr.bf16.mxu1 %v7735_v62  ;;  %v3884_v25 = vld [vmem:[#allocation5 + $0x49] sm:$0xf]  ;;  %6666 = vmatmul.mubr.bf16.gmra.mrb[108].mxu0 %v4697_v51  ;;  %v7125_v28 = vpack.c.bf16 %v3821_v19, %v3820_v49  ;;  %v7140_v4 = vpack.c.bf16 %v3883_v18, %v3882_v39  ;;  %v7740_v50 = vld [vmem:[%s10408_s4 + $0x338] sm:$0xff]   ;;  %v5173_v57 = vrot.slane %v7131_v24, %v10568_v53  ;;  %v3788_v1 = vld [vmem:[#allocation5 + $0x40] sm:$0xf] }
 0x2e3   :  { %6731 = vmatmul.mubr.bf16.gmra.mrb[108].mxu1 %v4873_v34  ;;  %v7141_v56 = vpack.c.bf16 %v3885_v11, %v3884_v25  ;;  %6771 = vmatprep.mubr.bf16.mxu0 %v5086_v8  ;;  %v7741_v47 = vld [vmem:[%s10408_s4 + $0x3b8] sm:$0xff]   ;;  %v3789_v9 = vld [vmem:[#allocation5 + $0x48] sm:$0xf]  ;;  %v3851_v59 = vld [vmem:[#allocation5 + $0x40] sm:$0xf]  ;;  %v4998_v17 = vcombine.low %v4990_v29, %v4997_v10  ;;  %v5095_v38 = vrot.slane %v7124_v6, %v10568_v53 }
 0x2e4   :  { %6836 = vmatprep.mubr.bf16.mxu1 %v5262_v58  ;;  %7528 = vmatpush3.bf16.msra.mxu0 %v7736_v33  ;;  %v3787_v13 = vld [vmem:[#allocation5 + $0x38] sm:$0xf]  ;;  %v5102_v26 = vrot.slane %v7125_v28, %v10568_v53  ;;  %v5271_v12 = vrot.slane %v7140_v4, %v10568_v53  ;;  %v3853_v22 = vld [vmem:[#allocation5 + $0x50] sm:$0xf]  ;;  %v3852_v45 = vld [vmem:[#allocation5 + $0x48] sm:$0xf]  ;;  %v7117_v44 = vpack.c.bf16 %v3789_v9, %v3788_v1 }
 0x2e5   :  { %7568 = vmatpush3.bf16.msra.mxu1 %v7737_v40  ;;  %7529 = vmatprep.subr.bf16.mxu0 %v7738_v55  ;;  %v5278_v16 = vrot.slane %v7141_v56, %v10568_v53  ;;  %v3850_v30 = vld [vmem:[#allocation5 + $0x38] sm:$0xf]  ;;  %v3824_v52 = vld [vmem:[#allocation5 + $0x71] sm:$0xf]  ;;  %v3889_v31 = vld [vmem:[#allocation5 + $0x81] sm:$0xf]  ;;  %v7116_v36 = vpack.c.bf16 %v3787_v13, %v3786_v60  ;;  %v5174_v5 = vcombine.low %v5166_v54, %v5173_v57 }
 0x2e6   :  { %7569 = vmatprep.subr.bf16.mxu1 %v7739_v3  ;;  %v3887_v61 = vld [vmem:[#allocation5 + $0x71] sm:$0xf]  ;;  %v3822_v42 = vld [vmem:[#allocation5 + $0x61] sm:$0xf]  ;;  %v3823_v62 = vld [vmem:[#allocation5 + $0x69] sm:$0xf]  ;;  %v7132_v46 = vpack.c.bf16 %v3851_v59, %v3850_v30  ;;  %v7133_v23 = vpack.c.bf16 %v3853_v22, %v3852_v45  ;;  %v5103_v35 = vcombine.low %v5095_v38, %v5102_v26  ;;  %v5014_v2 = vrot.slane %v7117_v44, %v10568_v53 }
 0x2e7   :  { %v3825_v20 = vld [vmem:[#allocation5 + $0x79] sm:$0xf]  ;;  %v3886_v63 = vld [vmem:[#allocation5 + $0x69] sm:$0xf]  ;;  %v5279_v33 = vcombine.low %v5271_v12, %v5278_v16  ;;  %v7126_v32 = vpack.c.bf16 %v3823_v62, %v3822_v42  ;;  %v3790_v7 = vld [vmem:[#allocation5 + $0x60] sm:$0xf]  ;;  %v5007_v11 = vrot.slane %v7116_v36, %v10568_v53 }
 0x2e8   :  { %7530 = vmatpush3.bf16.msra.mxu0 %v7740_v50  ;;  %v7127_v37 = vpack.c.bf16 %v3825_v20, %v3824_v52  ;;  %v3888_v0 = vld [vmem:[#allocation5 + $0x79] sm:$0xf]  ;;  %v7142_v43 = vpack.c.bf16 %v3887_v61, %v3886_v63  ;;  %v5183_v51 = vrot.slane %v7132_v46, %v10568_v53  ;;  %v5190_v55 = vrot.slane %v7133_v23, %v10568_v53  ;;  %v3791_v15 = vld [vmem:[#allocation5 + $0x68] sm:$0xf]  ;;  %v3792_v49 = vld [vmem:[#allocation5 + $0x70] sm:$0xf] }
 0x2e9   :  { %7570 = vmatpush3.bf16.msra.mxu1 %v7741_v47  ;;  %v7143_v40 = vpack.c.bf16 %v3889_v31, %v3888_v0  ;;  %v3793_v18 = vld [vmem:[#allocation5 + $0x78] sm:$0xf]  ;;  %v3854_v48 = vld [vmem:[#allocation5 + $0x68] sm:$0xf]  ;;  %v3855_v41 = vld [vmem:[#allocation5 + $0x70] sm:$0xf]  ;;  %v5112_v27 = vrot.slane %v7126_v32, %v10568_v53  ;;  %v5015_v19 = vcombine.low %v5007_v11, %v5014_v2  ;;  %v7118_v39 = vpack.c.bf16 %v3791_v15, %v3790_v7 }
 0x2ea   :  { %v5119_v3 = vrot.slane %v7127_v37, %v10568_v53  ;;  %v5288_v34 = vrot.slane %v7142_v43, %v10568_v53  ;;  %v3857_v14 = vld [vmem:[#allocation5 + $0x80] sm:$0xf]  ;;  %v3893_v24 = vld [vmem:[#allocation5 + $0xb1] sm:$0xf]  ;;  %v7119_v25 = vpack.c.bf16 %v3793_v18, %v3792_v49  ;;  %v3856_v28 = vld [vmem:[#allocation5 + $0x78] sm:$0xf]  ;;  %v5191_v10 = vcombine.low %v5183_v51, %v5190_v55 }
 0x2eb   :  { %6772 = vmatmul.mubr.bf16.vlgmr.msra.gmra.mrb[112].mxu0 %v4998_v17  ;;  %v5295_v8 = vrot.slane %v7143_v40, %v10568_v53  ;;  %v3828_v58 = vld [vmem:[#allocation5 + $0xa1] sm:$0xf]  ;;  %v3826_v4 = vld [vmem:[#allocation5 + $0x91] sm:$0xf]  ;;  %v3827_v56 = vld [vmem:[#allocation5 + $0x99] sm:$0xf]  ;;  %v7134_v47 = vpack.c.bf16 %v3855_v41, %v3854_v48  ;;  %v7135_v6 = vpack.c.bf16 %v3857_v14, %v3856_v28  ;;  %v5024_v59 = vrot.slane %v7118_v39, %v10568_v53 }
 0x2ec   :  { %6837 = vmatmul.mubr.bf16.vlgmr.msra.gmra.mrb[112].mxu1 %v5174_v5  ;;  %6779 = vmatprep.mubr.bf16.mxu0 %v5103_v35  ;;  %v3891_v21 = vld [vmem:[#allocation5 + $0xa1] sm:$0xf]  ;;  %v5120_v50 = vcombine.low %v5112_v27, %v5119_v3  ;;  %v3829_v60 = vld [vmem:[#allocation5 + $0xa9] sm:$0xf]  ;;  %v3890_v29 = vld [vmem:[#allocation5 + $0x99] sm:$0xf]  ;;  %v5031_v26 = vrot.slane %v7119_v25, %v10568_v53  ;;  %v7128_v12 = vpack.c.bf16 %v3827_v56, %v3826_v4 }
 0x2ed   :  { %6844 = vmatprep.mubr.bf16.mxu1 %v5279_v33  ;;  %v3892_v54 = vld [vmem:[#allocation5 + $0xa9] sm:$0xf]  ;;  %v5296_v57 = vcombine.low %v5288_v34, %v5295_v8  ;;  %v7129_v13 = vpack.c.bf16 %v3829_v60, %v3828_v58  ;;  %v7144_v1 = vpack.c.bf16 %v3891_v21, %v3890_v29  ;;  %v5200_v16 = vrot.slane %v7134_v47, %v10568_v53  ;;  %v3796_v45 = vld [vmem:[#allocation5 + $0xa0] sm:$0xf]  ;;  %v3861_v31 = vld [vmem:[#allocation5 + $0xb0] sm:$0xf] }
 0x2ee   :  { %v7145_v9 = vpack.c.bf16 %v3893_v24, %v3892_v54  ;;  %v5207_v30 = vrot.slane %v7135_v6, %v10568_v53  ;;  %v3859_v61 = vld [vmem:[#allocation5 + $0xa0] sm:$0xf]  ;;  %v3794_v38 = vld [vmem:[#allocation5 + $0x90] sm:$0xf]  ;;  %v3795_v36 = vld [vmem:[#allocation5 + $0x98] sm:$0xf]  ;;  %v5032_v44 = vcombine.low %v5024_v59, %v5031_v26  ;;  %v5129_v42 = vrot.slane %v7128_v12, %v10568_v53 }
 0x2ef   :  { %v5136_v22 = vrot.slane %v7129_v13, %v10568_v53  ;;  %v5305_v52 = vrot.slane %v7144_v1, %v10568_v53  ;;  %v3797_v62 = vld [vmem:[#allocation5 + $0xa8] sm:$0xf]  ;;  %v3858_v20 = vld [vmem:[#allocation5 + $0x98] sm:$0xf]  ;;  %v7120_v33 = vpack.c.bf16 %v3795_v36, %v3794_v38  ;;  %v7146_v15 = vld [vmem:[%s10411_s5] ss:$0 sm:$0xff] }
 0x2f0   :  { %v5312_v17 = vrot.slane %v7145_v9, %v10568_v53  ;;  %v3860_v5 = vld [vmem:[#allocation5 + $0xa8] sm:$0xf]  ;;  %v5208_v46 = vcombine.low %v5200_v16, %v5207_v30  ;;  %v7121_v23 = vpack.c.bf16 %v3797_v62, %v3796_v45  ;;  %v7136_v37 = vpack.c.bf16 %v3859_v61, %v3858_v20 }
 0x2f1   :  { %v7137_v63 = vpack.c.bf16 %v3861_v31, %v3860_v5  ;;  %v5137_v0 = vcombine.low %v5129_v42, %v5136_v22  ;;  %v5041_v2 = vrot.slane %v7120_v33, %v10568_v53 }
 0x2f2   :  { %v5313_v35 = vcombine.low %v5305_v52, %v5312_v17  ;;  %v5048_v43 = vrot.slane %v7121_v23, %v10568_v53  ;;  %v5217_v40 = vrot.slane %v7136_v37, %v10568_v53 }
 0x2f3   :  { %6780 = vmatmul.mubr.bf16.gmra.mrb[116].mxu0 %v5015_v19  ;;  %v5224_v32 = vrot.slane %v7137_v63, %v10568_v53 }
 0x2f4   :  { %6845 = vmatmul.mubr.bf16.gmra.mrb[116].mxu1 %v5191_v10  ;;  %6787 = vmatprep.mubr.bf16.mxu0 %v5120_v50  ;;  %v5049_v7 = vcombine.low %v5041_v2, %v5048_v43 }
 0x2f5   :  { %6852 = vmatprep.mubr.bf16.mxu1 %v5296_v57  ;;  %v5225_v51 = vcombine.low %v5217_v40, %v5224_v32 }
 0x2fb   :  { %6788 = vmatmul.mubr.bf16.gmra.mrb[120].mxu0 %v5032_v44 }
 0x2fc   :  { %6853 = vmatmul.mubr.bf16.gmra.mrb[120].mxu1 %v5208_v46  ;;  %6795 = vmatprep.mubr.bf16.mxu0 %v5137_v0 }
 0x2fd   :  { %6860 = vmatprep.mubr.bf16.mxu1 %v5313_v35 }
 0x303   :  { %6796 = vmatmul.mubr.bf16.gmra.mrb[124].mxu0 %v5049_v7 }
 0x304   :  { %6861 = vmatmul.mubr.bf16.gmra.mrb[124].mxu1 %v5225_v51 }
 0x358   :  { %v7291_v55 = vpop.f32.mrb[64].mxu0 }
 0x359   :  { %v7331_v3 = vpop.f32.mrb[64].mxu1  ;;  %v7292_v49 = vpop.f32.mrb[65].mxu0 }
 0x35a   :  { %v7332_v18 = vpop.f32.mrb[65].mxu1  ;;  %v7293_v11 = vadd.f32 %v7292_v49, %v7291_v55  ;;  %v7294_v8 = vpop.f32.mrb[66].mxu0 }
 0x35b   :  { %v7333_v34 = vadd.f32 %v7332_v18, %v7331_v3  ;;  %v7334_v48 = vpop.f32.mrb[66].mxu1  ;;  %v7295_v41 = vpop.f32.mrb[67].mxu0 }
 0x35c   :  { %v7335_v14 = vpop.f32.mrb[67].mxu1  ;;  %v6384_v27 = vadd.f32 %v7293_v11, %v7146_v15  ;;  %v7296_v53 = vadd.f32 %v7295_v41, %v7294_v8 }
 0x35d   :  { %v7336_v58 = vadd.f32 %v7335_v14, %v7334_v48 }
 0x35e   :  { %v6449_v21 = vadd.f32 %v7333_v34, %v6384_v27  ;;  %v6387_v24 = vadd.f32 %v7296_v53, %v7146_v15 }
 0x360   :  { %v10329_v19 = vadd.f32 %v7336_v58, %v6387_v24 }
 0x363   :  { %v7297_v39 = vpop.f32.mrb[68].mxu0 }
 0x364   :  { %v7337_v25 = vpop.f32.mrb[68].mxu1  ;;  %v7298_v28 = vpop.f32.mrb[69].mxu0 }
 0x365   :  { %v7338_v4 = vpop.f32.mrb[69].mxu1  ;;  %v7299_v56 = vadd.f32 %v7298_v28, %v7297_v39  ;;  %v7300_v50 = vpop.f32.mrb[70].mxu0 }
 0x366   :  { %v7339_v10 = vadd.f32 %v7338_v4, %v7337_v25  ;;  %v7340_v47 = vpop.f32.mrb[70].mxu1  ;;  %v7301_v6 = vpop.f32.mrb[71].mxu0 }
 0x367   :  { %v7341_v60 = vpop.f32.mrb[71].mxu1  ;;  %v6392_v29 = vadd.f32 %v7299_v56, %v7146_v15  ;;  %v7302_v54 = vadd.f32 %v7301_v6, %v7300_v50 }
 0x368   :  { %v7342_v57 = vadd.f32 %v7341_v60, %v7340_v47 }
 0x369   :  { %v6457_v13 = vadd.f32 %v7339_v10, %v6392_v29  ;;  %v6395_v1 = vadd.f32 %v7302_v54, %v7146_v15 }
 0x36b   :  { %v10331_v9 = vadd.f32 %v7342_v57, %v6395_v1  ;;  %v7303_v26 = vpop.f32.mrb[72].mxu0 }
 0x36c   :  { %v7343_v12 = vpop.f32.mrb[72].mxu1  ;;  %v7304_v16 = vpop.f32.mrb[73].mxu0 }
 0x36d   :  { %v7344_v30 = vpop.f32.mrb[73].mxu1  ;;  %v7305_v59 = vadd.f32 %v7304_v16, %v7303_v26  ;;  %v7306_v52 = vpop.f32.mrb[74].mxu0 }
 0x36e   :  { %v7345_v22 = vadd.f32 %v7344_v30, %v7343_v12  ;;  %v7346_v17 = vpop.f32.mrb[74].mxu1  ;;  %v7307_v45 = vpop.f32.mrb[75].mxu0 }
 0x36f   :  { %v7347_v61 = vpop.f32.mrb[75].mxu1  ;;  %v6400_v31 = vadd.f32 %v7305_v59, %v7146_v15  ;;  %v7308_v38 = vadd.f32 %v7307_v45, %v7306_v52 }
 0x370   :  { %v7348_v36 = vadd.f32 %v7347_v61, %v7346_v17 }
 0x371   :  { %v6465_v44 = vadd.f32 %v7345_v22, %v6400_v31  ;;  %v6403_v42 = vadd.f32 %v7308_v38, %v7146_v15 }
 0x373   :  { %v10333_v62 = vadd.f32 %v7348_v36, %v6403_v42  ;;  %v7309_v20 = vpop.f32.mrb[76].mxu0 }
 0x374   :  { %v7349_v5 = vpop.f32.mrb[76].mxu1  ;;  %v7310_v46 = vpop.f32.mrb[77].mxu0 }
 0x375   :  { %v7350_v23 = vpop.f32.mrb[77].mxu1  ;;  %v7311_v37 = vadd.f32 %v7310_v46, %v7309_v20  ;;  %v7312_v0 = vpop.f32.mrb[78].mxu0 }
 0x376   :  { %v7351_v63 = vadd.f32 %v7350_v23, %v7349_v5  ;;  %v7352_v35 = vpop.f32.mrb[78].mxu1  ;;  %v7313_v33 = vpop.f32.mrb[79].mxu0 }
 0x377   :  { %v7353_v43 = vpop.f32.mrb[79].mxu1  ;;  %v6408_v40 = vadd.f32 %v7311_v37, %v7146_v15  ;;  %v7314_v32 = vadd.f32 %v7313_v33, %v7312_v0 }
 0x378   :  { %v7354_v2 = vadd.f32 %v7353_v43, %v7352_v35 }
 0x379   :  { %v6473_v7 = vadd.f32 %v7351_v63, %v6408_v40  ;;  %v6411_v51 = vadd.f32 %v7314_v32, %v7146_v15 }
 0x37b   :  { %v10335_v55 = vadd.f32 %v7354_v2, %v6411_v51 }
 0x37c   :  { %v7371_v3 = vpop.f32.mrb[80].mxu0 }
 0x37d   :  { %v7411_v49 = vpop.f32.mrb[80].mxu1  ;;  %v7372_v18 = vpop.f32.mrb[81].mxu0 }
 0x37e   :  { %v7412_v11 = vpop.f32.mrb[81].mxu1  ;;  %v7373_v34 = vadd.f32 %v7372_v18, %v7371_v3  ;;  %v7374_v48 = vpop.f32.mrb[82].mxu0 }
 0x37f   :  { %v7413_v8 = vadd.f32 %v7412_v11, %v7411_v49  ;;  %v7414_v41 = vpop.f32.mrb[82].mxu1  ;;  %v7375_v14 = vpop.f32.mrb[83].mxu0 }
 0x380   :  { %v7415_v27 = vpop.f32.mrb[83].mxu1  ;;  %v6514_v53 = vadd.f32 %v7373_v34, %v6449_v21  ;;  %v7376_v58 = vadd.f32 %v7375_v14, %v7374_v48 }
 0x381   :  { %v7416_v24 = vadd.f32 %v7415_v27, %v7414_v41 }
 0x382   :  { %v6579_v39 = vadd.f32 %v7413_v8, %v6514_v53  ;;  %v6517_v25 = vadd.f32 %v7376_v58, %v10329_v19 }
 0x384   :  { %v10338_v28 = vadd.f32 %v7416_v24, %v6517_v25  ;;  %v7377_v15 = vpop.f32.mrb[84].mxu0 }
 0x385   :  { %v7417_v4 = vpop.f32.mrb[84].mxu1  ;;  %v7378_v56 = vpop.f32.mrb[85].mxu0 }
 0x386   :  { %v7418_v10 = vpop.f32.mrb[85].mxu1  ;;  %v7379_v50 = vadd.f32 %v7378_v56, %v7377_v15  ;;  %v7380_v6 = vpop.f32.mrb[86].mxu0 }
 0x387   :  { %v7419_v47 = vadd.f32 %v7418_v10, %v7417_v4  ;;  %v7420_v60 = vpop.f32.mrb[86].mxu1  ;;  %v7381_v29 = vpop.f32.mrb[87].mxu0 }
 0x388   :  { %v7421_v54 = vpop.f32.mrb[87].mxu1  ;;  %v6522_v57 = vadd.f32 %v7379_v50, %v6457_v13  ;;  %v7382_v1 = vadd.f32 %v7381_v29, %v7380_v6 }
 0x389   :  { %v7422_v21 = vadd.f32 %v7421_v54, %v7420_v60 }
 0x38a   :  { %v6587_v26 = vadd.f32 %v7419_v47, %v6522_v57  ;;  %v6525_v12 = vadd.f32 %v7382_v1, %v10331_v9 }
 0x38c   :  { %v10341_v16 = vadd.f32 %v7422_v21, %v6525_v12  ;;  %v7383_v19 = vpop.f32.mrb[88].mxu0 }
 0x38d   :  { %v7423_v30 = vpop.f32.mrb[88].mxu1  ;;  %v7384_v59 = vpop.f32.mrb[89].mxu0 }
 0x38e   :  { %v7424_v22 = vpop.f32.mrb[89].mxu1  ;;  %v7385_v52 = vadd.f32 %v7384_v59, %v7383_v19  ;;  %v7386_v45 = vpop.f32.mrb[90].mxu0 }
 0x38f   :  { %v7425_v17 = vadd.f32 %v7424_v22, %v7423_v30  ;;  %v7426_v61 = vpop.f32.mrb[90].mxu1  ;;  %v7387_v31 = vpop.f32.mrb[91].mxu0 }
 0x390   :  { %v7427_v38 = vpop.f32.mrb[91].mxu1  ;;  %v6530_v36 = vadd.f32 %v7385_v52, %v6465_v44  ;;  %v7388_v42 = vadd.f32 %v7387_v31, %v7386_v45 }
 0x391   :  { %v7428_v13 = vadd.f32 %v7427_v38, %v7426_v61 }
 0x392   :  { %v6595_v20 = vadd.f32 %v7425_v17, %v6530_v36  ;;  %v6533_v5 = vadd.f32 %v7388_v42, %v10333_v62 }
 0x394   :  { %v10344_v46 = vadd.f32 %v7428_v13, %v6533_v5  ;;  %v7389_v9 = vpop.f32.mrb[92].mxu0 }
 0x395   :  { %v7429_v23 = vpop.f32.mrb[92].mxu1  ;;  %v7390_v37 = vpop.f32.mrb[93].mxu0 }
 0x396   :  { %v7430_v63 = vpop.f32.mrb[93].mxu1  ;;  %v7391_v0 = vadd.f32 %v7390_v37, %v7389_v9  ;;  %v7392_v33 = vpop.f32.mrb[94].mxu0 }
 0x397   :  { %v7431_v35 = vadd.f32 %v7430_v63, %v7429_v23  ;;  %v7432_v43 = vpop.f32.mrb[94].mxu1  ;;  %v7393_v40 = vpop.f32.mrb[95].mxu0 }
 0x398   :  { %v7433_v32 = vpop.f32.mrb[95].mxu1  ;;  %v6538_v2 = vadd.f32 %v7391_v0, %v6473_v7  ;;  %v7394_v51 = vadd.f32 %v7393_v40, %v7392_v33 }
 0x399   :  { %v7434_v44 = vadd.f32 %v7433_v32, %v7432_v43 }
 0x39a   :  { %v6603_v3 = vadd.f32 %v7431_v35, %v6538_v2  ;;  %v6541_v49 = vadd.f32 %v7394_v51, %v10335_v55 }
 0x39c   :  { %v10347_v18 = vadd.f32 %v7434_v44, %v6541_v49 }
 0x39d   :  { %v7451_v62 = vpop.f32.mrb[96].mxu0 }
 0x39e   :  { %v7491_v11 = vpop.f32.mrb[96].mxu1  ;;  %v7452_v34 = vpop.f32.mrb[97].mxu0 }
 0x39f   :  { %v7492_v8 = vpop.f32.mrb[97].mxu1  ;;  %v7453_v48 = vadd.f32 %v7452_v34, %v7451_v62  ;;  %v7454_v14 = vpop.f32.mrb[98].mxu0 }
 0x3a0   :  { %v7493_v41 = vadd.f32 %v7492_v8, %v7491_v11  ;;  %v7494_v27 = vpop.f32.mrb[98].mxu1  ;;  %v7455_v53 = vpop.f32.mrb[99].mxu0 }
 0x3a1   :  { %v7495_v58 = vpop.f32.mrb[99].mxu1  ;;  %v6644_v24 = vadd.f32 %v7453_v48, %v6579_v39  ;;  %v7456_v25 = vadd.f32 %v7455_v53, %v7454_v14 }
 0x3a2   :  { %v7496_v7 = vadd.f32 %v7495_v58, %v7494_v27 }
 0x3a3   :  { %v6709_v15 = vadd.f32 %v7493_v41, %v6644_v24  ;;  %v6647_v4 = vadd.f32 %v7456_v25, %v10338_v28 }
 0x3a5   :  { %v10350_v56 = vadd.f32 %v7496_v7, %v6647_v4  ;;  %v7457_v55 = vpop.f32.mrb[100].mxu0 }
 0x3a6   :  { %v7497_v10 = vpop.f32.mrb[100].mxu1  ;;  %v7458_v50 = vpop.f32.mrb[101].mxu0 }
 0x3a7   :  { %v7498_v47 = vpop.f32.mrb[101].mxu1  ;;  %v7459_v6 = vadd.f32 %v7458_v50, %v7457_v55  ;;  %v7460_v29 = vpop.f32.mrb[102].mxu0 }
 0x3a8   :  { %v7499_v60 = vadd.f32 %v7498_v47, %v7497_v10  ;;  %v7500_v54 = vpop.f32.mrb[102].mxu1  ;;  %v7461_v57 = vpop.f32.mrb[103].mxu0 }
 0x3a9   :  { %v7501_v1 = vpop.f32.mrb[103].mxu1  ;;  %v6652_v21 = vadd.f32 %v7459_v6, %v6587_v26  ;;  %v7462_v12 = vadd.f32 %v7461_v57, %v7460_v29 }
 0x3aa   :  { %v7502_v39 = vadd.f32 %v7501_v1, %v7500_v54 }
 0x3ab   :  { %v10352_v19 = vadd.f32 %v7499_v60, %v6652_v21  ;;  %v6655_v30 = vadd.f32 %v7462_v12, %v10341_v16 }
 0x3ad   :  { %v10355_v28 = vadd.f32 %v7502_v39, %v6655_v30  ;;  %v7463_v59 = vpop.f32.mrb[104].mxu0 }
 0x3ae   :  { %v7503_v22 = vpop.f32.mrb[104].mxu1  ;;  %v7464_v52 = vpop.f32.mrb[105].mxu0 }
 0x3af   :  { %v7504_v17 = vpop.f32.mrb[105].mxu1  ;;  %v7465_v45 = vadd.f32 %v7464_v52, %v7463_v59  ;;  %v7466_v31 = vpop.f32.mrb[106].mxu0 }
 0x3b0   :  { %v7505_v61 = vadd.f32 %v7504_v17, %v7503_v22  ;;  %v7506_v38 = vpop.f32.mrb[106].mxu1  ;;  %v7467_v36 = vpop.f32.mrb[107].mxu0 }
 0x3b1   :  { %v7507_v42 = vpop.f32.mrb[107].mxu1  ;;  %v6660_v13 = vadd.f32 %v7465_v45, %v6595_v20  ;;  %v7468_v26 = vadd.f32 %v7467_v36, %v7466_v31 }
 0x3b2   :  { %v7508_v5 = vadd.f32 %v7507_v42, %v7506_v38 }
 0x3b3   :  { %v10357_v9 = vadd.f32 %v7505_v61, %v6660_v13  ;;  %v6663_v23 = vadd.f32 %v7468_v26, %v10344_v46 }
 0x3b5   :  { %v10360_v16 = vadd.f32 %v7508_v5, %v6663_v23  ;;  %v7469_v37 = vpop.f32.mrb[108].mxu0 }
 0x3b6   :  { %v7509_v63 = vpop.f32.mrb[108].mxu1  ;;  %v7470_v0 = vpop.f32.mrb[109].mxu0 }
 0x3b7   :  { %v7510_v35 = vpop.f32.mrb[109].mxu1  ;;  %v7471_v33 = vadd.f32 %v7470_v0, %v7469_v37  ;;  %v7472_v40 = vpop.f32.mrb[110].mxu0 }
 0x3b8   :  { %v7511_v43 = vadd.f32 %v7510_v35, %v7509_v63  ;;  %v7512_v32 = vpop.f32.mrb[110].mxu1  ;;  %v7473_v2 = vpop.f32.mrb[111].mxu0 }
 0x3b9   :  { %v7513_v51 = vpop.f32.mrb[111].mxu1  ;;  %v6668_v44 = vadd.f32 %v7471_v33, %v6603_v3  ;;  %v7474_v20 = vadd.f32 %v7473_v2, %v7472_v40 }
 0x3ba   :  { %v7514_v49 = vadd.f32 %v7513_v51, %v7512_v32 }
 0x3bb   :  { %v10362_v62 = vadd.f32 %v7511_v43, %v6668_v44  ;;  %v6671_v11 = vadd.f32 %v7474_v20, %v10347_v18 }
 0x3bd   :  { %v10365_v46 = vadd.f32 %v7514_v49, %v6671_v11 }
 0x3be   :  { %v7531_v34 = vpop.f32.mrb[112].mxu0 }
 0x3bf   :  { %v7571_v8 = vpop.f32.mrb[112].mxu1  ;;  %v7532_v48 = vpop.f32.mrb[113].mxu0 }
 0x3c0   :  { %v7572_v41 = vpop.f32.mrb[113].mxu1  ;;  %v7533_v14 = vadd.f32 %v7532_v48, %v7531_v34  ;;  %v7534_v53 = vpop.f32.mrb[114].mxu0 }
 0x3c1   :  { %v7573_v27 = vadd.f32 %v7572_v41, %v7571_v8  ;;  %v7574_v58 = vpop.f32.mrb[114].mxu1  ;;  %v7535_v24 = vpop.f32.mrb[115].mxu0 }
 0x3c2   :  { %v7575_v25 = vpop.f32.mrb[115].mxu1  ;;  %v6774_v7 = vadd.f32 %v7533_v14, %v6709_v15  ;;  %v7536_v3 = vadd.f32 %v7535_v24, %v7534_v53 }
 0x3c3   :  { %v7576_v4 = vadd.f32 %v7575_v25, %v7574_v58 }
 0x3c4   :  { %v6839_v55 = vadd.f32 %v7573_v27, %v6774_v7  ;;  %v6777_v10 = vadd.f32 %v7536_v3, %v10350_v56 }
 0x3c6   :  { %7744 = vtanh.f32 %v6839_v55  ;;  %v6842_v18 = vadd.f32 %v7576_v4, %v6777_v10  ;;  %v7537_v50 = vpop.f32.mrb[116].mxu0 }
 0x3c7   :  { %v7577_v47 = vpop.f32.mrb[116].mxu1  ;;  %v7538_v6 = vpop.f32.mrb[117].mxu0 }
 0x3c8   :  { %v7578_v60 = vpop.f32.mrb[117].mxu1  ;;  %7746 = vtanh.f32 %v6842_v18  ;;  %v7539_v29 = vadd.f32 %v7538_v6, %v7537_v50  ;;  %v7540_v57 = vpop.f32.mrb[118].mxu0 }
 0x3c9   :  { %v7579_v54 = vadd.f32 %v7578_v60, %v7577_v47  ;;  %v7580_v1 = vpop.f32.mrb[118].mxu1  ;;  %v7541_v21 = vpop.f32.mrb[119].mxu0 }
 0x3ca   :  { %v7581_v12 = vpop.f32.mrb[119].mxu1  ;;  %v6782_v15 = vadd.f32 %v7539_v29, %v10352_v19  ;;  %v7542_v39 = vadd.f32 %v7541_v21, %v7540_v57 }
 0x3cb   :  { %v7582_v30 = vadd.f32 %v7581_v12, %v7580_v1 }
 0x3cc   :  { %v6847_v59 = vadd.f32 %v7579_v54, %v6782_v15  ;;  %v6785_v56 = vadd.f32 %v7542_v39, %v10355_v28 }
 0x3ce   :  { %7748 = vtanh.f32 %v6847_v59  ;;  %v6850_v22 = vadd.f32 %v7582_v30, %v6785_v56  ;;  %v7543_v52 = vpop.f32.mrb[120].mxu0 }
 0x3cf   :  { %v7583_v17 = vpop.f32.mrb[120].mxu1  ;;  %v7544_v45 = vpop.f32.mrb[121].mxu0 }
 0x3d0   :  { %v7584_v61 = vpop.f32.mrb[121].mxu1  ;;  %v7745_v31 = vpop.eup %7744  ;;  %7750 = vtanh.f32 %v6850_v22  ;;  %v7545_v38 = vadd.f32 %v7544_v45, %v7543_v52 }
 0x3d1   :  { %v7585_v36 = vadd.f32 %v7584_v61, %v7583_v17  ;;  %v7546_v42 = vpop.f32.mrb[122].mxu0  ;;  %v7586_v13 = vpop.f32.mrb[122].mxu1  ;;  %6878 = vst.msk [vmem:[%s10412_s6] sm:$0xff] %vm6877_vm0, %v7745_v31 }
 0x3d2   :  { %v7547_v19 = vpop.f32.mrb[123].mxu0  ;;  %v7587_v28 = vpop.f32.mrb[123].mxu1  ;;  %v6790_v5 = vadd.f32 %v7545_v38, %v10357_v9 }
 0x3d3   :  { %v7747_v26 = vpop.eup %7746  ;;  %v7548_v23 = vadd.f32 %v7547_v19, %v7546_v42  ;;  %v7588_v37 = vadd.f32 %v7587_v28, %v7586_v13 }
 0x3d4   :  { %6879 = vst.msk [vmem:[%s10412_s6 + $0x8] sm:$0xff] %vm6877_vm0, %v7747_v26  ;;  %v6855_v63 = vadd.f32 %v7585_v36, %v6790_v5 }
 0x3d5   :  { %v6793_v0 = vadd.f32 %v7548_v23, %v10360_v16 }
 0x3d6   :  { %7752 = vtanh.f32 %v6855_v63  ;;  %v7549_v33 = vpop.f32.mrb[124].mxu0 }
 0x3d7   :  { %v6858_v35 = vadd.f32 %v7588_v37, %v6793_v0  ;;  %v7589_v43 = vpop.f32.mrb[124].mxu1  ;;  %v7550_v40 = vpop.f32.mrb[125].mxu0 }
 0x3d8   :  { %v7590_v32 = vpop.f32.mrb[125].mxu1  ;;  %v7749_v2 = vpop.eup %7748  ;;  %v7551_v51 = vadd.f32 %v7550_v40, %v7549_v33 }
 0x3d9   :  { %7754 = vtanh.f32 %v6858_v35  ;;  %v7591_v9 = vadd.f32 %v7590_v32, %v7589_v43  ;;  %v7552_v44 = vpop.f32.mrb[126].mxu0  ;;  %v7592_v20 = vpop.f32.mrb[126].mxu1  ;;  %6880 = vst.msk [vmem:[%s10412_s6 + $0x10] sm:$0xff] %vm6877_vm0, %v7749_v2 }
 0x3da   :  { %v7553_v49 = vpop.f32.mrb[127].mxu0  ;;  %v7593_v11 = vpop.f32.mrb[127].mxu1  ;;  %v6798_v34 = vadd.f32 %v7551_v51, %v10362_v62 }
 0x3db   :  { %v7751_v16 = vpop.eup %7750  ;;  %v7554_v8 = vadd.f32 %v7553_v49, %v7552_v44  ;;  %v7594_v48 = vadd.f32 %v7593_v11, %v7592_v20 }
 0x3dc   :  { %6881 = vst.msk [vmem:[%s10412_s6 + $0x18] sm:$0xff] %vm6877_vm0, %v7751_v16  ;;  %v6863_v41 = vadd.f32 %v7591_v9, %v6798_v34 }
 0x3dd   :  { %v6801_v14 = vadd.f32 %v7554_v8, %v10365_v46 }
 0x3de   :  { %7756 = vtanh.f32 %v6863_v41 }
 0x3df   :  { %v6866_v27 = vadd.f32 %v7594_v48, %v6801_v14 }
 0x3e0   :  { %v7753_v53 = vpop.eup %7752 }
 0x3e1   :  { %7758 = vtanh.f32 %v6866_v27  ;;  %6882 = vst.msk [vmem:[%s10412_s6 + $0x20] sm:$0xff] %vm6877_vm0, %v7753_v53 }
 0x3e3   :  { %v7755_v62 = vpop.eup %7754 }
 0x3e4   :  { %6883 = vst.msk [vmem:[%s10412_s6 + $0x28] sm:$0xff] %vm6877_vm0, %v7755_v62 }
 0x3e8   :  { %v7757_v58 = vpop.eup %7756 }
 0x3e9   :  { %6884 = vst.msk [vmem:[%s10412_s6 + $0x30] sm:$0xff] %vm6877_vm0, %v7757_v58 }
 0x3eb   :  { %v7759_v46 = vpop.eup %7758 }
 0x3ec   :  { %6885 = vst.msk [vmem:[%s10412_s6 + $0x38] sm:$0xff] %vm6877_vm0, %v7759_v46 }

</bundles_post_ra>
